<compile_context>
chip_gen: v7x
topology: tpu7x:2x2x1
jax: 0.10.0
libtpu: 0.0.40
codegen_flags: <defaults>
</compile_context>

<pallas_src>
import functools

import jax
import jax.numpy as jnp
from jax.experimental import pallas as pl
from jax.experimental.pallas import tpu as pltpu

VMEM = pl.BlockSpec(memory_space=pltpu.MemorySpace.VMEM)
BN_EPS = 1e-5
LANE = 128
COUT = 32                    # conv channels of both Conv2d layers


def _round_up(n, m):
    return ((n + m - 1) // m) * m


# ----------------------------- Pallas kernels -------------------------------

def conv_block_kernel(patches_ref, w_ref, b_ref, mask_ref, out_ref):
    """Fused Conv2d (im2col matmul, eval-BN folded into w/b) + Hardtanh(0,20) + MaskConv.

    patches: (M, K_pad) bf16, w: (K_pad, 128) bf16 (Cout zero-padded to a full
    lane), b: (1, 128) f32, mask: (M, 1) f32 time-validity mask.  The output
    (M, 128) bf16 is lane-dense (unmasked stores); the wrapper slices channels.
    """
    y = jnp.dot(patches_ref[...], w_ref[...], preferred_element_type=jnp.float32)
    y = jnp.clip(y + b_ref[...], 0.0, 20.0)            # Hardtanh(0, 20)
    out_ref[...] = (y * mask_ref[...]).astype(out_ref.dtype)


def _lstm_cell(g, c, H):
    """PyTorch LSTM cell, gate order (i, f, g, o).  g: (B, 4H), c: (B, H)."""
    i_g = jax.nn.sigmoid(g[:, 0 * H:1 * H])
    f_g = jax.nn.sigmoid(g[:, 1 * H:2 * H])
    g_g = jnp.tanh(g[:, 2 * H:3 * H])
    o_g = jax.nn.sigmoid(g[:, 3 * H:4 * H])
    c_new = f_g * c + i_g * g_g
    h_new = o_g * jnp.tanh(c_new)
    return h_new, c_new


def _bidir_lstm_layer(x, valid, wih_ref, b_ref, whh_ref, T, B, H):
    """One bidirectional LSTM layer with both directions fused.

    x: (T*B, I) value (rows t-major), valid: (T*B, 1) f32 packed-seq validity.
    wih: (I, 8H) = [fwd i,f,g,o | bwd i,f,g,o]; b: (1, 8H);
    whh: (2H, 8H) block-diagonal [[whh_f, 0], [0, whh_b]].
    Returns the summed bidirectional output (T*B, H) f32, zero at invalid steps
    (pack_padded_sequence -> LSTM -> pad_packed_sequence -> sum over directions).
    """
    # Loop-invariant loads + time-parallel input projection hoisted out of the
    # recurrence (one MXU matmul with M = T*B rows instead of T tiny ones).
    whh = whh_ref[...]
    z = jnp.dot(x.astype(jnp.bfloat16), wih_ref[...],
                preferred_element_type=jnp.float32) + b_ref[...]       # (T*B, 8H)

    h_f = jnp.zeros((B, H), jnp.float32)
    h_b = jnp.zeros((B, H), jnp.float32)
    c_f = jnp.zeros((B, H), jnp.float32)
    c_b = jnp.zeros((B, H), jnp.float32)
    y_f = [None] * T
    y_b = [None] * T
    for s in range(T):                      # fully unrolled: T is static & small
        tf, tb = s, T - 1 - s               # fwd walks up while bwd walks down
        hcat = jnp.concatenate([h_f, h_b], axis=1).astype(jnp.bfloat16)  # (B, 2H)
        rec = jnp.dot(hcat, whh, preferred_element_type=jnp.float32)     # (B, 8H)
        g_f = rec[:, :4 * H] + z[tf * B:(tf + 1) * B, :4 * H]
        g_b = rec[:, 4 * H:] + z[tb * B:(tb + 1) * B, 4 * H:]
        hf_new, cf_new = _lstm_cell(g_f, c_f, H)
        hb_new, cb_new = _lstm_cell(g_b, c_b, H)
        vf = valid[tf * B:(tf + 1) * B, :]                               # (B, 1)
        vb = valid[tb * B:(tb + 1) * B, :]
        y_f[tf] = vf * hf_new
        y_b[tb] = vb * hb_new
        # Packed-sequence semantics: state frozen (and outputs zeroed) past length.
        h_f = vf * hf_new + (1.0 - vf) * h_f
        c_f = vf * cf_new + (1.0 - vf) * c_f
        h_b = vb * hb_new + (1.0 - vb) * h_b
        c_b = vb * cb_new + (1.0 - vb) * c_b
    return jnp.concatenate([y_f[t] + y_b[t] for t in range(T)], axis=0)  # (T*B, H)


def rnn_fc_softmax_kernel(x_ref, valid_ref,
                          wih0_ref, b0_ref, whh0_ref,
                          wih1_ref, b1_ref, whh1_ref,
                          fcw_ref, fcb_ref, out_ref, *, T, B, H):
    """Whole post-conv pipeline in one launch:
       BatchRNN(layer0, no BN) -> BatchRNN(layer1, input BN folded into wih1/b1)
       -> SequenceWise(BatchNorm1d + Linear, BN folded) -> InferenceBatchSoftmax.
       Output is lane-dense (T*B, 128); padded class columns carry a -1e30 bias
       so they get zero softmax mass, and the wrapper slices them off."""
    valid = valid_ref[...]                                   # (T*B, 1) f32
    h1 = _bidir_lstm_layer(x_ref[...], valid, wih0_ref, b0_ref, whh0_ref, T, B, H)
    h2 = _bidir_lstm_layer(h1, valid, wih1_ref, b1_ref, whh1_ref, T, B, H)
    logits = jnp.dot(h2.astype(jnp.bfloat16), fcw_ref[...],
                     preferred_element_type=jnp.float32) + fcb_ref[...]  # (T*B, 128)
    m = jnp.max(logits, axis=-1, keepdims=True)
    e = jnp.exp(logits - m)
    out_ref[...] = e / jnp.sum(e, axis=-1, keepdims=True)


# ------------------------------- glue / model -------------------------------

def get_seq_lens(lengths):
    # conv1: pad_t=5, k_t=11, stride_t=2 ; conv2: pad_t=5, k_t=11, stride_t=1
    l = lengths
    for (p, k, s) in [(5, 11, 2), (5, 11, 1)]:
        l = (l + 2 * p - (k - 1) - 1) // s + 1
    return l.astype(jnp.int32)


def im2col_nhwc(x, kd, kt, sd, st, pd, pt):
    """Channel-last patch extraction using only static slices/stacks (no gather).

    x: (B, D, T, C) -> patches (B*Do*To, kd*kt*C), features flattened in
    (kd, kt, c) order, matching weights packed as w.transpose(2, 3, 1, 0).
    """
    B, D, T, C = x.shape
    xp = jnp.pad(x, ((0, 0), (pd, pd), (pt, pt), (0, 0)))
    Do = (D + 2 * pd - kd) // sd + 1
    To = (T + 2 * pt - kt) // st + 1
    rows = jnp.stack([xp[:, i * sd:i * sd + kd, :, :] for i in range(Do)],
                     axis=1)                                   # (B, Do, kd, Tp, C)
    wins = jnp.stack([rows[:, :, :, j * st:j * st + kt, :] for j in range(To)],
                     axis=2)                                   # (B, Do, To, kd, kt, C)
    return wins.reshape(B * Do * To, kd * kt * C), Do, To


def conv_block(x_nhwc, w_pad, b_pad, time_len, kd, kt, sd, st, pd, pt):
    """x_nhwc: (B, D, T, C) bf16 -> (B, Do, To, 32) bf16 (conv+BN+hardtanh+mask)."""
    B = x_nhwc.shape[0]
    patches, Do, To = im2col_nhwc(x_nhwc, kd, kt, sd, st, pd, pt)
    K = patches.shape[1]
    patches = jnp.pad(patches, ((0, 0), (0, w_pad.shape[0] - K)))  # K -> mult of 128
    # MaskConv: zero every position t >= length.  (PyTorch masks every module of
    # the conv stack with the *final* output lengths; conv2 preserves T here.)
    tmask = (jnp.arange(To)[None, :] < time_len[:, None]).astype(jnp.float32)
    mask = jnp.broadcast_to(tmask[:, None, :], (B, Do, To)).reshape(B * Do * To, 1)
    out = pl.pallas_call(
        conv_block_kernel,
        out_shape=jax.ShapeDtypeStruct((B * Do * To, LANE), jnp.bfloat16),
        in_specs=[VMEM] * 4,
        out_specs=VMEM,
    )(patches, w_pad, b_pad, mask)
    return out[:, :COUT].reshape(B, Do, To, COUT)


def deepspeech_forward(x, lengths, kp, *, num_classes):
    B = x.shape[0]
    out_len = get_seq_lens(lengths)

    # MaskConv(Conv2d -> BatchNorm2d -> Hardtanh) x 2, channel-last layout.
    h = jnp.transpose(x, (0, 2, 3, 1)).astype(jnp.bfloat16)        # (B, D, T, 1)
    h = conv_block(h, kp['c1w'], kp['c1b'], out_len, 41, 11, 2, 2, 20, 5)
    h = conv_block(h, kp['c2w'], kp['c2b'], out_len, 21, 11, 2, 1, 10, 5)

    # (B, Do, To, C) -> (T, B, C*Do): PyTorch's view(B, C*D, T).transpose ordering
    # (feature index = c*D + d).  Flatten rows time-major and pad features to 128.
    _, D2, T2, C = h.shape
    h = jnp.transpose(h, (2, 0, 3, 1)).reshape(T2, B, C * D2)
    in_pad = kp['wih0'].shape[0]
    rnn_in = jnp.pad(h, ((0, 0), (0, 0), (0, in_pad - C * D2))).reshape(T2 * B, in_pad)
    valid = (jnp.arange(T2)[:, None] < out_len[None, :]).astype(jnp.float32)
    valid = valid.reshape(T2 * B, 1)

    H = kp['whh0'].shape[0] // 2
    kern = functools.partial(rnn_fc_softmax_kernel, T=T2, B=B, H=H)
    probs = pl.pallas_call(
        kern,
        out_shape=jax.ShapeDtypeStruct((T2 * B, LANE), jnp.float32),
        in_specs=[VMEM] * 10,
        out_specs=VMEM,
    )(rnn_in, valid,
      kp['wih0'], kp['b0'], kp['whh0'],
      kp['wih1'], kp['b1'], kp['whh1'],
      kp['fc_w'], kp['fc_b'])
    probs = probs[:, :num_classes].reshape(T2, B, num_classes).transpose(1, 0, 2)
    return probs, out_len                                          # (B, T, classes)


# --------------------------- parameters (host side) --------------------------

def init_raw_params(key, d_freq, hidden, nb_layers, num_classes):
    """Random parameters in PyTorch layout (Conv2d / LSTM / Linear conventions)."""
    assert nb_layers == 2, "fused kernel realizes the 2-layer configuration"
    D1 = (d_freq + 2 * 20 - 41) // 2 + 1
    D2 = (D1 + 2 * 10 - 21) // 2 + 1
    rnn_input = COUT * D2
    ks = iter(jax.random.split(key, 64))

    def u(shape, fan_in):
        b = 1.0 / (fan_in ** 0.5)
        return jax.random.uniform(next(ks), shape, jnp.float32, -b, b)

    raw = {
        'c1w': u((32, 1, 41, 11), 1 * 41 * 11), 'c1b': u((32,), 1 * 41 * 11),
        'c2w': u((32, 32, 21, 11), 32 * 21 * 11), 'c2b': u((32,), 32 * 21 * 11),
        'rnns': [],
        'fc_w': u((num_classes, hidden), hidden),
    }
    in_size = rnn_input
    for li in range(nb_layers):
        raw['rnns'].append({
            'wih_f': u((4 * hidden, in_size), hidden),
            'whh_f': u((4 * hidden, hidden), hidden),
            'b_f': u((4 * hidden,), hidden) + u((4 * hidden,), hidden),  # b_ih + b_hh
            'wih_b': u((4 * hidden, in_size), hidden),
            'whh_b': u((4 * hidden, hidden), hidden),
            'b_b': u((4 * hidden,), hidden) + u((4 * hidden,), hidden),
            'has_bn': li > 0,   # BatchRNN: SequenceWise BatchNorm1d on input, layers >= 1
        })
        in_size = hidden
    return raw, rnn_input


def prepare_params(raw, hidden, rnn_input, num_classes):
    """Fold eval-mode BatchNorms into weights/biases, pre-transpose/pack to
    lane-aligned kernel layouts, and cast MXU operands to bf16 (done once)."""
    H = hidden
    bn_s = float(1.0 / (1.0 + BN_EPS) ** 0.5)   # eval BN, default running stats
    bn_t = 0.0                                  # (mean=0, var=1, gamma=1, beta=0)

    def conv_pack(w, b):
        cout = w.shape[0]
        k = w.shape[1] * w.shape[2] * w.shape[3]
        wf = w.transpose(2, 3, 1, 0).reshape(k, cout) * bn_s        # fold BN scale
        bf = b * bn_s + bn_t                                        # fold BN shift
        w_pad = jnp.zeros((_round_up(k, LANE), LANE), jnp.float32)
        w_pad = w_pad.at[:k, :cout].set(wf).astype(jnp.bfloat16)
        b_pad = jnp.zeros((1, LANE), jnp.float32).at[0, :cout].set(bf)
        return w_pad, b_pad

    def rnn_pack(layer, in_size, in_pad):
        # Pre-transpose to (I, 4H) / (H, 4H); fold the eval-mode SequenceWise
        # input BatchNorm1d (x*s + t) into wih and the bias of each direction.
        s = jnp.full((in_size,), bn_s if layer['has_bn'] else 1.0, jnp.float32)
        t = jnp.full((in_size,), bn_t if layer['has_bn'] else 0.0, jnp.float32)
        wih_f = layer['wih_f'].T * s[:, None]
        wih_b = layer['wih_b'].T * s[:, None]
        b_f = layer['b_f'] + t @ layer['wih_f'].T
        b_b = layer['b_b'] + t @ layer['wih_b'].T
        wih = jnp.zeros((in_pad, 8 * H), jnp.float32)
        wih = wih.at[:in_size, :4 * H].set(wih_f).at[:in_size, 4 * H:].set(wih_b)
        whh = jnp.zeros((2 * H, 8 * H), jnp.float32)
        whh = whh.at[:H, :4 * H].set(layer['whh_f'].T).at[H:, 4 * H:].set(layer['whh_b'].T)
        b = jnp.concatenate([b_f, b_b]).reshape(1, 8 * H)
        return wih.astype(jnp.bfloat16), b, whh.astype(jnp.bfloat16)

    kp = {}
    kp['c1w'], kp['c1b'] = conv_pack(raw['c1w'], raw['c1b'])
    kp['c2w'], kp['c2b'] = conv_pack(raw['c2w'], raw['c2b'])
    kp['wih0'], kp['b0'], kp['whh0'] = rnn_pack(raw['rnns'][0], rnn_input,
                                                _round_up(rnn_input, LANE))
    kp['wih1'], kp['b1'], kp['whh1'] = rnn_pack(raw['rnns'][1], H, H)
    # fc: SequenceWise(BatchNorm1d(H) -> Linear(H, C, bias=False)), BN folded.
    # Padded class columns get a -1e30 bias -> zero probability after softmax.
    s_fc = jnp.full((H,), bn_s, jnp.float32)
    t_fc = jnp.full((H,), bn_t, jnp.float32)
    fc_wT = raw['fc_w'].T * s_fc[:, None]                           # (H, C)
    fc_bias = t_fc @ raw['fc_w'].T                                  # (C,)
    kp['fc_w'] = (jnp.zeros((H, LANE), jnp.float32)
                  .at[:, :num_classes].set(fc_wT).astype(jnp.bfloat16))
    kp['fc_b'] = (jnp.full((1, LANE), -1e30, jnp.float32)
                  .at[0, :num_classes].set(fc_bias))
    return kp


if __name__ == "__main__":
    key = jax.random.PRNGKey(0)
    labels = "_abcdefgh"                        # 9 labels -> num_classes = 10
    num_classes = len(labels) + 1
    hidden = 32
    nb_layers = 2
    sample_rate, window_size = 800, 0.02
    d_freq = int(sample_rate * window_size / 2) + 1      # 9 frequency bins
    B, T = 2, 16

    kpk, kx = jax.random.split(key)
    raw, rnn_input = init_raw_params(kpk, d_freq, hidden, nb_layers, num_classes)
    kparams = prepare_params(raw, hidden, rnn_input, num_classes)

    x = jax.random.normal(kx, (B, 1, d_freq, T), jnp.float32)    # NCHW, like PyTorch
    lengths = jnp.array([16, 12], dtype=jnp.int32)               # sorted descending

    fwd = jax.jit(functools.partial(deepspeech_forward, num_classes=num_classes))
    probs, out_len = fwd(x, lengths, kparams)
    jax.block_until_ready((probs, out_len))

    T_out = int(out_len.max())
    assert probs.shape == (B, T_out, num_classes), probs.shape
    assert out_len.shape == (B,)
    # softmax rows sum to 1
    assert bool(jnp.allclose(jnp.sum(probs, axis=-1), 1.0, atol=1e-4))
    print("KERNEL_OK")
</pallas_src>

<mosaic_0001>
module attributes {stable_mosaic.version = 11 : i64} {
  func.func @conv_block_kernel(%arg0: memref<80x512xbf16, #tpu.memory_space<vmem>>, %arg1: memref<512x128xbf16, #tpu.memory_space<vmem>>, %arg2: memref<1x128xf32, #tpu.memory_space<vmem>>, %arg3: memref<80x1xf32, #tpu.memory_space<vmem>>, %arg4: memref<80x128xbf16, #tpu.memory_space<vmem>>) attributes {dimension_semantics = [], scalar_prefetch = 0 : i64, scratch_operands = 0 : i64, tpu.core_type = #tpu.core_type<tc>} {
    %c0 = arith.constant 0 : index
    %c0_0 = arith.constant 0 : index
    %0 = vector.load %arg0[%c0, %c0_0] : memref<80x512xbf16, #tpu.memory_space<vmem>>, vector<80x512xbf16>
    %c0_1 = arith.constant 0 : index
    %c0_2 = arith.constant 0 : index
    %1 = vector.load %arg1[%c0_1, %c0_2] : memref<512x128xbf16, #tpu.memory_space<vmem>>, vector<512x128xbf16>
    %cst = arith.constant dense<0.000000e+00> : vector<80x128xf32>
    %2 = tpu.matmul %0, %1, %cst {dimension_numbers = #tpu.dot_dimension_numbers<[1], [0], [0], [1], [0, 0, 1, 1], [], []>} : vector<80x512xbf16>, vector<512x128xbf16>, vector<80x128xf32> -> vector<80x128xf32>
    %c0_3 = arith.constant 0 : index
    %c0_4 = arith.constant 0 : index
    %3 = vector.load %arg2[%c0_3, %c0_4] : memref<1x128xf32, #tpu.memory_space<vmem>>, vector<1x128xf32>
    %4 = vector.broadcast %3 : vector<1x128xf32> to vector<80x128xf32>
    %5 = arith.addf %2, %4 : vector<80x128xf32>
    %cst_5 = arith.constant 0.000000e+00 : f32
    %cst_6 = arith.constant 2.000000e+01 : f32
    %6 = vector.broadcast %cst_5 : f32 to vector<80x128xf32>
    %7 = arith.maximumf %6, %5 : vector<80x128xf32>
    %8 = vector.broadcast %cst_6 : f32 to vector<80x128xf32>
    %9 = arith.minimumf %8, %7 : vector<80x128xf32>
    %c0_7 = arith.constant 0 : index
    %c0_8 = arith.constant 0 : index
    %10 = vector.load %arg3[%c0_7, %c0_8] : memref<80x1xf32, #tpu.memory_space<vmem>>, vector<80x1xf32>
    %11 = vector.broadcast %10 : vector<80x1xf32> to vector<80x128xf32>
    %12 = arith.mulf %9, %11 : vector<80x128xf32>
    %13 = arith.truncf %12 : vector<80x128xf32> to vector<80x128xbf16>
    %c0_9 = arith.constant 0 : index
    %c0_10 = arith.constant 0 : index
    %14 = vector.load %arg4[%c0_9, %c0_10] : memref<80x128xbf16, #tpu.memory_space<vmem>>, vector<80x128xbf16>
    tpu.vector_store %arg4[%c0_9, %c0_10], %13 {strides = array<i32>} : memref<80x128xbf16, #tpu.memory_space<vmem>>, vector<80x128xbf16>,
    return
  }
}

module attributes {stable_mosaic.version = 11 : i64} {
  func.func @conv_block_kernel(%arg0: memref<48x7424xbf16, #tpu.memory_space<vmem>>, %arg1: memref<7424x128xbf16, #tpu.memory_space<vmem>>, %arg2: memref<1x128xf32, #tpu.memory_space<vmem>>, %arg3: memref<48x1xf32, #tpu.memory_space<vmem>>, %arg4: memref<48x128xbf16, #tpu.memory_space<vmem>>) attributes {dimension_semantics = [], scalar_prefetch = 0 : i64, scratch_operands = 0 : i64, tpu.core_type = #tpu.core_type<tc>} {
    %c0 = arith.constant 0 : index
    %c0_0 = arith.constant 0 : index
    %0 = vector.load %arg0[%c0, %c0_0] : memref<48x7424xbf16, #tpu.memory_space<vmem>>, vector<48x7424xbf16>
    %c0_1 = arith.constant 0 : index
    %c0_2 = arith.constant 0 : index
    %1 = vector.load %arg1[%c0_1, %c0_2] : memref<7424x128xbf16, #tpu.memory_space<vmem>>, vector<7424x128xbf16>
    %cst = arith.constant dense<0.000000e+00> : vector<48x128xf32>
    %2 = tpu.matmul %0, %1, %cst {dimension_numbers = #tpu.dot_dimension_numbers<[1], [0], [0], [1], [0, 0, 1, 1], [], []>} : vector<48x7424xbf16>, vector<7424x128xbf16>, vector<48x128xf32> -> vector<48x128xf32>
    %c0_3 = arith.constant 0 : index
    %c0_4 = arith.constant 0 : index
    %3 = vector.load %arg2[%c0_3, %c0_4] : memref<1x128xf32, #tpu.memory_space<vmem>>, vector<1x128xf32>
    %4 = vector.broadcast %3 : vector<1x128xf32> to vector<48x128xf32>
    %5 = arith.addf %2, %4 : vector<48x128xf32>
    %cst_5 = arith.constant 0.000000e+00 : f32
    %cst_6 = arith.constant 2.000000e+01 : f32
    %6 = vector.broadcast %cst_5 : f32 to vector<48x128xf32>
    %7 = arith.maximumf %6, %5 : vector<48x128xf32>
    %8 = vector.broadcast %cst_6 : f32 to vector<48x128xf32>
    %9 = arith.minimumf %8, %7 : vector<48x128xf32>
    %c0_7 = arith.constant 0 : index
    %c0_8 = arith.constant 0 : index
    %10 = vector.load %arg3[%c0_7, %c0_8] : memref<48x1xf32, #tpu.memory_space<vmem>>, vector<48x1xf32>
    %11 = vector.broadcast %10 : vector<48x1xf32> to vector<48x128xf32>
    %12 = arith.mulf %9, %11 : vector<48x128xf32>
    %13 = arith.truncf %12 : vector<48x128xf32> to vector<48x128xbf16>
    %c0_9 = arith.constant 0 : index
    %c0_10 = arith.constant 0 : index
    %14 = vector.load %arg4[%c0_9, %c0_10] : memref<48x128xbf16, #tpu.memory_space<vmem>>, vector<48x128xbf16>
    tpu.vector_store %arg4[%c0_9, %c0_10], %13 {strides = array<i32>} : memref<48x128xbf16, #tpu.memory_space<vmem>>, vector<48x128xbf16>,
    return
  }
}

module attributes {stable_mosaic.version = 11 : i64} {
  func.func @rnn_fc_softmax_kernel(%arg0: memref<16x128xbf16, #tpu.memory_space<vmem>>, %arg1: memref<16x1xf32, #tpu.memory_space<vmem>>, %arg2: memref<128x256xbf16, #tpu.memory_space<vmem>>, %arg3: memref<1x256xf32, #tpu.memory_space<vmem>>, %arg4: memref<64x256xbf16, #tpu.memory_space<vmem>>, %arg5: memref<32x256xbf16, #tpu.memory_space<vmem>>, %arg6: memref<1x256xf32, #tpu.memory_space<vmem>>, %arg7: memref<64x256xbf16, #tpu.memory_space<vmem>>, %arg8: memref<32x128xbf16, #tpu.memory_space<vmem>>, %arg9: memref<1x128xf32, #tpu.memory_space<vmem>>, %arg10: memref<16x128xf32, #tpu.memory_space<vmem>>) attributes {dimension_semantics = [], scalar_prefetch = 0 : i64, scratch_operands = 0 : i64, tpu.core_type = #tpu.core_type<tc>} {
    %c0 = arith.constant 0 : index
    %c0_0 = arith.constant 0 : index
    %0 = vector.load %arg1[%c0, %c0_0] : memref<16x1xf32, #tpu.memory_space<vmem>>, vector<16x1xf32>
    %c0_1 = arith.constant 0 : index
    %c0_2 = arith.constant 0 : index
    %1 = vector.load %arg0[%c0_1, %c0_2] : memref<16x128xbf16, #tpu.memory_space<vmem>>, vector<16x128xbf16>
    %c0_3 = arith.constant 0 : index
    %c0_4 = arith.constant 0 : index
    %2 = vector.load %arg4[%c0_3, %c0_4] : memref<64x256xbf16, #tpu.memory_space<vmem>>, vector<64x256xbf16>
    %c0_5 = arith.constant 0 : index
    %c0_6 = arith.constant 0 : index
    %3 = vector.load %arg2[%c0_5, %c0_6] : memref<128x256xbf16, #tpu.memory_space<vmem>>, vector<128x256xbf16>
    %cst = arith.constant dense<0.000000e+00> : vector<16x256xf32>
    %4 = tpu.matmul %1, %3, %cst {dimension_numbers = #tpu.dot_dimension_numbers<[1], [0], [0], [1], [0, 0, 1, 1], [], []>} : vector<16x128xbf16>, vector<128x256xbf16>, vector<16x256xf32> -> vector<16x256xf32>
    %c0_7 = arith.constant 0 : index
    %c0_8 = arith.constant 0 : index
    %5 = vector.load %arg3[%c0_7, %c0_8] : memref<1x256xf32, #tpu.memory_space<vmem>>, vector<1x256xf32>
    %6 = vector.broadcast %5 : vector<1x256xf32> to vector<16x256xf32>
    %7 = arith.addf %4, %6 : vector<16x256xf32>
    %cst_9 = arith.constant 0.000000e+00 : f32
    %8 = vector.broadcast %cst_9 : f32 to vector<2x32xf32>
    %cst_10 = arith.constant 0.000000e+00 : f32
    %9 = vector.broadcast %cst_10 : f32 to vector<2x32xf32>
    %cst_11 = arith.constant 0.000000e+00 : f32
    %10 = vector.broadcast %cst_11 : f32 to vector<2x32xf32>
    %cst_12 = arith.constant 0.000000e+00 : f32
    %11 = vector.broadcast %cst_12 : f32 to vector<2x32xf32>
    %12 = tpu.concatenate %8, %9 in 1 : vector<2x32xf32>, vector<2x32xf32> -> vector<2x64xf32>
    %13 = arith.truncf %12 : vector<2x64xf32> to vector<2x64xbf16>
    %cst_13 = arith.constant dense<0.000000e+00> : vector<2x256xf32>
    %14 = tpu.matmul %13, %2, %cst_13 {dimension_numbers = #tpu.dot_dimension_numbers<[1], [0], [0], [1], [0, 0, 1, 1], [], []>} : vector<2x64xbf16>, vector<64x256xbf16>, vector<2x256xf32> -> vector<2x256xf32>
    %15 = vector.extract_strided_slice %14 {offsets = [0, 0], sizes = [2, 128], strides = [1, 1]} : vector<2x256xf32> to vector<2x128xf32>
    %16 = vector.extract_strided_slice %7 {offsets = [0, 0], sizes = [2, 128], strides = [1, 1]} : vector<16x256xf32> to vector<2x128xf32>
    %17 = arith.addf %15, %16 : vector<2x128xf32>
    %18 = vector.extract_strided_slice %14 {offsets = [0, 128], sizes = [2, 128], strides = [1, 1]} : vector<2x256xf32> to vector<2x128xf32>
    %19 = vector.extract_strided_slice %7 {offsets = [14, 128], sizes = [2, 128], strides = [1, 1]} : vector<16x256xf32> to vector<2x128xf32>
    %20 = arith.addf %18, %19 : vector<2x128xf32>
    %21 = vector.extract_strided_slice %17 {offsets = [0, 0], sizes = [2, 32], strides = [1, 1]} : vector<2x128xf32> to vector<2x32xf32>
    %22 = arith.negf %21 : vector<2x32xf32>
    %23 = math.exp %22 : vector<2x32xf32>
    %cst_14 = arith.constant 1.000000e+00 : f32
    %24 = vector.broadcast %cst_14 : f32 to vector<2x32xf32>
    %25 = arith.addf %24, %23 : vector<2x32xf32>
    %26 = arith.divf %24, %25 : vector<2x32xf32>
    %27 = vector.extract_strided_slice %17 {offsets = [0, 32], sizes = [2, 32], strides = [1, 1]} : vector<2x128xf32> to vector<2x32xf32>
    %28 = arith.negf %27 : vector<2x32xf32>
    %29 = math.exp %28 : vector<2x32xf32>
    %cst_15 = arith.constant 1.000000e+00 : f32
    %30 = vector.broadcast %cst_15 : f32 to vector<2x32xf32>
    %31 = arith.addf %30, %29 : vector<2x32xf32>
    %32 = arith.divf %30, %31 : vector<2x32xf32>
    %33 = vector.extract_strided_slice %17 {offsets = [0, 64], sizes = [2, 32], strides = [1, 1]} : vector<2x128xf32> to vector<2x32xf32>
    %34 = math.tanh %33 : vector<2x32xf32>
    %35 = vector.extract_strided_slice %17 {offsets = [0, 96], sizes = [2, 32], strides = [1, 1]} : vector<2x128xf32> to vector<2x32xf32>
    %36 = arith.negf %35 : vector<2x32xf32>
    %37 = math.exp %36 : vector<2x32xf32>
    %cst_16 = arith.constant 1.000000e+00 : f32
    %38 = vector.broadcast %cst_16 : f32 to vector<2x32xf32>
    %39 = arith.addf %38, %37 : vector<2x32xf32>
    %40 = arith.divf %38, %39 : vector<2x32xf32>
    %41 = arith.mulf %32, %10 : vector<2x32xf32>
    %42 = arith.mulf %26, %34 : vector<2x32xf32>
    %43 = arith.addf %41, %42 : vector<2x32xf32>
    %44 = math.tanh %43 : vector<2x32xf32>
    %45 = arith.mulf %40, %44 : vector<2x32xf32>
    %46 = vector.extract_strided_slice %20 {offsets = [0, 0], sizes = [2, 32], strides = [1, 1]} : vector<2x128xf32> to vector<2x32xf32>
    %47 = arith.negf %46 : vector<2x32xf32>
    %48 = math.exp %47 : vector<2x32xf32>
    %cst_17 = arith.constant 1.000000e+00 : f32
    %49 = vector.broadcast %cst_17 : f32 to vector<2x32xf32>
    %50 = arith.addf %49, %48 : vector<2x32xf32>
    %51 = arith.divf %49, %50 : vector<2x32xf32>
    %52 = vector.extract_strided_slice %20 {offsets = [0, 32], sizes = [2, 32], strides = [1, 1]} : vector<2x128xf32> to vector<2x32xf32>
    %53 = arith.negf %52 : vector<2x32xf32>
    %54 = math.exp %53 : vector<2x32xf32>
    %cst_18 = arith.constant 1.000000e+00 : f32
    %55 = vector.broadcast %cst_18 : f32 to vector<2x32xf32>
    %56 = arith.addf %55, %54 : vector<2x32xf32>
    %57 = arith.divf %55, %56 : vector<2x32xf32>
    %58 = vector.extract_strided_slice %20 {offsets = [0, 64], sizes = [2, 32], strides = [1, 1]} : vector<2x128xf32> to vector<2x32xf32>
    %59 = math.tanh %58 : vector<2x32xf32>
    %60 = vector.extract_strided_slice %20 {offsets = [0, 96], sizes = [2, 32], strides = [1, 1]} : vector<2x128xf32> to vector<2x32xf32>
    %61 = arith.negf %60 : vector<2x32xf32>
    %62 = math.exp %61 : vector<2x32xf32>
    %cst_19 = arith.constant 1.000000e+00 : f32
    %63 = vector.broadcast %cst_19 : f32 to vector<2x32xf32>
    %64 = arith.addf %63, %62 : vector<2x32xf32>
    %65 = arith.divf %63, %64 : vector<2x32xf32>
    %66 = arith.mulf %57, %11 : vector<2x32xf32>
    %67 = arith.mulf %51, %59 : vector<2x32xf32>
    %68 = arith.addf %66, %67 : vector<2x32xf32>
    %69 = math.tanh %68 : vector<2x32xf32>
    %70 = arith.mulf %65, %69 : vector<2x32xf32>
    %71 = vector.extract_strided_slice %0 {offsets = [0, 0], sizes = [2, 1], strides = [1, 1]} : vector<16x1xf32> to vector<2x1xf32>
    %72 = vector.extract_strided_slice %0 {offsets = [14, 0], sizes = [2, 1], strides = [1, 1]} : vector<16x1xf32> to vector<2x1xf32>
    %73 = vector.broadcast %71 : vector<2x1xf32> to vector<2x32xf32>
    %74 = arith.mulf %73, %45 : vector<2x32xf32>
    %75 = vector.broadcast %72 : vector<2x1xf32> to vector<2x32xf32>
    %76 = arith.mulf %75, %70 : vector<2x32xf32>
    %77 = vector.broadcast %71 : vector<2x1xf32> to vector<2x32xf32>
    %78 = arith.mulf %77, %45 : vector<2x32xf32>
    %cst_20 = arith.constant 1.000000e+00 : f32
    %79 = vector.broadcast %cst_20 : f32 to vector<2x1xf32>
    %80 = arith.subf %79, %71 : vector<2x1xf32>
    %81 = vector.broadcast %80 : vector<2x1xf32> to vector<2x32xf32>
    %82 = arith.mulf %81, %8 : vector<2x32xf32>
    %83 = arith.addf %78, %82 : vector<2x32xf32>
    %84 = vector.broadcast %71 : vector<2x1xf32> to vector<2x32xf32>
    %85 = arith.mulf %84, %43 : vector<2x32xf32>
    %cst_21 = arith.constant 1.000000e+00 : f32
    %86 = vector.broadcast %cst_21 : f32 to vector<2x1xf32>
    %87 = arith.subf %86, %71 : vector<2x1xf32>
    %88 = vector.broadcast %87 : vector<2x1xf32> to vector<2x32xf32>
    %89 = arith.mulf %88, %10 : vector<2x32xf32>
    %90 = arith.addf %85, %89 : vector<2x32xf32>
    %91 = vector.broadcast %72 : vector<2x1xf32> to vector<2x32xf32>
    %92 = arith.mulf %91, %70 : vector<2x32xf32>
    %cst_22 = arith.constant 1.000000e+00 : f32
    %93 = vector.broadcast %cst_22 : f32 to vector<2x1xf32>
    %94 = arith.subf %93, %72 : vector<2x1xf32>
    %95 = vector.broadcast %94 : vector<2x1xf32> to vector<2x32xf32>
    %96 = arith.mulf %95, %9 : vector<2x32xf32>
    %97 = arith.addf %92, %96 : vector<2x32xf32>
    %98 = vector.broadcast %72 : vector<2x1xf32> to vector<2x32xf32>
    %99 = arith.mulf %98, %68 : vector<2x32xf32>
    %cst_23 = arith.constant 1.000000e+00 : f32
    %100 = vector.broadcast %cst_23 : f32 to vector<2x1xf32>
    %101 = arith.subf %100, %72 : vector<2x1xf32>
    %102 = vector.broadcast %101 : vector<2x1xf32> to vector<2x32xf32>
    %103 = arith.mulf %102, %11 : vector<2x32xf32>
    %104 = arith.addf %99, %103 : vector<2x32xf32>
    %105 = tpu.concatenate %83, %97 in 1 : vector<2x32xf32>, vector<2x32xf32> -> vector<2x64xf32>
    %106 = arith.truncf %105 : vector<2x64xf32> to vector<2x64xbf16>
    %cst_24 = arith.constant dense<0.000000e+00> : vector<2x256xf32>
    %107 = tpu.matmul %106, %2, %cst_24 {dimension_numbers = #tpu.dot_dimension_numbers<[1], [0], [0], [1], [0, 0, 1, 1], [], []>} : vector<2x64xbf16>, vector<64x256xbf16>, vector<2x256xf32> -> vector<2x256xf32>
    %108 = vector.extract_strided_slice %107 {offsets = [0, 0], sizes = [2, 128], strides = [1, 1]} : vector<2x256xf32> to vector<2x128xf32>
    %109 = vector.extract_strided_slice %7 {offsets = [2, 0], sizes = [2, 128], strides = [1, 1]} : vector<16x256xf32> to vector<2x128xf32>
    %110 = arith.addf %108, %109 : vector<2x128xf32>
    %111 = vector.extract_strided_slice %107 {offsets = [0, 128], sizes = [2, 128], strides = [1, 1]} : vector<2x256xf32> to vector<2x128xf32>
    %112 = vector.extract_strided_slice %7 {offsets = [12, 128], sizes = [2, 128], strides = [1, 1]} : vector<16x256xf32> to vector<2x128xf32>
    %113 = arith.addf %111, %112 : vector<2x128xf32>
    %114 = vector.extract_strided_slice %110 {offsets = [0, 0], sizes = [2, 32], strides = [1, 1]} : vector<2x128xf32> to vector<2x32xf32>
    %115 = arith.negf %114 : vector<2x32xf32>
    %116 = math.exp %115 : vector<2x32xf32>
    %cst_25 = arith.constant 1.000000e+00 : f32
    %117 = vector.broadcast %cst_25 : f32 to vector<2x32xf32>
    %118 = arith.addf %117, %116 : vector<2x32xf32>
    %119 = arith.divf %117, %118 : vector<2x32xf32>
    %120 = vector.extract_strided_slice %110 {offsets = [0, 32], sizes = [2, 32], strides = [1, 1]} : vector<2x128xf32> to vector<2x32xf32>
    %121 = arith.negf %120 : vector<2x32xf32>
    %122 = math.exp %121 : vector<2x32xf32>
    %cst_26 = arith.constant 1.000000e+00 : f32
    %123 = vector.broadcast %cst_26 : f32 to vector<2x32xf32>
    %124 = arith.addf %123, %122 : vector<2x32xf32>
    %125 = arith.divf %123, %124 : vector<2x32xf32>
    %126 = vector.extract_strided_slice %110 {offsets = [0, 64], sizes = [2, 32], strides = [1, 1]} : vector<2x128xf32> to vector<2x32xf32>
    %127 = math.tanh %126 : vector<2x32xf32>
    %128 = vector.extract_strided_slice %110 {offsets = [0, 96], sizes = [2, 32], strides = [1, 1]} : vector<2x128xf32> to vector<2x32xf32>
    %129 = arith.negf %128 : vector<2x32xf32>
    %130 = math.exp %129 : vector<2x32xf32>
    %cst_27 = arith.constant 1.000000e+00 : f32
    %131 = vector.broadcast %cst_27 : f32 to vector<2x32xf32>
    %132 = arith.addf %131, %130 : vector<2x32xf32>
    %133 = arith.divf %131, %132 : vector<2x32xf32>
    %134 = arith.mulf %125, %90 : vector<2x32xf32>
    %135 = arith.mulf %119, %127 : vector<2x32xf32>
    %136 = arith.addf %134, %135 : vector<2x32xf32>
    %137 = math.tanh %136 : vector<2x32xf32>
    %138 = arith.mulf %133, %137 : vector<2x32xf32>
    %139 = vector.extract_strided_slice %113 {offsets = [0, 0], sizes = [2, 32], strides = [1, 1]} : vector<2x128xf32> to vector<2x32xf32>
    %140 = arith.negf %139 : vector<2x32xf32>
    %141 = math.exp %140 : vector<2x32xf32>
    %cst_28 = arith.constant 1.000000e+00 : f32
    %142 = vector.broadcast %cst_28 : f32 to vector<2x32xf32>
    %143 = arith.addf %142, %141 : vector<2x32xf32>
    %144 = arith.divf %142, %143 : vector<2x32xf32>
    %145 = vector.extract_strided_slice %113 {offsets = [0, 32], sizes = [2, 32], strides = [1, 1]} : vector<2x128xf32> to vector<2x32xf32>
    %146 = arith.negf %145 : vector<2x32xf32>
    %147 = math.exp %146 : vector<2x32xf32>
    %cst_29 = arith.constant 1.000000e+00 : f32
    %148 = vector.broadcast %cst_29 : f32 to vector<2x32xf32>
    %149 = arith.addf %148, %147 : vector<2x32xf32>
    %150 = arith.divf %148, %149 : vector<2x32xf32>
    %151 = vector.extract_strided_slice %113 {offsets = [0, 64], sizes = [2, 32], strides = [1, 1]} : vector<2x128xf32> to vector<2x32xf32>
    %152 = math.tanh %151 : vector<2x32xf32>
    %153 = vector.extract_strided_slice %113 {offsets = [0, 96], sizes = [2, 32], strides = [1, 1]} : vector<2x128xf32> to vector<2x32xf32>
    %154 = arith.negf %153 : vector<2x32xf32>
    %155 = math.exp %154 : vector<2x32xf32>
    %cst_30 = arith.constant 1.000000e+00 : f32
    %156 = vector.broadcast %cst_30 : f32 to vector<2x32xf32>
    %157 = arith.addf %156, %155 : vector<2x32xf32>
    %158 = arith.divf %156, %157 : vector<2x32xf32>
    %159 = arith.mulf %150, %104 : vector<2x32xf32>
    %160 = arith.mulf %144, %152 : vector<2x32xf32>
    %161 = arith.addf %159, %160 : vector<2x32xf32>
    %162 = math.tanh %161 : vector<2x32xf32>
    %163 = arith.mulf %158, %162 : vector<2x32xf32>
    %164 = vector.extract_strided_slice %0 {offsets = [2, 0], sizes = [2, 1], strides = [1, 1]} : vector<16x1xf32> to vector<2x1xf32>
    %165 = vector.extract_strided_slice %0 {offsets = [12, 0], sizes = [2, 1], strides = [1, 1]} : vector<16x1xf32> to vector<2x1xf32>
    %166 = vector.broadcast %164 : vector<2x1xf32> to vector<2x32xf32>
    %167 = arith.mulf %166, %138 : vector<2x32xf32>
    %168 = vector.broadcast %165 : vector<2x1xf32> to vector<2x32xf32>
    %169 = arith.mulf %168, %163 : vector<2x32xf32>
    %170 = vector.broadcast %164 : vector<2x1xf32> to vector<2x32xf32>
    %171 = arith.mulf %170, %138 : vector<2x32xf32>
    %cst_31 = arith.constant 1.000000e+00 : f32
    %172 = vector.broadcast %cst_31 : f32 to vector<2x1xf32>
    %173 = arith.subf %172, %164 : vector<2x1xf32>
    %174 = vector.broadcast %173 : vector<2x1xf32> to vector<2x32xf32>
    %175 = arith.mulf %174, %83 : vector<2x32xf32>
    %176 = arith.addf %171, %175 : vector<2x32xf32>
    %177 = vector.broadcast %164 : vector<2x1xf32> to vector<2x32xf32>
    %178 = arith.mulf %177, %136 : vector<2x32xf32>
    %cst_32 = arith.constant 1.000000e+00 : f32
    %179 = vector.broadcast %cst_32 : f32 to vector<2x1xf32>
    %180 = arith.subf %179, %164 : vector<2x1xf32>
    %181 = vector.broadcast %180 : vector<2x1xf32> to vector<2x32xf32>
    %182 = arith.mulf %181, %90 : vector<2x32xf32>
    %183 = arith.addf %178, %182 : vector<2x32xf32>
    %184 = vector.broadcast %165 : vector<2x1xf32> to vector<2x32xf32>
    %185 = arith.mulf %184, %163 : vector<2x32xf32>
    %cst_33 = arith.constant 1.000000e+00 : f32
    %186 = vector.broadcast %cst_33 : f32 to vector<2x1xf32>
    %187 = arith.subf %186, %165 : vector<2x1xf32>
    %188 = vector.broadcast %187 : vector<2x1xf32> to vector<2x32xf32>
    %189 = arith.mulf %188, %97 : vector<2x32xf32>
    %190 = arith.addf %185, %189 : vector<2x32xf32>
    %191 = vector.broadcast %165 : vector<2x1xf32> to vector<2x32xf32>
    %192 = arith.mulf %191, %161 : vector<2x32xf32>
    %cst_34 = arith.constant 1.000000e+00 : f32
    %193 = vector.broadcast %cst_34 : f32 to vector<2x1xf32>
    %194 = arith.subf %193, %165 : vector<2x1xf32>
    %195 = vector.broadcast %194 : vector<2x1xf32> to vector<2x32xf32>
    %196 = arith.mulf %195, %104 : vector<2x32xf32>
    %197 = arith.addf %192, %196 : vector<2x32xf32>
    %198 = tpu.concatenate %176, %190 in 1 : vector<2x32xf32>, vector<2x32xf32> -> vector<2x64xf32>
    %199 = arith.truncf %198 : vector<2x64xf32> to vector<2x64xbf16>
    %cst_35 = arith.constant dense<0.000000e+00> : vector<2x256xf32>
    %200 = tpu.matmul %199, %2, %cst_35 {dimension_numbers = #tpu.dot_dimension_numbers<[1], [0], [0], [1], [0, 0, 1, 1], [], []>} : vector<2x64xbf16>, vector<64x256xbf16>, vector<2x256xf32> -> vector<2x256xf32>
    %201 = vector.extract_strided_slice %200 {offsets = [0, 0], sizes = [2, 128], strides = [1, 1]} : vector<2x256xf32> to vector<2x128xf32>
    %202 = vector.extract_strided_slice %7 {offsets = [4, 0], sizes = [2, 128], strides = [1, 1]} : vector<16x256xf32> to vector<2x128xf32>
    %203 = arith.addf %201, %202 : vector<2x128xf32>
    %204 = vector.extract_strided_slice %200 {offsets = [0, 128], sizes = [2, 128], strides = [1, 1]} : vector<2x256xf32> to vector<2x128xf32>
    %205 = vector.extract_strided_slice %7 {offsets = [10, 128], sizes = [2, 128], strides = [1, 1]} : vector<16x256xf32> to vector<2x128xf32>
    %206 = arith.addf %204, %205 : vector<2x128xf32>
    %207 = vector.extract_strided_slice %203 {offsets = [0, 0], sizes = [2, 32], strides = [1, 1]} : vector<2x128xf32> to vector<2x32xf32>
    %208 = arith.negf %207 : vector<2x32xf32>
    %209 = math.exp %208 : vector<2x32xf32>
    %cst_36 = arith.constant 1.000000e+00 : f32
    %210 = vector.broadcast %cst_36 : f32 to vector<2x32xf32>
    %211 = arith.addf %210, %209 : vector<2x32xf32>
    %212 = arith.divf %210, %211 : vector<2x32xf32>
    %213 = vector.extract_strided_slice %203 {offsets = [0, 32], sizes = [2, 32], strides = [1, 1]} : vector<2x128xf32> to vector<2x32xf32>
    %214 = arith.negf %213 : vector<2x32xf32>
    %215 = math.exp %214 : vector<2x32xf32>
    %cst_37 = arith.constant 1.000000e+00 : f32
    %216 = vector.broadcast %cst_37 : f32 to vector<2x32xf32>
    %217 = arith.addf %216, %215 : vector<2x32xf32>
    %218 = arith.divf %216, %217 : vector<2x32xf32>
    %219 = vector.extract_strided_slice %203 {offsets = [0, 64], sizes = [2, 32], strides = [1, 1]} : vector<2x128xf32> to vector<2x32xf32>
    %220 = math.tanh %219 : vector<2x32xf32>
    %221 = vector.extract_strided_slice %203 {offsets = [0, 96], sizes = [2, 32], strides = [1, 1]} : vector<2x128xf32> to vector<2x32xf32>
    %222 = arith.negf %221 : vector<2x32xf32>
    %223 = math.exp %222 : vector<2x32xf32>
    %cst_38 = arith.constant 1.000000e+00 : f32
    %224 = vector.broadcast %cst_38 : f32 to vector<2x32xf32>
    %225 = arith.addf %224, %223 : vector<2x32xf32>
    %226 = arith.divf %224, %225 : vector<2x32xf32>
    %227 = arith.mulf %218, %183 : vector<2x32xf32>
    %228 = arith.mulf %212, %220 : vector<2x32xf32>
    %229 = arith.addf %227, %228 : vector<2x32xf32>
    %230 = math.tanh %229 : vector<2x32xf32>
    %231 = arith.mulf %226, %230 : vector<2x32xf32>
    %232 = vector.extract_strided_slice %206 {offsets = [0, 0], sizes = [2, 32], strides = [1, 1]} : vector<2x128xf32> to vector<2x32xf32>
    %233 = arith.negf %232 : vector<2x32xf32>
    %234 = math.exp %233 : vector<2x32xf32>
    %cst_39 = arith.constant 1.000000e+00 : f32
    %235 = vector.broadcast %cst_39 : f32 to vector<2x32xf32>
    %236 = arith.addf %235, %234 : vector<2x32xf32>
    %237 = arith.divf %235, %236 : vector<2x32xf32>
    %238 = vector.extract_strided_slice %206 {offsets = [0, 32], sizes = [2, 32], strides = [1, 1]} : vector<2x128xf32> to vector<2x32xf32>
    %239 = arith.negf %238 : vector<2x32xf32>
    %240 = math.exp %239 : vector<2x32xf32>
    %cst_40 = arith.constant 1.000000e+00 : f32
    %241 = vector.broadcast %cst_40 : f32 to vector<2x32xf32>
    %242 = arith.addf %241, %240 : vector<2x32xf32>
    %243 = arith.divf %241, %242 : vector<2x32xf32>
    %244 = vector.extract_strided_slice %206 {offsets = [0, 64], sizes = [2, 32], strides = [1, 1]} : vector<2x128xf32> to vector<2x32xf32>
    %245 = math.tanh %244 : vector<2x32xf32>
    %246 = vector.extract_strided_slice %206 {offsets = [0, 96], sizes = [2, 32], strides = [1, 1]} : vector<2x128xf32> to vector<2x32xf32>
    %247 = arith.negf %246 : vector<2x32xf32>
    %248 = math.exp %247 : vector<2x32xf32>
    %cst_41 = arith.constant 1.000000e+00 : f32
    %249 = vector.broadcast %cst_41 : f32 to vector<2x32xf32>
    %250 = arith.addf %249, %248 : vector<2x32xf32>
    %251 = arith.divf %249, %250 : vector<2x32xf32>
    %252 = arith.mulf %243, %197 : vector<2x32xf32>
    %253 = arith.mulf %237, %245 : vector<2x32xf32>
    %254 = arith.addf %252, %253 : vector<2x32xf32>
    %255 = math.tanh %254 : vector<2x32xf32>
    %256 = arith.mulf %251, %255 : vector<2x32xf32>
    %257 = vector.extract_strided_slice %0 {offsets = [4, 0], sizes = [2, 1], strides = [1, 1]} : vector<16x1xf32> to vector<2x1xf32>
    %258 = vector.extract_strided_slice %0 {offsets = [10, 0], sizes = [2, 1], strides = [1, 1]} : vector<16x1xf32> to vector<2x1xf32>
    %259 = vector.broadcast %257 : vector<2x1xf32> to vector<2x32xf32>
    %260 = arith.mulf %259, %231 : vector<2x32xf32>
    %261 = vector.broadcast %258 : vector<2x1xf32> to vector<2x32xf32>
    %262 = arith.mulf %261, %256 : vector<2x32xf32>
    %263 = vector.broadcast %257 : vector<2x1xf32> to vector<2x32xf32>
    %264 = arith.mulf %263, %231 : vector<2x32xf32>
    %cst_42 = arith.constant 1.000000e+00 : f32
    %265 = vector.broadcast %cst_42 : f32 to vector<2x1xf32>
    %266 = arith.subf %265, %257 : vector<2x1xf32>
    %267 = vector.broadcast %266 : vector<2x1xf32> to vector<2x32xf32>
    %268 = arith.mulf %267, %176 : vector<2x32xf32>
    %269 = arith.addf %264, %268 : vector<2x32xf32>
    %270 = vector.broadcast %257 : vector<2x1xf32> to vector<2x32xf32>
    %271 = arith.mulf %270, %229 : vector<2x32xf32>
    %cst_43 = arith.constant 1.000000e+00 : f32
    %272 = vector.broadcast %cst_43 : f32 to vector<2x1xf32>
    %273 = arith.subf %272, %257 : vector<2x1xf32>
    %274 = vector.broadcast %273 : vector<2x1xf32> to vector<2x32xf32>
    %275 = arith.mulf %274, %183 : vector<2x32xf32>
    %276 = arith.addf %271, %275 : vector<2x32xf32>
    %277 = vector.broadcast %258 : vector<2x1xf32> to vector<2x32xf32>
    %278 = arith.mulf %277, %256 : vector<2x32xf32>
    %cst_44 = arith.constant 1.000000e+00 : f32
    %279 = vector.broadcast %cst_44 : f32 to vector<2x1xf32>
    %280 = arith.subf %279, %258 : vector<2x1xf32>
    %281 = vector.broadcast %280 : vector<2x1xf32> to vector<2x32xf32>
    %282 = arith.mulf %281, %190 : vector<2x32xf32>
    %283 = arith.addf %278, %282 : vector<2x32xf32>
    %284 = vector.broadcast %258 : vector<2x1xf32> to vector<2x32xf32>
    %285 = arith.mulf %284, %254 : vector<2x32xf32>
    %cst_45 = arith.constant 1.000000e+00 : f32
    %286 = vector.broadcast %cst_45 : f32 to vector<2x1xf32>
    %287 = arith.subf %286, %258 : vector<2x1xf32>
    %288 = vector.broadcast %287 : vector<2x1xf32> to vector<2x32xf32>
    %289 = arith.mulf %288, %197 : vector<2x32xf32>
    %290 = arith.addf %285, %289 : vector<2x32xf32>
    %291 = tpu.concatenate %269, %283 in 1 : vector<2x32xf32>, vector<2x32xf32> -> vector<2x64xf32>
    %292 = arith.truncf %291 : vector<2x64xf32> to vector<2x64xbf16>
    %cst_46 = arith.constant dense<0.000000e+00> : vector<2x256xf32>
    %293 = tpu.matmul %292, %2, %cst_46 {dimension_numbers = #tpu.dot_dimension_numbers<[1], [0], [0], [1], [0, 0, 1, 1], [], []>} : vector<2x64xbf16>, vector<64x256xbf16>, vector<2x256xf32> -> vector<2x256xf32>
    %294 = vector.extract_strided_slice %293 {offsets = [0, 0], sizes = [2, 128], strides = [1, 1]} : vector<2x256xf32> to vector<2x128xf32>
    %295 = vector.extract_strided_slice %7 {offsets = [6, 0], sizes = [2, 128], strides = [1, 1]} : vector<16x256xf32> to vector<2x128xf32>
    %296 = arith.addf %294, %295 : vector<2x128xf32>
    %297 = vector.extract_strided_slice %293 {offsets = [0, 128], sizes = [2, 128], strides = [1, 1]} : vector<2x256xf32> to vector<2x128xf32>
    %298 = vector.extract_strided_slice %7 {offsets = [8, 128], sizes = [2, 128], strides = [1, 1]} : vector<16x256xf32> to vector<2x128xf32>
    %299 = arith.addf %297, %298 : vector<2x128xf32>
    %300 = vector.extract_strided_slice %296 {offsets = [0, 0], sizes = [2, 32], strides = [1, 1]} : vector<2x128xf32> to vector<2x32xf32>
    %301 = arith.negf %300 : vector<2x32xf32>
    %302 = math.exp %301 : vector<2x32xf32>
    %cst_47 = arith.constant 1.000000e+00 : f32
    %303 = vector.broadcast %cst_47 : f32 to vector<2x32xf32>
    %304 = arith.addf %303, %302 : vector<2x32xf32>
    %305 = arith.divf %303, %304 : vector<2x32xf32>
    %306 = vector.extract_strided_slice %296 {offsets = [0, 32], sizes = [2, 32], strides = [1, 1]} : vector<2x128xf32> to vector<2x32xf32>
    %307 = arith.negf %306 : vector<2x32xf32>
    %308 = math.exp %307 : vector<2x32xf32>
    %cst_48 = arith.constant 1.000000e+00 : f32
    %309 = vector.broadcast %cst_48 : f32 to vector<2x32xf32>
    %310 = arith.addf %309, %308 : vector<2x32xf32>
    %311 = arith.divf %309, %310 : vector<2x32xf32>
    %312 = vector.extract_strided_slice %296 {offsets = [0, 64], sizes = [2, 32], strides = [1, 1]} : vector<2x128xf32> to vector<2x32xf32>
    %313 = math.tanh %312 : vector<2x32xf32>
    %314 = vector.extract_strided_slice %296 {offsets = [0, 96], sizes = [2, 32], strides = [1, 1]} : vector<2x128xf32> to vector<2x32xf32>
    %315 = arith.negf %314 : vector<2x32xf32>
    %316 = math.exp %315 : vector<2x32xf32>
    %cst_49 = arith.constant 1.000000e+00 : f32
    %317 = vector.broadcast %cst_49 : f32 to vector<2x32xf32>
    %318 = arith.addf %317, %316 : vector<2x32xf32>
    %319 = arith.divf %317, %318 : vector<2x32xf32>
    %320 = arith.mulf %311, %276 : vector<2x32xf32>
    %321 = arith.mulf %305, %313 : vector<2x32xf32>
    %322 = arith.addf %320, %321 : vector<2x32xf32>
    %323 = math.tanh %322 : vector<2x32xf32>
    %324 = arith.mulf %319, %323 : vector<2x32xf32>
    %325 = vector.extract_strided_slice %299 {offsets = [0, 0], sizes = [2, 32], strides = [1, 1]} : vector<2x128xf32> to vector<2x32xf32>
    %326 = arith.negf %325 : vector<2x32xf32>
    %327 = math.exp %326 : vector<2x32xf32>
    %cst_50 = arith.constant 1.000000e+00 : f32
    %328 = vector.broadcast %cst_50 : f32 to vector<2x32xf32>
    %329 = arith.addf %328, %327 : vector<2x32xf32>
    %330 = arith.divf %328, %329 : vector<2x32xf32>
    %331 = vector.extract_strided_slice %299 {offsets = [0, 32], sizes = [2, 32], strides = [1, 1]} : vector<2x128xf32> to vector<2x32xf32>
    %332 = arith.negf %331 : vector<2x32xf32>
    %333 = math.exp %332 : vector<2x32xf32>
    %cst_51 = arith.constant 1.000000e+00 : f32
    %334 = vector.broadcast %cst_51 : f32 to vector<2x32xf32>
    %335 = arith.addf %334, %333 : vector<2x32xf32>
    %336 = arith.divf %334, %335 : vector<2x32xf32>
    %337 = vector.extract_strided_slice %299 {offsets = [0, 64], sizes = [2, 32], strides = [1, 1]} : vector<2x128xf32> to vector<2x32xf32>
    %338 = math.tanh %337 : vector<2x32xf32>
    %339 = vector.extract_strided_slice %299 {offsets = [0, 96], sizes = [2, 32], strides = [1, 1]} : vector<2x128xf32> to vector<2x32xf32>
    %340 = arith.negf %339 : vector<2x32xf32>
    %341 = math.exp %340 : vector<2x32xf32>
    %cst_52 = arith.constant 1.000000e+00 : f32
    %342 = vector.broadcast %cst_52 : f32 to vector<2x32xf32>
    %343 = arith.addf %342, %341 : vector<2x32xf32>
    %344 = arith.divf %342, %343 : vector<2x32xf32>
    %345 = arith.mulf %336, %290 : vector<2x32xf32>
    %346 = arith.mulf %330, %338 : vector<2x32xf32>
    %347 = arith.addf %345, %346 : vector<2x32xf32>
    %348 = math.tanh %347 : vector<2x32xf32>
    %349 = arith.mulf %344, %348 : vector<2x32xf32>
    %350 = vector.extract_strided_slice %0 {offsets = [6, 0], sizes = [2, 1], strides = [1, 1]} : vector<16x1xf32> to vector<2x1xf32>
    %351 = vector.extract_strided_slice %0 {offsets = [8, 0], sizes = [2, 1], strides = [1, 1]} : vector<16x1xf32> to vector<2x1xf32>
    %352 = vector.broadcast %350 : vector<2x1xf32> to vector<2x32xf32>
    %353 = arith.mulf %352, %324 : vector<2x32xf32>
    %354 = vector.broadcast %351 : vector<2x1xf32> to vector<2x32xf32>
    %355 = arith.mulf %354, %349 : vector<2x32xf32>
    %356 = vector.broadcast %350 : vector<2x1xf32> to vector<2x32xf32>
    %357 = arith.mulf %356, %324 : vector<2x32xf32>
    %cst_53 = arith.constant 1.000000e+00 : f32
    %358 = vector.broadcast %cst_53 : f32 to vector<2x1xf32>
    %359 = arith.subf %358, %350 : vector<2x1xf32>
    %360 = vector.broadcast %359 : vector<2x1xf32> to vector<2x32xf32>
    %361 = arith.mulf %360, %269 : vector<2x32xf32>
    %362 = arith.addf %357, %361 : vector<2x32xf32>
    %363 = vector.broadcast %350 : vector<2x1xf32> to vector<2x32xf32>
    %364 = arith.mulf %363, %322 : vector<2x32xf32>
    %cst_54 = arith.constant 1.000000e+00 : f32
    %365 = vector.broadcast %cst_54 : f32 to vector<2x1xf32>
    %366 = arith.subf %365, %350 : vector<2x1xf32>
    %367 = vector.broadcast %366 : vector<2x1xf32> to vector<2x32xf32>
    %368 = arith.mulf %367, %276 : vector<2x32xf32>
    %369 = arith.addf %364, %368 : vector<2x32xf32>
    %370 = vector.broadcast %351 : vector<2x1xf32> to vector<2x32xf32>
    %371 = arith.mulf %370, %349 : vector<2x32xf32>
    %cst_55 = arith.constant 1.000000e+00 : f32
    %372 = vector.broadcast %cst_55 : f32 to vector<2x1xf32>
    %373 = arith.subf %372, %351 : vector<2x1xf32>
    %374 = vector.broadcast %373 : vector<2x1xf32> to vector<2x32xf32>
    %375 = arith.mulf %374, %283 : vector<2x32xf32>
    %376 = arith.addf %371, %375 : vector<2x32xf32>
    %377 = vector.broadcast %351 : vector<2x1xf32> to vector<2x32xf32>
    %378 = arith.mulf %377, %347 : vector<2x32xf32>
    %cst_56 = arith.constant 1.000000e+00 : f32
    %379 = vector.broadcast %cst_56 : f32 to vector<2x1xf32>
    %380 = arith.subf %379, %351 : vector<2x1xf32>
    %381 = vector.broadcast %380 : vector<2x1xf32> to vector<2x32xf32>
    %382 = arith.mulf %381, %290 : vector<2x32xf32>
    %383 = arith.addf %378, %382 : vector<2x32xf32>
    %384 = tpu.concatenate %362, %376 in 1 : vector<2x32xf32>, vector<2x32xf32> -> vector<2x64xf32>
    %385 = arith.truncf %384 : vector<2x64xf32> to vector<2x64xbf16>
    %cst_57 = arith.constant dense<0.000000e+00> : vector<2x256xf32>
    %386 = tpu.matmul %385, %2, %cst_57 {dimension_numbers = #tpu.dot_dimension_numbers<[1], [0], [0], [1], [0, 0, 1, 1], [], []>} : vector<2x64xbf16>, vector<64x256xbf16>, vector<2x256xf32> -> vector<2x256xf32>
    %387 = vector.extract_strided_slice %386 {offsets = [0, 0], sizes = [2, 128], strides = [1, 1]} : vector<2x256xf32> to vector<2x128xf32>
    %388 = vector.extract_strided_slice %7 {offsets = [8, 0], sizes = [2, 128], strides = [1, 1]} : vector<16x256xf32> to vector<2x128xf32>
    %389 = arith.addf %387, %388 : vector<2x128xf32>
    %390 = vector.extract_strided_slice %386 {offsets = [0, 128], sizes = [2, 128], strides = [1, 1]} : vector<2x256xf32> to vector<2x128xf32>
    %391 = vector.extract_strided_slice %7 {offsets = [6, 128], sizes = [2, 128], strides = [1, 1]} : vector<16x256xf32> to vector<2x128xf32>
    %392 = arith.addf %390, %391 : vector<2x128xf32>
    %393 = vector.extract_strided_slice %389 {offsets = [0, 0], sizes = [2, 32], strides = [1, 1]} : vector<2x128xf32> to vector<2x32xf32>
    %394 = arith.negf %393 : vector<2x32xf32>
    %395 = math.exp %394 : vector<2x32xf32>
    %cst_58 = arith.constant 1.000000e+00 : f32
    %396 = vector.broadcast %cst_58 : f32 to vector<2x32xf32>
    %397 = arith.addf %396, %395 : vector<2x32xf32>
    %398 = arith.divf %396, %397 : vector<2x32xf32>
    %399 = vector.extract_strided_slice %389 {offsets = [0, 32], sizes = [2, 32], strides = [1, 1]} : vector<2x128xf32> to vector<2x32xf32>
    %400 = arith.negf %399 : vector<2x32xf32>
    %401 = math.exp %400 : vector<2x32xf32>
    %cst_59 = arith.constant 1.000000e+00 : f32
    %402 = vector.broadcast %cst_59 : f32 to vector<2x32xf32>
    %403 = arith.addf %402, %401 : vector<2x32xf32>
    %404 = arith.divf %402, %403 : vector<2x32xf32>
    %405 = vector.extract_strided_slice %389 {offsets = [0, 64], sizes = [2, 32], strides = [1, 1]} : vector<2x128xf32> to vector<2x32xf32>
    %406 = math.tanh %405 : vector<2x32xf32>
    %407 = vector.extract_strided_slice %389 {offsets = [0, 96], sizes = [2, 32], strides = [1, 1]} : vector<2x128xf32> to vector<2x32xf32>
    %408 = arith.negf %407 : vector<2x32xf32>
    %409 = math.exp %408 : vector<2x32xf32>
    %cst_60 = arith.constant 1.000000e+00 : f32
    %410 = vector.broadcast %cst_60 : f32 to vector<2x32xf32>
    %411 = arith.addf %410, %409 : vector<2x32xf32>
    %412 = arith.divf %410, %411 : vector<2x32xf32>
    %413 = arith.mulf %404, %369 : vector<2x32xf32>
    %414 = arith.mulf %398, %406 : vector<2x32xf32>
    %415 = arith.addf %413, %414 : vector<2x32xf32>
    %416 = math.tanh %415 : vector<2x32xf32>
    %417 = arith.mulf %412, %416 : vector<2x32xf32>
    %418 = vector.extract_strided_slice %392 {offsets = [0, 0], sizes = [2, 32], strides = [1, 1]} : vector<2x128xf32> to vector<2x32xf32>
    %419 = arith.negf %418 : vector<2x32xf32>
    %420 = math.exp %419 : vector<2x32xf32>
    %cst_61 = arith.constant 1.000000e+00 : f32
    %421 = vector.broadcast %cst_61 : f32 to vector<2x32xf32>
    %422 = arith.addf %421, %420 : vector<2x32xf32>
    %423 = arith.divf %421, %422 : vector<2x32xf32>
    %424 = vector.extract_strided_slice %392 {offsets = [0, 32], sizes = [2, 32], strides = [1, 1]} : vector<2x128xf32> to vector<2x32xf32>
    %425 = arith.negf %424 : vector<2x32xf32>
    %426 = math.exp %425 : vector<2x32xf32>
    %cst_62 = arith.constant 1.000000e+00 : f32
    %427 = vector.broadcast %cst_62 : f32 to vector<2x32xf32>
    %428 = arith.addf %427, %426 : vector<2x32xf32>
    %429 = arith.divf %427, %428 : vector<2x32xf32>
    %430 = vector.extract_strided_slice %392 {offsets = [0, 64], sizes = [2, 32], strides = [1, 1]} : vector<2x128xf32> to vector<2x32xf32>
    %431 = math.tanh %430 : vector<2x32xf32>
    %432 = vector.extract_strided_slice %392 {offsets = [0, 96], sizes = [2, 32], strides = [1, 1]} : vector<2x128xf32> to vector<2x32xf32>
    %433 = arith.negf %432 : vector<2x32xf32>
    %434 = math.exp %433 : vector<2x32xf32>
    %cst_63 = arith.constant 1.000000e+00 : f32
    %435 = vector.broadcast %cst_63 : f32 to vector<2x32xf32>
    %436 = arith.addf %435, %434 : vector<2x32xf32>
    %437 = arith.divf %435, %436 : vector<2x32xf32>
    %438 = arith.mulf %429, %383 : vector<2x32xf32>
    %439 = arith.mulf %423, %431 : vector<2x32xf32>
    %440 = arith.addf %438, %439 : vector<2x32xf32>
    %441 = math.tanh %440 : vector<2x32xf32>
    %442 = arith.mulf %437, %441 : vector<2x32xf32>
    %443 = vector.extract_strided_slice %0 {offsets = [8, 0], sizes = [2, 1], strides = [1, 1]} : vector<16x1xf32> to vector<2x1xf32>
    %444 = vector.extract_strided_slice %0 {offsets = [6, 0], sizes = [2, 1], strides = [1, 1]} : vector<16x1xf32> to vector<2x1xf32>
    %445 = vector.broadcast %443 : vector<2x1xf32> to vector<2x32xf32>
    %446 = arith.mulf %445, %417 : vector<2x32xf32>
    %447 = vector.broadcast %444 : vector<2x1xf32> to vector<2x32xf32>
    %448 = arith.mulf %447, %442 : vector<2x32xf32>
    %449 = vector.broadcast %443 : vector<2x1xf32> to vector<2x32xf32>
    %450 = arith.mulf %449, %417 : vector<2x32xf32>
    %cst_64 = arith.constant 1.000000e+00 : f32
    %451 = vector.broadcast %cst_64 : f32 to vector<2x1xf32>
    %452 = arith.subf %451, %443 : vector<2x1xf32>
    %453 = vector.broadcast %452 : vector<2x1xf32> to vector<2x32xf32>
    %454 = arith.mulf %453, %362 : vector<2x32xf32>
    %455 = arith.addf %450, %454 : vector<2x32xf32>
    %456 = vector.broadcast %443 : vector<2x1xf32> to vector<2x32xf32>
    %457 = arith.mulf %456, %415 : vector<2x32xf32>
    %cst_65 = arith.constant 1.000000e+00 : f32
    %458 = vector.broadcast %cst_65 : f32 to vector<2x1xf32>
    %459 = arith.subf %458, %443 : vector<2x1xf32>
    %460 = vector.broadcast %459 : vector<2x1xf32> to vector<2x32xf32>
    %461 = arith.mulf %460, %369 : vector<2x32xf32>
    %462 = arith.addf %457, %461 : vector<2x32xf32>
    %463 = vector.broadcast %444 : vector<2x1xf32> to vector<2x32xf32>
    %464 = arith.mulf %463, %442 : vector<2x32xf32>
    %cst_66 = arith.constant 1.000000e+00 : f32
    %465 = vector.broadcast %cst_66 : f32 to vector<2x1xf32>
    %466 = arith.subf %465, %444 : vector<2x1xf32>
    %467 = vector.broadcast %466 : vector<2x1xf32> to vector<2x32xf32>
    %468 = arith.mulf %467, %376 : vector<2x32xf32>
    %469 = arith.addf %464, %468 : vector<2x32xf32>
    %470 = vector.broadcast %444 : vector<2x1xf32> to vector<2x32xf32>
    %471 = arith.mulf %470, %440 : vector<2x32xf32>
    %cst_67 = arith.constant 1.000000e+00 : f32
    %472 = vector.broadcast %cst_67 : f32 to vector<2x1xf32>
    %473 = arith.subf %472, %444 : vector<2x1xf32>
    %474 = vector.broadcast %473 : vector<2x1xf32> to vector<2x32xf32>
    %475 = arith.mulf %474, %383 : vector<2x32xf32>
    %476 = arith.addf %471, %475 : vector<2x32xf32>
    %477 = tpu.concatenate %455, %469 in 1 : vector<2x32xf32>, vector<2x32xf32> -> vector<2x64xf32>
    %478 = arith.truncf %477 : vector<2x64xf32> to vector<2x64xbf16>
    %cst_68 = arith.constant dense<0.000000e+00> : vector<2x256xf32>
    %479 = tpu.matmul %478, %2, %cst_68 {dimension_numbers = #tpu.dot_dimension_numbers<[1], [0], [0], [1], [0, 0, 1, 1], [], []>} : vector<2x64xbf16>, vector<64x256xbf16>, vector<2x256xf32> -> vector<2x256xf32>
    %480 = vector.extract_strided_slice %479 {offsets = [0, 0], sizes = [2, 128], strides = [1, 1]} : vector<2x256xf32> to vector<2x128xf32>
    %481 = vector.extract_strided_slice %7 {offsets = [10, 0], sizes = [2, 128], strides = [1, 1]} : vector<16x256xf32> to vector<2x128xf32>
    %482 = arith.addf %480, %481 : vector<2x128xf32>
    %483 = vector.extract_strided_slice %479 {offsets = [0, 128], sizes = [2, 128], strides = [1, 1]} : vector<2x256xf32> to vector<2x128xf32>
    %484 = vector.extract_strided_slice %7 {offsets = [4, 128], sizes = [2, 128], strides = [1, 1]} : vector<16x256xf32> to vector<2x128xf32>
    %485 = arith.addf %483, %484 : vector<2x128xf32>
    %486 = vector.extract_strided_slice %482 {offsets = [0, 0], sizes = [2, 32], strides = [1, 1]} : vector<2x128xf32> to vector<2x32xf32>
    %487 = arith.negf %486 : vector<2x32xf32>
    %488 = math.exp %487 : vector<2x32xf32>
    %cst_69 = arith.constant 1.000000e+00 : f32
    %489 = vector.broadcast %cst_69 : f32 to vector<2x32xf32>
    %490 = arith.addf %489, %488 : vector<2x32xf32>
    %491 = arith.divf %489, %490 : vector<2x32xf32>
    %492 = vector.extract_strided_slice %482 {offsets = [0, 32], sizes = [2, 32], strides = [1, 1]} : vector<2x128xf32> to vector<2x32xf32>
    %493 = arith.negf %492 : vector<2x32xf32>
    %494 = math.exp %493 : vector<2x32xf32>
    %cst_70 = arith.constant 1.000000e+00 : f32
    %495 = vector.broadcast %cst_70 : f32 to vector<2x32xf32>
    %496 = arith.addf %495, %494 : vector<2x32xf32>
    %497 = arith.divf %495, %496 : vector<2x32xf32>
    %498 = vector.extract_strided_slice %482 {offsets = [0, 64], sizes = [2, 32], strides = [1, 1]} : vector<2x128xf32> to vector<2x32xf32>
    %499 = math.tanh %498 : vector<2x32xf32>
    %500 = vector.extract_strided_slice %482 {offsets = [0, 96], sizes = [2, 32], strides = [1, 1]} : vector<2x128xf32> to vector<2x32xf32>
    %501 = arith.negf %500 : vector<2x32xf32>
    %502 = math.exp %501 : vector<2x32xf32>
    %cst_71 = arith.constant 1.000000e+00 : f32
    %503 = vector.broadcast %cst_71 : f32 to vector<2x32xf32>
    %504 = arith.addf %503, %502 : vector<2x32xf32>
    %505 = arith.divf %503, %504 : vector<2x32xf32>
    %506 = arith.mulf %497, %462 : vector<2x32xf32>
    %507 = arith.mulf %491, %499 : vector<2x32xf32>
    %508 = arith.addf %506, %507 : vector<2x32xf32>
    %509 = math.tanh %508 : vector<2x32xf32>
    %510 = arith.mulf %505, %509 : vector<2x32xf32>
    %511 = vector.extract_strided_slice %485 {offsets = [0, 0], sizes = [2, 32], strides = [1, 1]} : vector<2x128xf32> to vector<2x32xf32>
    %512 = arith.negf %511 : vector<2x32xf32>
    %513 = math.exp %512 : vector<2x32xf32>
    %cst_72 = arith.constant 1.000000e+00 : f32
    %514 = vector.broadcast %cst_72 : f32 to vector<2x32xf32>
    %515 = arith.addf %514, %513 : vector<2x32xf32>
    %516 = arith.divf %514, %515 : vector<2x32xf32>
    %517 = vector.extract_strided_slice %485 {offsets = [0, 32], sizes = [2, 32], strides = [1, 1]} : vector<2x128xf32> to vector<2x32xf32>
    %518 = arith.negf %517 : vector<2x32xf32>
    %519 = math.exp %518 : vector<2x32xf32>
    %cst_73 = arith.constant 1.000000e+00 : f32
    %520 = vector.broadcast %cst_73 : f32 to vector<2x32xf32>
    %521 = arith.addf %520, %519 : vector<2x32xf32>
    %522 = arith.divf %520, %521 : vector<2x32xf32>
    %523 = vector.extract_strided_slice %485 {offsets = [0, 64], sizes = [2, 32], strides = [1, 1]} : vector<2x128xf32> to vector<2x32xf32>
    %524 = math.tanh %523 : vector<2x32xf32>
    %525 = vector.extract_strided_slice %485 {offsets = [0, 96], sizes = [2, 32], strides = [1, 1]} : vector<2x128xf32> to vector<2x32xf32>
    %526 = arith.negf %525 : vector<2x32xf32>
    %527 = math.exp %526 : vector<2x32xf32>
    %cst_74 = arith.constant 1.000000e+00 : f32
    %528 = vector.broadcast %cst_74 : f32 to vector<2x32xf32>
    %529 = arith.addf %528, %527 : vector<2x32xf32>
    %530 = arith.divf %528, %529 : vector<2x32xf32>
    %531 = arith.mulf %522, %476 : vector<2x32xf32>
    %532 = arith.mulf %516, %524 : vector<2x32xf32>
    %533 = arith.addf %531, %532 : vector<2x32xf32>
    %534 = math.tanh %533 : vector<2x32xf32>
    %535 = arith.mulf %530, %534 : vector<2x32xf32>
    %536 = vector.extract_strided_slice %0 {offsets = [10, 0], sizes = [2, 1], strides = [1, 1]} : vector<16x1xf32> to vector<2x1xf32>
    %537 = vector.extract_strided_slice %0 {offsets = [4, 0], sizes = [2, 1], strides = [1, 1]} : vector<16x1xf32> to vector<2x1xf32>
    %538 = vector.broadcast %536 : vector<2x1xf32> to vector<2x32xf32>
    %539 = arith.mulf %538, %510 : vector<2x32xf32>
    %540 = vector.broadcast %537 : vector<2x1xf32> to vector<2x32xf32>
    %541 = arith.mulf %540, %535 : vector<2x32xf32>
    %542 = vector.broadcast %536 : vector<2x1xf32> to vector<2x32xf32>
    %543 = arith.mulf %542, %510 : vector<2x32xf32>
    %cst_75 = arith.constant 1.000000e+00 : f32
    %544 = vector.broadcast %cst_75 : f32 to vector<2x1xf32>
    %545 = arith.subf %544, %536 : vector<2x1xf32>
    %546 = vector.broadcast %545 : vector<2x1xf32> to vector<2x32xf32>
    %547 = arith.mulf %546, %455 : vector<2x32xf32>
    %548 = arith.addf %543, %547 : vector<2x32xf32>
    %549 = vector.broadcast %536 : vector<2x1xf32> to vector<2x32xf32>
    %550 = arith.mulf %549, %508 : vector<2x32xf32>
    %cst_76 = arith.constant 1.000000e+00 : f32
    %551 = vector.broadcast %cst_76 : f32 to vector<2x1xf32>
    %552 = arith.subf %551, %536 : vector<2x1xf32>
    %553 = vector.broadcast %552 : vector<2x1xf32> to vector<2x32xf32>
    %554 = arith.mulf %553, %462 : vector<2x32xf32>
    %555 = arith.addf %550, %554 : vector<2x32xf32>
    %556 = vector.broadcast %537 : vector<2x1xf32> to vector<2x32xf32>
    %557 = arith.mulf %556, %535 : vector<2x32xf32>
    %cst_77 = arith.constant 1.000000e+00 : f32
    %558 = vector.broadcast %cst_77 : f32 to vector<2x1xf32>
    %559 = arith.subf %558, %537 : vector<2x1xf32>
    %560 = vector.broadcast %559 : vector<2x1xf32> to vector<2x32xf32>
    %561 = arith.mulf %560, %469 : vector<2x32xf32>
    %562 = arith.addf %557, %561 : vector<2x32xf32>
    %563 = vector.broadcast %537 : vector<2x1xf32> to vector<2x32xf32>
    %564 = arith.mulf %563, %533 : vector<2x32xf32>
    %cst_78 = arith.constant 1.000000e+00 : f32
    %565 = vector.broadcast %cst_78 : f32 to vector<2x1xf32>
    %566 = arith.subf %565, %537 : vector<2x1xf32>
    %567 = vector.broadcast %566 : vector<2x1xf32> to vector<2x32xf32>
    %568 = arith.mulf %567, %476 : vector<2x32xf32>
    %569 = arith.addf %564, %568 : vector<2x32xf32>
    %570 = tpu.concatenate %548, %562 in 1 : vector<2x32xf32>, vector<2x32xf32> -> vector<2x64xf32>
    %571 = arith.truncf %570 : vector<2x64xf32> to vector<2x64xbf16>
    %cst_79 = arith.constant dense<0.000000e+00> : vector<2x256xf32>
    %572 = tpu.matmul %571, %2, %cst_79 {dimension_numbers = #tpu.dot_dimension_numbers<[1], [0], [0], [1], [0, 0, 1, 1], [], []>} : vector<2x64xbf16>, vector<64x256xbf16>, vector<2x256xf32> -> vector<2x256xf32>
    %573 = vector.extract_strided_slice %572 {offsets = [0, 0], sizes = [2, 128], strides = [1, 1]} : vector<2x256xf32> to vector<2x128xf32>
    %574 = vector.extract_strided_slice %7 {offsets = [12, 0], sizes = [2, 128], strides = [1, 1]} : vector<16x256xf32> to vector<2x128xf32>
    %575 = arith.addf %573, %574 : vector<2x128xf32>
    %576 = vector.extract_strided_slice %572 {offsets = [0, 128], sizes = [2, 128], strides = [1, 1]} : vector<2x256xf32> to vector<2x128xf32>
    %577 = vector.extract_strided_slice %7 {offsets = [2, 128], sizes = [2, 128], strides = [1, 1]} : vector<16x256xf32> to vector<2x128xf32>
    %578 = arith.addf %576, %577 : vector<2x128xf32>
    %579 = vector.extract_strided_slice %575 {offsets = [0, 0], sizes = [2, 32], strides = [1, 1]} : vector<2x128xf32> to vector<2x32xf32>
    %580 = arith.negf %579 : vector<2x32xf32>
    %581 = math.exp %580 : vector<2x32xf32>
    %cst_80 = arith.constant 1.000000e+00 : f32
    %582 = vector.broadcast %cst_80 : f32 to vector<2x32xf32>
    %583 = arith.addf %582, %581 : vector<2x32xf32>
    %584 = arith.divf %582, %583 : vector<2x32xf32>
    %585 = vector.extract_strided_slice %575 {offsets = [0, 32], sizes = [2, 32], strides = [1, 1]} : vector<2x128xf32> to vector<2x32xf32>
    %586 = arith.negf %585 : vector<2x32xf32>
    %587 = math.exp %586 : vector<2x32xf32>
    %cst_81 = arith.constant 1.000000e+00 : f32
    %588 = vector.broadcast %cst_81 : f32 to vector<2x32xf32>
    %589 = arith.addf %588, %587 : vector<2x32xf32>
    %590 = arith.divf %588, %589 : vector<2x32xf32>
    %591 = vector.extract_strided_slice %575 {offsets = [0, 64], sizes = [2, 32], strides = [1, 1]} : vector<2x128xf32> to vector<2x32xf32>
    %592 = math.tanh %591 : vector<2x32xf32>
    %593 = vector.extract_strided_slice %575 {offsets = [0, 96], sizes = [2, 32], strides = [1, 1]} : vector<2x128xf32> to vector<2x32xf32>
    %594 = arith.negf %593 : vector<2x32xf32>
    %595 = math.exp %594 : vector<2x32xf32>
    %cst_82 = arith.constant 1.000000e+00 : f32
    %596 = vector.broadcast %cst_82 : f32 to vector<2x32xf32>
    %597 = arith.addf %596, %595 : vector<2x32xf32>
    %598 = arith.divf %596, %597 : vector<2x32xf32>
    %599 = arith.mulf %590, %555 : vector<2x32xf32>
    %600 = arith.mulf %584, %592 : vector<2x32xf32>
    %601 = arith.addf %599, %600 : vector<2x32xf32>
    %602 = math.tanh %601 : vector<2x32xf32>
    %603 = arith.mulf %598, %602 : vector<2x32xf32>
    %604 = vector.extract_strided_slice %578 {offsets = [0, 0], sizes = [2, 32], strides = [1, 1]} : vector<2x128xf32> to vector<2x32xf32>
    %605 = arith.negf %604 : vector<2x32xf32>
    %606 = math.exp %605 : vector<2x32xf32>
    %cst_83 = arith.constant 1.000000e+00 : f32
    %607 = vector.broadcast %cst_83 : f32 to vector<2x32xf32>
    %608 = arith.addf %607, %606 : vector<2x32xf32>
    %609 = arith.divf %607, %608 : vector<2x32xf32>
    %610 = vector.extract_strided_slice %578 {offsets = [0, 32], sizes = [2, 32], strides = [1, 1]} : vector<2x128xf32> to vector<2x32xf32>
    %611 = arith.negf %610 : vector<2x32xf32>
    %612 = math.exp %611 : vector<2x32xf32>
    %cst_84 = arith.constant 1.000000e+00 : f32
    %613 = vector.broadcast %cst_84 : f32 to vector<2x32xf32>
    %614 = arith.addf %613, %612 : vector<2x32xf32>
    %615 = arith.divf %613, %614 : vector<2x32xf32>
    %616 = vector.extract_strided_slice %578 {offsets = [0, 64], sizes = [2, 32], strides = [1, 1]} : vector<2x128xf32> to vector<2x32xf32>
    %617 = math.tanh %616 : vector<2x32xf32>
    %618 = vector.extract_strided_slice %578 {offsets = [0, 96], sizes = [2, 32], strides = [1, 1]} : vector<2x128xf32> to vector<2x32xf32>
    %619 = arith.negf %618 : vector<2x32xf32>
    %620 = math.exp %619 : vector<2x32xf32>
    %cst_85 = arith.constant 1.000000e+00 : f32
    %621 = vector.broadcast %cst_85 : f32 to vector<2x32xf32>
    %622 = arith.addf %621, %620 : vector<2x32xf32>
    %623 = arith.divf %621, %622 : vector<2x32xf32>
    %624 = arith.mulf %615, %569 : vector<2x32xf32>
    %625 = arith.mulf %609, %617 : vector<2x32xf32>
    %626 = arith.addf %624, %625 : vector<2x32xf32>
    %627 = math.tanh %626 : vector<2x32xf32>
    %628 = arith.mulf %623, %627 : vector<2x32xf32>
    %629 = vector.extract_strided_slice %0 {offsets = [12, 0], sizes = [2, 1], strides = [1, 1]} : vector<16x1xf32> to vector<2x1xf32>
    %630 = vector.extract_strided_slice %0 {offsets = [2, 0], sizes = [2, 1], strides = [1, 1]} : vector<16x1xf32> to vector<2x1xf32>
    %631 = vector.broadcast %629 : vector<2x1xf32> to vector<2x32xf32>
    %632 = arith.mulf %631, %603 : vector<2x32xf32>
    %633 = vector.broadcast %630 : vector<2x1xf32> to vector<2x32xf32>
    %634 = arith.mulf %633, %628 : vector<2x32xf32>
    %635 = vector.broadcast %629 : vector<2x1xf32> to vector<2x32xf32>
    %636 = arith.mulf %635, %603 : vector<2x32xf32>
    %cst_86 = arith.constant 1.000000e+00 : f32
    %637 = vector.broadcast %cst_86 : f32 to vector<2x1xf32>
    %638 = arith.subf %637, %629 : vector<2x1xf32>
    %639 = vector.broadcast %638 : vector<2x1xf32> to vector<2x32xf32>
    %640 = arith.mulf %639, %548 : vector<2x32xf32>
    %641 = arith.addf %636, %640 : vector<2x32xf32>
    %642 = vector.broadcast %629 : vector<2x1xf32> to vector<2x32xf32>
    %643 = arith.mulf %642, %601 : vector<2x32xf32>
    %cst_87 = arith.constant 1.000000e+00 : f32
    %644 = vector.broadcast %cst_87 : f32 to vector<2x1xf32>
    %645 = arith.subf %644, %629 : vector<2x1xf32>
    %646 = vector.broadcast %645 : vector<2x1xf32> to vector<2x32xf32>
    %647 = arith.mulf %646, %555 : vector<2x32xf32>
    %648 = arith.addf %643, %647 : vector<2x32xf32>
    %649 = vector.broadcast %630 : vector<2x1xf32> to vector<2x32xf32>
    %650 = arith.mulf %649, %628 : vector<2x32xf32>
    %cst_88 = arith.constant 1.000000e+00 : f32
    %651 = vector.broadcast %cst_88 : f32 to vector<2x1xf32>
    %652 = arith.subf %651, %630 : vector<2x1xf32>
    %653 = vector.broadcast %652 : vector<2x1xf32> to vector<2x32xf32>
    %654 = arith.mulf %653, %562 : vector<2x32xf32>
    %655 = arith.addf %650, %654 : vector<2x32xf32>
    %656 = vector.broadcast %630 : vector<2x1xf32> to vector<2x32xf32>
    %657 = arith.mulf %656, %626 : vector<2x32xf32>
    %cst_89 = arith.constant 1.000000e+00 : f32
    %658 = vector.broadcast %cst_89 : f32 to vector<2x1xf32>
    %659 = arith.subf %658, %630 : vector<2x1xf32>
    %660 = vector.broadcast %659 : vector<2x1xf32> to vector<2x32xf32>
    %661 = arith.mulf %660, %569 : vector<2x32xf32>
    %662 = arith.addf %657, %661 : vector<2x32xf32>
    %663 = tpu.concatenate %641, %655 in 1 : vector<2x32xf32>, vector<2x32xf32> -> vector<2x64xf32>
    %664 = arith.truncf %663 : vector<2x64xf32> to vector<2x64xbf16>
    %cst_90 = arith.constant dense<0.000000e+00> : vector<2x256xf32>
    %665 = tpu.matmul %664, %2, %cst_90 {dimension_numbers = #tpu.dot_dimension_numbers<[1], [0], [0], [1], [0, 0, 1, 1], [], []>} : vector<2x64xbf16>, vector<64x256xbf16>, vector<2x256xf32> -> vector<2x256xf32>
    %666 = vector.extract_strided_slice %665 {offsets = [0, 0], sizes = [2, 128], strides = [1, 1]} : vector<2x256xf32> to vector<2x128xf32>
    %667 = vector.extract_strided_slice %7 {offsets = [14, 0], sizes = [2, 128], strides = [1, 1]} : vector<16x256xf32> to vector<2x128xf32>
    %668 = arith.addf %666, %667 : vector<2x128xf32>
    %669 = vector.extract_strided_slice %665 {offsets = [0, 128], sizes = [2, 128], strides = [1, 1]} : vector<2x256xf32> to vector<2x128xf32>
    %670 = vector.extract_strided_slice %7 {offsets = [0, 128], sizes = [2, 128], strides = [1, 1]} : vector<16x256xf32> to vector<2x128xf32>
    %671 = arith.addf %669, %670 : vector<2x128xf32>
    %672 = vector.extract_strided_slice %668 {offsets = [0, 0], sizes = [2, 32], strides = [1, 1]} : vector<2x128xf32> to vector<2x32xf32>
    %673 = arith.negf %672 : vector<2x32xf32>
    %674 = math.exp %673 : vector<2x32xf32>
    %cst_91 = arith.constant 1.000000e+00 : f32
    %675 = vector.broadcast %cst_91 : f32 to vector<2x32xf32>
    %676 = arith.addf %675, %674 : vector<2x32xf32>
    %677 = arith.divf %675, %676 : vector<2x32xf32>
    %678 = vector.extract_strided_slice %668 {offsets = [0, 32], sizes = [2, 32], strides = [1, 1]} : vector<2x128xf32> to vector<2x32xf32>
    %679 = arith.negf %678 : vector<2x32xf32>
    %680 = math.exp %679 : vector<2x32xf32>
    %cst_92 = arith.constant 1.000000e+00 : f32
    %681 = vector.broadcast %cst_92 : f32 to vector<2x32xf32>
    %682 = arith.addf %681, %680 : vector<2x32xf32>
    %683 = arith.divf %681, %682 : vector<2x32xf32>
    %684 = vector.extract_strided_slice %668 {offsets = [0, 64], sizes = [2, 32], strides = [1, 1]} : vector<2x128xf32> to vector<2x32xf32>
    %685 = math.tanh %684 : vector<2x32xf32>
    %686 = vector.extract_strided_slice %668 {offsets = [0, 96], sizes = [2, 32], strides = [1, 1]} : vector<2x128xf32> to vector<2x32xf32>
    %687 = arith.negf %686 : vector<2x32xf32>
    %688 = math.exp %687 : vector<2x32xf32>
    %cst_93 = arith.constant 1.000000e+00 : f32
    %689 = vector.broadcast %cst_93 : f32 to vector<2x32xf32>
    %690 = arith.addf %689, %688 : vector<2x32xf32>
    %691 = arith.divf %689, %690 : vector<2x32xf32>
    %692 = arith.mulf %683, %648 : vector<2x32xf32>
    %693 = arith.mulf %677, %685 : vector<2x32xf32>
    %694 = arith.addf %692, %693 : vector<2x32xf32>
    %695 = math.tanh %694 : vector<2x32xf32>
    %696 = arith.mulf %691, %695 : vector<2x32xf32>
    %697 = vector.extract_strided_slice %671 {offsets = [0, 0], sizes = [2, 32], strides = [1, 1]} : vector<2x128xf32> to vector<2x32xf32>
    %698 = arith.negf %697 : vector<2x32xf32>
    %699 = math.exp %698 : vector<2x32xf32>
    %cst_94 = arith.constant 1.000000e+00 : f32
    %700 = vector.broadcast %cst_94 : f32 to vector<2x32xf32>
    %701 = arith.addf %700, %699 : vector<2x32xf32>
    %702 = arith.divf %700, %701 : vector<2x32xf32>
    %703 = vector.extract_strided_slice %671 {offsets = [0, 32], sizes = [2, 32], strides = [1, 1]} : vector<2x128xf32> to vector<2x32xf32>
    %704 = arith.negf %703 : vector<2x32xf32>
    %705 = math.exp %704 : vector<2x32xf32>
    %cst_95 = arith.constant 1.000000e+00 : f32
    %706 = vector.broadcast %cst_95 : f32 to vector<2x32xf32>
    %707 = arith.addf %706, %705 : vector<2x32xf32>
    %708 = arith.divf %706, %707 : vector<2x32xf32>
    %709 = vector.extract_strided_slice %671 {offsets = [0, 64], sizes = [2, 32], strides = [1, 1]} : vector<2x128xf32> to vector<2x32xf32>
    %710 = math.tanh %709 : vector<2x32xf32>
    %711 = vector.extract_strided_slice %671 {offsets = [0, 96], sizes = [2, 32], strides = [1, 1]} : vector<2x128xf32> to vector<2x32xf32>
    %712 = arith.negf %711 : vector<2x32xf32>
    %713 = math.exp %712 : vector<2x32xf32>
    %cst_96 = arith.constant 1.000000e+00 : f32
    %714 = vector.broadcast %cst_96 : f32 to vector<2x32xf32>
    %715 = arith.addf %714, %713 : vector<2x32xf32>
    %716 = arith.divf %714, %715 : vector<2x32xf32>
    %717 = arith.mulf %708, %662 : vector<2x32xf32>
    %718 = arith.mulf %702, %710 : vector<2x32xf32>
    %719 = arith.addf %717, %718 : vector<2x32xf32>
    %720 = math.tanh %719 : vector<2x32xf32>
    %721 = arith.mulf %716, %720 : vector<2x32xf32>
    %722 = vector.extract_strided_slice %0 {offsets = [14, 0], sizes = [2, 1], strides = [1, 1]} : vector<16x1xf32> to vector<2x1xf32>
    %723 = vector.extract_strided_slice %0 {offsets = [0, 0], sizes = [2, 1], strides = [1, 1]} : vector<16x1xf32> to vector<2x1xf32>
    %724 = vector.broadcast %722 : vector<2x1xf32> to vector<2x32xf32>
    %725 = arith.mulf %724, %696 : vector<2x32xf32>
    %726 = vector.broadcast %723 : vector<2x1xf32> to vector<2x32xf32>
    %727 = arith.mulf %726, %721 : vector<2x32xf32>
    %728 = arith.addf %74, %727 : vector<2x32xf32>
    %729 = arith.addf %167, %634 : vector<2x32xf32>
    %730 = arith.addf %260, %541 : vector<2x32xf32>
    %731 = arith.addf %353, %448 : vector<2x32xf32>
    %732 = arith.addf %446, %355 : vector<2x32xf32>
    %733 = arith.addf %539, %262 : vector<2x32xf32>
    %734 = arith.addf %632, %169 : vector<2x32xf32>
    %735 = arith.addf %725, %76 : vector<2x32xf32>
    %736 = tpu.concatenate %728, %729, %730, %731, %732, %733, %734, %735 in 0 : vector<2x32xf32>, vector<2x32xf32>, vector<2x32xf32>, vector<2x32xf32>, vector<2x32xf32>, vector<2x32xf32>, vector<2x32xf32>, vector<2x32xf32> -> vector<16x32xf32>
    %c0_97 = arith.constant 0 : index
    %c0_98 = arith.constant 0 : index
    %737 = vector.load %arg7[%c0_97, %c0_98] : memref<64x256xbf16, #tpu.memory_space<vmem>>, vector<64x256xbf16>
    %738 = arith.truncf %736 : vector<16x32xf32> to vector<16x32xbf16>
    %c0_99 = arith.constant 0 : index
    %c0_100 = arith.constant 0 : index
    %739 = vector.load %arg5[%c0_99, %c0_100] : memref<32x256xbf16, #tpu.memory_space<vmem>>, vector<32x256xbf16>
    %cst_101 = arith.constant dense<0.000000e+00> : vector<16x256xf32>
    %740 = tpu.matmul %738, %739, %cst_101 {dimension_numbers = #tpu.dot_dimension_numbers<[1], [0], [0], [1], [0, 0, 1, 1], [], []>} : vector<16x32xbf16>, vector<32x256xbf16>, vector<16x256xf32> -> vector<16x256xf32>
    %c0_102 = arith.constant 0 : index
    %c0_103 = arith.constant 0 : index
    %741 = vector.load %arg6[%c0_102, %c0_103] : memref<1x256xf32, #tpu.memory_space<vmem>>, vector<1x256xf32>
    %742 = vector.broadcast %741 : vector<1x256xf32> to vector<16x256xf32>
    %743 = arith.addf %740, %742 : vector<16x256xf32>
    %cst_104 = arith.constant 0.000000e+00 : f32
    %744 = vector.broadcast %cst_104 : f32 to vector<2x32xf32>
    %cst_105 = arith.constant 0.000000e+00 : f32
    %745 = vector.broadcast %cst_105 : f32 to vector<2x32xf32>
    %cst_106 = arith.constant 0.000000e+00 : f32
    %746 = vector.broadcast %cst_106 : f32 to vector<2x32xf32>
    %cst_107 = arith.constant 0.000000e+00 : f32
    %747 = vector.broadcast %cst_107 : f32 to vector<2x32xf32>
    %748 = tpu.concatenate %744, %745 in 1 : vector<2x32xf32>, vector<2x32xf32> -> vector<2x64xf32>
    %749 = arith.truncf %748 : vector<2x64xf32> to vector<2x64xbf16>
    %cst_108 = arith.constant dense<0.000000e+00> : vector<2x256xf32>
    %750 = tpu.matmul %749, %737, %cst_108 {dimension_numbers = #tpu.dot_dimension_numbers<[1], [0], [0], [1], [0, 0, 1, 1], [], []>} : vector<2x64xbf16>, vector<64x256xbf16>, vector<2x256xf32> -> vector<2x256xf32>
    %751 = vector.extract_strided_slice %750 {offsets = [0, 0], sizes = [2, 128], strides = [1, 1]} : vector<2x256xf32> to vector<2x128xf32>
    %752 = vector.extract_strided_slice %743 {offsets = [0, 0], sizes = [2, 128], strides = [1, 1]} : vector<16x256xf32> to vector<2x128xf32>
    %753 = arith.addf %751, %752 : vector<2x128xf32>
    %754 = vector.extract_strided_slice %750 {offsets = [0, 128], sizes = [2, 128], strides = [1, 1]} : vector<2x256xf32> to vector<2x128xf32>
    %755 = vector.extract_strided_slice %743 {offsets = [14, 128], sizes = [2, 128], strides = [1, 1]} : vector<16x256xf32> to vector<2x128xf32>
    %756 = arith.addf %754, %755 : vector<2x128xf32>
    %757 = vector.extract_strided_slice %753 {offsets = [0, 0], sizes = [2, 32], strides = [1, 1]} : vector<2x128xf32> to vector<2x32xf32>
    %758 = arith.negf %757 : vector<2x32xf32>
    %759 = math.exp %758 : vector<2x32xf32>
    %cst_109 = arith.constant 1.000000e+00 : f32
    %760 = vector.broadcast %cst_109 : f32 to vector<2x32xf32>
    %761 = arith.addf %760, %759 : vector<2x32xf32>
    %762 = arith.divf %760, %761 : vector<2x32xf32>
    %763 = vector.extract_strided_slice %753 {offsets = [0, 32], sizes = [2, 32], strides = [1, 1]} : vector<2x128xf32> to vector<2x32xf32>
    %764 = arith.negf %763 : vector<2x32xf32>
    %765 = math.exp %764 : vector<2x32xf32>
    %cst_110 = arith.constant 1.000000e+00 : f32
    %766 = vector.broadcast %cst_110 : f32 to vector<2x32xf32>
    %767 = arith.addf %766, %765 : vector<2x32xf32>
    %768 = arith.divf %766, %767 : vector<2x32xf32>
    %769 = vector.extract_strided_slice %753 {offsets = [0, 64], sizes = [2, 32], strides = [1, 1]} : vector<2x128xf32> to vector<2x32xf32>
    %770 = math.tanh %769 : vector<2x32xf32>
    %771 = vector.extract_strided_slice %753 {offsets = [0, 96], sizes = [2, 32], strides = [1, 1]} : vector<2x128xf32> to vector<2x32xf32>
    %772 = arith.negf %771 : vector<2x32xf32>
    %773 = math.exp %772 : vector<2x32xf32>
    %cst_111 = arith.constant 1.000000e+00 : f32
    %774 = vector.broadcast %cst_111 : f32 to vector<2x32xf32>
    %775 = arith.addf %774, %773 : vector<2x32xf32>
    %776 = arith.divf %774, %775 : vector<2x32xf32>
    %777 = arith.mulf %768, %746 : vector<2x32xf32>
    %778 = arith.mulf %762, %770 : vector<2x32xf32>
    %779 = arith.addf %777, %778 : vector<2x32xf32>
    %780 = math.tanh %779 : vector<2x32xf32>
    %781 = arith.mulf %776, %780 : vector<2x32xf32>
    %782 = vector.extract_strided_slice %756 {offsets = [0, 0], sizes = [2, 32], strides = [1, 1]} : vector<2x128xf32> to vector<2x32xf32>
    %783 = arith.negf %782 : vector<2x32xf32>
    %784 = math.exp %783 : vector<2x32xf32>
    %cst_112 = arith.constant 1.000000e+00 : f32
    %785 = vector.broadcast %cst_112 : f32 to vector<2x32xf32>
    %786 = arith.addf %785, %784 : vector<2x32xf32>
    %787 = arith.divf %785, %786 : vector<2x32xf32>
    %788 = vector.extract_strided_slice %756 {offsets = [0, 32], sizes = [2, 32], strides = [1, 1]} : vector<2x128xf32> to vector<2x32xf32>
    %789 = arith.negf %788 : vector<2x32xf32>
    %790 = math.exp %789 : vector<2x32xf32>
    %cst_113 = arith.constant 1.000000e+00 : f32
    %791 = vector.broadcast %cst_113 : f32 to vector<2x32xf32>
    %792 = arith.addf %791, %790 : vector<2x32xf32>
    %793 = arith.divf %791, %792 : vector<2x32xf32>
    %794 = vector.extract_strided_slice %756 {offsets = [0, 64], sizes = [2, 32], strides = [1, 1]} : vector<2x128xf32> to vector<2x32xf32>
    %795 = math.tanh %794 : vector<2x32xf32>
    %796 = vector.extract_strided_slice %756 {offsets = [0, 96], sizes = [2, 32], strides = [1, 1]} : vector<2x128xf32> to vector<2x32xf32>
    %797 = arith.negf %796 : vector<2x32xf32>
    %798 = math.exp %797 : vector<2x32xf32>
    %cst_114 = arith.constant 1.000000e+00 : f32
    %799 = vector.broadcast %cst_114 : f32 to vector<2x32xf32>
    %800 = arith.addf %799, %798 : vector<2x32xf32>
    %801 = arith.divf %799, %800 : vector<2x32xf32>
    %802 = arith.mulf %793, %747 : vector<2x32xf32>
    %803 = arith.mulf %787, %795 : vector<2x32xf32>
    %804 = arith.addf %802, %803 : vector<2x32xf32>
    %805 = math.tanh %804 : vector<2x32xf32>
    %806 = arith.mulf %801, %805 : vector<2x32xf32>
    %807 = vector.extract_strided_slice %0 {offsets = [0, 0], sizes = [2, 1], strides = [1, 1]} : vector<16x1xf32> to vector<2x1xf32>
    %808 = vector.extract_strided_slice %0 {offsets = [14, 0], sizes = [2, 1], strides = [1, 1]} : vector<16x1xf32> to vector<2x1xf32>
    %809 = vector.broadcast %807 : vector<2x1xf32> to vector<2x32xf32>
    %810 = arith.mulf %809, %781 : vector<2x32xf32>
    %811 = vector.broadcast %808 : vector<2x1xf32> to vector<2x32xf32>
    %812 = arith.mulf %811, %806 : vector<2x32xf32>
    %813 = vector.broadcast %807 : vector<2x1xf32> to vector<2x32xf32>
    %814 = arith.mulf %813, %781 : vector<2x32xf32>
    %cst_115 = arith.constant 1.000000e+00 : f32
    %815 = vector.broadcast %cst_115 : f32 to vector<2x1xf32>
    %816 = arith.subf %815, %807 : vector<2x1xf32>
    %817 = vector.broadcast %816 : vector<2x1xf32> to vector<2x32xf32>
    %818 = arith.mulf %817, %744 : vector<2x32xf32>
    %819 = arith.addf %814, %818 : vector<2x32xf32>
    %820 = vector.broadcast %807 : vector<2x1xf32> to vector<2x32xf32>
    %821 = arith.mulf %820, %779 : vector<2x32xf32>
    %cst_116 = arith.constant 1.000000e+00 : f32
    %822 = vector.broadcast %cst_116 : f32 to vector<2x1xf32>
    %823 = arith.subf %822, %807 : vector<2x1xf32>
    %824 = vector.broadcast %823 : vector<2x1xf32> to vector<2x32xf32>
    %825 = arith.mulf %824, %746 : vector<2x32xf32>
    %826 = arith.addf %821, %825 : vector<2x32xf32>
    %827 = vector.broadcast %808 : vector<2x1xf32> to vector<2x32xf32>
    %828 = arith.mulf %827, %806 : vector<2x32xf32>
    %cst_117 = arith.constant 1.000000e+00 : f32
    %829 = vector.broadcast %cst_117 : f32 to vector<2x1xf32>
    %830 = arith.subf %829, %808 : vector<2x1xf32>
    %831 = vector.broadcast %830 : vector<2x1xf32> to vector<2x32xf32>
    %832 = arith.mulf %831, %745 : vector<2x32xf32>
    %833 = arith.addf %828, %832 : vector<2x32xf32>
    %834 = vector.broadcast %808 : vector<2x1xf32> to vector<2x32xf32>
    %835 = arith.mulf %834, %804 : vector<2x32xf32>
    %cst_118 = arith.constant 1.000000e+00 : f32
    %836 = vector.broadcast %cst_118 : f32 to vector<2x1xf32>
    %837 = arith.subf %836, %808 : vector<2x1xf32>
    %838 = vector.broadcast %837 : vector<2x1xf32> to vector<2x32xf32>
    %839 = arith.mulf %838, %747 : vector<2x32xf32>
    %840 = arith.addf %835, %839 : vector<2x32xf32>
    %841 = tpu.concatenate %819, %833 in 1 : vector<2x32xf32>, vector<2x32xf32> -> vector<2x64xf32>
    %842 = arith.truncf %841 : vector<2x64xf32> to vector<2x64xbf16>
    %cst_119 = arith.constant dense<0.000000e+00> : vector<2x256xf32>
    %843 = tpu.matmul %842, %737, %cst_119 {dimension_numbers = #tpu.dot_dimension_numbers<[1], [0], [0], [1], [0, 0, 1, 1], [], []>} : vector<2x64xbf16>, vector<64x256xbf16>, vector<2x256xf32> -> vector<2x256xf32>
    %844 = vector.extract_strided_slice %843 {offsets = [0, 0], sizes = [2, 128], strides = [1, 1]} : vector<2x256xf32> to vector<2x128xf32>
    %845 = vector.extract_strided_slice %743 {offsets = [2, 0], sizes = [2, 128], strides = [1, 1]} : vector<16x256xf32> to vector<2x128xf32>
    %846 = arith.addf %844, %845 : vector<2x128xf32>
    %847 = vector.extract_strided_slice %843 {offsets = [0, 128], sizes = [2, 128], strides = [1, 1]} : vector<2x256xf32> to vector<2x128xf32>
    %848 = vector.extract_strided_slice %743 {offsets = [12, 128], sizes = [2, 128], strides = [1, 1]} : vector<16x256xf32> to vector<2x128xf32>
    %849 = arith.addf %847, %848 : vector<2x128xf32>
    %850 = vector.extract_strided_slice %846 {offsets = [0, 0], sizes = [2, 32], strides = [1, 1]} : vector<2x128xf32> to vector<2x32xf32>
    %851 = arith.negf %850 : vector<2x32xf32>
    %852 = math.exp %851 : vector<2x32xf32>
    %cst_120 = arith.constant 1.000000e+00 : f32
    %853 = vector.broadcast %cst_120 : f32 to vector<2x32xf32>
    %854 = arith.addf %853, %852 : vector<2x32xf32>
    %855 = arith.divf %853, %854 : vector<2x32xf32>
    %856 = vector.extract_strided_slice %846 {offsets = [0, 32], sizes = [2, 32], strides = [1, 1]} : vector<2x128xf32> to vector<2x32xf32>
    %857 = arith.negf %856 : vector<2x32xf32>
    %858 = math.exp %857 : vector<2x32xf32>
    %cst_121 = arith.constant 1.000000e+00 : f32
    %859 = vector.broadcast %cst_121 : f32 to vector<2x32xf32>
    %860 = arith.addf %859, %858 : vector<2x32xf32>
    %861 = arith.divf %859, %860 : vector<2x32xf32>
    %862 = vector.extract_strided_slice %846 {offsets = [0, 64], sizes = [2, 32], strides = [1, 1]} : vector<2x128xf32> to vector<2x32xf32>
    %863 = math.tanh %862 : vector<2x32xf32>
    %864 = vector.extract_strided_slice %846 {offsets = [0, 96], sizes = [2, 32], strides = [1, 1]} : vector<2x128xf32> to vector<2x32xf32>
    %865 = arith.negf %864 : vector<2x32xf32>
    %866 = math.exp %865 : vector<2x32xf32>
    %cst_122 = arith.constant 1.000000e+00 : f32
    %867 = vector.broadcast %cst_122 : f32 to vector<2x32xf32>
    %868 = arith.addf %867, %866 : vector<2x32xf32>
    %869 = arith.divf %867, %868 : vector<2x32xf32>
    %870 = arith.mulf %861, %826 : vector<2x32xf32>
    %871 = arith.mulf %855, %863 : vector<2x32xf32>
    %872 = arith.addf %870, %871 : vector<2x32xf32>
    %873 = math.tanh %872 : vector<2x32xf32>
    %874 = arith.mulf %869, %873 : vector<2x32xf32>
    %875 = vector.extract_strided_slice %849 {offsets = [0, 0], sizes = [2, 32], strides = [1, 1]} : vector<2x128xf32> to vector<2x32xf32>
    %876 = arith.negf %875 : vector<2x32xf32>
    %877 = math.exp %876 : vector<2x32xf32>
    %cst_123 = arith.constant 1.000000e+00 : f32
    %878 = vector.broadcast %cst_123 : f32 to vector<2x32xf32>
    %879 = arith.addf %878, %877 : vector<2x32xf32>
    %880 = arith.divf %878, %879 : vector<2x32xf32>
    %881 = vector.extract_strided_slice %849 {offsets = [0, 32], sizes = [2, 32], strides = [1, 1]} : vector<2x128xf32> to vector<2x32xf32>
    %882 = arith.negf %881 : vector<2x32xf32>
    %883 = math.exp %882 : vector<2x32xf32>
    %cst_124 = arith.constant 1.000000e+00 : f32
    %884 = vector.broadcast %cst_124 : f32 to vector<2x32xf32>
    %885 = arith.addf %884, %883 : vector<2x32xf32>
    %886 = arith.divf %884, %885 : vector<2x32xf32>
    %887 = vector.extract_strided_slice %849 {offsets = [0, 64], sizes = [2, 32], strides = [1, 1]} : vector<2x128xf32> to vector<2x32xf32>
    %888 = math.tanh %887 : vector<2x32xf32>
    %889 = vector.extract_strided_slice %849 {offsets = [0, 96], sizes = [2, 32], strides = [1, 1]} : vector<2x128xf32> to vector<2x32xf32>
    %890 = arith.negf %889 : vector<2x32xf32>
    %891 = math.exp %890 : vector<2x32xf32>
    %cst_125 = arith.constant 1.000000e+00 : f32
    %892 = vector.broadcast %cst_125 : f32 to vector<2x32xf32>
    %893 = arith.addf %892, %891 : vector<2x32xf32>
    %894 = arith.divf %892, %893 : vector<2x32xf32>
    %895 = arith.mulf %886, %840 : vector<2x32xf32>
    %896 = arith.mulf %880, %888 : vector<2x32xf32>
    %897 = arith.addf %895, %896 : vector<2x32xf32>
    %898 = math.tanh %897 : vector<2x32xf32>
    %899 = arith.mulf %894, %898 : vector<2x32xf32>
    %900 = vector.extract_strided_slice %0 {offsets = [2, 0], sizes = [2, 1], strides = [1, 1]} : vector<16x1xf32> to vector<2x1xf32>
    %901 = vector.extract_strided_slice %0 {offsets = [12, 0], sizes = [2, 1], strides = [1, 1]} : vector<16x1xf32> to vector<2x1xf32>
    %902 = vector.broadcast %900 : vector<2x1xf32> to vector<2x32xf32>
    %903 = arith.mulf %902, %874 : vector<2x32xf32>
    %904 = vector.broadcast %901 : vector<2x1xf32> to vector<2x32xf32>
    %905 = arith.mulf %904, %899 : vector<2x32xf32>
    %906 = vector.broadcast %900 : vector<2x1xf32> to vector<2x32xf32>
    %907 = arith.mulf %906, %874 : vector<2x32xf32>
    %cst_126 = arith.constant 1.000000e+00 : f32
    %908 = vector.broadcast %cst_126 : f32 to vector<2x1xf32>
    %909 = arith.subf %908, %900 : vector<2x1xf32>
    %910 = vector.broadcast %909 : vector<2x1xf32> to vector<2x32xf32>
    %911 = arith.mulf %910, %819 : vector<2x32xf32>
    %912 = arith.addf %907, %911 : vector<2x32xf32>
    %913 = vector.broadcast %900 : vector<2x1xf32> to vector<2x32xf32>
    %914 = arith.mulf %913, %872 : vector<2x32xf32>
    %cst_127 = arith.constant 1.000000e+00 : f32
    %915 = vector.broadcast %cst_127 : f32 to vector<2x1xf32>
    %916 = arith.subf %915, %900 : vector<2x1xf32>
    %917 = vector.broadcast %916 : vector<2x1xf32> to vector<2x32xf32>
    %918 = arith.mulf %917, %826 : vector<2x32xf32>
    %919 = arith.addf %914, %918 : vector<2x32xf32>
    %920 = vector.broadcast %901 : vector<2x1xf32> to vector<2x32xf32>
    %921 = arith.mulf %920, %899 : vector<2x32xf32>
    %cst_128 = arith.constant 1.000000e+00 : f32
    %922 = vector.broadcast %cst_128 : f32 to vector<2x1xf32>
    %923 = arith.subf %922, %901 : vector<2x1xf32>
    %924 = vector.broadcast %923 : vector<2x1xf32> to vector<2x32xf32>
    %925 = arith.mulf %924, %833 : vector<2x32xf32>
    %926 = arith.addf %921, %925 : vector<2x32xf32>
    %927 = vector.broadcast %901 : vector<2x1xf32> to vector<2x32xf32>
    %928 = arith.mulf %927, %897 : vector<2x32xf32>
    %cst_129 = arith.constant 1.000000e+00 : f32
    %929 = vector.broadcast %cst_129 : f32 to vector<2x1xf32>
    %930 = arith.subf %929, %901 : vector<2x1xf32>
    %931 = vector.broadcast %930 : vector<2x1xf32> to vector<2x32xf32>
    %932 = arith.mulf %931, %840 : vector<2x32xf32>
    %933 = arith.addf %928, %932 : vector<2x32xf32>
    %934 = tpu.concatenate %912, %926 in 1 : vector<2x32xf32>, vector<2x32xf32> -> vector<2x64xf32>
    %935 = arith.truncf %934 : vector<2x64xf32> to vector<2x64xbf16>
    %cst_130 = arith.constant dense<0.000000e+00> : vector<2x256xf32>
    %936 = tpu.matmul %935, %737, %cst_130 {dimension_numbers = #tpu.dot_dimension_numbers<[1], [0], [0], [1], [0, 0, 1, 1], [], []>} : vector<2x64xbf16>, vector<64x256xbf16>, vector<2x256xf32> -> vector<2x256xf32>
    %937 = vector.extract_strided_slice %936 {offsets = [0, 0], sizes = [2, 128], strides = [1, 1]} : vector<2x256xf32> to vector<2x128xf32>
    %938 = vector.extract_strided_slice %743 {offsets = [4, 0], sizes = [2, 128], strides = [1, 1]} : vector<16x256xf32> to vector<2x128xf32>
    %939 = arith.addf %937, %938 : vector<2x128xf32>
    %940 = vector.extract_strided_slice %936 {offsets = [0, 128], sizes = [2, 128], strides = [1, 1]} : vector<2x256xf32> to vector<2x128xf32>
    %941 = vector.extract_strided_slice %743 {offsets = [10, 128], sizes = [2, 128], strides = [1, 1]} : vector<16x256xf32> to vector<2x128xf32>
    %942 = arith.addf %940, %941 : vector<2x128xf32>
    %943 = vector.extract_strided_slice %939 {offsets = [0, 0], sizes = [2, 32], strides = [1, 1]} : vector<2x128xf32> to vector<2x32xf32>
    %944 = arith.negf %943 : vector<2x32xf32>
    %945 = math.exp %944 : vector<2x32xf32>
    %cst_131 = arith.constant 1.000000e+00 : f32
    %946 = vector.broadcast %cst_131 : f32 to vector<2x32xf32>
    %947 = arith.addf %946, %945 : vector<2x32xf32>
    %948 = arith.divf %946, %947 : vector<2x32xf32>
    %949 = vector.extract_strided_slice %939 {offsets = [0, 32], sizes = [2, 32], strides = [1, 1]} : vector<2x128xf32> to vector<2x32xf32>
    %950 = arith.negf %949 : vector<2x32xf32>
    %951 = math.exp %950 : vector<2x32xf32>
    %cst_132 = arith.constant 1.000000e+00 : f32
    %952 = vector.broadcast %cst_132 : f32 to vector<2x32xf32>
    %953 = arith.addf %952, %951 : vector<2x32xf32>
    %954 = arith.divf %952, %953 : vector<2x32xf32>
    %955 = vector.extract_strided_slice %939 {offsets = [0, 64], sizes = [2, 32], strides = [1, 1]} : vector<2x128xf32> to vector<2x32xf32>
    %956 = math.tanh %955 : vector<2x32xf32>
    %957 = vector.extract_strided_slice %939 {offsets = [0, 96], sizes = [2, 32], strides = [1, 1]} : vector<2x128xf32> to vector<2x32xf32>
    %958 = arith.negf %957 : vector<2x32xf32>
    %959 = math.exp %958 : vector<2x32xf32>
    %cst_133 = arith.constant 1.000000e+00 : f32
    %960 = vector.broadcast %cst_133 : f32 to vector<2x32xf32>
    %961 = arith.addf %960, %959 : vector<2x32xf32>
    %962 = arith.divf %960, %961 : vector<2x32xf32>
    %963 = arith.mulf %954, %919 : vector<2x32xf32>
    %964 = arith.mulf %948, %956 : vector<2x32xf32>
    %965 = arith.addf %963, %964 : vector<2x32xf32>
    %966 = math.tanh %965 : vector<2x32xf32>
    %967 = arith.mulf %962, %966 : vector<2x32xf32>
    %968 = vector.extract_strided_slice %942 {offsets = [0, 0], sizes = [2, 32], strides = [1, 1]} : vector<2x128xf32> to vector<2x32xf32>
    %969 = arith.negf %968 : vector<2x32xf32>
    %970 = math.exp %969 : vector<2x32xf32>
    %cst_134 = arith.constant 1.000000e+00 : f32
    %971 = vector.broadcast %cst_134 : f32 to vector<2x32xf32>
    %972 = arith.addf %971, %970 : vector<2x32xf32>
    %973 = arith.divf %971, %972 : vector<2x32xf32>
    %974 = vector.extract_strided_slice %942 {offsets = [0, 32], sizes = [2, 32], strides = [1, 1]} : vector<2x128xf32> to vector<2x32xf32>
    %975 = arith.negf %974 : vector<2x32xf32>
    %976 = math.exp %975 : vector<2x32xf32>
    %cst_135 = arith.constant 1.000000e+00 : f32
    %977 = vector.broadcast %cst_135 : f32 to vector<2x32xf32>
    %978 = arith.addf %977, %976 : vector<2x32xf32>
    %979 = arith.divf %977, %978 : vector<2x32xf32>
    %980 = vector.extract_strided_slice %942 {offsets = [0, 64], sizes = [2, 32], strides = [1, 1]} : vector<2x128xf32> to vector<2x32xf32>
    %981 = math.tanh %980 : vector<2x32xf32>
    %982 = vector.extract_strided_slice %942 {offsets = [0, 96], sizes = [2, 32], strides = [1, 1]} : vector<2x128xf32> to vector<2x32xf32>
    %983 = arith.negf %982 : vector<2x32xf32>
    %984 = math.exp %983 : vector<2x32xf32>
    %cst_136 = arith.constant 1.000000e+00 : f32
    %985 = vector.broadcast %cst_136 : f32 to vector<2x32xf32>
    %986 = arith.addf %985, %984 : vector<2x32xf32>
    %987 = arith.divf %985, %986 : vector<2x32xf32>
    %988 = arith.mulf %979, %933 : vector<2x32xf32>
    %989 = arith.mulf %973, %981 : vector<2x32xf32>
    %990 = arith.addf %988, %989 : vector<2x32xf32>
    %991 = math.tanh %990 : vector<2x32xf32>
    %992 = arith.mulf %987, %991 : vector<2x32xf32>
    %993 = vector.extract_strided_slice %0 {offsets = [4, 0], sizes = [2, 1], strides = [1, 1]} : vector<16x1xf32> to vector<2x1xf32>
    %994 = vector.extract_strided_slice %0 {offsets = [10, 0], sizes = [2, 1], strides = [1, 1]} : vector<16x1xf32> to vector<2x1xf32>
    %995 = vector.broadcast %993 : vector<2x1xf32> to vector<2x32xf32>
    %996 = arith.mulf %995, %967 : vector<2x32xf32>
    %997 = vector.broadcast %994 : vector<2x1xf32> to vector<2x32xf32>
    %998 = arith.mulf %997, %992 : vector<2x32xf32>
    %999 = vector.broadcast %993 : vector<2x1xf32> to vector<2x32xf32>
    %1000 = arith.mulf %999, %967 : vector<2x32xf32>
    %cst_137 = arith.constant 1.000000e+00 : f32
    %1001 = vector.broadcast %cst_137 : f32 to vector<2x1xf32>
    %1002 = arith.subf %1001, %993 : vector<2x1xf32>
    %1003 = vector.broadcast %1002 : vector<2x1xf32> to vector<2x32xf32>
    %1004 = arith.mulf %1003, %912 : vector<2x32xf32>
    %1005 = arith.addf %1000, %1004 : vector<2x32xf32>
    %1006 = vector.broadcast %993 : vector<2x1xf32> to vector<2x32xf32>
    %1007 = arith.mulf %1006, %965 : vector<2x32xf32>
    %cst_138 = arith.constant 1.000000e+00 : f32
    %1008 = vector.broadcast %cst_138 : f32 to vector<2x1xf32>
    %1009 = arith.subf %1008, %993 : vector<2x1xf32>
    %1010 = vector.broadcast %1009 : vector<2x1xf32> to vector<2x32xf32>
    %1011 = arith.mulf %1010, %919 : vector<2x32xf32>
    %1012 = arith.addf %1007, %1011 : vector<2x32xf32>
    %1013 = vector.broadcast %994 : vector<2x1xf32> to vector<2x32xf32>
    %1014 = arith.mulf %1013, %992 : vector<2x32xf32>
    %cst_139 = arith.constant 1.000000e+00 : f32
    %1015 = vector.broadcast %cst_139 : f32 to vector<2x1xf32>
    %1016 = arith.subf %1015, %994 : vector<2x1xf32>
    %1017 = vector.broadcast %1016 : vector<2x1xf32> to vector<2x32xf32>
    %1018 = arith.mulf %1017, %926 : vector<2x32xf32>
    %1019 = arith.addf %1014, %1018 : vector<2x32xf32>
    %1020 = vector.broadcast %994 : vector<2x1xf32> to vector<2x32xf32>
    %1021 = arith.mulf %1020, %990 : vector<2x32xf32>
    %cst_140 = arith.constant 1.000000e+00 : f32
    %1022 = vector.broadcast %cst_140 : f32 to vector<2x1xf32>
    %1023 = arith.subf %1022, %994 : vector<2x1xf32>
    %1024 = vector.broadcast %1023 : vector<2x1xf32> to vector<2x32xf32>
    %1025 = arith.mulf %1024, %933 : vector<2x32xf32>
    %1026 = arith.addf %1021, %1025 : vector<2x32xf32>
    %1027 = tpu.concatenate %1005, %1019 in 1 : vector<2x32xf32>, vector<2x32xf32> -> vector<2x64xf32>
    %1028 = arith.truncf %1027 : vector<2x64xf32> to vector<2x64xbf16>
    %cst_141 = arith.constant dense<0.000000e+00> : vector<2x256xf32>
    %1029 = tpu.matmul %1028, %737, %cst_141 {dimension_numbers = #tpu.dot_dimension_numbers<[1], [0], [0], [1], [0, 0, 1, 1], [], []>} : vector<2x64xbf16>, vector<64x256xbf16>, vector<2x256xf32> -> vector<2x256xf32>
    %1030 = vector.extract_strided_slice %1029 {offsets = [0, 0], sizes = [2, 128], strides = [1, 1]} : vector<2x256xf32> to vector<2x128xf32>
    %1031 = vector.extract_strided_slice %743 {offsets = [6, 0], sizes = [2, 128], strides = [1, 1]} : vector<16x256xf32> to vector<2x128xf32>
    %1032 = arith.addf %1030, %1031 : vector<2x128xf32>
    %1033 = vector.extract_strided_slice %1029 {offsets = [0, 128], sizes = [2, 128], strides = [1, 1]} : vector<2x256xf32> to vector<2x128xf32>
    %1034 = vector.extract_strided_slice %743 {offsets = [8, 128], sizes = [2, 128], strides = [1, 1]} : vector<16x256xf32> to vector<2x128xf32>
    %1035 = arith.addf %1033, %1034 : vector<2x128xf32>
    %1036 = vector.extract_strided_slice %1032 {offsets = [0, 0], sizes = [2, 32], strides = [1, 1]} : vector<2x128xf32> to vector<2x32xf32>
    %1037 = arith.negf %1036 : vector<2x32xf32>
    %1038 = math.exp %1037 : vector<2x32xf32>
    %cst_142 = arith.constant 1.000000e+00 : f32
    %1039 = vector.broadcast %cst_142 : f32 to vector<2x32xf32>
    %1040 = arith.addf %1039, %1038 : vector<2x32xf32>
    %1041 = arith.divf %1039, %1040 : vector<2x32xf32>
    %1042 = vector.extract_strided_slice %1032 {offsets = [0, 32], sizes = [2, 32], strides = [1, 1]} : vector<2x128xf32> to vector<2x32xf32>
    %1043 = arith.negf %1042 : vector<2x32xf32>
    %1044 = math.exp %1043 : vector<2x32xf32>
    %cst_143 = arith.constant 1.000000e+00 : f32
    %1045 = vector.broadcast %cst_143 : f32 to vector<2x32xf32>
    %1046 = arith.addf %1045, %1044 : vector<2x32xf32>
    %1047 = arith.divf %1045, %1046 : vector<2x32xf32>
    %1048 = vector.extract_strided_slice %1032 {offsets = [0, 64], sizes = [2, 32], strides = [1, 1]} : vector<2x128xf32> to vector<2x32xf32>
    %1049 = math.tanh %1048 : vector<2x32xf32>
    %1050 = vector.extract_strided_slice %1032 {offsets = [0, 96], sizes = [2, 32], strides = [1, 1]} : vector<2x128xf32> to vector<2x32xf32>
    %1051 = arith.negf %1050 : vector<2x32xf32>
    %1052 = math.exp %1051 : vector<2x32xf32>
    %cst_144 = arith.constant 1.000000e+00 : f32
    %1053 = vector.broadcast %cst_144 : f32 to vector<2x32xf32>
    %1054 = arith.addf %1053, %1052 : vector<2x32xf32>
    %1055 = arith.divf %1053, %1054 : vector<2x32xf32>
    %1056 = arith.mulf %1047, %1012 : vector<2x32xf32>
    %1057 = arith.mulf %1041, %1049 : vector<2x32xf32>
    %1058 = arith.addf %1056, %1057 : vector<2x32xf32>
    %1059 = math.tanh %1058 : vector<2x32xf32>
    %1060 = arith.mulf %1055, %1059 : vector<2x32xf32>
    %1061 = vector.extract_strided_slice %1035 {offsets = [0, 0], sizes = [2, 32], strides = [1, 1]} : vector<2x128xf32> to vector<2x32xf32>
    %1062 = arith.negf %1061 : vector<2x32xf32>
    %1063 = math.exp %1062 : vector<2x32xf32>
    %cst_145 = arith.constant 1.000000e+00 : f32
    %1064 = vector.broadcast %cst_145 : f32 to vector<2x32xf32>
    %1065 = arith.addf %1064, %1063 : vector<2x32xf32>
    %1066 = arith.divf %1064, %1065 : vector<2x32xf32>
    %1067 = vector.extract_strided_slice %1035 {offsets = [0, 32], sizes = [2, 32], strides = [1, 1]} : vector<2x128xf32> to vector<2x32xf32>
    %1068 = arith.negf %1067 : vector<2x32xf32>
    %1069 = math.exp %1068 : vector<2x32xf32>
    %cst_146 = arith.constant 1.000000e+00 : f32
    %1070 = vector.broadcast %cst_146 : f32 to vector<2x32xf32>
    %1071 = arith.addf %1070, %1069 : vector<2x32xf32>
    %1072 = arith.divf %1070, %1071 : vector<2x32xf32>
    %1073 = vector.extract_strided_slice %1035 {offsets = [0, 64], sizes = [2, 32], strides = [1, 1]} : vector<2x128xf32> to vector<2x32xf32>
    %1074 = math.tanh %1073 : vector<2x32xf32>
    %1075 = vector.extract_strided_slice %1035 {offsets = [0, 96], sizes = [2, 32], strides = [1, 1]} : vector<2x128xf32> to vector<2x32xf32>
    %1076 = arith.negf %1075 : vector<2x32xf32>
    %1077 = math.exp %1076 : vector<2x32xf32>
    %cst_147 = arith.constant 1.000000e+00 : f32
    %1078 = vector.broadcast %cst_147 : f32 to vector<2x32xf32>
    %1079 = arith.addf %1078, %1077 : vector<2x32xf32>
    %1080 = arith.divf %1078, %1079 : vector<2x32xf32>
    %1081 = arith.mulf %1072, %1026 : vector<2x32xf32>
    %1082 = arith.mulf %1066, %1074 : vector<2x32xf32>
    %1083 = arith.addf %1081, %1082 : vector<2x32xf32>
    %1084 = math.tanh %1083 : vector<2x32xf32>
    %1085 = arith.mulf %1080, %1084 : vector<2x32xf32>
    %1086 = vector.extract_strided_slice %0 {offsets = [6, 0], sizes = [2, 1], strides = [1, 1]} : vector<16x1xf32> to vector<2x1xf32>
    %1087 = vector.extract_strided_slice %0 {offsets = [8, 0], sizes = [2, 1], strides = [1, 1]} : vector<16x1xf32> to vector<2x1xf32>
    %1088 = vector.broadcast %1086 : vector<2x1xf32> to vector<2x32xf32>
    %1089 = arith.mulf %1088, %1060 : vector<2x32xf32>
    %1090 = vector.broadcast %1087 : vector<2x1xf32> to vector<2x32xf32>
    %1091 = arith.mulf %1090, %1085 : vector<2x32xf32>
    %1092 = vector.broadcast %1086 : vector<2x1xf32> to vector<2x32xf32>
    %1093 = arith.mulf %1092, %1060 : vector<2x32xf32>
    %cst_148 = arith.constant 1.000000e+00 : f32
    %1094 = vector.broadcast %cst_148 : f32 to vector<2x1xf32>
    %1095 = arith.subf %1094, %1086 : vector<2x1xf32>
    %1096 = vector.broadcast %1095 : vector<2x1xf32> to vector<2x32xf32>
    %1097 = arith.mulf %1096, %1005 : vector<2x32xf32>
    %1098 = arith.addf %1093, %1097 : vector<2x32xf32>
    %1099 = vector.broadcast %1086 : vector<2x1xf32> to vector<2x32xf32>
    %1100 = arith.mulf %1099, %1058 : vector<2x32xf32>
    %cst_149 = arith.constant 1.000000e+00 : f32
    %1101 = vector.broadcast %cst_149 : f32 to vector<2x1xf32>
    %1102 = arith.subf %1101, %1086 : vector<2x1xf32>
    %1103 = vector.broadcast %1102 : vector<2x1xf32> to vector<2x32xf32>
    %1104 = arith.mulf %1103, %1012 : vector<2x32xf32>
    %1105 = arith.addf %1100, %1104 : vector<2x32xf32>
    %1106 = vector.broadcast %1087 : vector<2x1xf32> to vector<2x32xf32>
    %1107 = arith.mulf %1106, %1085 : vector<2x32xf32>
    %cst_150 = arith.constant 1.000000e+00 : f32
    %1108 = vector.broadcast %cst_150 : f32 to vector<2x1xf32>
    %1109 = arith.subf %1108, %1087 : vector<2x1xf32>
    %1110 = vector.broadcast %1109 : vector<2x1xf32> to vector<2x32xf32>
    %1111 = arith.mulf %1110, %1019 : vector<2x32xf32>
    %1112 = arith.addf %1107, %1111 : vector<2x32xf32>
    %1113 = vector.broadcast %1087 : vector<2x1xf32> to vector<2x32xf32>
    %1114 = arith.mulf %1113, %1083 : vector<2x32xf32>
    %cst_151 = arith.constant 1.000000e+00 : f32
    %1115 = vector.broadcast %cst_151 : f32 to vector<2x1xf32>
    %1116 = arith.subf %1115, %1087 : vector<2x1xf32>
    %1117 = vector.broadcast %1116 : vector<2x1xf32> to vector<2x32xf32>
    %1118 = arith.mulf %1117, %1026 : vector<2x32xf32>
    %1119 = arith.addf %1114, %1118 : vector<2x32xf32>
    %1120 = tpu.concatenate %1098, %1112 in 1 : vector<2x32xf32>, vector<2x32xf32> -> vector<2x64xf32>
    %1121 = arith.truncf %1120 : vector<2x64xf32> to vector<2x64xbf16>
    %cst_152 = arith.constant dense<0.000000e+00> : vector<2x256xf32>
    %1122 = tpu.matmul %1121, %737, %cst_152 {dimension_numbers = #tpu.dot_dimension_numbers<[1], [0], [0], [1], [0, 0, 1, 1], [], []>} : vector<2x64xbf16>, vector<64x256xbf16>, vector<2x256xf32> -> vector<2x256xf32>
    %1123 = vector.extract_strided_slice %1122 {offsets = [0, 0], sizes = [2, 128], strides = [1, 1]} : vector<2x256xf32> to vector<2x128xf32>
    %1124 = vector.extract_strided_slice %743 {offsets = [8, 0], sizes = [2, 128], strides = [1, 1]} : vector<16x256xf32> to vector<2x128xf32>
    %1125 = arith.addf %1123, %1124 : vector<2x128xf32>
    %1126 = vector.extract_strided_slice %1122 {offsets = [0, 128], sizes = [2, 128], strides = [1, 1]} : vector<2x256xf32> to vector<2x128xf32>
    %1127 = vector.extract_strided_slice %743 {offsets = [6, 128], sizes = [2, 128], strides = [1, 1]} : vector<16x256xf32> to vector<2x128xf32>
    %1128 = arith.addf %1126, %1127 : vector<2x128xf32>
    %1129 = vector.extract_strided_slice %1125 {offsets = [0, 0], sizes = [2, 32], strides = [1, 1]} : vector<2x128xf32> to vector<2x32xf32>
    %1130 = arith.negf %1129 : vector<2x32xf32>
    %1131 = math.exp %1130 : vector<2x32xf32>
    %cst_153 = arith.constant 1.000000e+00 : f32
    %1132 = vector.broadcast %cst_153 : f32 to vector<2x32xf32>
    %1133 = arith.addf %1132, %1131 : vector<2x32xf32>
    %1134 = arith.divf %1132, %1133 : vector<2x32xf32>
    %1135 = vector.extract_strided_slice %1125 {offsets = [0, 32], sizes = [2, 32], strides = [1, 1]} : vector<2x128xf32> to vector<2x32xf32>
    %1136 = arith.negf %1135 : vector<2x32xf32>
    %1137 = math.exp %1136 : vector<2x32xf32>
    %cst_154 = arith.constant 1.000000e+00 : f32
    %1138 = vector.broadcast %cst_154 : f32 to vector<2x32xf32>
    %1139 = arith.addf %1138, %1137 : vector<2x32xf32>
    %1140 = arith.divf %1138, %1139 : vector<2x32xf32>
    %1141 = vector.extract_strided_slice %1125 {offsets = [0, 64], sizes = [2, 32], strides = [1, 1]} : vector<2x128xf32> to vector<2x32xf32>
    %1142 = math.tanh %1141 : vector<2x32xf32>
    %1143 = vector.extract_strided_slice %1125 {offsets = [0, 96], sizes = [2, 32], strides = [1, 1]} : vector<2x128xf32> to vector<2x32xf32>
    %1144 = arith.negf %1143 : vector<2x32xf32>
    %1145 = math.exp %1144 : vector<2x32xf32>
    %cst_155 = arith.constant 1.000000e+00 : f32
    %1146 = vector.broadcast %cst_155 : f32 to vector<2x32xf32>
    %1147 = arith.addf %1146, %1145 : vector<2x32xf32>
    %1148 = arith.divf %1146, %1147 : vector<2x32xf32>
    %1149 = arith.mulf %1140, %1105 : vector<2x32xf32>
    %1150 = arith.mulf %1134, %1142 : vector<2x32xf32>
    %1151 = arith.addf %1149, %1150 : vector<2x32xf32>
    %1152 = math.tanh %1151 : vector<2x32xf32>
    %1153 = arith.mulf %1148, %1152 : vector<2x32xf32>
    %1154 = vector.extract_strided_slice %1128 {offsets = [0, 0], sizes = [2, 32], strides = [1, 1]} : vector<2x128xf32> to vector<2x32xf32>
    %1155 = arith.negf %1154 : vector<2x32xf32>
    %1156 = math.exp %1155 : vector<2x32xf32>
    %cst_156 = arith.constant 1.000000e+00 : f32
    %1157 = vector.broadcast %cst_156 : f32 to vector<2x32xf32>
    %1158 = arith.addf %1157, %1156 : vector<2x32xf32>
    %1159 = arith.divf %1157, %1158 : vector<2x32xf32>
    %1160 = vector.extract_strided_slice %1128 {offsets = [0, 32], sizes = [2, 32], strides = [1, 1]} : vector<2x128xf32> to vector<2x32xf32>
    %1161 = arith.negf %1160 : vector<2x32xf32>
    %1162 = math.exp %1161 : vector<2x32xf32>
    %cst_157 = arith.constant 1.000000e+00 : f32
    %1163 = vector.broadcast %cst_157 : f32 to vector<2x32xf32>
    %1164 = arith.addf %1163, %1162 : vector<2x32xf32>
    %1165 = arith.divf %1163, %1164 : vector<2x32xf32>
    %1166 = vector.extract_strided_slice %1128 {offsets = [0, 64], sizes = [2, 32], strides = [1, 1]} : vector<2x128xf32> to vector<2x32xf32>
    %1167 = math.tanh %1166 : vector<2x32xf32>
    %1168 = vector.extract_strided_slice %1128 {offsets = [0, 96], sizes = [2, 32], strides = [1, 1]} : vector<2x128xf32> to vector<2x32xf32>
    %1169 = arith.negf %1168 : vector<2x32xf32>
    %1170 = math.exp %1169 : vector<2x32xf32>
    %cst_158 = arith.constant 1.000000e+00 : f32
    %1171 = vector.broadcast %cst_158 : f32 to vector<2x32xf32>
    %1172 = arith.addf %1171, %1170 : vector<2x32xf32>
    %1173 = arith.divf %1171, %1172 : vector<2x32xf32>
    %1174 = arith.mulf %1165, %1119 : vector<2x32xf32>
    %1175 = arith.mulf %1159, %1167 : vector<2x32xf32>
    %1176 = arith.addf %1174, %1175 : vector<2x32xf32>
    %1177 = math.tanh %1176 : vector<2x32xf32>
    %1178 = arith.mulf %1173, %1177 : vector<2x32xf32>
    %1179 = vector.extract_strided_slice %0 {offsets = [8, 0], sizes = [2, 1], strides = [1, 1]} : vector<16x1xf32> to vector<2x1xf32>
    %1180 = vector.extract_strided_slice %0 {offsets = [6, 0], sizes = [2, 1], strides = [1, 1]} : vector<16x1xf32> to vector<2x1xf32>
    %1181 = vector.broadcast %1179 : vector<2x1xf32> to vector<2x32xf32>
    %1182 = arith.mulf %1181, %1153 : vector<2x32xf32>
    %1183 = vector.broadcast %1180 : vector<2x1xf32> to vector<2x32xf32>
    %1184 = arith.mulf %1183, %1178 : vector<2x32xf32>
    %1185 = vector.broadcast %1179 : vector<2x1xf32> to vector<2x32xf32>
    %1186 = arith.mulf %1185, %1153 : vector<2x32xf32>
    %cst_159 = arith.constant 1.000000e+00 : f32
    %1187 = vector.broadcast %cst_159 : f32 to vector<2x1xf32>
    %1188 = arith.subf %1187, %1179 : vector<2x1xf32>
    %1189 = vector.broadcast %1188 : vector<2x1xf32> to vector<2x32xf32>
    %1190 = arith.mulf %1189, %1098 : vector<2x32xf32>
    %1191 = arith.addf %1186, %1190 : vector<2x32xf32>
    %1192 = vector.broadcast %1179 : vector<2x1xf32> to vector<2x32xf32>
    %1193 = arith.mulf %1192, %1151 : vector<2x32xf32>
    %cst_160 = arith.constant 1.000000e+00 : f32
    %1194 = vector.broadcast %cst_160 : f32 to vector<2x1xf32>
    %1195 = arith.subf %1194, %1179 : vector<2x1xf32>
    %1196 = vector.broadcast %1195 : vector<2x1xf32> to vector<2x32xf32>
    %1197 = arith.mulf %1196, %1105 : vector<2x32xf32>
    %1198 = arith.addf %1193, %1197 : vector<2x32xf32>
    %1199 = vector.broadcast %1180 : vector<2x1xf32> to vector<2x32xf32>
    %1200 = arith.mulf %1199, %1178 : vector<2x32xf32>
    %cst_161 = arith.constant 1.000000e+00 : f32
    %1201 = vector.broadcast %cst_161 : f32 to vector<2x1xf32>
    %1202 = arith.subf %1201, %1180 : vector<2x1xf32>
    %1203 = vector.broadcast %1202 : vector<2x1xf32> to vector<2x32xf32>
    %1204 = arith.mulf %1203, %1112 : vector<2x32xf32>
    %1205 = arith.addf %1200, %1204 : vector<2x32xf32>
    %1206 = vector.broadcast %1180 : vector<2x1xf32> to vector<2x32xf32>
    %1207 = arith.mulf %1206, %1176 : vector<2x32xf32>
    %cst_162 = arith.constant 1.000000e+00 : f32
    %1208 = vector.broadcast %cst_162 : f32 to vector<2x1xf32>
    %1209 = arith.subf %1208, %1180 : vector<2x1xf32>
    %1210 = vector.broadcast %1209 : vector<2x1xf32> to vector<2x32xf32>
    %1211 = arith.mulf %1210, %1119 : vector<2x32xf32>
    %1212 = arith.addf %1207, %1211 : vector<2x32xf32>
    %1213 = tpu.concatenate %1191, %1205 in 1 : vector<2x32xf32>, vector<2x32xf32> -> vector<2x64xf32>
    %1214 = arith.truncf %1213 : vector<2x64xf32> to vector<2x64xbf16>
    %cst_163 = arith.constant dense<0.000000e+00> : vector<2x256xf32>
    %1215 = tpu.matmul %1214, %737, %cst_163 {dimension_numbers = #tpu.dot_dimension_numbers<[1], [0], [0], [1], [0, 0, 1, 1], [], []>} : vector<2x64xbf16>, vector<64x256xbf16>, vector<2x256xf32> -> vector<2x256xf32>
    %1216 = vector.extract_strided_slice %1215 {offsets = [0, 0], sizes = [2, 128], strides = [1, 1]} : vector<2x256xf32> to vector<2x128xf32>
    %1217 = vector.extract_strided_slice %743 {offsets = [10, 0], sizes = [2, 128], strides = [1, 1]} : vector<16x256xf32> to vector<2x128xf32>
    %1218 = arith.addf %1216, %1217 : vector<2x128xf32>
    %1219 = vector.extract_strided_slice %1215 {offsets = [0, 128], sizes = [2, 128], strides = [1, 1]} : vector<2x256xf32> to vector<2x128xf32>
    %1220 = vector.extract_strided_slice %743 {offsets = [4, 128], sizes = [2, 128], strides = [1, 1]} : vector<16x256xf32> to vector<2x128xf32>
    %1221 = arith.addf %1219, %1220 : vector<2x128xf32>
    %1222 = vector.extract_strided_slice %1218 {offsets = [0, 0], sizes = [2, 32], strides = [1, 1]} : vector<2x128xf32> to vector<2x32xf32>
    %1223 = arith.negf %1222 : vector<2x32xf32>
    %1224 = math.exp %1223 : vector<2x32xf32>
    %cst_164 = arith.constant 1.000000e+00 : f32
    %1225 = vector.broadcast %cst_164 : f32 to vector<2x32xf32>
    %1226 = arith.addf %1225, %1224 : vector<2x32xf32>
    %1227 = arith.divf %1225, %1226 : vector<2x32xf32>
    %1228 = vector.extract_strided_slice %1218 {offsets = [0, 32], sizes = [2, 32], strides = [1, 1]} : vector<2x128xf32> to vector<2x32xf32>
    %1229 = arith.negf %1228 : vector<2x32xf32>
    %1230 = math.exp %1229 : vector<2x32xf32>
    %cst_165 = arith.constant 1.000000e+00 : f32
    %1231 = vector.broadcast %cst_165 : f32 to vector<2x32xf32>
    %1232 = arith.addf %1231, %1230 : vector<2x32xf32>
    %1233 = arith.divf %1231, %1232 : vector<2x32xf32>
    %1234 = vector.extract_strided_slice %1218 {offsets = [0, 64], sizes = [2, 32], strides = [1, 1]} : vector<2x128xf32> to vector<2x32xf32>
    %1235 = math.tanh %1234 : vector<2x32xf32>
    %1236 = vector.extract_strided_slice %1218 {offsets = [0, 96], sizes = [2, 32], strides = [1, 1]} : vector<2x128xf32> to vector<2x32xf32>
    %1237 = arith.negf %1236 : vector<2x32xf32>
    %1238 = math.exp %1237 : vector<2x32xf32>
    %cst_166 = arith.constant 1.000000e+00 : f32
    %1239 = vector.broadcast %cst_166 : f32 to vector<2x32xf32>
    %1240 = arith.addf %1239, %1238 : vector<2x32xf32>
    %1241 = arith.divf %1239, %1240 : vector<2x32xf32>
    %1242 = arith.mulf %1233, %1198 : vector<2x32xf32>
    %1243 = arith.mulf %1227, %1235 : vector<2x32xf32>
    %1244 = arith.addf %1242, %1243 : vector<2x32xf32>
    %1245 = math.tanh %1244 : vector<2x32xf32>
    %1246 = arith.mulf %1241, %1245 : vector<2x32xf32>
    %1247 = vector.extract_strided_slice %1221 {offsets = [0, 0], sizes = [2, 32], strides = [1, 1]} : vector<2x128xf32> to vector<2x32xf32>
    %1248 = arith.negf %1247 : vector<2x32xf32>
    %1249 = math.exp %1248 : vector<2x32xf32>
    %cst_167 = arith.constant 1.000000e+00 : f32
    %1250 = vector.broadcast %cst_167 : f32 to vector<2x32xf32>
    %1251 = arith.addf %1250, %1249 : vector<2x32xf32>
    %1252 = arith.divf %1250, %1251 : vector<2x32xf32>
    %1253 = vector.extract_strided_slice %1221 {offsets = [0, 32], sizes = [2, 32], strides = [1, 1]} : vector<2x128xf32> to vector<2x32xf32>
    %1254 = arith.negf %1253 : vector<2x32xf32>
    %1255 = math.exp %1254 : vector<2x32xf32>
    %cst_168 = arith.constant 1.000000e+00 : f32
    %1256 = vector.broadcast %cst_168 : f32 to vector<2x32xf32>
    %1257 = arith.addf %1256, %1255 : vector<2x32xf32>
    %1258 = arith.divf %1256, %1257 : vector<2x32xf32>
    %1259 = vector.extract_strided_slice %1221 {offsets = [0, 64], sizes = [2, 32], strides = [1, 1]} : vector<2x128xf32> to vector<2x32xf32>
    %1260 = math.tanh %1259 : vector<2x32xf32>
    %1261 = vector.extract_strided_slice %1221 {offsets = [0, 96], sizes = [2, 32], strides = [1, 1]} : vector<2x128xf32> to vector<2x32xf32>
    %1262 = arith.negf %1261 : vector<2x32xf32>
    %1263 = math.exp %1262 : vector<2x32xf32>
    %cst_169 = arith.constant 1.000000e+00 : f32
    %1264 = vector.broadcast %cst_169 : f32 to vector<2x32xf32>
    %1265 = arith.addf %1264, %1263 : vector<2x32xf32>
    %1266 = arith.divf %1264, %1265 : vector<2x32xf32>
    %1267 = arith.mulf %1258, %1212 : vector<2x32xf32>
    %1268 = arith.mulf %1252, %1260 : vector<2x32xf32>
    %1269 = arith.addf %1267, %1268 : vector<2x32xf32>
    %1270 = math.tanh %1269 : vector<2x32xf32>
    %1271 = arith.mulf %1266, %1270 : vector<2x32xf32>
    %1272 = vector.extract_strided_slice %0 {offsets = [10, 0], sizes = [2, 1], strides = [1, 1]} : vector<16x1xf32> to vector<2x1xf32>
    %1273 = vector.extract_strided_slice %0 {offsets = [4, 0], sizes = [2, 1], strides = [1, 1]} : vector<16x1xf32> to vector<2x1xf32>
    %1274 = vector.broadcast %1272 : vector<2x1xf32> to vector<2x32xf32>
    %1275 = arith.mulf %1274, %1246 : vector<2x32xf32>
    %1276 = vector.broadcast %1273 : vector<2x1xf32> to vector<2x32xf32>
    %1277 = arith.mulf %1276, %1271 : vector<2x32xf32>
    %1278 = vector.broadcast %1272 : vector<2x1xf32> to vector<2x32xf32>
    %1279 = arith.mulf %1278, %1246 : vector<2x32xf32>
    %cst_170 = arith.constant 1.000000e+00 : f32
    %1280 = vector.broadcast %cst_170 : f32 to vector<2x1xf32>
    %1281 = arith.subf %1280, %1272 : vector<2x1xf32>
    %1282 = vector.broadcast %1281 : vector<2x1xf32> to vector<2x32xf32>
    %1283 = arith.mulf %1282, %1191 : vector<2x32xf32>
    %1284 = arith.addf %1279, %1283 : vector<2x32xf32>
    %1285 = vector.broadcast %1272 : vector<2x1xf32> to vector<2x32xf32>
    %1286 = arith.mulf %1285, %1244 : vector<2x32xf32>
    %cst_171 = arith.constant 1.000000e+00 : f32
    %1287 = vector.broadcast %cst_171 : f32 to vector<2x1xf32>
    %1288 = arith.subf %1287, %1272 : vector<2x1xf32>
    %1289 = vector.broadcast %1288 : vector<2x1xf32> to vector<2x32xf32>
    %1290 = arith.mulf %1289, %1198 : vector<2x32xf32>
    %1291 = arith.addf %1286, %1290 : vector<2x32xf32>
    %1292 = vector.broadcast %1273 : vector<2x1xf32> to vector<2x32xf32>
    %1293 = arith.mulf %1292, %1271 : vector<2x32xf32>
    %cst_172 = arith.constant 1.000000e+00 : f32
    %1294 = vector.broadcast %cst_172 : f32 to vector<2x1xf32>
    %1295 = arith.subf %1294, %1273 : vector<2x1xf32>
    %1296 = vector.broadcast %1295 : vector<2x1xf32> to vector<2x32xf32>
    %1297 = arith.mulf %1296, %1205 : vector<2x32xf32>
    %1298 = arith.addf %1293, %1297 : vector<2x32xf32>
    %1299 = vector.broadcast %1273 : vector<2x1xf32> to vector<2x32xf32>
    %1300 = arith.mulf %1299, %1269 : vector<2x32xf32>
    %cst_173 = arith.constant 1.000000e+00 : f32
    %1301 = vector.broadcast %cst_173 : f32 to vector<2x1xf32>
    %1302 = arith.subf %1301, %1273 : vector<2x1xf32>
    %1303 = vector.broadcast %1302 : vector<2x1xf32> to vector<2x32xf32>
    %1304 = arith.mulf %1303, %1212 : vector<2x32xf32>
    %1305 = arith.addf %1300, %1304 : vector<2x32xf32>
    %1306 = tpu.concatenate %1284, %1298 in 1 : vector<2x32xf32>, vector<2x32xf32> -> vector<2x64xf32>
    %1307 = arith.truncf %1306 : vector<2x64xf32> to vector<2x64xbf16>
    %cst_174 = arith.constant dense<0.000000e+00> : vector<2x256xf32>
    %1308 = tpu.matmul %1307, %737, %cst_174 {dimension_numbers = #tpu.dot_dimension_numbers<[1], [0], [0], [1], [0, 0, 1, 1], [], []>} : vector<2x64xbf16>, vector<64x256xbf16>, vector<2x256xf32> -> vector<2x256xf32>
    %1309 = vector.extract_strided_slice %1308 {offsets = [0, 0], sizes = [2, 128], strides = [1, 1]} : vector<2x256xf32> to vector<2x128xf32>
    %1310 = vector.extract_strided_slice %743 {offsets = [12, 0], sizes = [2, 128], strides = [1, 1]} : vector<16x256xf32> to vector<2x128xf32>
    %1311 = arith.addf %1309, %1310 : vector<2x128xf32>
    %1312 = vector.extract_strided_slice %1308 {offsets = [0, 128], sizes = [2, 128], strides = [1, 1]} : vector<2x256xf32> to vector<2x128xf32>
    %1313 = vector.extract_strided_slice %743 {offsets = [2, 128], sizes = [2, 128], strides = [1, 1]} : vector<16x256xf32> to vector<2x128xf32>
    %1314 = arith.addf %1312, %1313 : vector<2x128xf32>
    %1315 = vector.extract_strided_slice %1311 {offsets = [0, 0], sizes = [2, 32], strides = [1, 1]} : vector<2x128xf32> to vector<2x32xf32>
    %1316 = arith.negf %1315 : vector<2x32xf32>
    %1317 = math.exp %1316 : vector<2x32xf32>
    %cst_175 = arith.constant 1.000000e+00 : f32
    %1318 = vector.broadcast %cst_175 : f32 to vector<2x32xf32>
    %1319 = arith.addf %1318, %1317 : vector<2x32xf32>
    %1320 = arith.divf %1318, %1319 : vector<2x32xf32>
    %1321 = vector.extract_strided_slice %1311 {offsets = [0, 32], sizes = [2, 32], strides = [1, 1]} : vector<2x128xf32> to vector<2x32xf32>
    %1322 = arith.negf %1321 : vector<2x32xf32>
    %1323 = math.exp %1322 : vector<2x32xf32>
    %cst_176 = arith.constant 1.000000e+00 : f32
    %1324 = vector.broadcast %cst_176 : f32 to vector<2x32xf32>
    %1325 = arith.addf %1324, %1323 : vector<2x32xf32>
    %1326 = arith.divf %1324, %1325 : vector<2x32xf32>
    %1327 = vector.extract_strided_slice %1311 {offsets = [0, 64], sizes = [2, 32], strides = [1, 1]} : vector<2x128xf32> to vector<2x32xf32>
    %1328 = math.tanh %1327 : vector<2x32xf32>
    %1329 = vector.extract_strided_slice %1311 {offsets = [0, 96], sizes = [2, 32], strides = [1, 1]} : vector<2x128xf32> to vector<2x32xf32>
    %1330 = arith.negf %1329 : vector<2x32xf32>
    %1331 = math.exp %1330 : vector<2x32xf32>
    %cst_177 = arith.constant 1.000000e+00 : f32
    %1332 = vector.broadcast %cst_177 : f32 to vector<2x32xf32>
    %1333 = arith.addf %1332, %1331 : vector<2x32xf32>
    %1334 = arith.divf %1332, %1333 : vector<2x32xf32>
    %1335 = arith.mulf %1326, %1291 : vector<2x32xf32>
    %1336 = arith.mulf %1320, %1328 : vector<2x32xf32>
    %1337 = arith.addf %1335, %1336 : vector<2x32xf32>
    %1338 = math.tanh %1337 : vector<2x32xf32>
    %1339 = arith.mulf %1334, %1338 : vector<2x32xf32>
    %1340 = vector.extract_strided_slice %1314 {offsets = [0, 0], sizes = [2, 32], strides = [1, 1]} : vector<2x128xf32> to vector<2x32xf32>
    %1341 = arith.negf %1340 : vector<2x32xf32>
    %1342 = math.exp %1341 : vector<2x32xf32>
    %cst_178 = arith.constant 1.000000e+00 : f32
    %1343 = vector.broadcast %cst_178 : f32 to vector<2x32xf32>
    %1344 = arith.addf %1343, %1342 : vector<2x32xf32>
    %1345 = arith.divf %1343, %1344 : vector<2x32xf32>
    %1346 = vector.extract_strided_slice %1314 {offsets = [0, 32], sizes = [2, 32], strides = [1, 1]} : vector<2x128xf32> to vector<2x32xf32>
    %1347 = arith.negf %1346 : vector<2x32xf32>
    %1348 = math.exp %1347 : vector<2x32xf32>
    %cst_179 = arith.constant 1.000000e+00 : f32
    %1349 = vector.broadcast %cst_179 : f32 to vector<2x32xf32>
    %1350 = arith.addf %1349, %1348 : vector<2x32xf32>
    %1351 = arith.divf %1349, %1350 : vector<2x32xf32>
    %1352 = vector.extract_strided_slice %1314 {offsets = [0, 64], sizes = [2, 32], strides = [1, 1]} : vector<2x128xf32> to vector<2x32xf32>
    %1353 = math.tanh %1352 : vector<2x32xf32>
    %1354 = vector.extract_strided_slice %1314 {offsets = [0, 96], sizes = [2, 32], strides = [1, 1]} : vector<2x128xf32> to vector<2x32xf32>
    %1355 = arith.negf %1354 : vector<2x32xf32>
    %1356 = math.exp %1355 : vector<2x32xf32>
    %cst_180 = arith.constant 1.000000e+00 : f32
    %1357 = vector.broadcast %cst_180 : f32 to vector<2x32xf32>
    %1358 = arith.addf %1357, %1356 : vector<2x32xf32>
    %1359 = arith.divf %1357, %1358 : vector<2x32xf32>
    %1360 = arith.mulf %1351, %1305 : vector<2x32xf32>
    %1361 = arith.mulf %1345, %1353 : vector<2x32xf32>
    %1362 = arith.addf %1360, %1361 : vector<2x32xf32>
    %1363 = math.tanh %1362 : vector<2x32xf32>
    %1364 = arith.mulf %1359, %1363 : vector<2x32xf32>
    %1365 = vector.extract_strided_slice %0 {offsets = [12, 0], sizes = [2, 1], strides = [1, 1]} : vector<16x1xf32> to vector<2x1xf32>
    %1366 = vector.extract_strided_slice %0 {offsets = [2, 0], sizes = [2, 1], strides = [1, 1]} : vector<16x1xf32> to vector<2x1xf32>
    %1367 = vector.broadcast %1365 : vector<2x1xf32> to vector<2x32xf32>
    %1368 = arith.mulf %1367, %1339 : vector<2x32xf32>
    %1369 = vector.broadcast %1366 : vector<2x1xf32> to vector<2x32xf32>
    %1370 = arith.mulf %1369, %1364 : vector<2x32xf32>
    %1371 = vector.broadcast %1365 : vector<2x1xf32> to vector<2x32xf32>
    %1372 = arith.mulf %1371, %1339 : vector<2x32xf32>
    %cst_181 = arith.constant 1.000000e+00 : f32
    %1373 = vector.broadcast %cst_181 : f32 to vector<2x1xf32>
    %1374 = arith.subf %1373, %1365 : vector<2x1xf32>
    %1375 = vector.broadcast %1374 : vector<2x1xf32> to vector<2x32xf32>
    %1376 = arith.mulf %1375, %1284 : vector<2x32xf32>
    %1377 = arith.addf %1372, %1376 : vector<2x32xf32>
    %1378 = vector.broadcast %1365 : vector<2x1xf32> to vector<2x32xf32>
    %1379 = arith.mulf %1378, %1337 : vector<2x32xf32>
    %cst_182 = arith.constant 1.000000e+00 : f32
    %1380 = vector.broadcast %cst_182 : f32 to vector<2x1xf32>
    %1381 = arith.subf %1380, %1365 : vector<2x1xf32>
    %1382 = vector.broadcast %1381 : vector<2x1xf32> to vector<2x32xf32>
    %1383 = arith.mulf %1382, %1291 : vector<2x32xf32>
    %1384 = arith.addf %1379, %1383 : vector<2x32xf32>
    %1385 = vector.broadcast %1366 : vector<2x1xf32> to vector<2x32xf32>
    %1386 = arith.mulf %1385, %1364 : vector<2x32xf32>
    %cst_183 = arith.constant 1.000000e+00 : f32
    %1387 = vector.broadcast %cst_183 : f32 to vector<2x1xf32>
    %1388 = arith.subf %1387, %1366 : vector<2x1xf32>
    %1389 = vector.broadcast %1388 : vector<2x1xf32> to vector<2x32xf32>
    %1390 = arith.mulf %1389, %1298 : vector<2x32xf32>
    %1391 = arith.addf %1386, %1390 : vector<2x32xf32>
    %1392 = vector.broadcast %1366 : vector<2x1xf32> to vector<2x32xf32>
    %1393 = arith.mulf %1392, %1362 : vector<2x32xf32>
    %cst_184 = arith.constant 1.000000e+00 : f32
    %1394 = vector.broadcast %cst_184 : f32 to vector<2x1xf32>
    %1395 = arith.subf %1394, %1366 : vector<2x1xf32>
    %1396 = vector.broadcast %1395 : vector<2x1xf32> to vector<2x32xf32>
    %1397 = arith.mulf %1396, %1305 : vector<2x32xf32>
    %1398 = arith.addf %1393, %1397 : vector<2x32xf32>
    %1399 = tpu.concatenate %1377, %1391 in 1 : vector<2x32xf32>, vector<2x32xf32> -> vector<2x64xf32>
    %1400 = arith.truncf %1399 : vector<2x64xf32> to vector<2x64xbf16>
    %cst_185 = arith.constant dense<0.000000e+00> : vector<2x256xf32>
    %1401 = tpu.matmul %1400, %737, %cst_185 {dimension_numbers = #tpu.dot_dimension_numbers<[1], [0], [0], [1], [0, 0, 1, 1], [], []>} : vector<2x64xbf16>, vector<64x256xbf16>, vector<2x256xf32> -> vector<2x256xf32>
    %1402 = vector.extract_strided_slice %1401 {offsets = [0, 0], sizes = [2, 128], strides = [1, 1]} : vector<2x256xf32> to vector<2x128xf32>
    %1403 = vector.extract_strided_slice %743 {offsets = [14, 0], sizes = [2, 128], strides = [1, 1]} : vector<16x256xf32> to vector<2x128xf32>
    %1404 = arith.addf %1402, %1403 : vector<2x128xf32>
    %1405 = vector.extract_strided_slice %1401 {offsets = [0, 128], sizes = [2, 128], strides = [1, 1]} : vector<2x256xf32> to vector<2x128xf32>
    %1406 = vector.extract_strided_slice %743 {offsets = [0, 128], sizes = [2, 128], strides = [1, 1]} : vector<16x256xf32> to vector<2x128xf32>
    %1407 = arith.addf %1405, %1406 : vector<2x128xf32>
    %1408 = vector.extract_strided_slice %1404 {offsets = [0, 0], sizes = [2, 32], strides = [1, 1]} : vector<2x128xf32> to vector<2x32xf32>
    %1409 = arith.negf %1408 : vector<2x32xf32>
    %1410 = math.exp %1409 : vector<2x32xf32>
    %cst_186 = arith.constant 1.000000e+00 : f32
    %1411 = vector.broadcast %cst_186 : f32 to vector<2x32xf32>
    %1412 = arith.addf %1411, %1410 : vector<2x32xf32>
    %1413 = arith.divf %1411, %1412 : vector<2x32xf32>
    %1414 = vector.extract_strided_slice %1404 {offsets = [0, 32], sizes = [2, 32], strides = [1, 1]} : vector<2x128xf32> to vector<2x32xf32>
    %1415 = arith.negf %1414 : vector<2x32xf32>
    %1416 = math.exp %1415 : vector<2x32xf32>
    %cst_187 = arith.constant 1.000000e+00 : f32
    %1417 = vector.broadcast %cst_187 : f32 to vector<2x32xf32>
    %1418 = arith.addf %1417, %1416 : vector<2x32xf32>
    %1419 = arith.divf %1417, %1418 : vector<2x32xf32>
    %1420 = vector.extract_strided_slice %1404 {offsets = [0, 64], sizes = [2, 32], strides = [1, 1]} : vector<2x128xf32> to vector<2x32xf32>
    %1421 = math.tanh %1420 : vector<2x32xf32>
    %1422 = vector.extract_strided_slice %1404 {offsets = [0, 96], sizes = [2, 32], strides = [1, 1]} : vector<2x128xf32> to vector<2x32xf32>
    %1423 = arith.negf %1422 : vector<2x32xf32>
    %1424 = math.exp %1423 : vector<2x32xf32>
    %cst_188 = arith.constant 1.000000e+00 : f32
    %1425 = vector.broadcast %cst_188 : f32 to vector<2x32xf32>
    %1426 = arith.addf %1425, %1424 : vector<2x32xf32>
    %1427 = arith.divf %1425, %1426 : vector<2x32xf32>
    %1428 = arith.mulf %1419, %1384 : vector<2x32xf32>
    %1429 = arith.mulf %1413, %1421 : vector<2x32xf32>
    %1430 = arith.addf %1428, %1429 : vector<2x32xf32>
    %1431 = math.tanh %1430 : vector<2x32xf32>
    %1432 = arith.mulf %1427, %1431 : vector<2x32xf32>
    %1433 = vector.extract_strided_slice %1407 {offsets = [0, 0], sizes = [2, 32], strides = [1, 1]} : vector<2x128xf32> to vector<2x32xf32>
    %1434 = arith.negf %1433 : vector<2x32xf32>
    %1435 = math.exp %1434 : vector<2x32xf32>
    %cst_189 = arith.constant 1.000000e+00 : f32
    %1436 = vector.broadcast %cst_189 : f32 to vector<2x32xf32>
    %1437 = arith.addf %1436, %1435 : vector<2x32xf32>
    %1438 = arith.divf %1436, %1437 : vector<2x32xf32>
    %1439 = vector.extract_strided_slice %1407 {offsets = [0, 32], sizes = [2, 32], strides = [1, 1]} : vector<2x128xf32> to vector<2x32xf32>
    %1440 = arith.negf %1439 : vector<2x32xf32>
    %1441 = math.exp %1440 : vector<2x32xf32>
    %cst_190 = arith.constant 1.000000e+00 : f32
    %1442 = vector.broadcast %cst_190 : f32 to vector<2x32xf32>
    %1443 = arith.addf %1442, %1441 : vector<2x32xf32>
    %1444 = arith.divf %1442, %1443 : vector<2x32xf32>
    %1445 = vector.extract_strided_slice %1407 {offsets = [0, 64], sizes = [2, 32], strides = [1, 1]} : vector<2x128xf32> to vector<2x32xf32>
    %1446 = math.tanh %1445 : vector<2x32xf32>
    %1447 = vector.extract_strided_slice %1407 {offsets = [0, 96], sizes = [2, 32], strides = [1, 1]} : vector<2x128xf32> to vector<2x32xf32>
    %1448 = arith.negf %1447 : vector<2x32xf32>
    %1449 = math.exp %1448 : vector<2x32xf32>
    %cst_191 = arith.constant 1.000000e+00 : f32
    %1450 = vector.broadcast %cst_191 : f32 to vector<2x32xf32>
    %1451 = arith.addf %1450, %1449 : vector<2x32xf32>
    %1452 = arith.divf %1450, %1451 : vector<2x32xf32>
    %1453 = arith.mulf %1444, %1398 : vector<2x32xf32>
    %1454 = arith.mulf %1438, %1446 : vector<2x32xf32>
    %1455 = arith.addf %1453, %1454 : vector<2x32xf32>
    %1456 = math.tanh %1455 : vector<2x32xf32>
    %1457 = arith.mulf %1452, %1456 : vector<2x32xf32>
    %1458 = vector.extract_strided_slice %0 {offsets = [14, 0], sizes = [2, 1], strides = [1, 1]} : vector<16x1xf32> to vector<2x1xf32>
    %1459 = vector.extract_strided_slice %0 {offsets = [0, 0], sizes = [2, 1], strides = [1, 1]} : vector<16x1xf32> to vector<2x1xf32>
    %1460 = vector.broadcast %1458 : vector<2x1xf32> to vector<2x32xf32>
    %1461 = arith.mulf %1460, %1432 : vector<2x32xf32>
    %1462 = vector.broadcast %1459 : vector<2x1xf32> to vector<2x32xf32>
    %1463 = arith.mulf %1462, %1457 : vector<2x32xf32>
    %1464 = arith.addf %810, %1463 : vector<2x32xf32>
    %1465 = arith.addf %903, %1370 : vector<2x32xf32>
    %1466 = arith.addf %996, %1277 : vector<2x32xf32>
    %1467 = arith.addf %1089, %1184 : vector<2x32xf32>
    %1468 = arith.addf %1182, %1091 : vector<2x32xf32>
    %1469 = arith.addf %1275, %998 : vector<2x32xf32>
    %1470 = arith.addf %1368, %905 : vector<2x32xf32>
    %1471 = arith.addf %1461, %812 : vector<2x32xf32>
    %1472 = tpu.concatenate %1464, %1465, %1466, %1467, %1468, %1469, %1470, %1471 in 0 : vector<2x32xf32>, vector<2x32xf32>, vector<2x32xf32>, vector<2x32xf32>, vector<2x32xf32>, vector<2x32xf32>, vector<2x32xf32>, vector<2x32xf32> -> vector<16x32xf32>
    %1473 = arith.truncf %1472 : vector<16x32xf32> to vector<16x32xbf16>
    %c0_192 = arith.constant 0 : index
    %c0_193 = arith.constant 0 : index
    %1474 = vector.load %arg8[%c0_192, %c0_193] : memref<32x128xbf16, #tpu.memory_space<vmem>>, vector<32x128xbf16>
    %cst_194 = arith.constant dense<0.000000e+00> : vector<16x128xf32>
    %1475 = tpu.matmul %1473, %1474, %cst_194 {dimension_numbers = #tpu.dot_dimension_numbers<[1], [0], [0], [1], [0, 0, 1, 1], [], []>} : vector<16x32xbf16>, vector<32x128xbf16>, vector<16x128xf32> -> vector<16x128xf32>
    %c0_195 = arith.constant 0 : index
    %c0_196 = arith.constant 0 : index
    %1476 = vector.load %arg9[%c0_195, %c0_196] : memref<1x128xf32, #tpu.memory_space<vmem>>, vector<1x128xf32>
    %1477 = vector.broadcast %1476 : vector<1x128xf32> to vector<16x128xf32>
    %1478 = arith.addf %1475, %1477 : vector<16x128xf32>
    %cst_197 = arith.constant dense<0xFF800000> : vector<16xf32>
    %1479 = vector.multi_reduction <maximumf>, %1478, %cst_197 [1] : vector<16x128xf32> to vector<16xf32>
    %1480 = vector.shape_cast %1479 : vector<16xf32> to vector<16x1xf32>
    %1481 = vector.broadcast %1480 : vector<16x1xf32> to vector<16x128xf32>
    %1482 = arith.subf %1478, %1481 : vector<16x128xf32>
    %1483 = math.exp %1482 : vector<16x128xf32>
    %cst_198 = arith.constant dense<0.000000e+00> : vector<16xf32>
    %1484 = vector.multi_reduction <add>, %1483, %cst_198 [1] : vector<16x128xf32> to vector<16xf32>
    %1485 = vector.shape_cast %1484 : vector<16xf32> to vector<16x1xf32>
    %1486 = vector.broadcast %1485 : vector<16x1xf32> to vector<16x128xf32>
    %1487 = arith.divf %1483, %1486 : vector<16x128xf32>
    %c0_199 = arith.constant 0 : index
    %c0_200 = arith.constant 0 : index
    %1488 = vector.load %arg10[%c0_199, %c0_200] : memref<16x128xf32, #tpu.memory_space<vmem>>, vector<16x128xf32>
    tpu.vector_store %arg10[%c0_199, %c0_200], %1487 {strides = array<i32>} : memref<16x128xf32, #tpu.memory_space<vmem>>, vector<16x128xf32>,
    return
  }
}

</mosaic_0001>

<bundles_post_ra>
// kernel: deepspeech_forward.3
= control target key start
LH: loop header
LB: loop body
LE: loop exit
PB: predicated region body
PF: predicated region fallthrough
CT: control target
= control target key end

     0   :  { %v950_v1 = vmov 0   ;;  %s1192_s1 = inlined_call_operand.vmem [shape: bf16[512,128], index: 1, kind: input, shape index: {}]   ;;  %s1193_s0 = inlined_call_operand.vmem [shape: bf16[80,512], index: 0, kind: input, shape index: {}]   ;;  %s1194_s3 = inlined_call_operand.vmem [shape: f32[80,1], index: 3, kind: input, shape index: {}]   ;;  %s1195_s2 = inlined_call_operand.vmem [shape: f32[1,128], index: 2, kind: input, shape index: {}]   ;;  %s1196_s4 = inlined_call_operand.vmem [shape: bf16[80,128], index: 4, kind: output, shape index: {}]  }
   0x1   :  { %v888_v0 = vld [vmem:[%s1192_s1 + $0x40] sm:$0xff]   ;;  %886 = vset.pattern.permute.xlu0 %v950_v1  ;;  %887 = vset.pattern.permute.xlu1 %v950_v1  ;;  %v892_v5 = vld [vmem:[%s1192_s1 + $0x48] sm:$0xff]   ;;  %v896_v9 = vld [vmem:[%s1192_s1 + $0x50] sm:$0xff]  }
   0x2   :  { %v889_v2 = vld [vmem:[%s1192_s1 + $0xc0] sm:$0xff]   ;;  %793 = vmatprep.subr.bf16.mxu0 %v888_v0  ;;  %v893_v6 = vld [vmem:[%s1192_s1 + $0xc8] sm:$0xff]   ;;  %v897_v10 = vld [vmem:[%s1192_s1 + $0xd0] sm:$0xff]  }
   0x3   :  { %v890_v3 = vld [vmem:[%s1192_s1] sm:$0xff]   ;;  %839 = vmatprep.subr.bf16.mxu1 %v889_v2  ;;  %v894_v7 = vld [vmem:[%s1192_s1 + $0x8] sm:$0xff]   ;;  %v898_v11 = vld [vmem:[%s1192_s1 + $0x10] sm:$0xff]  }
   0x4   :  { %v891_v4 = vld [vmem:[%s1192_s1 + $0x80] sm:$0xff]   ;;  %794 = vmatpush3.bf16.msra.mxu0 %v890_v3  ;;  %v895_v8 = vld [vmem:[%s1192_s1 + $0x88] sm:$0xff]   ;;  %v899_v12 = vld [vmem:[%s1192_s1 + $0x90] sm:$0xff]  }
   0x5   :  { %840 = vmatpush3.bf16.msra.mxu1 %v891_v4  ;;  %795 = vmatprep.subr.bf16.mxu0 %v892_v5  ;;  %v900_v13 = vld [vmem:[%s1192_s1 + $0x58] sm:$0xff]   ;;  %v904_v17 = vld [vmem:[%s1192_s1 + $0x60] sm:$0xff]   ;;  %v908_v21 = vld [vmem:[%s1192_s1 + $0x68] sm:$0xff]  }
   0x6   :  { %841 = vmatprep.subr.bf16.mxu1 %v893_v6  ;;  %v901_v14 = vld [vmem:[%s1192_s1 + $0xd8] sm:$0xff]   ;;  %v905_v18 = vld [vmem:[%s1192_s1 + $0xe0] sm:$0xff]   ;;  %v909_v22 = vld [vmem:[%s1192_s1 + $0xe8] sm:$0xff]  }
   0x7   :  { %v902_v15 = vld [vmem:[%s1192_s1 + $0x18] sm:$0xff]   ;;  %v906_v19 = vld [vmem:[%s1192_s1 + $0x20] sm:$0xff]   ;;  %v910_v23 = vld [vmem:[%s1192_s1 + $0x28] sm:$0xff]  }
   0x8   :  { %796 = vmatpush3.bf16.msra.mxu0 %v894_v7  ;;  %v903_v16 = vld [vmem:[%s1192_s1 + $0x98] sm:$0xff]   ;;  %v907_v20 = vld [vmem:[%s1192_s1 + $0xa0] sm:$0xff]   ;;  %v911_v24 = vld [vmem:[%s1192_s1 + $0xa8] sm:$0xff]  }
   0x9   :  { %842 = vmatpush3.bf16.msra.mxu1 %v895_v8  ;;  %797 = vmatprep.subr.bf16.mxu0 %v896_v9  ;;  %v912_v25 = vld [vmem:[%s1192_s1 + $0x70] sm:$0xff]   ;;  %v916_v29 = vld [vmem:[%s1192_s1 + $0x78] sm:$0xff]   ;;  %v567_v43 = vld [vmem:[%s1194_s3] sm:$0xff] }
   0xa   :  { %843 = vmatprep.subr.bf16.mxu1 %v897_v10  ;;  %v913_v26 = vld [vmem:[%s1192_s1 + $0xf0] sm:$0xff]   ;;  %v917_v30 = vld [vmem:[%s1192_s1 + $0xf8] sm:$0xff]   ;;  %579 = vperm.xlu0 %886, %v567_v43   ;;  %v568_v45 = vld [vmem:[%s1194_s3 + $0x8] sm:$0xff] }
   0xb   :  { %v914_v27 = vld [vmem:[%s1192_s1 + $0x30] sm:$0xff]   ;;  %v918_v31 = vld [vmem:[%s1192_s1 + $0x38] sm:$0xff]   ;;  %v571_v51 = vld [vmem:[%s1194_s3 + $0x20] sm:$0xff] }
   0xc   :  { %798 = vmatpush3.bf16.msra.mxu0 %v898_v11  ;;  %v915_v28 = vld [vmem:[%s1192_s1 + $0xb0] sm:$0xff]   ;;  %v919_v32 = vld [vmem:[%s1192_s1 + $0xb8] sm:$0xff]   ;;  %v572_v52 = vld [vmem:[%s1194_s3 + $0x28] sm:$0xff] }
   0xd   :  { %844 = vmatpush3.bf16.msra.mxu1 %v899_v12  ;;  %799 = vmatprep.subr.bf16.mxu0 %v900_v13  ;;  %v920_v33 = vld [vmem:[%s1193_s0] ss:$16 sps:$4 sm:$0xff]   ;;  %v922_v34 = vld [vmem:[%s1193_s0 + $0x4] ss:$16 sps:$4 sm:$0xff]   ;;  %v923_v35 = vld [vmem:[%s1193_s0 + $0x8] ss:$16 sps:$4 sm:$0xff]  }
   0xe   :  { %845 = vmatprep.subr.bf16.mxu1 %v901_v14  ;;  %v925_v36 = vld [vmem:[%s1193_s0 + $0xc] ss:$16 sps:$4 sm:$0xff]   ;;  %433 = vmatprep.mubr.bf16.mxu0 %v922_v34  ;;  %v926_v37 = vld [vmem:[%s1193_s0 + $0x24] ss:$16 sps:$4 sm:$0xff]   ;;  %v930_v39 = vld [vmem:[%s1193_s0 + $0x20] ss:$16 sps:$4 sm:$0xff]  }
   0xf   :  { %506 = vmatprep.mubr.bf16.mxu1 %v925_v36  ;;  %v928_v38 = vld [vmem:[%s1193_s0 + $0x2c] ss:$16 sps:$4 sm:$0xff]   ;;  %v931_v40 = vld [vmem:[%s1193_s0 + $0x28] ss:$16 sps:$4 sm:$0xff]   ;;  %v932_v41 = vld [vmem:[%s1193_s0 + $0x44] ss:$16 sps:$4 sm:$0xff]   ;;  %584 = vperm.xlu0 %886, %v568_v45  }
  0x10   :  { %800 = vmatpush3.bf16.msra.mxu0 %v902_v15  ;;  %v934_v42 = vld [vmem:[%s1193_s0 + $0x4c] ss:$16 sps:$4 sm:$0xff]   ;;  %v569_v44 = vld [vmem:[%s1194_s3 + $0x10] sm:$0xff]  ;;  %v937_v48 = vld [vmem:[%s1193_s0 + $0x48] ss:$16 sps:$4 sm:$0xff]  }
  0x11   :  { %846 = vmatpush3.bf16.msra.mxu1 %v903_v16  ;;  %801 = vmatprep.subr.bf16.mxu0 %v904_v17  ;;  %v936_v46 = vld [vmem:[%s1193_s0 + $0x40] ss:$16 sps:$4 sm:$0xff]   ;;  %v570_v47 = vld [vmem:[%s1194_s3 + $0x18] sm:$0xff]  ;;  %v938_v49 = vld [vmem:[%s1193_s0 + $0x64] ss:$16 sps:$4 sm:$0xff]  }
  0x12   :  { %847 = vmatprep.subr.bf16.mxu1 %v905_v18  ;;  %589 = vperm.xlu1 %887, %v569_v44   ;;  %v940_v50 = vld [vmem:[%s1193_s0 + $0x6c] ss:$16 sps:$4 sm:$0xff]   ;;  %v573_v53 = vld [vmem:[%s1194_s3 + $0x30] sm:$0xff]  ;;  %v943_v56 = vld [vmem:[%s1193_s0 + $0x68] ss:$16 sps:$4 sm:$0xff]  }
  0x13   :  { %599 = vperm.xlu0 %886, %v571_v51   ;;  %v942_v54 = vld [vmem:[%s1193_s0 + $0x60] ss:$16 sps:$4 sm:$0xff]   ;;  %v574_v55 = vld [vmem:[%s1194_s3 + $0x38] sm:$0xff]  ;;  %v944_v57 = vld [vmem:[%s1193_s0 + $0x84] ss:$16 sps:$4 sm:$0xff]  }
  0x14   :  { %802 = vmatpush3.bf16.msra.mxu0 %v906_v19  ;;  %v946_v58 = vld [vmem:[%s1193_s0 + $0x8c] ss:$16 sps:$4 sm:$0xff]   ;;  %v575_v59 = vld [vmem:[%s1194_s3 + $0x40] sm:$0xff]  ;;  %v949_v62 = vld [vmem:[%s1193_s0 + $0x88] ss:$16 sps:$4 sm:$0xff]  }
  0x15   :  { %848 = vmatpush3.bf16.msra.mxu1 %v907_v20  ;;  %803 = vmatprep.subr.bf16.mxu0 %v908_v21  ;;  %v576_v60 = vld [vmem:[%s1194_s3 + $0x48] sm:$0xff]  ;;  %v948_v61 = vld [vmem:[%s1193_s0 + $0x80] ss:$16 sps:$4 sm:$0xff]  }
  0x16   :  { %849 = vmatprep.subr.bf16.mxu1 %v909_v22  ;;  %594 = vperm.xlu1 %887, %v570_v47   ;;  %v1165_v2 = vld [vmem:[%s1195_s2] ss:$0 sm:$0xff] }
  0x17   :  { %609 = vperm.xlu0 %886, %v573_v53  }
  0x18   :  { %804 = vmatpush3.bf16.msra.mxu0 %v910_v23 }
  0x19   :  { %850 = vmatpush3.bf16.msra.mxu1 %v911_v24  ;;  %805 = vmatprep.subr.bf16.mxu0 %v912_v25 }
  0x1a   :  { %851 = vmatprep.subr.bf16.mxu1 %v913_v26  ;;  %604 = vperm.xlu1 %887, %v572_v52  }
  0x1b   :  { %619 = vperm.xlu0 %886, %v575_v59  }
  0x1c   :  { %806 = vmatpush3.bf16.msra.mxu0 %v914_v27 }
  0x1d   :  { %852 = vmatpush3.bf16.msra.mxu1 %v915_v28  ;;  %807 = vmatprep.subr.bf16.mxu0 %v916_v29 }
  0x1e   :  { %853 = vmatprep.subr.bf16.mxu1 %v917_v30  ;;  %614 = vperm.xlu1 %887, %v574_v55  }
  0x20   :  { %808 = vmatpush3.bf16.msra.mxu0 %v918_v31 }
  0x21   :  { %854 = vmatpush3.bf16.msra.mxu1 %v919_v32 }
  0x22   :  { %624 = vperm.xlu1 %887, %v576_v60  }
  0x23   :  { %434 = vmatmul.mubr.bf16.vlgmr.msra.gmra.mrb[0].mxu0 %v920_v33 }
  0x24   :  { %507 = vmatmul.mubr.bf16.vlgmr.msra.gmra.mrb[0].mxu1 %v923_v35  ;;  %441 = vmatprep.mubr.bf16.mxu0 %v926_v37 }
  0x25   :  { %514 = vmatprep.mubr.bf16.mxu1 %v928_v38 }
  0x2b   :  { %442 = vmatmul.mubr.bf16.gmra.mrb[4].mxu0 %v930_v39 }
  0x2c   :  { %515 = vmatmul.mubr.bf16.gmra.mrb[4].mxu1 %v931_v40  ;;  %449 = vmatprep.mubr.bf16.mxu0 %v932_v41 }
  0x2d   :  { %522 = vmatprep.mubr.bf16.mxu1 %v934_v42 }
  0x33   :  { %450 = vmatmul.mubr.bf16.gmra.mrb[8].mxu0 %v936_v46 }
  0x34   :  { %523 = vmatmul.mubr.bf16.gmra.mrb[8].mxu1 %v937_v48  ;;  %457 = vmatprep.mubr.bf16.mxu0 %v938_v49 }
  0x35   :  { %530 = vmatprep.mubr.bf16.mxu1 %v940_v50 }
  0x3b   :  { %458 = vmatmul.mubr.bf16.gmra.mrb[12].mxu0 %v942_v54 }
  0x3c   :  { %531 = vmatmul.mubr.bf16.gmra.mrb[12].mxu1 %v943_v56  ;;  %465 = vmatprep.mubr.bf16.mxu0 %v944_v57 }
  0x3d   :  { %538 = vmatprep.mubr.bf16.mxu1 %v946_v58 }
  0x43   :  { %466 = vmatmul.mubr.bf16.gmra.mrb[16].mxu0 %v948_v61 }
  0x44   :  { %539 = vmatmul.mubr.bf16.gmra.mrb[16].mxu1 %v949_v62 }
  0x89   :  { %v580_v0 = vpop.permute.xlu0 %579 }
  0x8e   :  { %v585_v19 = vpop.permute.xlu0 %584 }
  0x91   :  { %v590_v39 = vpop.permute.xlu1 %589 }
  0x95   :  { %v595_v58 = vpop.permute.xlu1 %594 }
  0xf6   :  { %v809_v63 = vpop.f32.mrb[0].mxu0 }
  0xf7   :  { %v855_v1 = vpop.f32.mrb[0].mxu1  ;;  %v810_v3 = vpop.f32.mrb[1].mxu0 }
  0xf8   :  { %v811_v4 = vadd.f32 %v810_v3, %v809_v63  ;;  %v856_v5 = vpop.f32.mrb[1].mxu1  ;;  %v812_v6 = vpop.f32.mrb[2].mxu0 }
  0xf9   :  { %v857_v7 = vadd.f32 %v856_v5, %v855_v1  ;;  %v858_v8 = vpop.f32.mrb[2].mxu1  ;;  %v813_v9 = vpop.f32.mrb[3].mxu0 }
  0xfa   :  { %v436_v10 = vadd.f32 %v811_v4, %v1165_v2  ;;  %v814_v11 = vadd.f32 %v813_v9, %v812_v6  ;;  %v859_v12 = vpop.f32.mrb[3].mxu1 }
  0xfb   :  { %v860_v13 = vadd.f32 %v859_v12, %v858_v8 }
  0xfc   :  { %v509_v14 = vadd.f32 %v857_v7, %v436_v10  ;;  %v439_v15 = vadd.f32 %v814_v11, %v1165_v2 }
  0xfe   :  { %v512_v16 = vadd.f32 %v860_v13, %v439_v15  ;;  %v815_v17 = vpop.f32.mrb[4].mxu0  ;;  %v547_v18 = vmax.f32 %v509_v14, 0.0 }
  0xff   :  { %v861_v20 = vpop.f32.mrb[4].mxu1  ;;  %v816_v21 = vpop.f32.mrb[5].mxu0 }
 0x100   :  { %v557_v22 = vmin.f32 %v547_v18, 20.0  ;;  %v817_v23 = vadd.f32 %v816_v21, %v815_v17  ;;  %v862_v24 = vpop.f32.mrb[5].mxu1  ;;  %v818_v25 = vpop.f32.mrb[6].mxu0  ;;  %v548_v26 = vmax.f32 %v512_v16, 0.0 }
 0x101   :  { %v863_v27 = vadd.f32 %v862_v24, %v861_v20  ;;  %v864_v28 = vpop.f32.mrb[6].mxu1  ;;  %v819_v29 = vpop.f32.mrb[7].mxu0 }
 0x102   :  { %v444_v30 = vadd.f32 %v817_v23, %v1165_v2  ;;  %v820_v31 = vadd.f32 %v819_v29, %v818_v25  ;;  %v865_v32 = vpop.f32.mrb[7].mxu1  ;;  %v558_v33 = vmin.f32 %v548_v26, 20.0  ;;  %v627_v35 = vmul.f32 %v580_v0, %v557_v22  ;;  %v600_v20 = vpop.permute.xlu0 %599 }
 0x103   :  { %v866_v34 = vadd.f32 %v865_v32, %v864_v28 }
 0x104   :  { %v517_v36 = vadd.f32 %v863_v27, %v444_v30  ;;  %v447_v37 = vadd.f32 %v820_v31, %v1165_v2  ;;  %v628_v38 = vmul.f32 %v585_v19, %v558_v33  ;;  %v605_v19 = vpop.permute.xlu1 %604 }
 0x106   :  { %v520_v40 = vadd.f32 %v866_v34, %v447_v37  ;;  %v549_v41 = vmax.f32 %v517_v36, 0.0  ;;  %v767_v42 = vpack.c.bf16 %v628_v38, %v627_v35  ;;  %v821_v43 = vpop.f32.mrb[8].mxu0 }
 0x107   :  { %v867_v44 = vpop.f32.mrb[8].mxu1  ;;  %v822_v45 = vpop.f32.mrb[9].mxu0 }
 0x108   :  { %v559_v46 = vmin.f32 %v549_v41, 20.0  ;;  %768 = vst [vmem:[%s1196_s4] sm:$0xff] %v767_v42   ;;  %v550_v47 = vmax.f32 %v520_v40, 0.0  ;;  %v823_v48 = vadd.f32 %v822_v45, %v821_v43  ;;  %v868_v49 = vpop.f32.mrb[9].mxu1  ;;  %v824_v50 = vpop.f32.mrb[10].mxu0 }
 0x109   :  { %v869_v51 = vadd.f32 %v868_v49, %v867_v44  ;;  %v870_v52 = vpop.f32.mrb[10].mxu1  ;;  %v825_v53 = vpop.f32.mrb[11].mxu0 }
 0x10a   :  { %v560_v54 = vmin.f32 %v550_v47, 20.0  ;;  %v452_v55 = vadd.f32 %v823_v48, %v1165_v2  ;;  %v826_v56 = vadd.f32 %v825_v53, %v824_v50  ;;  %v871_v57 = vpop.f32.mrb[11].mxu1  ;;  %v629_v60 = vmul.f32 %v590_v39, %v559_v46  ;;  %v615_v44 = vpop.permute.xlu1 %614 }
 0x10b   :  { %v872_v59 = vadd.f32 %v871_v57, %v870_v52  ;;  %v610_v45 = vpop.permute.xlu0 %609 }
 0x10c   :  { %v630_v61 = vmul.f32 %v595_v58, %v560_v54  ;;  %v525_v62 = vadd.f32 %v869_v51, %v452_v55  ;;  %v455_v63 = vadd.f32 %v826_v56, %v1165_v2 }
 0x10e   :  { %v772_v0 = vpack.c.bf16 %v630_v61, %v629_v60  ;;  %v528_v1 = vadd.f32 %v872_v59, %v455_v63  ;;  %v551_v3 = vmax.f32 %v525_v62, 0.0  ;;  %v827_v4 = vpop.f32.mrb[12].mxu0  ;;  %v625_v57 = vpop.permute.xlu1 %624 }
 0x10f   :  { %v873_v5 = vpop.f32.mrb[12].mxu1  ;;  %v828_v6 = vpop.f32.mrb[13].mxu0 }
 0x110   :  { %789 = vst [vmem:[%s1196_s4 + $0x8] sm:$0xff] %v772_v0   ;;  %v552_v7 = vmax.f32 %v528_v1, 0.0  ;;  %v561_v8 = vmin.f32 %v551_v3, 20.0  ;;  %v829_v9 = vadd.f32 %v828_v6, %v827_v4  ;;  %v874_v10 = vpop.f32.mrb[13].mxu1  ;;  %v830_v11 = vpop.f32.mrb[14].mxu0 }
 0x111   :  { %v875_v12 = vadd.f32 %v874_v10, %v873_v5  ;;  %v876_v13 = vpop.f32.mrb[14].mxu1  ;;  %v831_v14 = vpop.f32.mrb[15].mxu0 }
 0x112   :  { %v562_v15 = vmin.f32 %v552_v7, 20.0  ;;  %v460_v16 = vadd.f32 %v829_v9, %v1165_v2  ;;  %v832_v17 = vadd.f32 %v831_v14, %v830_v11  ;;  %v877_v18 = vpop.f32.mrb[15].mxu1  ;;  %v631_v23 = vmul.f32 %v600_v20, %v561_v8  ;;  %v620_v58 = vpop.permute.xlu0 %619 }
 0x113   :  { %v878_v21 = vadd.f32 %v877_v18, %v876_v13 }
 0x114   :  { %v632_v22 = vmul.f32 %v605_v19, %v562_v15  ;;  %v533_v24 = vadd.f32 %v875_v12, %v460_v16  ;;  %v463_v25 = vadd.f32 %v832_v17, %v1165_v2 }
 0x116   :  { %v777_v26 = vpack.c.bf16 %v632_v22, %v631_v23  ;;  %v553_v27 = vmax.f32 %v533_v24, 0.0  ;;  %v536_v28 = vadd.f32 %v878_v21, %v463_v25  ;;  %v833_v29 = vpop.f32.mrb[16].mxu0 }
 0x117   :  { %v879_v30 = vpop.f32.mrb[16].mxu1  ;;  %v834_v31 = vpop.f32.mrb[17].mxu0 }
 0x118   :  { %790 = vst [vmem:[%s1196_s4 + $0x10] sm:$0xff] %v777_v26   ;;  %v563_v32 = vmin.f32 %v553_v27, 20.0  ;;  %v554_v33 = vmax.f32 %v536_v28, 0.0  ;;  %v835_v34 = vadd.f32 %v834_v31, %v833_v29  ;;  %v880_v35 = vpop.f32.mrb[17].mxu1  ;;  %v836_v36 = vpop.f32.mrb[18].mxu0 }
 0x119   :  { %v881_v37 = vadd.f32 %v880_v35, %v879_v30  ;;  %v882_v38 = vpop.f32.mrb[18].mxu1  ;;  %v837_v39 = vpop.f32.mrb[19].mxu0 }
 0x11a   :  { %v564_v40 = vmin.f32 %v554_v33, 20.0  ;;  %v468_v41 = vadd.f32 %v835_v34, %v1165_v2  ;;  %v838_v42 = vadd.f32 %v837_v39, %v836_v36  ;;  %v883_v43 = vpop.f32.mrb[19].mxu1  ;;  %v633_v47 = vmul.f32 %v610_v45, %v563_v32 }
 0x11b   :  { %v884_v46 = vadd.f32 %v883_v43, %v882_v38 }
 0x11c   :  { %v634_v48 = vmul.f32 %v615_v44, %v564_v40  ;;  %v541_v49 = vadd.f32 %v881_v37, %v468_v41  ;;  %v471_v50 = vadd.f32 %v838_v42, %v1165_v2 }
 0x11e   :  { %v782_v51 = vpack.c.bf16 %v634_v48, %v633_v47  ;;  %v555_v52 = vmax.f32 %v541_v49, 0.0  ;;  %v544_v53 = vadd.f32 %v884_v46, %v471_v50 }
 0x120   :  { %791 = vst [vmem:[%s1196_s4 + $0x18] sm:$0xff] %v782_v51   ;;  %v565_v54 = vmin.f32 %v555_v52, 20.0  ;;  %v556_v55 = vmax.f32 %v544_v53, 0.0 }
 0x122   :  { %v566_v56 = vmin.f32 %v556_v55, 20.0  ;;  %v635_v59 = vmul.f32 %v620_v58, %v565_v54 }
 0x124   :  { %v636_v60 = vmul.f32 %v625_v57, %v566_v56 }
 0x126   :  { %v787_v61 = vpack.c.bf16 %v636_v60, %v635_v59 }
 0x128   :  { %792 = vst [vmem:[%s1196_s4 + $0x20] sm:$0xff] %v787_v61  }

// kernel: deepspeech_forward.5
= control target key start
LH: loop header
LB: loop body
LE: loop exit
PB: predicated region body
PF: predicated region fallthrough
CT: control target
= control target key end

     0   :  { %v3424_v1 = vmov 0   ;;  %v3425_v24 = vmov 0.0|0.0   ;;  %v66_v27 = vlaneseq  ;;  %s3427_s23 = smov 32   ;;  %vm395_vm0 = vcmask 261120   ;;  %s4634_s2 = inlined_call_operand.vmem [shape: bf16[128,256], index: 2, kind: input, shape index: {}]   ;;  %s4635_s4 = inlined_call_operand.vmem [shape: bf16[64,256], index: 4, kind: input, shape index: {}]   ;;  %s4636_s0 = inlined_call_operand.vmem [shape: bf16[16,128], index: 0, kind: input, shape index: {}]   ;;  %s4637_s3 = inlined_call_operand.vmem [shape: f32[1,256], index: 3, kind: input, shape index: {}]   ;;  %s4638_s1 = inlined_call_operand.vmem [shape: f32[16,1], index: 1, kind: input, shape index: {}]   ;;  %s4639_s7 = inlined_call_operand.vmem [shape: bf16[64,256], index: 7, kind: input, shape index: {}]   ;;  %s4640_s5 = inlined_call_operand.vmem [shape: bf16[32,256], index: 5, kind: input, shape index: {}]   ;;  %s4641_s6 = inlined_call_operand.vmem [shape: f32[1,256], index: 6, kind: input, shape index: {}]   ;;  %s4642_s8 = inlined_call_operand.vmem [shape: bf16[32,128], index: 8, kind: input, shape index: {}]   ;;  %s4643_s9 = inlined_call_operand.vmem [shape: f32[1,128], index: 9, kind: input, shape index: {}]   ;;  %s4644_s10 = inlined_call_operand.vmem [shape: f32[16,128], index: 10, kind: output, shape index: {}]  }
   0x1   :  { %v3089_v0 = vld [vmem:[%s4634_s2 + $0x4] ss:$8 sps:$4 sm:$0xff]   ;;  %194 = vmatprep.mubr.bf16.mxu0 %v3424_v1  ;;  %282 = vmatprep.mubr.bf16.mxu1 %v3424_v1  ;;  %v3091_v2 = vld [vmem:[%s4634_s2] ss:$8 sps:$4 sm:$0xff]   ;;  %v3092_v3 = vld [vmem:[%s4634_s2 + $0x14] ss:$8 sps:$4 sm:$0xff]  }
   0x2   :  { %3037 = vset.pattern.permute.xlu1 %v3424_v1  ;;  %3038 = vset.pattern.permute.xlu0 %v3424_v1  ;;  %v3094_v4 = vld [vmem:[%s4634_s2 + $0x10] ss:$8 sps:$4 sm:$0xff]   ;;  %v3095_v5 = vld [vmem:[%s4634_s2 + $0x24] ss:$8 sps:$4 sm:$0xff]   ;;  %v3097_v6 = vld [vmem:[%s4634_s2 + $0x20] ss:$8 sps:$4 sm:$0xff]  }
   0x3   :  { %162 = vmatprep.subr.bf16.mxu0 %v3089_v0  ;;  %v3511_v7 = vld [vmem:[%s4635_s4 + $0x4] ss:$8 sps:$4 sm:$0xff]   ;;  %v3516_v8 = vld [vmem:[%s4635_s4] ss:$8 sps:$4 sm:$0xff]   ;;  %v3098_v9 = vld [vmem:[%s4634_s2 + $0x34] ss:$8 sps:$4 sm:$0xff]  }
   0x4   :  { %163 = vmatpush1.bf16.msra.mxu0 %v3091_v2  ;;  %250 = vmatprep.subr.bf16.mxu1 %v3511_v7  ;;  %v3526_v10 = vld [vmem:[%s4635_s4 + $0x14] ss:$8 sps:$4 sm:$0xff]   ;;  %v3531_v11 = vld [vmem:[%s4635_s4 + $0x10] ss:$8 sps:$4 sm:$0xff]   ;;  %v3101_v13 = vld [vmem:[%s4634_s2 + $0x44] ss:$8 sps:$4 sm:$0xff]  }
   0x5   :  { %164 = vmatprep.subr.bf16.mxu0 %v3092_v3  ;;  %251 = vmatpush1.bf16.msra.mxu1 %v3516_v8  ;;  %v3100_v12 = vld [vmem:[%s4634_s2 + $0x30] ss:$8 sps:$4 sm:$0xff]   ;;  %v3543_v14 = vld [vmem:[%s4635_s4 + $0x24] ss:$8 sps:$4 sm:$0xff]   ;;  %v3549_v15 = vld [vmem:[%s4635_s4 + $0x20] ss:$8 sps:$4 sm:$0xff]  }
   0x6   :  { %252 = vmatprep.subr.bf16.mxu1 %v3526_v10  ;;  %v3103_v16 = vld [vmem:[%s4634_s2 + $0x40] ss:$8 sps:$4 sm:$0xff]   ;;  %v3558_v17 = vld [vmem:[%s4635_s4 + $0x34] ss:$8 sps:$4 sm:$0xff]   ;;  %v3567_v19 = vld [vmem:[%s4635_s4 + $0x30] ss:$8 sps:$4 sm:$0xff]  }
   0x7   :  { %v3107_v18 = vld [vmem:[%s4634_s2 + $0x54] ss:$8 sps:$4 sm:$0xff]   ;;  %v3109_v20 = vld [vmem:[%s4634_s2 + $0x50] ss:$8 sps:$4 sm:$0xff]   ;;  %v3113_v21 = vld [vmem:[%s4634_s2 + $0x64] ss:$8 sps:$4 sm:$0xff]  }
   0x8   :  { %165 = vmatpush1.bf16.msra.mxu0 %v3094_v4  ;;  %v3115_v22 = vld [vmem:[%s4634_s2 + $0x60] ss:$8 sps:$4 sm:$0xff]   ;;  %v3119_v23 = vld [vmem:[%s4634_s2 + $0x74] ss:$8 sps:$4 sm:$0xff]   ;;  %v3121_v25 = vld [vmem:[%s4634_s2 + $0x70] ss:$8 sps:$4 sm:$0xff]  }
   0x9   :  { %166 = vmatprep.subr.bf16.mxu0 %v3095_v5  ;;  %253 = vmatpush1.bf16.msra.mxu1 %v3531_v11  ;;  %v3125_v26 = vld [vmem:[%s4636_s0] sm:$0xff]   ;;  %v3610_v28 = vshrl.u32 %v66_v27, 7  ;;  %v37_v60 = vld [vmem:[%s4638_s1 + $0x8] sm:$0xff]  ;;  %vm246_vm1 = vcmask 523264   ;;  %vm1481_vm2 = vcmask 1041408   ;;  %vm1483_vm3 = vcmask 1043456  }
   0xa   :  { %254 = vmatprep.subr.bf16.mxu1 %v3543_v14  ;;  %v64_v33 = vld [vmem:[%s4637_s3] sm:$0x3]  ;;  %s3426_s3 = smov 64   ;;  %vm1485_vm4 = vcmask 1045504   ;;  %vm3430_vm5 = vmmov 0  }
   0xb   :  { %v68_v31 = vsub.s32 0, %v3610_v28  ;;  %v72_v34 = vsub.s32 1, %v3610_v28  ;;  %v36_v0 = vld [vmem:[%s4638_s1] sm:$0xff]  ;;  %s3428_s1 = smov 96  }
   0xc   :  { %167 = vmatpush1.bf16.msra.mxu0 %v3097_v6  ;;  %v361_v2 = vsub.f32 1.0, %v36_v0 }
   0xd   :  { %168 = vmatprep.subr.bf16.mxu0 %v3098_v9  ;;  %255 = vmatpush1.bf16.msra.mxu1 %v3549_v15  ;;  %v69_v36 = vrot.slane %v64_v33, %v68_v31  ;;  %v73_v37 = vrot.slane %v64_v33, %v72_v34 }
   0xe   :  { %256 = vmatprep.subr.bf16.mxu1 %v3558_v17 }
  0x10   :  { %169 = vmatpush1.bf16.msra.mxu0 %v3100_v12 }
  0x11   :  { %170 = vmatprep.subr.bf16.mxu0 %v3101_v13  ;;  %257 = vmatpush1.bf16.msra.mxu1 %v3567_v19 }
  0x12   :  { %401 = vmatprep.subr.bf16.mxu1 %v3511_v7 }
  0x14   :  { %171 = vmatpush1.bf16.msra.mxu0 %v3103_v16  ;;  %283 = vmatmul.mubr.bf16.vlgmr.msra.gmra.mrb[0].mxu1 %v3425_v24  ;;  %v371_v16 = vsub.f32 1.0, %v37_v60 }
  0x15   :  { %172 = vmatprep.subr.bf16.mxu0 %v3107_v18  ;;  %402 = vmatpush1.bf16.msra.mxu1 %v3516_v8 }
  0x16   :  { %433 = vmatprep.mubr.bf16.mxu1 %v3424_v1  ;;  %403 = vmatprep.subr.bf16.mxu1 %v3526_v10 }
  0x18   :  { %173 = vmatpush1.bf16.msra.mxu0 %v3109_v20 }
  0x19   :  { %174 = vmatprep.subr.bf16.mxu0 %v3113_v21  ;;  %404 = vmatpush1.bf16.msra.mxu1 %v3531_v11 }
  0x1a   :  { %405 = vmatprep.subr.bf16.mxu1 %v3543_v14 }
  0x1c   :  { %175 = vmatpush1.bf16.msra.mxu0 %v3115_v22 }
  0x1d   :  { %176 = vmatprep.subr.bf16.mxu0 %v3119_v23  ;;  %406 = vmatpush1.bf16.msra.mxu1 %v3549_v15 }
  0x1e   :  { %407 = vmatprep.subr.bf16.mxu1 %v3558_v17 }
  0x20   :  { %177 = vmatpush1.bf16.msra.mxu0 %v3121_v25 }
  0x21   :  { %559 = vmatprep.subr.bf16.mxu0 %v3511_v7  ;;  %408 = vmatpush1.bf16.msra.mxu1 %v3567_v19 }
  0x22   :  { %716 = vmatprep.subr.bf16.mxu1 %v3511_v7 }
  0x23   :  { %195 = vmatmul.mubr.bf16.vlgmr.msra.gmra.mrb[0].mxu0 %v3125_v26 }
  0x24   :  { %560 = vmatpush1.bf16.msra.mxu0 %v3516_v8  ;;  %591 = vmatprep.mubr.bf16.mxu0 %v3424_v1 }
  0x25   :  { %561 = vmatprep.subr.bf16.mxu0 %v3526_v10 }
  0x28   :  { %562 = vmatpush1.bf16.msra.mxu0 %v3531_v11 }
  0x29   :  { %563 = vmatprep.subr.bf16.mxu0 %v3543_v14 }
  0x2c   :  { %564 = vmatpush1.bf16.msra.mxu0 %v3549_v15 }
  0x2d   :  { %565 = vmatprep.subr.bf16.mxu0 %v3558_v17 }
  0x30   :  { %566 = vmatpush1.bf16.msra.mxu0 %v3567_v19 }
  0x31   :  { %869 = vmatprep.subr.bf16.mxu0 %v3511_v7 }
  0xe7   :  { %v284_v29 = vpop.f32.mrb[0].mxu1 }
  0xe8   :  { %v286_v30 = vpop.f32.mrb[1].mxu1 }
  0xe9   :  { %v288_v32 = vpop.f32.mrb[2].mxu1 }
  0xea   :  { %v289_v35 = vpop.f32.mrb[3].mxu1 }
  0xf6   :  { %v196_v38 = vpop.f32.mrb[0].mxu0 }
  0xf7   :  { %v3621_v39 = vadd.f32 %v196_v38, %v69_v36  ;;  %v198_v40 = vpop.f32.mrb[1].mxu0 }
  0xf8   :  { %v3623_v41 = vadd.f32 %v198_v40, %v73_v37  ;;  %v200_v42 = vpop.f32.mrb[2].mxu0 }
  0xf9   :  { %v3625_v43 = vadd.f32 %v200_v42, %v69_v36  ;;  %v291_v44 = vadd.f32 %v284_v29, %v3621_v39  ;;  %v202_v45 = vpop.f32.mrb[3].mxu0 }
  0xfa   :  { %v3628_v46 = vadd.f32 %v202_v45, %v73_v37 }
  0xfb   :  { %3146 = vtanh.f32 %v291_v44  ;;  %v2956_v51 = vmul.f32 -1.442695, %v291_v44 }
  0xfc   :  { %v293_v47 = vrot.slane %v3628_v46, 6 }
  0xfe   :  { %v295_v48 = vadd.f32 %v293_v47, %v286_v30 }
 0x100   :  { %3148 = vtanh.f32 %v295_v48  ;;  %v2957_v52 = vmul.f32 -1.442695, %v295_v48 }
 0x101   :  { %3150 = vpow2.f32 %v2956_v51 }
 0x102   :  { %3152 = vpow2.f32 %v2957_v52 }
 0x105   :  { %v3147_v49 = vpop.eup %3146 }
 0x106   :  { %305 = vrot.lane.b32.xlu1 %v3147_v49, %s3426_s3 }
 0x10a   :  { %v3149_v50 = vpop.eup %3148 }
 0x10b   :  { %329 = vrot.lane.b32.xlu0 %v3149_v50, %s3426_s3  ;;  %v3151_v53 = vpop.eup %3150 }
 0x10c   :  { %v299_v54 = vadd.f32 1.0, %v3151_v53  ;;  %v3153_v55 = vpop.eup %3152 }
 0x10d   :  { %v323_v56 = vadd.f32 1.0, %v3153_v55 }
 0x10e   :  { %3154 = vrcp.f32 %v299_v54 }
 0x10f   :  { %3156 = vrcp.f32 %v323_v56  ;;  %v443_v56 = vrot.slane %v3621_v39, 2 }
 0x118   :  { %v3155_v57 = vpop.eup %3154 }
 0x119   :  { %v3157_v61 = vpop.eup %3156  ;;  %v303_v9 = vmul.f32 0.0, %v3155_v57 }
 0x11a   :  { %v327_v3 = vmul.f32 0.0, %v3157_v61 }
 0x178   :  { %v306_v58 = vpop.permute.xlu1 %305 }
 0x179   :  { %v308_v59 = vmul.f32 %v3155_v57, %v306_v58  ;;  %v446_v58 = vrot.slane %v3628_v46, 4 }
 0x17b   :  { %310 = vrot.lane.b32.xlu1 %v308_v59, %s3427_s23 }
 0x17d   :  { %v330_v62 = vpop.permute.xlu0 %329 }
 0x17e   :  { %v332_v63 = vmul.f32 %v3157_v61, %v330_v62 }
 0x17f   :  { %352 = vperm.xlu1 %3037, %v37_v60  }
 0x180   :  { %334 = vrot.lane.b32.xlu0 %v332_v63, %s3427_s23 }
 0x183   :  { %346 = vperm.xlu1 %3037, %v36_v0  }
 0x187   :  { %364 = vperm.xlu1 %3037, %v361_v2  }
 0x1ed   :  { %v311_v6 = vpop.permute.xlu1 %310 }
 0x1ee   :  { %v3641_v12 = vadd.f32 %v311_v6, %v303_v9 }
 0x1f2   :  { %v335_v4 = vpop.permute.xlu0 %334 }
 0x1f3   :  { %v337_v5 = vadd.f32 %v335_v4, %v327_v3 }
 0x1f5   :  { %3158 = vtanh.f32 %v337_v5  ;;  %v380_v23 = vrot.slane %v337_v5, 2 }
 0x1f6   :  { %3160 = vtanh.f32 %v3641_v12 }
 0x1fe   :  { %v3648_v25 = vpop.permute.xlu1 %352 }
 0x1ff   :  { %v3159_v13 = vpop.eup %3158 }
 0x200   :  { %340 = vrot.lane.b32.xlu0 %v3159_v13, %s3426_s3  ;;  %v3161_v18 = vpop.eup %3160 }
 0x202   :  { %v3652_v27 = vpop.permute.xlu1 %346 }
 0x204   :  { %374 = vperm.xlu0 %3038, %v371_v16  }
 0x206   :  { %v3654_v30 = vpop.permute.xlu1 %364 }
 0x207   :  { %v3666_v38 = vmul.f32 0.0, %v3654_v30 }
 0x208   :  { %316 = vrot.lane.b32.xlu0 %v3161_v18, %s3426_s3 }
 0x272   :  { %v341_v20 = vpop.permute.xlu0 %340 }
 0x273   :  { %v343_v21 = vmul.f32 %v3157_v61, %v341_v20 }
 0x275   :  { %v356_v22 = vrot.slane %v343_v21, 2 }
 0x277   :  { %357 = vrot.lane.b32.xlu1 %v356_v22, %s3427_s23 }
 0x27b   :  { %381 = vrot.lane.b32.xlu1 %v380_v23, %s3428_s1 }
 0x283   :  { %v3650_v26 = vpop.permute.xlu0 %374 }
 0x284   :  { %v3660_v36 = vmul.f32 0.0, %v3650_v26 }
 0x287   :  { %v317_v29 = vpop.permute.xlu0 %316 }
 0x288   :  { %v319_v32 = vmul.f32 %v3155_v57, %v317_v29 }
 0x28a   :  { %v3657_v35 = vmul.f32 %v3652_v27, %v319_v32 }
 0x28c   :  { %v3674_v44 = vadd.f32 %v3666_v38, %v3657_v35 }
 0x2e9   :  { %v358_v33 = vpop.permute.xlu1 %357 }
 0x2ea   :  { %v3663_v37 = vmul.f32 %v358_v33, %v3648_v25  ;;  %v369_v33 = vmul.f32 %v3652_v27, %v3641_v12 }
 0x2ec   :  { %v3670_v40 = vadd.f32 %v3660_v36, %v3663_v37 }
 0x2ed   :  { %v382_v42 = vpop.permute.xlu1 %381 }
 0x2ee   :  { %v391_v45 = vrot.slane %v3670_v40, 6  ;;  %v384_v47 = vmul.f32 %v382_v42, %v3648_v25 }
 0x2f0   :  { %v3679_v48 = vadd.f32 %v384_v47, %v3660_v36  ;;  %v3039_v49 = vpack.i.bf16 %v391_v45, %v3674_v44  ;;  %v3705_v47 = vadd.f32 %v369_v33, %v3666_v38  ;;  %v600_v33 = vrot.slane %v3621_v39, 4 }
 0x2f2   :  { %3040 = vrot.lane.b32.xlu0 %v3039_v49, %s3427_s23  ;;  %v481_v50 = vrot.slane %v3679_v48, 6 }
 0x2f4   :  { %482 = vrot.lane.b32.xlu1 %v481_v50, %s3427_s23 }
 0x364   :  { %v3041_v51 = vpop.permute.xlu0 %3040 }
 0x365   :  { %v3043_v52 = vunpack.i.h.bf16 %v3041_v51  ;;  %v3042_v53 = vunpack.i.l.bf16 %v3041_v51 }
 0x366   :  { %v483_v29 = vpop.permute.xlu1 %482 }
 0x367   :  { %v396_v54 = vsel %vm395_vm0, %v3042_v53, %v3043_v52 }
 0x368   :  { %v397_v55 = vpack.c.bf16 %v396_v54, %v396_v54 }
 0x36a   :  { %2958 = vmatmul.mubr.msk.bf16.vlgmr.msra.gmra.mrb[4].mxu1 %vm246_vm1, %v397_v55 }
 0x36b   :  { %717 = vmatpush1.bf16.msra.mxu1 %v3516_v8  ;;  %748 = vmatprep.mubr.bf16.mxu1 %v3424_v1 }
 0x36c   :  { %718 = vmatprep.subr.bf16.mxu1 %v3526_v10 }
 0x36f   :  { %719 = vmatpush1.bf16.msra.mxu1 %v3531_v11 }
 0x370   :  { %720 = vmatprep.subr.bf16.mxu1 %v3543_v14 }
 0x373   :  { %721 = vmatpush1.bf16.msra.mxu1 %v3549_v15 }
 0x374   :  { %722 = vmatprep.subr.bf16.mxu1 %v3558_v17 }
 0x377   :  { %723 = vmatpush1.bf16.msra.mxu1 %v3567_v19 }
 0x378   :  { %1024 = vmatprep.subr.bf16.mxu1 %v3511_v7 }
 0x43d   :  { %v435_v57 = vpop.f32.mrb[4].mxu1 }
 0x43e   :  { %v445_v59 = vadd.f32 %v443_v56, %v435_v57  ;;  %v437_v60 = vpop.f32.mrb[5].mxu1 }
 0x43f   :  { %v448_v61 = vadd.f32 %v446_v58, %v437_v60  ;;  %v439_v62 = vpop.f32.mrb[6].mxu1 }
 0x440   :  { %v440_v63 = vpop.f32.mrb[7].mxu1  ;;  %v2959_v4 = vmul.f32 -1.442695, %v445_v59  ;;  %v533_v62 = vrot.slane %v3670_v40, 2 }
 0x441   :  { %3162 = vtanh.f32 %v448_v61  ;;  %v2960_v3 = vmul.f32 -1.442695, %v448_v61 }
 0x442   :  { %3164 = vtanh.f32 %v445_v59  ;;  %v514_v59 = vrot.slane %v3674_v44, 6 }
 0x443   :  { %3166 = vpow2.f32 %v2960_v3 }
 0x444   :  { %3168 = vpow2.f32 %v2959_v4  ;;  %v543_v4 = vrot.slane %v3679_v48, 2 }
 0x446   :  { %v545_v40 = vmul.f32 %v543_v4, %v3650_v26 }
 0x44b   :  { %v3163_v0 = vpop.eup %3162 }
 0x44c   :  { %487 = vrot.lane.b32.xlu0 %v3163_v0, %s3426_s3  ;;  %v3165_v2 = vpop.eup %3164  ;;  %v535_v0 = vmul.f32 %v533_v62, %v3650_v26 }
 0x44d   :  { %v3167_v5 = vpop.eup %3166 }
 0x44e   :  { %v476_v6 = vadd.f32 1.0, %v3167_v5  ;;  %v3169_v9 = vpop.eup %3168 }
 0x44f   :  { %v452_v13 = vadd.f32 1.0, %v3169_v9 }
 0x450   :  { %458 = vrot.lane.b32.xlu0 %v3165_v2, %s3426_s3  ;;  %3170 = vrcp.f32 %v476_v6 }
 0x451   :  { %3172 = vrcp.f32 %v452_v13 }
 0x45a   :  { %v3171_v16 = vpop.eup %3170 }
 0x45b   :  { %v3173_v21 = vpop.eup %3172  ;;  %v485_v32 = vmul.f32 %v3171_v16, %v483_v29 }
 0x45c   :  { %v456_v49 = vmul.f32 %v3173_v21, %v3705_v47 }
 0x4be   :  { %v488_v18 = vpop.permute.xlu0 %487 }
 0x4bf   :  { %v490_v20 = vmul.f32 %v3171_v16, %v488_v18 }
 0x4c1   :  { %492 = vrot.lane.b32.xlu1 %v490_v20, %s3427_s23 }
 0x4c2   :  { %v459_v22 = vpop.permute.xlu0 %458 }
 0x4c3   :  { %v461_v23 = vmul.f32 %v3173_v21, %v459_v22 }
 0x4c5   :  { %463 = vrot.lane.b32.xlu0 %v461_v23, %s3427_s23 }
 0x533   :  { %v493_v42 = vpop.permute.xlu1 %492 }
 0x534   :  { %v495_v45 = vadd.f32 %v493_v42, %v485_v32 }
 0x536   :  { %3174 = vtanh.f32 %v495_v45  ;;  %v538_v60 = vrot.slane %v495_v45, 4  ;;  %v603_v45 = vrot.slane %v3628_v46, 2 }
 0x537   :  { %v464_v50 = vpop.permute.xlu0 %463 }
 0x538   :  { %v466_v51 = vadd.f32 %v464_v50, %v456_v49 }
 0x53a   :  { %3176 = vtanh.f32 %v466_v51  ;;  %v521_v61 = vrot.slane %v466_v51, 6 }
 0x540   :  { %v3175_v52 = vpop.eup %3174 }
 0x541   :  { %498 = vrot.lane.b32.xlu1 %v3175_v52, %s3426_s3 }
 0x544   :  { %v3177_v53 = vpop.eup %3176 }
 0x545   :  { %469 = vrot.lane.b32.xlu0 %v3177_v53, %s3426_s3 }
 0x5b3   :  { %v499_v54 = vpop.permute.xlu1 %498 }
 0x5b4   :  { %v501_v55 = vmul.f32 %v3171_v16, %v499_v54 }
 0x5b6   :  { %v509_v12 = vrot.slane %v501_v55, 4  ;;  %v527_v55 = vrot.slane %v3705_v47, 6 }
 0x5b7   :  { %v470_v56 = vpop.permute.xlu0 %469 }
 0x5b8   :  { %v472_v57 = vmul.f32 %v3173_v21, %v470_v56  ;;  %510 = vrot.lane.b32.xlu1 %v509_v12, %s3427_s23 }
 0x5ba   :  { %v503_v58 = vrot.slane %v472_v57, 6 }
 0x5bc   :  { %504 = vrot.lane.b32.xlu0 %v503_v58, %s3427_s23  ;;  %515 = vrot.lane.b32.xlu1 %v514_v59, %s3427_s23 }
 0x5c0   :  { %539 = vrot.lane.b32.xlu1 %v538_v60, %s3428_s1 }
 0x5c4   :  { %522 = vrot.lane.b32.xlu1 %v521_v61, %s3428_s1 }
 0x62a   :  { %v511_v63 = vpop.permute.xlu1 %510 }
 0x62b   :  { %v3719_v2 = vmul.f32 %v511_v63, %v3648_v25 }
 0x62d   :  { %v3722_v44 = vadd.f32 %v535_v0, %v3719_v2 }
 0x62e   :  { %v516_v3 = vpop.permute.xlu1 %515  ;;  %v505_v18 = vpop.permute.xlu0 %504 }
 0x62f   :  { %v548_v5 = vrot.slane %v3722_v44, 2  ;;  %v3736_v48 = vmul.f32 %v505_v18, %v3652_v27  ;;  %v518_v20 = vmul.f32 %v516_v3, %v3654_v30 }
 0x631   :  { %549 = vrot.lane.b32.xlu0 %v548_v5, %s3427_s23  ;;  %v3740_v21 = vadd.f32 %v518_v20, %v3736_v48 }
 0x632   :  { %v540_v6 = vpop.permute.xlu1 %539 }
 0x633   :  { %v542_v9 = vmul.f32 %v540_v6, %v3648_v25 }
 0x635   :  { %v3731_v13 = vadd.f32 %v545_v40, %v542_v9 }
 0x636   :  { %v523_v3 = vpop.permute.xlu1 %522 }
 0x637   :  { %v643_v16 = vrot.slane %v3731_v13, 4  ;;  %v525_v4 = vmul.f32 %v523_v3, %v3652_v27  ;;  %v677_v3 = vrot.slane %v3740_v21, 6 }
 0x639   :  { %644 = vrot.lane.b32.xlu1 %v643_v16, %s3427_s23  ;;  %v679_v44 = vmul.f32 %v677_v3, %v3654_v30 }
 0x6a3   :  { %v550_v22 = vpop.permute.xlu0 %549 }
 0x6a4   :  { %v552_v23 = vsel %vm395_vm0, %v3740_v21, %v550_v22  ;;  %v757_v21 = vrot.slane %v3621_v39, 6 }
 0x6a5   :  { %v553_v29 = vpack.c.bf16 %v552_v23, %v552_v23 }
 0x6a7   :  { %v555_v32 = vrot.slane %v553_v29, 1 }
 0x6a9   :  { %2961 = vmatmul.mubr.msk.bf16.vlgmr.msra.gmra.mrb[4].mxu0 %vm246_vm1, %v555_v32 }
 0x6aa   :  { %870 = vmatpush1.bf16.msra.mxu0 %v3516_v8  ;;  %901 = vmatprep.mubr.bf16.mxu0 %v3424_v1 }
 0x6ab   :  { %871 = vmatprep.subr.bf16.mxu0 %v3526_v10  ;;  %v645_v22 = vpop.permute.xlu1 %644 }
 0x6ae   :  { %872 = vmatpush1.bf16.msra.mxu0 %v3531_v11 }
 0x6af   :  { %873 = vmatprep.subr.bf16.mxu0 %v3543_v14 }
 0x6b2   :  { %874 = vmatpush1.bf16.msra.mxu0 %v3549_v15 }
 0x6b3   :  { %875 = vmatprep.subr.bf16.mxu0 %v3558_v17 }
 0x6b6   :  { %876 = vmatpush1.bf16.msra.mxu0 %v3567_v19 }
 0x6b7   :  { %1182 = vmatprep.subr.bf16.mxu0 %v3511_v7 }
 0x77c   :  { %v593_v42 = vpop.f32.mrb[4].mxu0 }
 0x77d   :  { %v602_v49 = vadd.f32 %v600_v33, %v593_v42  ;;  %v595_v50 = vpop.f32.mrb[5].mxu0 }
 0x77e   :  { %v605_v51 = vadd.f32 %v603_v45, %v595_v50  ;;  %v597_v52 = vpop.f32.mrb[6].mxu0 }
 0x77f   :  { %v598_v53 = vpop.f32.mrb[7].mxu0  ;;  %v2962_v57 = vmul.f32 -1.442695, %v602_v49 }
 0x780   :  { %3178 = vtanh.f32 %v605_v51  ;;  %v2963_v56 = vmul.f32 -1.442695, %v605_v51 }
 0x781   :  { %3180 = vtanh.f32 %v602_v49 }
 0x782   :  { %3182 = vpow2.f32 %v2963_v56 }
 0x783   :  { %3184 = vpow2.f32 %v2962_v57 }
 0x78a   :  { %v3179_v54 = vpop.eup %3178 }
 0x78b   :  { %649 = vrot.lane.b32.xlu0 %v3179_v54, %s3426_s3  ;;  %v3181_v12 = vpop.eup %3180 }
 0x78c   :  { %v3183_v58 = vpop.eup %3182 }
 0x78d   :  { %v638_v59 = vadd.f32 1.0, %v3183_v58  ;;  %v3185_v60 = vpop.eup %3184 }
 0x78e   :  { %v609_v61 = vadd.f32 1.0, %v3185_v60 }
 0x78f   :  { %528 = vrot.lane.b32.xlu0 %v527_v55, %s3428_s1  ;;  %3186 = vrcp.f32 %v638_v59  ;;  %v692_v59 = vmul.f32 %v548_v5, %v3650_v26 }
 0x790   :  { %3188 = vrcp.f32 %v609_v61 }
 0x793   :  { %620 = vrot.lane.b32.xlu0 %v3181_v12, %s3426_s3 }
 0x799   :  { %v3187_v62 = vpop.eup %3186 }
 0x79a   :  { %v3189_v9 = vpop.eup %3188  ;;  %v647_v23 = vmul.f32 %v3187_v62, %v645_v22 }
 0x7fd   :  { %v650_v63 = vpop.permute.xlu0 %649 }
 0x7fe   :  { %v652_v0 = vmul.f32 %v3187_v62, %v650_v63 }
 0x800   :  { %654 = vrot.lane.b32.xlu1 %v652_v0, %s3427_s23 }
 0x801   :  { %v529_v47 = vpop.permute.xlu0 %528 }
 0x802   :  { %v531_v6 = vmul.f32 %v529_v47, %v3654_v30 }
 0x804   :  { %v3763_v40 = vadd.f32 %v531_v6, %v525_v4 }
 0x805   :  { %v621_v16 = vpop.permute.xlu0 %620 }
 0x806   :  { %v623_v18 = vmul.f32 %v3189_v9, %v621_v16  ;;  %v614_v20 = vrot.slane %v3763_v40, 2 }
 0x808   :  { %625 = vrot.lane.b32.xlu1 %v623_v18, %s3427_s23  ;;  %615 = vrot.lane.b32.xlu0 %v614_v20, %s3427_s23 }
 0x872   :  { %v655_v29 = vpop.permute.xlu1 %654 }
 0x873   :  { %v657_v32 = vadd.f32 %v655_v29, %v647_v23 }
 0x875   :  { %3190 = vtanh.f32 %v657_v32  ;;  %v695_v63 = vrot.slane %v657_v32, 6 }
 0x87a   :  { %v616_v33 = vpop.permute.xlu0 %615  ;;  %v626_v45 = vpop.permute.xlu1 %625 }
 0x87b   :  { %v618_v42 = vmul.f32 %v3189_v9, %v616_v33 }
 0x87d   :  { %v628_v49 = vadd.f32 %v626_v45, %v618_v42  ;;  %v687_v42 = vrot.slane %v3763_v40, 6 }
 0x87f   :  { %v3191_v50 = vpop.eup %3190  ;;  %3192 = vtanh.f32 %v628_v49  ;;  %v682_v57 = vrot.slane %v628_v49, 4  ;;  %v700_v49 = vrot.slane %v3731_v13, 2  ;;  %v689_v39 = vmul.f32 %v687_v42, %v3654_v30 }
 0x880   :  { %660 = vrot.lane.b32.xlu0 %v3191_v50, %s3426_s3 }
 0x889   :  { %v3193_v51 = vpop.eup %3192 }
 0x88a   :  { %631 = vrot.lane.b32.xlu1 %v3193_v51, %s3426_s3  ;;  %v702_v51 = vmul.f32 %v700_v49, %v3650_v26 }
 0x8f2   :  { %v661_v52 = vpop.permute.xlu0 %660 }
 0x8f3   :  { %v663_v53 = vmul.f32 %v3187_v62, %v661_v52 }
 0x8f5   :  { %v671_v54 = vrot.slane %v663_v53, 6 }
 0x8f7   :  { %672 = vrot.lane.b32.xlu0 %v671_v54, %s3427_s23 }
 0x8fc   :  { %v632_v55 = vpop.permute.xlu1 %631 }
 0x8fd   :  { %v634_v12 = vmul.f32 %v3189_v9, %v632_v55 }
 0x8ff   :  { %v665_v56 = vrot.slane %v634_v12, 4 }
 0x901   :  { %666 = vrot.lane.b32.xlu1 %v665_v56, %s3427_s23 }
 0x905   :  { %683 = vrot.lane.b32.xlu1 %v682_v57, %s3428_s1 }
 0x969   :  { %v673_v58 = vpop.permute.xlu0 %672 }
 0x96a   :  { %v3777_v60 = vmul.f32 %v673_v58, %v3648_v25 }
 0x96c   :  { %v3780_v61 = vadd.f32 %v692_v59, %v3777_v60 }
 0x96e   :  { %v705_v62 = vrot.slane %v3780_v61, 6 }
 0x970   :  { %706 = vrot.lane.b32.xlu0 %v705_v62, %s3427_s23 }
 0x973   :  { %v667_v0 = vpop.permute.xlu1 %666 }
 0x974   :  { %696 = vrot.lane.b32.xlu0 %v695_v63, %s3428_s1  ;;  %v3787_v47 = vmul.f32 %v667_v0, %v3652_v27 }
 0x976   :  { %v3791_v5 = vadd.f32 %v679_v44, %v3787_v47 }
 0x977   :  { %v684_v33 = vpop.permute.xlu1 %683 }
 0x978   :  { %v686_v50 = vmul.f32 %v684_v33, %v3652_v27 }
 0x97a   :  { %v3813_v52 = vadd.f32 %v689_v39, %v686_v50 }
 0x97c   :  { %v769_v13 = vrot.slane %v3813_v52, 4 }
 0x9e2   :  { %v707_v4 = vpop.permute.xlu0 %706 }
 0x9e3   :  { %v709_v6 = vsel %vm395_vm0, %v3791_v5, %v707_v4 }
 0x9e4   :  { %v710_v9 = vpack.c.bf16 %v709_v6, %v709_v6 }
 0x9e6   :  { %v712_v16 = vrot.slane %v710_v9, 2  ;;  %v697_v45 = vpop.permute.xlu0 %696 }
 0x9e8   :  { %2964 = vmatmul.mubr.msk.bf16.vlgmr.msra.gmra.mrb[8].mxu1 %vm246_vm1, %v712_v16 }
 0x9e9   :  { %1025 = vmatpush1.bf16.msra.mxu1 %v3516_v8  ;;  %1056 = vmatprep.mubr.bf16.mxu1 %v3424_v1 }
 0x9ea   :  { %1026 = vmatprep.subr.bf16.mxu1 %v3526_v10 }
 0x9ed   :  { %1027 = vmatpush1.bf16.msra.mxu1 %v3531_v11 }
 0x9ee   :  { %1028 = vmatprep.subr.bf16.mxu1 %v3543_v14 }
 0x9f1   :  { %1029 = vmatpush1.bf16.msra.mxu1 %v3549_v15 }
 0x9f2   :  { %1030 = vmatprep.subr.bf16.mxu1 %v3558_v17 }
 0x9f5   :  { %1031 = vmatpush1.bf16.msra.mxu1 %v3567_v19 }
 0x9f6   :  { %1339 = vmatprep.subr.bf16.mxu1 %v3511_v7  ;;  %v699_v7 = vmul.f32 %v697_v45, %v3648_v25 }
 0x9f8   :  { %v3815_v53 = vadd.f32 %v702_v51, %v699_v7 }
 0x9fa   :  { %v798_v40 = vrot.slane %v3815_v53, 2 }
 0xabb   :  { %v750_v18 = vpop.f32.mrb[8].mxu1 }
 0xabc   :  { %v759_v20 = vadd.f32 %v757_v21, %v750_v18  ;;  %v752_v22 = vpop.f32.mrb[9].mxu1 }
 0xabd   :  { %v760_v23 = vadd.f32 %v752_v22, %v3628_v46  ;;  %v754_v29 = vpop.f32.mrb[10].mxu1 }
 0xabe   :  { %3194 = vtanh.f32 %v759_v20  ;;  %v755_v32 = vpop.f32.mrb[11].mxu1  ;;  %v2965_v55 = vmul.f32 -1.442695, %v759_v20  ;;  %v841_v29 = vrot.slane %v3780_v61, 2 }
 0xabf   :  { %3196 = vtanh.f32 %v760_v23  ;;  %v2966_v12 = vmul.f32 -1.442695, %v760_v23 }
 0xac0   :  { %3198 = vpow2.f32 %v2965_v55  ;;  %v843_v42 = vmul.f32 %v841_v29, %v3650_v26  ;;  %v827_v55 = vrot.slane %v3791_v5, 6 }
 0xac1   :  { %3200 = vpow2.f32 %v2966_v12 }
 0xac8   :  { %v3195_v46 = vpop.eup %3194 }
 0xac9   :  { %v3197_v54 = vpop.eup %3196  ;;  %775 = vrot.lane.b32.xlu1 %v3195_v46, %s3426_s3 }
 0xaca   :  { %804 = vrot.lane.b32.xlu0 %v3197_v54, %s3426_s3  ;;  %v3199_v56 = vpop.eup %3198 }
 0xacb   :  { %v3201_v57 = vpop.eup %3200  ;;  %v764_v58 = vadd.f32 1.0, %v3199_v56  ;;  %v829_v56 = vmul.f32 %v827_v55, %v3654_v30 }
 0xacc   :  { %v793_v59 = vadd.f32 1.0, %v3201_v57 }
 0xacd   :  { %770 = vrot.lane.b32.xlu1 %v769_v13, %s3427_s23  ;;  %3202 = vrcp.f32 %v764_v58 }
 0xace   :  { %799 = vrot.lane.b32.xlu0 %v798_v40, %s3427_s23  ;;  %3204 = vrcp.f32 %v793_v59 }
 0xad7   :  { %v3203_v62 = vpop.eup %3202 }
 0xad8   :  { %v3205_v0 = vpop.eup %3204 }
 0xb3b   :  { %v776_v63 = vpop.permute.xlu1 %775 }
 0xb3c   :  { %v778_v3 = vmul.f32 %v3203_v62, %v776_v63  ;;  %v805_v44 = vpop.permute.xlu0 %804 }
 0xb3d   :  { %v807_v4 = vmul.f32 %v3205_v0, %v805_v44 }
 0xb3e   :  { %780 = vrot.lane.b32.xlu1 %v778_v3, %s3427_s23  ;;  %v912_v3 = vrot.slane %v3623_v41, 6 }
 0xb3f   :  { %809 = vrot.lane.b32.xlu0 %v807_v4, %s3427_s23  ;;  %v771_v6 = vpop.permute.xlu1 %770 }
 0xb40   :  { %v800_v9 = vpop.permute.xlu0 %799  ;;  %v773_v16 = vmul.f32 %v3203_v62, %v771_v6 }
 0xb41   :  { %v802_v21 = vmul.f32 %v3205_v0, %v800_v9 }
 0xbb0   :  { %v781_v18 = vpop.permute.xlu1 %780 }
 0xbb1   :  { %v783_v20 = vadd.f32 %v781_v18, %v773_v16  ;;  %v810_v22 = vpop.permute.xlu0 %809 }
 0xbb2   :  { %v3827_v23 = vadd.f32 %v810_v22, %v802_v21  ;;  %v837_v22 = vrot.slane %v3813_v52, 6 }
 0xbb3   :  { %3206 = vtanh.f32 %v783_v20  ;;  %v832_v13 = vrot.slane %v783_v20, 2 }
 0xbb4   :  { %3208 = vtanh.f32 %v3827_v23 }
 0xbbd   :  { %v3207_v32 = vpop.eup %3206 }
 0xbbe   :  { %v3209_v33 = vpop.eup %3208  ;;  %786 = vrot.lane.b32.xlu1 %v3207_v32, %s3426_s3 }
 0xbbf   :  { %815 = vrot.lane.b32.xlu0 %v3209_v33, %s3426_s3 }
 0xbc2   :  { %845 = vrot.lane.b32.xlu1 %v843_v42, %s3428_s1 }
 0xc30   :  { %v787_v45 = vpop.permute.xlu1 %786 }
 0xc31   :  { %v789_v49 = vmul.f32 %v3203_v62, %v787_v45  ;;  %v816_v50 = vpop.permute.xlu0 %815 }
 0xc32   :  { %v818_v7 = vmul.f32 %v3205_v0, %v816_v50 }
 0xc33   :  { %v820_v39 = vrot.slane %v789_v49, 2 }
 0xc34   :  { %v3836_v51 = vmul.f32 %v818_v7, %v3648_v25  ;;  %v846_v46 = vpop.permute.xlu1 %845 }
 0xc35   :  { %821 = vrot.lane.b32.xlu0 %v820_v39, %s3427_s23  ;;  %v849_v39 = vmul.f32 %v3827_v23, %v3648_v25 }
 0xc36   :  { %v3840_v61 = vadd.f32 %v846_v46, %v3836_v51 }
 0xc38   :  { %v858_v54 = vrot.slane %v3840_v61, 2 }
 0xc3a   :  { %859 = vrot.lane.b32.xlu1 %v858_v54, %s3426_s3 }
 0xc3e   :  { %833 = vrot.lane.b32.xlu1 %v832_v13, %s3428_s1 }
 0xca7   :  { %v822_v12 = vpop.permute.xlu0 %821 }
 0xca8   :  { %v3850_v57 = vmul.f32 %v822_v12, %v3652_v27 }
 0xcaa   :  { %v3853_v58 = vadd.f32 %v829_v56, %v3850_v57 }
 0xcac   :  { %v860_v59 = vpop.permute.xlu1 %859 }
 0xcad   :  { %v862_v62 = vsel %vm395_vm0, %v3853_v58, %v860_v59 }
 0xcae   :  { %v863_v63 = vpack.c.bf16 %v862_v62, %v862_v62 }
 0xcb0   :  { %v865_v0 = vrot.slane %v863_v63, 3  ;;  %v834_v18 = vpop.permute.xlu1 %833 }
 0xcb1   :  { %v836_v53 = vmul.f32 %v834_v18, %v3652_v27 }
 0xcb2   :  { %2967 = vmatmul.mubr.msk.bf16.vlgmr.msra.gmra.mrb[8].mxu0 %vm246_vm1, %v865_v0 }
 0xcb3   :  { %1183 = vmatpush1.bf16.msra.mxu0 %v3516_v8  ;;  %1214 = vmatprep.mubr.bf16.mxu0 %v3424_v1 }
 0xcb4   :  { %1184 = vmatprep.subr.bf16.mxu0 %v3526_v10 }
 0xcb7   :  { %1185 = vmatpush1.bf16.msra.mxu0 %v3531_v11 }
 0xcb8   :  { %1186 = vmatprep.subr.bf16.mxu0 %v3543_v14  ;;  %v851_v14 = vmul.f32 %v798_v40, %v3650_v26  ;;  %v839_v40 = vmul.f32 %v837_v22, %v3654_v30 }
 0xcba   :  { %v3877_v33 = vadd.f32 %v839_v40, %v836_v53 }
 0xcbb   :  { %1187 = vmatpush1.bf16.msra.mxu0 %v3549_v15 }
 0xcbc   :  { %1188 = vmatprep.subr.bf16.mxu0 %v3558_v17  ;;  %v923_v49 = vrot.slane %v3877_v33, 6 }
 0xcbf   :  { %1189 = vmatpush1.bf16.msra.mxu0 %v3567_v19 }
 0xd85   :  { %v903_v5 = vpop.f32.mrb[8].mxu0 }
 0xd86   :  { %v905_v44 = vpop.f32.mrb[9].mxu0  ;;  %v910_v10 = vadd.f32 %v903_v5, %v3625_v43 }
 0xd87   :  { %v914_v4 = vadd.f32 %v912_v3, %v905_v44  ;;  %v907_v8 = vpop.f32.mrb[10].mxu0  ;;  %v976_v44 = vrot.slane %v3853_v58, 6 }
 0xd88   :  { %v908_v6 = vpop.f32.mrb[11].mxu0  ;;  %v2968_v19 = vmul.f32 -1.442695, %v910_v10 }
 0xd89   :  { %3210 = vtanh.f32 %v914_v4  ;;  %v2969_v17 = vmul.f32 -1.442695, %v914_v4  ;;  %v978_v8 = vmul.f32 %v976_v44, %v3650_v26 }
 0xd8a   :  { %3212 = vtanh.f32 %v910_v10 }
 0xd8b   :  { %3214 = vpow2.f32 %v2969_v17 }
 0xd8c   :  { %3216 = vpow2.f32 %v2968_v19 }
 0xd93   :  { %v3211_v11 = vpop.eup %3210 }
 0xd94   :  { %953 = vrot.lane.b32.xlu0 %v3211_v11, %s3426_s3  ;;  %v3213_v15 = vpop.eup %3212 }
 0xd95   :  { %v3215_v9 = vpop.eup %3214 }
 0xd96   :  { %v947_v16 = vadd.f32 1.0, %v3215_v9  ;;  %v3217_v21 = vpop.eup %3216 }
 0xd97   :  { %v918_v20 = vadd.f32 1.0, %v3217_v21 }
 0xd98   :  { %853 = vrot.lane.b32.xlu0 %v851_v14, %s3427_s23  ;;  %3218 = vrcp.f32 %v947_v16 }
 0xd99   :  { %3220 = vrcp.f32 %v918_v20 }
 0xd9c   :  { %929 = vrot.lane.b32.xlu0 %v3213_v15, %s3426_s3 }
 0xda2   :  { %v3219_v29 = vpop.eup %3218 }
 0xda3   :  { %v3221_v52 = vpop.eup %3220 }
 0xe06   :  { %v954_v32 = vpop.permute.xlu0 %953 }
 0xe07   :  { %v956_v42 = vmul.f32 %v3219_v29, %v954_v32 }
 0xe09   :  { %958 = vrot.lane.b32.xlu1 %v956_v42, %s3427_s23 }
 0xe0a   :  { %v854_v45 = vpop.permute.xlu0 %853 }
 0xe0b   :  { %v856_v46 = vadd.f32 %v854_v45, %v849_v39  ;;  %v3411_v39 = vld [vmem:[%s4635_s4 + $0x14] ss:$8 sps:$4 sm:$0xff]  }
 0xe0d   :  { %924 = vrot.lane.b32.xlu1 %v923_v49, %s3427_s23  ;;  %v951_v13 = vmul.f32 %v3219_v29, %v856_v46  ;;  %v1004_v18 = vrot.slane %v856_v46, 2 }
 0xe0e   :  { %v930_v50 = vpop.permute.xlu0 %929 }
 0xe0f   :  { %v932_v7 = vmul.f32 %v3221_v52, %v930_v50 }
 0xe11   :  { %934 = vrot.lane.b32.xlu0 %v932_v7, %s3427_s23  ;;  %v3410_v7 = vld [vmem:[%s4635_s4] ss:$8 sps:$4 sm:$0xff]  }
 0xe7b   :  { %v959_v55 = vpop.permute.xlu1 %958 }
 0xe7c   :  { %v961_v12 = vadd.f32 %v959_v55, %v951_v13  ;;  %v3412_v13 = vld [vmem:[%s4635_s4 + $0x10] ss:$8 sps:$4 sm:$0xff]   ;;  %v3413_v55 = vld [vmem:[%s4635_s4 + $0x24] ss:$8 sps:$4 sm:$0xff]  }
 0xe7e   :  { %3222 = vtanh.f32 %v961_v12  ;;  %v998_v6 = vrot.slane %v961_v12, 2  ;;  %v3414_v12 = vld [vmem:[%s4635_s4 + $0x20] ss:$8 sps:$4 sm:$0xff]  }
 0xe7f   :  { %v925_v56 = vpop.permute.xlu1 %924 }
 0xe80   :  { %v927_v59 = vmul.f32 %v3221_v52, %v925_v56  ;;  %v3415_v56 = vld [vmem:[%s4635_s4 + $0x34] ss:$8 sps:$4 sm:$0xff]  }
 0xe83   :  { %v935_v62 = vpop.permute.xlu0 %934 }
 0xe84   :  { %v3887_v63 = vadd.f32 %v935_v62, %v927_v59  ;;  %v3416_v59 = vld [vmem:[%s4635_s4 + $0x30] ss:$8 sps:$4 sm:$0xff]  }
 0xe86   :  { %3224 = vtanh.f32 %v3887_v63 }
 0xe88   :  { %v3223_v0 = vpop.eup %3222 }
 0xe89   :  { %964 = vrot.lane.b32.xlu1 %v3223_v0, %s3426_s3  ;;  %v1069_v0 = vrot.slane %v3623_v41, 4 }
 0xe90   :  { %v3225_v5 = vpop.eup %3224 }
 0xe91   :  { %940 = vrot.lane.b32.xlu0 %v3225_v5, %s3426_s3 }
 0xe95   :  { %992 = vrot.lane.b32.xlu0 %v858_v54, %s3427_s23 }
 0xefb   :  { %v965_v23 = vpop.permute.xlu1 %964 }
 0xefc   :  { %v967_v3 = vmul.f32 %v3219_v29, %v965_v23  ;;  %v1066_v23 = vrot.slane %v3625_v43, 2 }
 0xefe   :  { %v970_v4 = vrot.slane %v967_v3, 2 }
 0xf00   :  { %971 = vrot.lane.b32.xlu1 %v970_v4, %s3427_s23 }
 0xf03   :  { %v941_v10 = vpop.permute.xlu0 %940 }
 0xf04   :  { %980 = vrot.lane.b32.xlu1 %v978_v8, %s3428_s1  ;;  %v943_v14 = vmul.f32 %v3221_v52, %v941_v10 }
 0xf06   :  { %v3908_v17 = vmul.f32 %v943_v14, %v3648_v25 }
 0xf07   :  { %v993_v11 = vpop.permute.xlu0 %992 }
 0xf08   :  { %999 = vrot.lane.b32.xlu1 %v998_v6, %s3428_s1  ;;  %v995_v61 = vmul.f32 %v993_v11, %v3654_v30  ;;  %v986_v11 = vmul.f32 %v923_v49, %v3650_v26 }
 0xf72   :  { %v972_v15 = vpop.permute.xlu1 %971 }
 0xf73   :  { %v3902_v54 = vmul.f32 %v972_v15, %v3652_v27 }
 0xf75   :  { %v3905_v58 = vadd.f32 %v995_v61, %v3902_v54 }
 0xf76   :  { %v981_v19 = vpop.permute.xlu1 %980 }
 0xf77   :  { %v1015_v9 = vrot.slane %v3905_v58, 6  ;;  %v3912_v16 = vadd.f32 %v981_v19, %v3908_v17 }
 0xf79   :  { %v3044_v21 = vpack.i.bf16 %v1015_v9, %v3912_v16 }
 0xf7a   :  { %v1000_v40 = vpop.permute.xlu1 %999 }
 0xf7b   :  { %3045 = vrot.lane.b32.xlu0 %v3044_v21, %s3427_s23  ;;  %v1002_v45 = vmul.f32 %v1000_v40, %v3652_v27 }
 0xf7f   :  { %1005 = vrot.lane.b32.xlu0 %v1004_v18, %s3428_s1 }
 0xfed   :  { %v3046_v20 = vpop.permute.xlu0 %3045 }
 0xfee   :  { %v3048_v22 = vunpack.i.h.bf16 %v3046_v20  ;;  %v3047_v53 = vunpack.i.l.bf16 %v3046_v20 }
 0xff0   :  { %v1019_v29 = vsel %vm395_vm0, %v3047_v53, %v3048_v22 }
 0xff1   :  { %v1020_v32 = vpack.c.bf16 %v1019_v29, %v1019_v29  ;;  %v1006_v42 = vpop.permute.xlu0 %1005 }
 0xff2   :  { %v1008_v52 = vmul.f32 %v1006_v42, %v3654_v30 }
 0xff3   :  { %2970 = vmatmul.mubr.msk.bf16.vlgmr.msra.gmra.mrb[12].mxu1 %vm246_vm1, %v1020_v32  ;;  %v984_v32 = vmul.f32 %v3887_v63, %v3648_v25 }
 0xff4   :  { %v3921_v50 = vadd.f32 %v1008_v52, %v1002_v45  ;;  %1340 = vmatpush1.bf16.msra.mxu1 %v3410_v7  ;;  %1371 = vmatprep.mubr.bf16.mxu1 %v3424_v1 }
 0xff5   :  { %1341 = vmatprep.subr.bf16.mxu1 %v3411_v39 }
 0xff6   :  { %v1104_v46 = vrot.slane %v3921_v50, 6 }
 0xff8   :  { %1105 = vrot.lane.b32.xlu0 %v1104_v46, %s3427_s23  ;;  %1342 = vmatpush1.bf16.msra.mxu1 %v3412_v13 }
 0xff9   :  { %1343 = vmatprep.subr.bf16.mxu1 %v3413_v55 }
 0xffc   :  { %1344 = vmatpush1.bf16.msra.mxu1 %v3414_v12 }
 0xffd   :  { %1345 = vmatprep.subr.bf16.mxu1 %v3415_v56 }
0x1000   :  { %1346 = vmatpush1.bf16.msra.mxu1 %v3416_v59 }
0x106a   :  { %v1106_v40 = vpop.permute.xlu0 %1105 }
0x10c6   :  { %v1058_v62 = vpop.f32.mrb[12].mxu1 }
0x10c7   :  { %v1060_v5 = vpop.f32.mrb[13].mxu1  ;;  %v1068_v8 = vadd.f32 %v1066_v23, %v1058_v62 }
0x10c8   :  { %v1071_v3 = vadd.f32 %v1069_v0, %v1060_v5  ;;  %v1062_v44 = vpop.f32.mrb[14].mxu1  ;;  %v1137_v5 = vrot.slane %v3912_v16, 6 }
0x10c9   :  { %v1063_v4 = vpop.f32.mrb[15].mxu1  ;;  %v2971_v15 = vmul.f32 -1.442695, %v1068_v8 }
0x10ca   :  { %3226 = vtanh.f32 %v1071_v3  ;;  %v2972_v14 = vmul.f32 -1.442695, %v1071_v3  ;;  %v1156_v4 = vrot.slane %v3905_v58, 2 }
0x10cb   :  { %3228 = vtanh.f32 %v1068_v8 }
0x10cc   :  { %3230 = vpow2.f32 %v2972_v14  ;;  %v1166_v14 = vrot.slane %v3921_v50, 2 }
0x10cd   :  { %3232 = vpow2.f32 %v2971_v15 }
0x10ce   :  { %v1168_v58 = vmul.f32 %v1166_v14, %v3654_v30 }
0x10d4   :  { %v3227_v6 = vpop.eup %3226 }
0x10d5   :  { %1110 = vrot.lane.b32.xlu1 %v3227_v6, %s3426_s3  ;;  %v3229_v10 = vpop.eup %3228  ;;  %v1158_v6 = vmul.f32 %v1156_v4, %v3654_v30 }
0x10d6   :  { %v3231_v61 = vpop.eup %3230 }
0x10d7   :  { %v1099_v19 = vadd.f32 1.0, %v3231_v61  ;;  %v3233_v9 = vpop.eup %3232 }
0x10d8   :  { %v1075_v21 = vadd.f32 1.0, %v3233_v9 }
0x10d9   :  { %1081 = vrot.lane.b32.xlu1 %v3229_v10, %s3426_s3  ;;  %3234 = vrcp.f32 %v1099_v19 }
0x10da   :  { %3236 = vrcp.f32 %v1075_v21 }
0x10dd   :  { %988 = vrot.lane.b32.xlu1 %v986_v11, %s3427_s23 }
0x10e3   :  { %v3235_v18 = vpop.eup %3234 }
0x10e4   :  { %v3237_v53 = vpop.eup %3236  ;;  %v1108_v45 = vmul.f32 %v3235_v18, %v1106_v40 }
0x1147   :  { %v1111_v20 = vpop.permute.xlu1 %1110 }
0x1148   :  { %v1113_v22 = vmul.f32 %v3235_v18, %v1111_v20 }
0x114a   :  { %1115 = vrot.lane.b32.xlu0 %v1113_v22, %s3427_s23 }
0x114b   :  { %v1082_v33 = vpop.permute.xlu1 %1081 }
0x114c   :  { %v1084_v49 = vmul.f32 %v3237_v53, %v1082_v33 }
0x114e   :  { %1086 = vrot.lane.b32.xlu0 %v1084_v49, %s3427_s23 }
0x114f   :  { %v989_v29 = vpop.permute.xlu1 %988 }
0x1150   :  { %v3959_v42 = vadd.f32 %v989_v29, %v984_v32  ;;  %v1226_v32 = vrot.slane %v3623_v41, 2 }
0x1152   :  { %v1079_v39 = vmul.f32 %v3237_v53, %v3959_v42 }
0x11bc   :  { %v1116_v52 = vpop.permute.xlu0 %1115 }
0x11bd   :  { %v1118_v7 = vadd.f32 %v1116_v52, %v1108_v45 }
0x11bf   :  { %3238 = vtanh.f32 %v1118_v7  ;;  %v1161_v3 = vrot.slane %v1118_v7, 4 }
0x11c0   :  { %v1087_v46 = vpop.permute.xlu0 %1086 }
0x11c1   :  { %v1089_v13 = vadd.f32 %v1087_v46, %v1079_v39  ;;  %v1223_v46 = vrot.slane %v3625_v43, 4 }
0x11c3   :  { %3240 = vtanh.f32 %v1089_v13  ;;  %v1144_v44 = vrot.slane %v1089_v13, 6 }
0x11c9   :  { %v3239_v55 = vpop.eup %3238 }
0x11ca   :  { %1121 = vrot.lane.b32.xlu1 %v3239_v55, %s3426_s3 }
0x11cd   :  { %v3241_v12 = vpop.eup %3240 }
0x11ce   :  { %1092 = vrot.lane.b32.xlu0 %v3241_v12, %s3426_s3  ;;  %v1150_v12 = vrot.slane %v3959_v42, 6 }
0x123c   :  { %v1122_v56 = vpop.permute.xlu1 %1121 }
0x123d   :  { %v1124_v59 = vmul.f32 %v3235_v18, %v1122_v56 }
0x123f   :  { %v1132_v63 = vrot.slane %v1124_v59, 4 }
0x1240   :  { %v1093_v62 = vpop.permute.xlu0 %1092 }
0x1241   :  { %v1095_v0 = vmul.f32 %v3237_v53, %v1093_v62  ;;  %1133 = vrot.lane.b32.xlu1 %v1132_v63, %s3427_s23 }
0x1243   :  { %v1126_v23 = vrot.slane %v1095_v0, 6 }
0x1245   :  { %1127 = vrot.lane.b32.xlu0 %v1126_v23, %s3427_s23  ;;  %1138 = vrot.lane.b32.xlu1 %v1137_v5, %s3427_s23 }
0x1249   :  { %1162 = vrot.lane.b32.xlu1 %v1161_v3, %s3428_s1 }
0x124d   :  { %1145 = vrot.lane.b32.xlu1 %v1144_v44, %s3428_s1 }
0x12b3   :  { %v1134_v8 = vpop.permute.xlu1 %1133 }
0x12b4   :  { %v3973_v10 = vmul.f32 %v1134_v8, %v3652_v27 }
0x12b6   :  { %v3976_v16 = vadd.f32 %v1158_v6, %v3973_v10 }
0x12b7   :  { %v1139_v11 = vpop.permute.xlu1 %1138  ;;  %v1128_v18 = vpop.permute.xlu0 %1127 }
0x12b8   :  { %v1171_v15 = vrot.slane %v3976_v16, 2  ;;  %v3990_v50 = vmul.f32 %v1128_v18, %v3648_v25  ;;  %v1141_v20 = vmul.f32 %v1139_v11, %v3650_v26 }
0x12ba   :  { %1172 = vrot.lane.b32.xlu0 %v1171_v15, %s3427_s23  ;;  %v3994_v22 = vadd.f32 %v1141_v20, %v3990_v50 }
0x12bb   :  { %v1163_v61 = vpop.permute.xlu1 %1162 }
0x12bc   :  { %v1165_v19 = vmul.f32 %v1163_v61, %v3652_v27 }
0x12be   :  { %v3985_v9 = vadd.f32 %v1168_v58, %v1165_v19 }
0x12bf   :  { %v1146_v8 = vpop.permute.xlu1 %1145 }
0x12c0   :  { %v1266_v21 = vrot.slane %v3985_v9, 4  ;;  %v1148_v6 = vmul.f32 %v1146_v8, %v3648_v25 }
0x12c2   :  { %1267 = vrot.lane.b32.xlu1 %v1266_v21, %s3427_s23 }
0x132c   :  { %v1173_v53 = vpop.permute.xlu0 %1172 }
0x132d   :  { %v1175_v33 = vsel %vm395_vm0, %v3994_v22, %v1173_v53 }
0x132e   :  { %v1176_v49 = vpack.c.bf16 %v1175_v33, %v1175_v33 }
0x1330   :  { %v1178_v40 = vrot.slane %v1176_v49, 1 }
0x1332   :  { %2973 = vmatmul.mubr.msk.bf16.vlgmr.msra.gmra.mrb[12].mxu0 %vm246_vm1, %v1178_v40 }
0x1333   :  { %1573 = vmatprep.mubr.bf16.mxu0 %v3424_v1 }
0x1334   :  { %v1268_v18 = vpop.permute.xlu1 %1267 }
0x1405   :  { %v1216_v29 = vpop.f32.mrb[12].mxu0 }
0x1406   :  { %v1218_v45 = vpop.f32.mrb[13].mxu0  ;;  %v1225_v13 = vadd.f32 %v1223_v46, %v1216_v29 }
0x1407   :  { %v1228_v52 = vadd.f32 %v1226_v32, %v1218_v45  ;;  %v1220_v7 = vpop.f32.mrb[14].mxu0 }
0x1408   :  { %v1221_v39 = vpop.f32.mrb[15].mxu0  ;;  %v2974_v63 = vmul.f32 -1.442695, %v1225_v13 }
0x1409   :  { %3242 = vtanh.f32 %v1228_v52  ;;  %v2975_v59 = vmul.f32 -1.442695, %v1228_v52 }
0x140a   :  { %3244 = vtanh.f32 %v1225_v13 }
0x140b   :  { %3246 = vpow2.f32 %v2975_v59 }
0x140c   :  { %3248 = vpow2.f32 %v2974_v63  ;;  %v1315_v63 = vmul.f32 %v1171_v15, %v3654_v30  ;;  %v4033_v15 = vadd.f32 %v3973_v10, %v3787_v47  ;;  %v1300_v47 = vrot.slane %v3994_v22, 6 }
0x1413   :  { %v3243_v55 = vpop.eup %3242 }
0x1414   :  { %1272 = vrot.lane.b32.xlu0 %v3243_v55, %s3426_s3  ;;  %v3245_v56 = vpop.eup %3244 }
0x1415   :  { %v3247_v62 = vpop.eup %3246 }
0x1416   :  { %v1261_v0 = vadd.f32 1.0, %v3247_v62  ;;  %v3249_v5 = vpop.eup %3248 }
0x1417   :  { %v1232_v23 = vadd.f32 1.0, %v3249_v5 }
0x1418   :  { %1151 = vrot.lane.b32.xlu0 %v1150_v12, %s3428_s1  ;;  %3250 = vrcp.f32 %v1261_v0  ;;  %v4022_v0 = vadd.f32 %v3990_v50, %v3777_v60 }
0x1419   :  { %3252 = vrcp.f32 %v1232_v23 }
0x141c   :  { %1243 = vrot.lane.b32.xlu0 %v3245_v56, %s3426_s3 }
0x1422   :  { %v3251_v3 = vpop.eup %3250 }
0x1423   :  { %v3253_v61 = vpop.eup %3252  ;;  %v1270_v20 = vmul.f32 %v3251_v3, %v1268_v18 }
0x1486   :  { %v1273_v44 = vpop.permute.xlu0 %1272 }
0x1487   :  { %v1275_v4 = vmul.f32 %v3251_v3, %v1273_v44 }
0x1489   :  { %1277 = vrot.lane.b32.xlu1 %v1275_v4, %s3427_s23 }
0x148a   :  { %v1152_v42 = vpop.permute.xlu0 %1151 }
0x148b   :  { %v1154_v11 = vmul.f32 %v1152_v42, %v3650_v26 }
0x148d   :  { %v1155_v14 = vadd.f32 %v1154_v11, %v1148_v6 }
0x148e   :  { %v1244_v58 = vpop.permute.xlu0 %1243 }
0x148f   :  { %v1246_v19 = vmul.f32 %v3253_v61, %v1244_v58  ;;  %v1237_v21 = vrot.slane %v1155_v14, 2  ;;  %v1310_v8 = vrot.slane %v1155_v14, 6 }
0x1491   :  { %1248 = vrot.lane.b32.xlu1 %v1246_v19, %s3427_s23  ;;  %1238 = vrot.lane.b32.xlu0 %v1237_v21, %s3427_s23  ;;  %v1312_v42 = vmul.f32 %v1310_v8, %v3650_v26 }
0x14fb   :  { %v1278_v53 = vpop.permute.xlu1 %1277 }
0x14fc   :  { %v1280_v33 = vadd.f32 %v1278_v53, %v1270_v20  ;;  %v1380_v20 = vrot.slane %v3625_v43, 6  ;;  %v1323_v43 = vrot.slane %v3985_v9, 2 }
0x14fe   :  { %3254 = vtanh.f32 %v1280_v33  ;;  %v1318_v14 = vrot.slane %v1280_v33, 6 }
0x1503   :  { %v1239_v49 = vpop.permute.xlu0 %1238  ;;  %v1249_v29 = vpop.permute.xlu1 %1248 }
0x1504   :  { %v1241_v40 = vmul.f32 %v3253_v61, %v1239_v49 }
0x1506   :  { %v1251_v32 = vadd.f32 %v1249_v29, %v1241_v40 }
0x1508   :  { %v3255_v45 = vpop.eup %3254  ;;  %3256 = vtanh.f32 %v1251_v32  ;;  %v1305_v56 = vrot.slane %v1251_v32, 4 }
0x1509   :  { %1283 = vrot.lane.b32.xlu0 %v3255_v45, %s3426_s3 }
0x1512   :  { %v3257_v52 = vpop.eup %3256 }
0x1513   :  { %1254 = vrot.lane.b32.xlu1 %v3257_v52, %s3426_s3 }
0x157b   :  { %v1284_v7 = vpop.permute.xlu0 %1283 }
0x157c   :  { %v1286_v39 = vmul.f32 %v3251_v3, %v1284_v7 }
0x157e   :  { %v1294_v46 = vrot.slane %v1286_v39, 6 }
0x1580   :  { %1295 = vrot.lane.b32.xlu0 %v1294_v46, %s3427_s23 }
0x1585   :  { %v1255_v13 = vpop.permute.xlu1 %1254 }
0x1586   :  { %v1257_v55 = vmul.f32 %v3253_v61, %v1255_v13 }
0x1588   :  { %v1288_v12 = vrot.slane %v1257_v55, 4 }
0x158a   :  { %1289 = vrot.lane.b32.xlu1 %v1288_v12, %s3427_s23 }
0x158e   :  { %1306 = vrot.lane.b32.xlu1 %v1305_v56, %s3428_s1 }
0x15f2   :  { %v1296_v59 = vpop.permute.xlu0 %1295 }
0x15f3   :  { %v1298_v62 = vmul.f32 %v1296_v59, %v3652_v27  ;;  %v1325_v59 = vmul.f32 %v1323_v43, %v3654_v30 }
0x15f5   :  { %v4025_v5 = vadd.f32 %v1298_v62, %v3736_v48  ;;  %v1316_v23 = vadd.f32 %v1315_v63, %v1298_v62 }
0x15f7   :  { %v3049_v3 = vpack.i.bf16 %v4022_v0, %v4025_v5  ;;  %v1328_v44 = vrot.slane %v1316_v23, 6  ;;  %v4079_v0 = vld [vmem:[%s4639_s7] ss:$8 sps:$4 sm:$0xff]   ;;  %v4085_v5 = vld [vmem:[%s4639_s7 + $0x14] ss:$8 sps:$4 sm:$0xff]  }
0x15f9   :  { %1329 = vrot.lane.b32.xlu0 %v1328_v44, %s3427_s23 }
0x15fc   :  { %v1290_v4 = vpop.permute.xlu1 %1289 }
0x15fd   :  { %v1292_v16 = vmul.f32 %v1290_v4, %v3648_v25 }
0x15ff   :  { %v4036_v60 = vadd.f32 %v1292_v16, %v3719_v2  ;;  %v1302_v2 = vmul.f32 %v1300_v47, %v3650_v26 }
0x1600   :  { %v1307_v48 = vpop.permute.xlu1 %1306 }
0x1601   :  { %v3054_v50 = vpack.i.bf16 %v4036_v60, %v4033_v15  ;;  %v1309_v6 = vmul.f32 %v1307_v48, %v3648_v25  ;;  %v1303_v10 = vadd.f32 %v1302_v2, %v1292_v16  ;;  %v3131_v60 = vld [vmem:[%s4640_s5] ss:$8 sps:$4 sm:$0xff]  }
0x1603   :  { %v1313_v11 = vadd.f32 %v1312_v42, %v1309_v6 }
0x1605   :  { %v1392_v61 = vrot.slane %v1313_v11, 4 }
0x1607   :  { %1393 = vrot.lane.b32.xlu1 %v1392_v61, %s3427_s23 }
0x160b   :  { %1319 = vrot.lane.b32.xlu1 %v1318_v14, %s3428_s1 }
0x166b   :  { %v1330_v58 = vpop.permute.xlu0 %1329 }
0x166c   :  { %v1332_v19 = vsel %vm395_vm0, %v1303_v10, %v1330_v58 }
0x166d   :  { %v1333_v21 = vpack.c.bf16 %v1332_v19, %v1332_v19 }
0x166f   :  { %v1335_v18 = vrot.slane %v1333_v21, 2 }
0x1671   :  { %2976 = vmatmul.mubr.msk.bf16.vlgmr.msra.gmra.mrb[16].mxu1 %vm246_vm1, %v1335_v18 }
0x1672   :  { %1656 = vmatprep.mubr.bf16.mxu1 %v3424_v1 }
0x1679   :  { %v1394_v7 = vpop.permute.xlu1 %1393 }
0x167d   :  { %v1320_v46 = vpop.permute.xlu1 %1319 }
0x167e   :  { %v1322_v12 = vmul.f32 %v1320_v46, %v3652_v27 }
0x1680   :  { %v1326_v63 = vadd.f32 %v1325_v59, %v1322_v12  ;;  %v1453_v12 = vadd.f32 %v3908_v17, %v3836_v51 }
0x1682   :  { %v1421_v23 = vrot.slane %v1326_v63, 2 }
0x1744   :  { %v1373_v53 = vpop.f32.mrb[16].mxu1 }
0x1745   :  { %v1382_v33 = vadd.f32 %v1380_v20, %v1373_v53  ;;  %v1375_v49 = vpop.f32.mrb[17].mxu1  ;;  %v4073_v20 = vld [vmem:[%s4639_s7 + $0x4] ss:$8 sps:$4 sm:$0xff]  }
0x1746   :  { %v1377_v40 = vpop.f32.mrb[18].mxu1  ;;  %v1383_v39 = vadd.f32 %v1375_v49, %v3623_v41  ;;  %1624 = vmatprep.subr.bf16.mxu1 %v4073_v20  ;;  %v3139_v49 = vld [vmem:[%s4640_s5 + $0x14] ss:$8 sps:$4 sm:$0xff]  }
0x1747   :  { %3258 = vtanh.f32 %v1382_v33  ;;  %v1378_v22 = vpop.f32.mrb[19].mxu1  ;;  %v2977_v32 = vmul.f32 -1.442695, %v1382_v33  ;;  %1625 = vmatpush1.bf16.msra.mxu1 %v4079_v0  ;;  %v4100_v33 = vld [vmem:[%s4639_s7 + $0x10] ss:$8 sps:$4 sm:$0xff]  }
0x1748   :  { %v2978_v41 = vmul.f32 -1.442695, %v1383_v39  ;;  %1626 = vmatprep.subr.bf16.mxu1 %v4085_v5  ;;  %v4119_v40 = vld [vmem:[%s4639_s7 + $0x20] ss:$8 sps:$4 sm:$0xff]   ;;  %v4125_v22 = vld [vmem:[%s4639_s7 + $0x34] ss:$8 sps:$4 sm:$0xff]  }
0x1749   :  { %3260 = vpow2.f32 %v2977_v32 }
0x174b   :  { %1627 = vmatpush1.bf16.msra.mxu1 %v4100_v33 }
0x1751   :  { %v3259_v29 = vpop.eup %3258 }
0x1752   :  { %1398 = vrot.lane.b32.xlu0 %v3259_v29, %s3426_s3  ;;  %v4131_v29 = vld [vmem:[%s4639_s7 + $0x30] ss:$8 sps:$4 sm:$0xff]  }
0x1753   :  { %v3261_v45 = vpop.eup %3260 }
0x1754   :  { %v1387_v52 = vadd.f32 1.0, %v3261_v45 }
0x1756   :  { %3262 = vrcp.f32 %v1387_v52 }
0x1757   :  { %3264 = vtanh.f32 %v1383_v39 }
0x1758   :  { %3266 = vpow2.f32 %v2978_v41 }
0x1760   :  { %v3263_v13 = vpop.eup %3262 }
0x1761   :  { %v3265_v62 = vpop.eup %3264  ;;  %v1396_v9 = vmul.f32 %v3263_v13, %v1394_v7 }
0x1762   :  { %v3267_v44 = vpop.eup %3266 }
0x1763   :  { %v1416_v8 = vadd.f32 1.0, %v3267_v44 }
0x17c4   :  { %v1399_v55 = vpop.permute.xlu0 %1398 }
0x17c5   :  { %v1401_v56 = vmul.f32 %v3263_v13, %v1399_v55 }
0x17c7   :  { %1403 = vrot.lane.b32.xlu0 %v1401_v56, %s3427_s23 }
0x17cb   :  { %1427 = vrot.lane.b32.xlu0 %v3265_v62, %s3426_s3 }
0x17cf   :  { %1422 = vrot.lane.b32.xlu0 %v1421_v23, %s3427_s23 }
0x1839   :  { %v1404_v4 = vpop.permute.xlu0 %1403 }
0x183a   :  { %v1406_v16 = vadd.f32 %v1404_v4, %v1396_v9 }
0x183c   :  { %3268 = vtanh.f32 %v1406_v16 }
0x183d   :  { %3270 = vrcp.f32 %v1416_v8  ;;  %v1428_v42 = vpop.permute.xlu0 %1427 }
0x1841   :  { %v1423_v61 = vpop.permute.xlu0 %1422 }
0x1846   :  { %v3269_v48 = vpop.eup %3268 }
0x1847   :  { %1409 = vrot.lane.b32.xlu1 %v3269_v48, %s3426_s3  ;;  %v3271_v6 = vpop.eup %3270 }
0x1848   :  { %v1430_v11 = vmul.f32 %v3271_v6, %v1428_v42  ;;  %v1425_v2 = vmul.f32 %v3271_v6, %v1423_v61  ;;  %v1503_v42 = vld [vmem:[%s4641_s6] sm:$0x3] }
0x184b   :  { %1432 = vrot.lane.b32.xlu1 %v1430_v11, %s3427_s23  ;;  %v1512_v11 = vrot.slane %v1503_v42, %v72_v34 }
0x18b9   :  { %v1410_v14 = vpop.permute.xlu1 %1409 }
0x18ba   :  { %v1412_v47 = vmul.f32 %v3263_v13, %v1410_v14 }
0x18bc   :  { %v1443_v10 = vrot.slane %v1412_v47, 2 }
0x18bd   :  { %v1433_v58 = vpop.permute.xlu1 %1432 }
0x18be   :  { %v1435_v19 = vadd.f32 %v1433_v58, %v1425_v2  ;;  %1444 = vrot.lane.b32.xlu0 %v1443_v10, %s3427_s23 }
0x18c0   :  { %3272 = vtanh.f32 %v1435_v19 }
0x18c2   :  { %3050 = vrot.lane.b32.xlu0 %v3049_v3, %s3428_s1  ;;  %v1452_v3 = vadd.f32 %v3902_v54, %v3850_v57  ;;  %v3137_v54 = vld [vmem:[%s4640_s5 + $0x10] ss:$8 sps:$4 sm:$0xff]  }
0x18ca   :  { %v3273_v21 = vpop.eup %3272 }
0x18cb   :  { %1438 = vrot.lane.b32.xlu1 %v3273_v21, %s3426_s3 }
0x18cf   :  { %3055 = vrot.lane.b32.xlu1 %v3054_v50, %s3428_s1  ;;  %v3133_v50 = vld [vmem:[%s4640_s5 + $0x4] ss:$8 sps:$4 sm:$0xff]  }
0x18d0   :  { %1541 = vmatprep.subr.bf16.mxu0 %v3133_v50 }
0x18d1   :  { %1542 = vmatpush1.bf16.msra.mxu0 %v3131_v60 }
0x18d2   :  { %1543 = vmatprep.subr.bf16.mxu0 %v3139_v49 }
0x18d5   :  { %1544 = vmatpush1.bf16.msra.mxu0 %v3137_v54 }
0x18d6   :  { %1750 = vmatprep.subr.bf16.mxu0 %v4073_v20 }
0x1930   :  { %v1445_v18 = vpop.permute.xlu0 %1444 }
0x1931   :  { %v1447_v53 = vmul.f32 %v1445_v18, %v3648_v25 }
0x1933   :  { %v1456_v15 = vadd.f32 %v1447_v53, %v3663_v37  ;;  %v4106_v37 = vld [vmem:[%s4639_s7 + $0x24] ss:$8 sps:$4 sm:$0xff]  }
0x1934   :  { %1628 = vmatprep.subr.bf16.mxu1 %v4106_v37  ;;  %v3051_v52 = vpop.permute.xlu0 %3050 }
0x1935   :  { %v3059_v57 = vpack.i.bf16 %v1456_v15, %v1452_v3  ;;  %1629 = vmatpush1.bf16.msra.mxu1 %v4119_v40  ;;  %v3053_v46 = vunpack.i.h.bf16 %v3051_v52  ;;  %v3052_v43 = vunpack.i.l.bf16 %v3051_v52 }
0x1936   :  { %1630 = vmatprep.subr.bf16.mxu1 %v4125_v22 }
0x1937   :  { %3060 = vrot.lane.b32.xlu0 %v3059_v57, %s3428_s1  ;;  %v1487_v63 = vsel %vm1481_vm2, %v1453_v12, %v3053_v46 }
0x1939   :  { %1631 = vmatpush1.bf16.msra.mxu1 %v4131_v29 }
0x193a   :  { %1908 = vmatprep.subr.bf16.mxu1 %v4073_v20 }
0x193c   :  { %1657 = vmatmul.mubr.bf16.vlgmr.msra.gmra.mrb[20].mxu1 %v3425_v24 }
0x193d   :  { %1909 = vmatpush1.bf16.msra.mxu1 %v4079_v0  ;;  %1940 = vmatprep.mubr.bf16.mxu1 %v3424_v1  ;;  %v1439_v32 = vpop.permute.xlu1 %1438 }
0x193e   :  { %1910 = vmatprep.subr.bf16.mxu1 %v4085_v5  ;;  %v1441_v24 = vmul.f32 %v3271_v6, %v1439_v32  ;;  %v1508_v6 = vrot.slane %v1503_v42, %v68_v31 }
0x1940   :  { %v1448_v45 = vmul.f32 %v1441_v24, %v3652_v27 }
0x1941   :  { %1911 = vmatpush1.bf16.msra.mxu1 %v4100_v33  ;;  %v3056_v39 = vpop.permute.xlu1 %3055 }
0x1942   :  { %1912 = vmatprep.subr.bf16.mxu1 %v4106_v37  ;;  %v1449_v7 = vadd.f32 %v1448_v45, %v3657_v35  ;;  %v3058_v13 = vunpack.i.h.bf16 %v3056_v39  ;;  %v3057_v55 = vunpack.i.l.bf16 %v3056_v39 }
0x1944   :  { %v1482_v56 = vsel %vm1481_vm2, %v1449_v7, %v3052_v43  ;;  %v1488_v35 = vsel %vm1483_vm3, %v1487_v63, %v3058_v13 }
0x1945   :  { %1913 = vmatpush1.bf16.msra.mxu1 %v4119_v40  ;;  %v1484_v41 = vsel %vm1483_vm3, %v1482_v56, %v3057_v55 }
0x1946   :  { %1914 = vmatprep.subr.bf16.mxu1 %v4125_v22 }
0x1949   :  { %1915 = vmatpush1.bf16.msra.mxu1 %v4131_v29 }
0x194a   :  { %2218 = vmatprep.subr.bf16.mxu1 %v4073_v20 }
0x19a9   :  { %v3061_v59 = vpop.permute.xlu0 %3060 }
0x19aa   :  { %v3063_v62 = vunpack.i.h.bf16 %v3061_v59  ;;  %v3062_v23 = vunpack.i.l.bf16 %v3061_v59 }
0x19ac   :  { %v1486_v44 = vsel %vm1485_vm4, %v1484_v41, %v3062_v23  ;;  %v1489_v9 = vsel %vm1485_vm4, %v1488_v35, %v3063_v62 }
0x19ad   :  { %v1498_v4 = vpack.c.bf16 %v1489_v9, %v1486_v44 }
0x19af   :  { %1516 = vrot.lane.b32.xlu1 %v1498_v4, %s3427_s23 }
0x1a0f   :  { %v1658_v17 = vpop.f32.mrb[20].mxu1 }
0x1a10   :  { %v1660_v8 = vpop.f32.mrb[21].mxu1 }
0x1a11   :  { %v1662_v16 = vpop.f32.mrb[22].mxu1 }
0x1a12   :  { %v1663_v48 = vpop.f32.mrb[23].mxu1 }
0x1a21   :  { %v1517_v51 = vpop.permute.xlu1 %1516 }
0x1a22   :  { %2983 = vmatmul.mubr.msk.bf16.vlgmr.msra.gmra.mrb[16].mxu0 %vm395_vm0, %v1517_v51 }
0x1a23   :  { %1751 = vmatpush1.bf16.msra.mxu0 %v4079_v0  ;;  %1782 = vmatprep.mubr.bf16.mxu0 %v3424_v1 }
0x1a24   :  { %1752 = vmatprep.subr.bf16.mxu0 %v4085_v5 }
0x1a27   :  { %1753 = vmatpush1.bf16.msra.mxu0 %v4100_v33 }
0x1a28   :  { %1754 = vmatprep.subr.bf16.mxu0 %v4106_v37 }
0x1a2b   :  { %1755 = vmatpush1.bf16.msra.mxu0 %v4119_v40 }
0x1a2c   :  { %1756 = vmatprep.subr.bf16.mxu0 %v4125_v22 }
0x1a2f   :  { %1757 = vmatpush1.bf16.msra.mxu0 %v4131_v29 }
0x1a30   :  { %2065 = vmatprep.subr.bf16.mxu0 %v4073_v20 }
0x1af5   :  { %v1575_v61 = vpop.f32.mrb[16].mxu0 }
0x1af6   :  { %v4175_v14 = vadd.f32 %v1575_v61, %v1508_v6  ;;  %v1577_v47 = vpop.f32.mrb[17].mxu0 }
0x1af7   :  { %v4177_v2 = vadd.f32 %v1577_v47, %v1512_v11  ;;  %v1579_v10 = vpop.f32.mrb[18].mxu0 }
0x1af8   :  { %v4179_v58 = vadd.f32 %v1579_v10, %v1508_v6  ;;  %v1665_v19 = vadd.f32 %v1658_v17, %v4175_v14  ;;  %v1581_v21 = vpop.f32.mrb[19].mxu0 }
0x1af9   :  { %v4182_v18 = vadd.f32 %v1581_v21, %v1512_v11 }
0x1afa   :  { %v2992_v15 = vmul.f32 -1.442695, %v1665_v19 }
0x1afb   :  { %v1667_v53 = vrot.slane %v4182_v18, 6 }
0x1afd   :  { %v1669_v31 = vadd.f32 %v1667_v53, %v1660_v8 }
0x1aff   :  { %3274 = vtanh.f32 %v1669_v31  ;;  %v2993_v3 = vmul.f32 -1.442695, %v1669_v31 }
0x1b00   :  { %3276 = vtanh.f32 %v1665_v19 }
0x1b01   :  { %3278 = vpow2.f32 %v2993_v3 }
0x1b02   :  { %3280 = vpow2.f32 %v2992_v15 }
0x1b09   :  { %v3275_v28 = vpop.eup %3274 }
0x1b0a   :  { %1703 = vrot.lane.b32.xlu0 %v3275_v28, %s3426_s3  ;;  %v3277_v34 = vpop.eup %3276  ;;  %v1795_v28 = vrot.slane %v4182_v18, 4 }
0x1b0b   :  { %v3279_v60 = vpop.eup %3278 }
0x1b0c   :  { %v1697_v50 = vadd.f32 1.0, %v3279_v60  ;;  %v3281_v57 = vpop.eup %3280 }
0x1b0d   :  { %v1673_v54 = vadd.f32 1.0, %v3281_v57 }
0x1b0e   :  { %1679 = vrot.lane.b32.xlu0 %v3277_v34, %s3426_s3  ;;  %3282 = vrcp.f32 %v1697_v50 }
0x1b0f   :  { %3284 = vrcp.f32 %v1673_v54 }
0x1b18   :  { %v3283_v49 = vpop.eup %3282 }
0x1b19   :  { %v3285_v45 = vpop.eup %3284  ;;  %v1701_v39 = vmul.f32 0.0, %v3283_v49 }
0x1b1a   :  { %v1677_v13 = vmul.f32 0.0, %v3285_v45 }
0x1b7c   :  { %v1704_v32 = vpop.permute.xlu0 %1703 }
0x1b7d   :  { %v1706_v24 = vmul.f32 %v3283_v49, %v1704_v32 }
0x1b7f   :  { %1708 = vrot.lane.b32.xlu1 %v1706_v24, %s3427_s23 }
0x1b80   :  { %v1680_v52 = vpop.permute.xlu0 %1679 }
0x1b81   :  { %v1682_v7 = vmul.f32 %v3285_v45, %v1680_v52 }
0x1b83   :  { %1684 = vrot.lane.b32.xlu1 %v1682_v7, %s3427_s23 }
0x1bf1   :  { %v1709_v46 = vpop.permute.xlu1 %1708 }
0x1bf2   :  { %v1711_v43 = vadd.f32 %v1709_v46, %v1701_v39 }
0x1bf4   :  { %3286 = vtanh.f32 %v1711_v43  ;;  %v1730_v35 = vrot.slane %v1711_v43, 2 }
0x1bf5   :  { %v1685_v55 = vpop.permute.xlu1 %1684 }
0x1bf6   :  { %v4189_v12 = vadd.f32 %v1685_v55, %v1677_v13 }
0x1bf8   :  { %3288 = vtanh.f32 %v4189_v12 }
0x1bfe   :  { %v3287_v56 = vpop.eup %3286 }
0x1bff   :  { %1714 = vrot.lane.b32.xlu0 %v3287_v56, %s3426_s3 }
0x1c02   :  { %v3289_v59 = vpop.eup %3288 }
0x1c03   :  { %1690 = vrot.lane.b32.xlu1 %v3289_v59, %s3426_s3 }
0x1c71   :  { %v1715_v63 = vpop.permute.xlu0 %1714 }
0x1c72   :  { %v1717_v62 = vmul.f32 %v3283_v49, %v1715_v63  ;;  %v1726_v63 = vmul.f32 %v4189_v12, %v3652_v27 }
0x1c74   :  { %v1720_v23 = vrot.slane %v1717_v62, 2 }
0x1c75   :  { %v1691_v41 = vpop.permute.xlu1 %1690 }
0x1c76   :  { %1721 = vrot.lane.b32.xlu0 %v1720_v23, %s3427_s23  ;;  %v1693_v44 = vmul.f32 %v3285_v45, %v1691_v41  ;;  %v4239_v41 = vadd.f32 %v1726_v63, %v3666_v38 }
0x1c78   :  { %v4197_v4 = vmul.f32 %v1693_v44, %v3652_v27 }
0x1c7a   :  { %1731 = vrot.lane.b32.xlu0 %v1730_v35, %s3428_s1  ;;  %v4208_v16 = vadd.f32 %v4197_v4, %v3666_v38 }
0x1ce8   :  { %v1722_v9 = vpop.permute.xlu0 %1721 }
0x1ce9   :  { %v4200_v51 = vmul.f32 %v1722_v9, %v3648_v25 }
0x1ceb   :  { %v4204_v17 = vadd.f32 %v4200_v51, %v3660_v36 }
0x1cec   :  { %v1732_v8 = vpop.permute.xlu0 %1731 }
0x1ced   :  { %v1741_v48 = vrot.slane %v4204_v17, 6  ;;  %v1734_v42 = vmul.f32 %v1732_v8, %v3648_v25 }
0x1cef   :  { %v4213_v6 = vadd.f32 %v1734_v42, %v3660_v36  ;;  %v3064_v11 = vpack.i.bf16 %v1741_v48, %v4208_v16  ;;  %v1792_v36 = vrot.slane %v4175_v14, 2 }
0x1cf1   :  { %v1830_v61 = vrot.slane %v4213_v6, 6  ;;  %3065 = vrot.lane.b32.xlu1 %v3064_v11, %s3427_s23 }
0x1cf3   :  { %1831 = vrot.lane.b32.xlu0 %v1830_v61, %s3427_s23 }
0x1d63   :  { %v3066_v47 = vpop.permute.xlu1 %3065 }
0x1d64   :  { %v3068_v10 = vunpack.i.h.bf16 %v3066_v47  ;;  %v3067_v19 = vunpack.i.l.bf16 %v3066_v47 }
0x1d65   :  { %v1832_v59 = vpop.permute.xlu0 %1831 }
0x1d66   :  { %v1745_v21 = vsel %vm395_vm0, %v3067_v19, %v3068_v10  ;;  %v1863_v19 = vrot.slane %v4208_v16, 6 }
0x1d67   :  { %v1746_v53 = vpack.c.bf16 %v1745_v21, %v1745_v21 }
0x1d69   :  { %2994 = vmatmul.mubr.msk.bf16.vlgmr.msra.gmra.mrb[20].mxu0 %vm246_vm1, %v1746_v53 }
0x1d6a   :  { %2066 = vmatpush1.bf16.msra.mxu0 %v4079_v0  ;;  %2097 = vmatprep.mubr.bf16.mxu0 %v3424_v1 }
0x1d6b   :  { %2067 = vmatprep.subr.bf16.mxu0 %v4085_v5 }
0x1d6e   :  { %2068 = vmatpush1.bf16.msra.mxu0 %v4100_v33 }
0x1d6f   :  { %2069 = vmatprep.subr.bf16.mxu0 %v4106_v37 }
0x1d72   :  { %2070 = vmatpush1.bf16.msra.mxu0 %v4119_v40 }
0x1d73   :  { %2071 = vmatprep.subr.bf16.mxu0 %v4125_v22 }
0x1d76   :  { %2072 = vmatpush1.bf16.msra.mxu0 %v4131_v29 }
0x1d77   :  { %2373 = vmatprep.subr.bf16.mxu0 %v4073_v20 }
0x1e3c   :  { %v1784_v31 = vpop.f32.mrb[20].mxu0 }
0x1e3d   :  { %v1794_v34 = vadd.f32 %v1792_v36, %v1784_v31  ;;  %v1786_v3 = vpop.f32.mrb[21].mxu0  ;;  %v1882_v36 = vrot.slane %v4204_v17, 2 }
0x1e3e   :  { %v1797_v15 = vadd.f32 %v1795_v28, %v1786_v3  ;;  %v1788_v60 = vpop.f32.mrb[22].mxu0 }
0x1e3f   :  { %v1789_v50 = vpop.f32.mrb[23].mxu0  ;;  %v2995_v32 = vmul.f32 -1.442695, %v1794_v34  ;;  %v1884_v28 = vmul.f32 %v1882_v36, %v3650_v26 }
0x1e40   :  { %3290 = vtanh.f32 %v1797_v15  ;;  %v2996_v49 = vmul.f32 -1.442695, %v1797_v15  ;;  %v1892_v15 = vrot.slane %v4213_v6, 2 }
0x1e41   :  { %3292 = vtanh.f32 %v1794_v34 }
0x1e42   :  { %3294 = vpow2.f32 %v2996_v49  ;;  %v1894_v17 = vmul.f32 %v1892_v15, %v3650_v26 }
0x1e43   :  { %3296 = vpow2.f32 %v2995_v32 }
0x1e4a   :  { %v3291_v57 = vpop.eup %3290 }
0x1e4b   :  { %1836 = vrot.lane.b32.xlu1 %v3291_v57, %s3426_s3  ;;  %v3293_v54 = vpop.eup %3292 }
0x1e4c   :  { %v3295_v24 = vpop.eup %3294 }
0x1e4d   :  { %v1825_v45 = vadd.f32 1.0, %v3295_v24  ;;  %v3297_v52 = vpop.eup %3296 }
0x1e4e   :  { %v1801_v7 = vadd.f32 1.0, %v3297_v52 }
0x1e4f   :  { %1807 = vrot.lane.b32.xlu1 %v3293_v54, %s3426_s3  ;;  %3298 = vrcp.f32 %v1825_v45 }
0x1e50   :  { %3300 = vrcp.f32 %v1801_v7 }
0x1e59   :  { %v3299_v39 = vpop.eup %3298 }
0x1e5a   :  { %v3301_v13 = vpop.eup %3300  ;;  %v1834_v62 = vmul.f32 %v3299_v39, %v1832_v59 }
0x1e5b   :  { %v1805_v44 = vmul.f32 %v3301_v13, %v4239_v41 }
0x1ebd   :  { %v1837_v46 = vpop.permute.xlu1 %1836 }
0x1ebe   :  { %v1839_v43 = vmul.f32 %v3299_v39, %v1837_v46 }
0x1ec0   :  { %1841 = vrot.lane.b32.xlu0 %v1839_v43, %s3427_s23  ;;  %v1949_v43 = vrot.slane %v4175_v14, 4 }
0x1ec1   :  { %v1808_v55 = vpop.permute.xlu1 %1807 }
0x1ec2   :  { %v1810_v56 = vmul.f32 %v3301_v13, %v1808_v55  ;;  %v1952_v55 = vrot.slane %v4182_v18, 2 }
0x1ec4   :  { %1812 = vrot.lane.b32.xlu1 %v1810_v56, %s3427_s23 }
0x1f32   :  { %v1842_v23 = vpop.permute.xlu0 %1841 }
0x1f33   :  { %v1844_v35 = vadd.f32 %v1842_v23, %v1834_v62 }
0x1f35   :  { %3302 = vtanh.f32 %v1844_v35  ;;  %v1887_v21 = vrot.slane %v1844_v35, 4 }
0x1f36   :  { %v1813_v9 = vpop.permute.xlu1 %1812 }
0x1f37   :  { %v1815_v8 = vadd.f32 %v1813_v9, %v1805_v44  ;;  %v1876_v44 = vrot.slane %v4239_v41, 6 }
0x1f39   :  { %3304 = vtanh.f32 %v1815_v8  ;;  %v1870_v53 = vrot.slane %v1815_v8, 6 }
0x1f3f   :  { %v3303_v48 = vpop.eup %3302 }
0x1f40   :  { %1847 = vrot.lane.b32.xlu0 %v3303_v48, %s3426_s3 }
0x1f43   :  { %v3305_v42 = vpop.eup %3304 }
0x1f44   :  { %1818 = vrot.lane.b32.xlu1 %v3305_v42, %s3426_s3 }
0x1fb2   :  { %v1848_v11 = vpop.permute.xlu0 %1847 }
0x1fb3   :  { %v1850_v12 = vmul.f32 %v3299_v39, %v1848_v11 }
0x1fb5   :  { %v1858_v61 = vrot.slane %v1850_v12, 4 }
0x1fb6   :  { %v1819_v47 = vpop.permute.xlu1 %1818 }
0x1fb7   :  { %v1821_v10 = vmul.f32 %v3301_v13, %v1819_v47  ;;  %1859 = vrot.lane.b32.xlu0 %v1858_v61, %s3427_s23 }
0x1fb9   :  { %v1852_v38 = vrot.slane %v1821_v10, 6 }
0x1fbb   :  { %1853 = vrot.lane.b32.xlu1 %v1852_v38, %s3427_s23  ;;  %1864 = vrot.lane.b32.xlu0 %v1863_v19, %s3427_s23 }
0x1fbf   :  { %1888 = vrot.lane.b32.xlu0 %v1887_v21, %s3428_s1 }
0x1fc3   :  { %1871 = vrot.lane.b32.xlu0 %v1870_v53, %s3428_s1 }
0x2029   :  { %v1860_v31 = vpop.permute.xlu0 %1859 }
0x202a   :  { %v4253_v34 = vmul.f32 %v1860_v31, %v3648_v25 }
0x202c   :  { %v4256_v16 = vadd.f32 %v1884_v28, %v4253_v34 }
0x202d   :  { %v1865_v3 = vpop.permute.xlu0 %1864  ;;  %v1854_v32 = vpop.permute.xlu1 %1853 }
0x202e   :  { %v1897_v60 = vrot.slane %v4256_v16, 2  ;;  %v4270_v6 = vmul.f32 %v1854_v32, %v3652_v27  ;;  %v1867_v24 = vmul.f32 %v1865_v3, %v3654_v30 }
0x2030   :  { %1898 = vrot.lane.b32.xlu1 %v1897_v60, %s3427_s23  ;;  %v4274_v45 = vadd.f32 %v1867_v24, %v4270_v6 }
0x2031   :  { %v1889_v50 = vpop.permute.xlu0 %1888 }
0x2032   :  { %v1891_v57 = vmul.f32 %v1889_v50, %v3648_v25 }
0x2034   :  { %v4265_v54 = vadd.f32 %v1894_v17, %v1891_v57 }
0x2035   :  { %v1872_v19 = vpop.permute.xlu0 %1871 }
0x2036   :  { %v1992_v49 = vrot.slane %v4265_v54, 4  ;;  %v1874_v21 = vmul.f32 %v1872_v19, %v3652_v27 }
0x2038   :  { %1993 = vrot.lane.b32.xlu0 %v1992_v49, %s3427_s23 }
0x20a2   :  { %v1899_v52 = vpop.permute.xlu1 %1898 }
0x20a3   :  { %v1901_v7 = vsel %vm395_vm0, %v4274_v45, %v1899_v52 }
0x20a4   :  { %v1902_v39 = vpack.c.bf16 %v1901_v7, %v1901_v7 }
0x20a6   :  { %v1904_v46 = vrot.slane %v1902_v39, 1 }
0x20a8   :  { %2997 = vmatmul.mubr.msk.bf16.vlgmr.msra.gmra.mrb[24].mxu1 %vm246_vm1, %v1904_v46 }
0x20a9   :  { %2219 = vmatpush1.bf16.msra.mxu1 %v4079_v0  ;;  %2250 = vmatprep.mubr.bf16.mxu1 %v3424_v1 }
0x20aa   :  { %2220 = vmatprep.subr.bf16.mxu1 %v4085_v5  ;;  %v1994_v50 = vpop.permute.xlu0 %1993 }
0x20ad   :  { %2221 = vmatpush1.bf16.msra.mxu1 %v4100_v33 }
0x20ae   :  { %2222 = vmatprep.subr.bf16.mxu1 %v4106_v37 }
0x20b1   :  { %2223 = vmatpush1.bf16.msra.mxu1 %v4119_v40 }
0x20b2   :  { %2224 = vmatprep.subr.bf16.mxu1 %v4125_v22 }
0x20b5   :  { %2225 = vmatpush1.bf16.msra.mxu1 %v4131_v29 }
0x20b6   :  { %2531 = vmatprep.subr.bf16.mxu1 %v4073_v20 }
0x217b   :  { %v1942_v13 = vpop.f32.mrb[24].mxu1 }
0x217c   :  { %v1951_v56 = vadd.f32 %v1949_v43, %v1942_v13  ;;  %v1944_v59 = vpop.f32.mrb[25].mxu1 }
0x217d   :  { %v1954_v63 = vadd.f32 %v1952_v55, %v1944_v59  ;;  %v1946_v62 = vpop.f32.mrb[26].mxu1 }
0x217e   :  { %v1947_v23 = vpop.f32.mrb[27].mxu1  ;;  %v2998_v48 = vmul.f32 -1.442695, %v1951_v56 }
0x217f   :  { %3306 = vtanh.f32 %v1954_v63  ;;  %v2999_v8 = vmul.f32 -1.442695, %v1954_v63 }
0x2180   :  { %3308 = vtanh.f32 %v1951_v56 }
0x2181   :  { %3310 = vpow2.f32 %v2999_v8 }
0x2182   :  { %3312 = vpow2.f32 %v2998_v48 }
0x2189   :  { %v3307_v35 = vpop.eup %3306 }
0x218a   :  { %1998 = vrot.lane.b32.xlu1 %v3307_v35, %s3426_s3  ;;  %v3309_v9 = vpop.eup %3308  ;;  %v2041_v35 = vmul.f32 %v1897_v60, %v3650_v26 }
0x218b   :  { %v3311_v42 = vpop.eup %3310 }
0x218c   :  { %v1987_v11 = vadd.f32 1.0, %v3311_v42  ;;  %v3313_v12 = vpop.eup %3312 }
0x218d   :  { %v1958_v61 = vadd.f32 1.0, %v3313_v12 }
0x218e   :  { %1877 = vrot.lane.b32.xlu1 %v1876_v44, %s3428_s1  ;;  %3314 = vrcp.f32 %v1987_v11  ;;  %v2026_v11 = vrot.slane %v4274_v45, 6  ;;  %v2106_v45 = vrot.slane %v4175_v14, 6 }
0x218f   :  { %3316 = vrcp.f32 %v1958_v61 }
0x2190   :  { %v2028_v16 = vmul.f32 %v2026_v11, %v3654_v30 }
0x2192   :  { %1969 = vrot.lane.b32.xlu1 %v3309_v9, %s3426_s3 }
0x2198   :  { %v3315_v47 = vpop.eup %3314 }
0x2199   :  { %v3317_v31 = vpop.eup %3316  ;;  %v1996_v17 = vmul.f32 %v3315_v47, %v1994_v50 }
0x21fc   :  { %v1999_v10 = vpop.permute.xlu1 %1998 }
0x21fd   :  { %v2001_v38 = vmul.f32 %v3315_v47, %v1999_v10 }
0x21ff   :  { %2003 = vrot.lane.b32.xlu0 %v2001_v38, %s3427_s23 }
0x2200   :  { %v1878_v41 = vpop.permute.xlu1 %1877 }
0x2201   :  { %v1880_v53 = vmul.f32 %v1878_v41, %v3654_v30 }
0x2203   :  { %v4297_v36 = vadd.f32 %v1880_v53, %v1874_v21 }
0x2204   :  { %v1970_v28 = vpop.permute.xlu1 %1969 }
0x2205   :  { %v1963_v3 = vrot.slane %v4297_v36, 2  ;;  %v1972_v15 = vmul.f32 %v3317_v31, %v1970_v28 }
0x2207   :  { %1974 = vrot.lane.b32.xlu0 %v1972_v15, %s3427_s23  ;;  %1964 = vrot.lane.b32.xlu1 %v1963_v3, %s3427_s23  ;;  %v2036_v15 = vrot.slane %v4297_v36, 6 }
0x2209   :  { %v2038_v14 = vmul.f32 %v2036_v15, %v3654_v30 }
0x2271   :  { %v2004_v57 = vpop.permute.xlu0 %2003 }
0x2272   :  { %v2006_v49 = vadd.f32 %v2004_v57, %v1996_v17  ;;  %v2049_v17 = vrot.slane %v4265_v54, 2 }
0x2274   :  { %3318 = vtanh.f32 %v2006_v49  ;;  %v2044_v48 = vrot.slane %v2006_v49, 6  ;;  %v2051_v49 = vmul.f32 %v2049_v17, %v3650_v26 }
0x2279   :  { %v1965_v32 = vpop.permute.xlu1 %1964  ;;  %v1975_v52 = vpop.permute.xlu0 %1974 }
0x227a   :  { %v1967_v24 = vmul.f32 %v3317_v31, %v1965_v32 }
0x227c   :  { %v1977_v7 = vadd.f32 %v1975_v52, %v1967_v24 }
0x227e   :  { %v3319_v39 = vpop.eup %3318  ;;  %3320 = vtanh.f32 %v1977_v7  ;;  %v2031_v62 = vrot.slane %v1977_v7, 4 }
0x227f   :  { %2009 = vrot.lane.b32.xlu1 %v3319_v39, %s3426_s3 }
0x2288   :  { %v3321_v46 = vpop.eup %3320 }
0x2289   :  { %1980 = vrot.lane.b32.xlu0 %v3321_v46, %s3426_s3 }
0x22f1   :  { %v2010_v43 = vpop.permute.xlu1 %2009 }
0x22f2   :  { %v2012_v13 = vmul.f32 %v3315_v47, %v2010_v43 }
0x22f4   :  { %v2020_v55 = vrot.slane %v2012_v13, 6 }
0x22f6   :  { %2021 = vrot.lane.b32.xlu1 %v2020_v55, %s3427_s23 }
0x22fb   :  { %v1981_v56 = vpop.permute.xlu0 %1980 }
0x22fc   :  { %v1983_v59 = vmul.f32 %v3317_v31, %v1981_v56 }
0x22fe   :  { %v2014_v63 = vrot.slane %v1983_v59, 4 }
0x2300   :  { %2015 = vrot.lane.b32.xlu0 %v2014_v63, %s3427_s23 }
0x2304   :  { %2032 = vrot.lane.b32.xlu0 %v2031_v62, %s3428_s1 }
0x2368   :  { %v2022_v23 = vpop.permute.xlu1 %2021 }
0x2369   :  { %v4311_v44 = vmul.f32 %v2022_v23, %v3648_v25 }
0x236b   :  { %v4314_v9 = vadd.f32 %v2041_v35, %v4311_v44 }
0x236d   :  { %v2054_v8 = vrot.slane %v4314_v9, 6 }
0x236f   :  { %2055 = vrot.lane.b32.xlu1 %v2054_v8, %s3427_s23 }
0x2372   :  { %v2016_v42 = vpop.permute.xlu0 %2015 }
0x2373   :  { %2045 = vrot.lane.b32.xlu1 %v2044_v48, %s3428_s1  ;;  %v4321_v12 = vmul.f32 %v2016_v42, %v3652_v27 }
0x2375   :  { %v4325_v60 = vadd.f32 %v2028_v16, %v4321_v12 }
0x2376   :  { %v2033_v3 = vpop.permute.xlu0 %2032 }
0x2377   :  { %v2035_v57 = vmul.f32 %v2033_v3, %v3652_v27 }
0x2379   :  { %v4347_v32 = vadd.f32 %v2038_v14, %v2035_v57 }
0x237b   :  { %v2118_v54 = vrot.slane %v4347_v32, 4 }
0x23e1   :  { %v2056_v61 = vpop.permute.xlu1 %2055 }
0x23e2   :  { %v2058_v47 = vsel %vm395_vm0, %v4325_v60, %v2056_v61 }
0x23e3   :  { %v2059_v10 = vpack.c.bf16 %v2058_v47, %v2058_v47 }
0x23e5   :  { %v2061_v38 = vrot.slane %v2059_v10, 2  ;;  %v2046_v50 = vpop.permute.xlu1 %2045 }
0x23e7   :  { %3000 = vmatmul.mubr.msk.bf16.vlgmr.msra.gmra.mrb[24].mxu0 %vm246_vm1, %v2061_v38  ;;  %v2190_v38 = vrot.slane %v4314_v9, 2 }
0x23e8   :  { %2374 = vmatpush1.bf16.msra.mxu0 %v4079_v0  ;;  %2405 = vmatprep.mubr.bf16.mxu0 %v3424_v1 }
0x23e9   :  { %2375 = vmatprep.subr.bf16.mxu0 %v4085_v5 }
0x23ec   :  { %2376 = vmatpush1.bf16.msra.mxu0 %v4100_v33 }
0x23ed   :  { %2377 = vmatprep.subr.bf16.mxu0 %v4106_v37 }
0x23f0   :  { %2378 = vmatpush1.bf16.msra.mxu0 %v4119_v40 }
0x23f1   :  { %2379 = vmatprep.subr.bf16.mxu0 %v4125_v22 }
0x23f4   :  { %2380 = vmatpush1.bf16.msra.mxu0 %v4131_v29 }
0x23f5   :  { %2688 = vmatprep.subr.bf16.mxu0 %v4073_v20  ;;  %v2048_v20 = vmul.f32 %v2046_v50, %v3648_v25 }
0x23f7   :  { %v4349_v24 = vadd.f32 %v2051_v49, %v2048_v20  ;;  %v2176_v20 = vrot.slane %v4325_v60, 6 }
0x23f9   :  { %v2147_v36 = vrot.slane %v4349_v24, 2  ;;  %v2178_v49 = vmul.f32 %v2176_v20, %v3654_v30 }
0x24ba   :  { %v2099_v19 = vpop.f32.mrb[24].mxu0 }
0x24bb   :  { %v2108_v41 = vadd.f32 %v2106_v45, %v2099_v19  ;;  %v2101_v21 = vpop.f32.mrb[25].mxu0 }
0x24bc   :  { %v2109_v53 = vadd.f32 %v2101_v21, %v4182_v18  ;;  %v2103_v31 = vpop.f32.mrb[26].mxu0 }
0x24bd   :  { %3322 = vtanh.f32 %v2108_v41  ;;  %v2104_v28 = vpop.f32.mrb[27].mxu0  ;;  %v3001_v7 = vmul.f32 -1.442695, %v2108_v41  ;;  %v2192_v41 = vmul.f32 %v2190_v38, %v3650_v26 }
0x24be   :  { %3324 = vtanh.f32 %v2109_v53  ;;  %v3002_v39 = vmul.f32 -1.442695, %v2109_v53 }
0x24bf   :  { %3326 = vpow2.f32 %v3001_v7 }
0x24c0   :  { %3328 = vpow2.f32 %v3002_v39 }
0x24c7   :  { %v3323_v18 = vpop.eup %3322 }
0x24c8   :  { %v3325_v52 = vpop.eup %3324  ;;  %2124 = vrot.lane.b32.xlu0 %v3323_v18, %s3426_s3 }
0x24c9   :  { %2153 = vrot.lane.b32.xlu1 %v3325_v52, %s3426_s3  ;;  %v3327_v46 = vpop.eup %3326 }
0x24ca   :  { %v3329_v43 = vpop.eup %3328  ;;  %v2113_v13 = vadd.f32 1.0, %v3327_v46 }
0x24cb   :  { %v2142_v55 = vadd.f32 1.0, %v3329_v43  ;;  %v2261_v43 = vrot.slane %v4177_v2, 6 }
0x24cc   :  { %2119 = vrot.lane.b32.xlu0 %v2118_v54, %s3427_s23  ;;  %3330 = vrcp.f32 %v2113_v13 }
0x24cd   :  { %2148 = vrot.lane.b32.xlu1 %v2147_v36, %s3427_s23  ;;  %3332 = vrcp.f32 %v2142_v55 }
0x24d6   :  { %v3331_v56 = vpop.eup %3330 }
0x24d7   :  { %v3333_v63 = vpop.eup %3332 }
0x253a   :  { %v2125_v59 = vpop.permute.xlu0 %2124 }
0x253b   :  { %v2127_v62 = vmul.f32 %v3331_v56, %v2125_v59  ;;  %v2154_v23 = vpop.permute.xlu1 %2153 }
0x253c   :  { %v2156_v35 = vmul.f32 %v3333_v63, %v2154_v23 }
0x253d   :  { %2129 = vrot.lane.b32.xlu0 %v2127_v62, %s3427_s23 }
0x253e   :  { %2158 = vrot.lane.b32.xlu1 %v2156_v35, %s3427_s23  ;;  %v2120_v8 = vpop.permute.xlu0 %2119 }
0x253f   :  { %v2149_v48 = vpop.permute.xlu1 %2148  ;;  %v2122_v42 = vmul.f32 %v3331_v56, %v2120_v8  ;;  %v2186_v8 = vrot.slane %v4347_v32, 6 }
0x2540   :  { %v2151_v11 = vmul.f32 %v3333_v63, %v2149_v48 }
0x25af   :  { %v2130_v16 = vpop.permute.xlu0 %2129 }
0x25b0   :  { %v2132_v61 = vadd.f32 %v2130_v16, %v2122_v42  ;;  %v2159_v47 = vpop.permute.xlu1 %2158 }
0x25b1   :  { %v4361_v10 = vadd.f32 %v2159_v47, %v2151_v11 }
0x25b2   :  { %3334 = vtanh.f32 %v2132_v61  ;;  %v2181_v57 = vrot.slane %v2132_v61, 2 }
0x25b3   :  { %3336 = vtanh.f32 %v4361_v10  ;;  %v2198_v61 = vmul.f32 %v4361_v10, %v3648_v25 }
0x25bc   :  { %v3335_v45 = vpop.eup %3334 }
0x25bd   :  { %v3337_v19 = vpop.eup %3336  ;;  %2135 = vrot.lane.b32.xlu0 %v3335_v45, %s3426_s3 }
0x25be   :  { %2164 = vrot.lane.b32.xlu1 %v3337_v19, %s3426_s3 }
0x25c1   :  { %2194 = vrot.lane.b32.xlu0 %v2192_v41, %s3428_s1 }
0x262f   :  { %v2136_v21 = vpop.permute.xlu0 %2135 }
0x2630   :  { %v2138_v53 = vmul.f32 %v3331_v56, %v2136_v21  ;;  %v2165_v31 = vpop.permute.xlu1 %2164 }
0x2631   :  { %v2167_v28 = vmul.f32 %v3333_v63, %v2165_v31 }
0x2632   :  { %v2169_v3 = vrot.slane %v2138_v53, 2 }
0x2633   :  { %v4370_v15 = vmul.f32 %v2167_v28, %v3648_v25  ;;  %v2195_v50 = vpop.permute.xlu0 %2194 }
0x2634   :  { %2170 = vrot.lane.b32.xlu1 %v2169_v3, %s3427_s23 }
0x2635   :  { %v4374_v9 = vadd.f32 %v2195_v50, %v4370_v15 }
0x2637   :  { %v2207_v17 = vrot.slane %v4374_v9, 2 }
0x2639   :  { %2208 = vrot.lane.b32.xlu0 %v2207_v17, %s3426_s3 }
0x263d   :  { %2182 = vrot.lane.b32.xlu0 %v2181_v57, %s3428_s1 }
0x26a6   :  { %v2171_v14 = vpop.permute.xlu1 %2170 }
0x26a7   :  { %v4384_v18 = vmul.f32 %v2171_v14, %v3652_v27 }
0x26a9   :  { %v4387_v52 = vadd.f32 %v2178_v49, %v4384_v18 }
0x26ab   :  { %v2209_v54 = vpop.permute.xlu0 %2208 }
0x26ac   :  { %v2211_v7 = vsel %vm395_vm0, %v4387_v52, %v2209_v54  ;;  %v2325_v54 = vrot.slane %v4387_v52, 6 }
0x26ad   :  { %v2212_v39 = vpack.c.bf16 %v2211_v7, %v2211_v7 }
0x26af   :  { %v2214_v46 = vrot.slane %v2212_v39, 3  ;;  %v2183_v23 = vpop.permute.xlu0 %2182  ;;  %v2327_v39 = vmul.f32 %v2325_v54, %v3650_v26 }
0x26b0   :  { %v2185_v24 = vmul.f32 %v2183_v23, %v3652_v27 }
0x26b1   :  { %3003 = vmatmul.mubr.msk.bf16.vlgmr.msra.gmra.mrb[28].mxu1 %vm246_vm1, %v2214_v46 }
0x26b2   :  { %2532 = vmatpush1.bf16.msra.mxu1 %v4079_v0  ;;  %2563 = vmatprep.mubr.bf16.mxu1 %v3424_v1 }
0x26b3   :  { %2533 = vmatprep.subr.bf16.mxu1 %v4085_v5 }
0x26b6   :  { %2534 = vmatpush1.bf16.msra.mxu1 %v4100_v33 }
0x26b7   :  { %2535 = vmatprep.subr.bf16.mxu1 %v4106_v37  ;;  %v2200_v37 = vmul.f32 %v2147_v36, %v3650_v26  ;;  %v2188_v36 = vmul.f32 %v2186_v8, %v3654_v30 }
0x26b9   :  { %v4411_v11 = vadd.f32 %v2188_v36, %v2185_v24 }
0x26ba   :  { %2536 = vmatpush1.bf16.msra.mxu1 %v4119_v40 }
0x26bb   :  { %2537 = vmatprep.subr.bf16.mxu1 %v4125_v22  ;;  %v2272_v38 = vrot.slane %v4411_v11, 6 }
0x26be   :  { %2538 = vmatpush1.bf16.msra.mxu1 %v4131_v29 }
0x2784   :  { %v2252_v60 = vpop.f32.mrb[28].mxu1 }
0x2785   :  { %v2254_v13 = vpop.f32.mrb[29].mxu1  ;;  %v2259_v5 = vadd.f32 %v2252_v60, %v4179_v58 }
0x2786   :  { %v2263_v55 = vadd.f32 %v2261_v43, %v2254_v13  ;;  %v2256_v0 = vpop.f32.mrb[30].mxu1 }
0x2787   :  { %v2257_v56 = vpop.f32.mrb[31].mxu1  ;;  %v3004_v29 = vmul.f32 -1.442695, %v2259_v5 }
0x2788   :  { %3338 = vtanh.f32 %v2263_v55  ;;  %v3005_v22 = vmul.f32 -1.442695, %v2263_v55 }
0x2789   :  { %3340 = vtanh.f32 %v2259_v5 }
0x278a   :  { %3342 = vpow2.f32 %v3005_v22 }
0x278b   :  { %3344 = vpow2.f32 %v3004_v29 }
0x2792   :  { %v3339_v33 = vpop.eup %3338 }
0x2793   :  { %2302 = vrot.lane.b32.xlu1 %v3339_v33, %s3426_s3  ;;  %v3341_v40 = vpop.eup %3340 }
0x2794   :  { %v3343_v59 = vpop.eup %3342 }
0x2795   :  { %v2296_v63 = vadd.f32 1.0, %v3343_v59  ;;  %v3345_v62 = vpop.eup %3344 }
0x2796   :  { %v2267_v35 = vadd.f32 1.0, %v3345_v62 }
0x2797   :  { %2202 = vrot.lane.b32.xlu1 %v2200_v37, %s3427_s23  ;;  %3346 = vrcp.f32 %v2296_v63 }
0x2798   :  { %3348 = vrcp.f32 %v2267_v35 }
0x279b   :  { %2278 = vrot.lane.b32.xlu1 %v3341_v40, %s3426_s3 }
0x27a1   :  { %v3347_v48 = vpop.eup %3346 }
0x27a2   :  { %v3349_v32 = vpop.eup %3348 }
0x2805   :  { %v2303_v42 = vpop.permute.xlu1 %2302 }
0x2806   :  { %v2305_v16 = vmul.f32 %v3347_v48, %v2303_v42  ;;  %v3418_v42 = vld [vmem:[%s4639_s7 + $0x14] ss:$8 sps:$4 sm:$0xff]  }
0x2808   :  { %2307 = vrot.lane.b32.xlu0 %v2305_v16, %s3427_s23 }
0x2809   :  { %v2203_v47 = vpop.permute.xlu1 %2202 }
0x280a   :  { %v2205_v45 = vadd.f32 %v2203_v47, %v2198_v61  ;;  %v3419_v61 = vld [vmem:[%s4639_s7 + $0x10] ss:$8 sps:$4 sm:$0xff]   ;;  %v3420_v47 = vld [vmem:[%s4639_s7 + $0x24] ss:$8 sps:$4 sm:$0xff]  }
0x280c   :  { %2273 = vrot.lane.b32.xlu0 %v2272_v38, %s3427_s23  ;;  %v2300_v21 = vmul.f32 %v3347_v48, %v2205_v45  ;;  %v2353_v40 = vrot.slane %v2205_v45, 2  ;;  %v3422_v45 = vld [vmem:[%s4639_s7 + $0x34] ss:$8 sps:$4 sm:$0xff]  }
0x280d   :  { %v2279_v19 = vpop.permute.xlu1 %2278 }
0x280e   :  { %v2281_v41 = vmul.f32 %v3349_v32, %v2279_v19 }
0x2810   :  { %2283 = vrot.lane.b32.xlu1 %v2281_v41, %s3427_s23  ;;  %v2418_v41 = vrot.slane %v4177_v2, 4 }
0x287a   :  { %v2308_v53 = vpop.permute.xlu0 %2307 }
0x287b   :  { %v2310_v31 = vadd.f32 %v2308_v53, %v2300_v21  ;;  %v2415_v53 = vrot.slane %v4179_v58, 2 }
0x287d   :  { %3350 = vtanh.f32 %v2310_v31  ;;  %v2347_v46 = vrot.slane %v2310_v31, 2 }
0x287e   :  { %v2274_v28 = vpop.permute.xlu0 %2273 }
0x287f   :  { %v2276_v3 = vmul.f32 %v3349_v32, %v2274_v28 }
0x2882   :  { %v2284_v10 = vpop.permute.xlu1 %2283 }
0x2883   :  { %v4421_v50 = vadd.f32 %v2284_v10, %v2276_v3 }
0x2885   :  { %3352 = vtanh.f32 %v4421_v50 }
0x2887   :  { %v3351_v57 = vpop.eup %3350 }
0x2888   :  { %2313 = vrot.lane.b32.xlu0 %v3351_v57, %s3426_s3 }
0x288f   :  { %v3353_v20 = vpop.eup %3352 }
0x2890   :  { %2289 = vrot.lane.b32.xlu1 %v3353_v20, %s3426_s3 }
0x2894   :  { %2341 = vrot.lane.b32.xlu1 %v2207_v17, %s3427_s23 }
0x28fa   :  { %v2314_v14 = vpop.permute.xlu0 %2313 }
0x28fb   :  { %v2316_v49 = vmul.f32 %v3347_v48, %v2314_v14  ;;  %v3417_v48 = vld [vmem:[%s4639_s7] ss:$8 sps:$4 sm:$0xff]   ;;  %v2335_v14 = vmul.f32 %v2272_v38, %v3650_v26 }
0x28fd   :  { %v2319_v7 = vrot.slane %v2316_v49, 2 }
0x28ff   :  { %2320 = vrot.lane.b32.xlu0 %v2319_v7, %s3427_s23 }
0x2902   :  { %v2290_v60 = vpop.permute.xlu1 %2289 }
0x2903   :  { %2329 = vrot.lane.b32.xlu0 %v2327_v39, %s3428_s1  ;;  %v2292_v13 = vmul.f32 %v3349_v32, %v2290_v60  ;;  %v3423_v32 = vld [vmem:[%s4639_s7 + $0x30] ss:$8 sps:$4 sm:$0xff]  }
0x2905   :  { %v4442_v0 = vmul.f32 %v2292_v13, %v3648_v25 }
0x2906   :  { %v2342_v43 = vpop.permute.xlu1 %2341 }
0x2907   :  { %2348 = vrot.lane.b32.xlu0 %v2347_v46, %s3428_s1  ;;  %v2344_v9 = vmul.f32 %v2342_v43, %v3654_v30 }
0x2971   :  { %v2321_v55 = vpop.permute.xlu0 %2320 }
0x2972   :  { %v4436_v17 = vmul.f32 %v2321_v55, %v3652_v27 }
0x2974   :  { %v4439_v52 = vadd.f32 %v2344_v9, %v4436_v17 }
0x2975   :  { %v2330_v56 = vpop.permute.xlu0 %2329 }
0x2976   :  { %v2364_v5 = vrot.slane %v4439_v52, 6  ;;  %v4446_v33 = vadd.f32 %v2330_v56, %v4442_v0 }
0x2978   :  { %v3069_v37 = vpack.i.bf16 %v2364_v5, %v4446_v33 }
0x2979   :  { %v2349_v63 = vpop.permute.xlu0 %2348 }
0x297a   :  { %3070 = vrot.lane.b32.xlu1 %v3069_v37, %s3427_s23  ;;  %v2351_v8 = vmul.f32 %v2349_v63, %v3652_v27  ;;  %v2333_v37 = vmul.f32 %v4421_v50, %v3648_v25 }
0x297e   :  { %2354 = vrot.lane.b32.xlu1 %v2353_v40, %s3428_s1 }
0x29ec   :  { %v3071_v22 = vpop.permute.xlu1 %3070 }
0x29ed   :  { %v3073_v29 = vunpack.i.h.bf16 %v3071_v22  ;;  %v3072_v59 = vunpack.i.l.bf16 %v3071_v22 }
0x29ef   :  { %v2368_v62 = vsel %vm395_vm0, %v3072_v59, %v3073_v29 }
0x29f0   :  { %v2369_v23 = vpack.c.bf16 %v2368_v62, %v2368_v62  ;;  %v2355_v35 = vpop.permute.xlu1 %2354 }
0x29f1   :  { %v2357_v24 = vmul.f32 %v2355_v35, %v3654_v30 }
0x29f2   :  { %3006 = vmatmul.mubr.msk.bf16.vlgmr.msra.gmra.mrb[28].mxu0 %vm246_vm1, %v2369_v23 }
0x29f3   :  { %v4455_v36 = vadd.f32 %v2357_v24, %v2351_v8  ;;  %2689 = vmatpush1.bf16.msra.mxu0 %v3417_v48  ;;  %2720 = vmatprep.mubr.bf16.mxu0 %v3424_v1  ;;  %v3421_v1 = vld [vmem:[%s4639_s7 + $0x20] ss:$8 sps:$4 sm:$0xff]  }
0x29f4   :  { %2690 = vmatprep.subr.bf16.mxu0 %v3418_v42 }
0x29f5   :  { %v2453_v16 = vrot.slane %v4455_v36, 6 }
0x29f7   :  { %2454 = vrot.lane.b32.xlu1 %v2453_v16, %s3427_s23  ;;  %2691 = vmatpush1.bf16.msra.mxu0 %v3419_v61  ;;  %v2486_v61 = vrot.slane %v4446_v33, 6 }
0x29f8   :  { %2692 = vmatprep.subr.bf16.mxu0 %v3420_v47 }
0x29fb   :  { %2693 = vmatpush1.bf16.msra.mxu0 %v3421_v1 }
0x29fc   :  { %2694 = vmatprep.subr.bf16.mxu0 %v3422_v45 }
0x29ff   :  { %2695 = vmatpush1.bf16.msra.mxu0 %v3423_v32  ;;  %v2505_v32 = vrot.slane %v4439_v52, 2 }
0x2a69   :  { %v2455_v56 = vpop.permute.xlu1 %2454 }
0x2ac5   :  { %v2407_v19 = vpop.f32.mrb[28].mxu0 }
0x2ac6   :  { %v2409_v21 = vpop.f32.mrb[29].mxu0  ;;  %v2417_v10 = vadd.f32 %v2415_v53, %v2407_v19 }
0x2ac7   :  { %v2420_v31 = vadd.f32 %v2418_v41, %v2409_v21  ;;  %v2411_v28 = vpop.f32.mrb[30].mxu0  ;;  %v2507_v41 = vmul.f32 %v2505_v32, %v3654_v30 }
0x2ac8   :  { %v2412_v3 = vpop.f32.mrb[31].mxu0  ;;  %v3007_v54 = vmul.f32 -1.442695, %v2417_v10 }
0x2ac9   :  { %3354 = vtanh.f32 %v2420_v31  ;;  %v3008_v49 = vmul.f32 -1.442695, %v2420_v31  ;;  %v2515_v31 = vrot.slane %v4455_v36, 2 }
0x2aca   :  { %3356 = vtanh.f32 %v2417_v10 }
0x2acb   :  { %3358 = vpow2.f32 %v3008_v49  ;;  %v2517_v52 = vmul.f32 %v2515_v31, %v3654_v30 }
0x2acc   :  { %3360 = vpow2.f32 %v3007_v54 }
0x2ad3   :  { %v3355_v57 = vpop.eup %3354 }
0x2ad4   :  { %2459 = vrot.lane.b32.xlu0 %v3355_v57, %s3426_s3  ;;  %v3357_v20 = vpop.eup %3356 }
0x2ad5   :  { %v3359_v7 = vpop.eup %3358 }
0x2ad6   :  { %v2448_v39 = vadd.f32 1.0, %v3359_v7  ;;  %v3361_v46 = vpop.eup %3360 }
0x2ad7   :  { %v2424_v60 = vadd.f32 1.0, %v3361_v46 }
0x2ad8   :  { %2430 = vrot.lane.b32.xlu0 %v3357_v20, %s3426_s3  ;;  %3362 = vrcp.f32 %v2448_v39 }
0x2ad9   :  { %3364 = vrcp.f32 %v2424_v60 }
0x2adc   :  { %2337 = vrot.lane.b32.xlu0 %v2335_v14, %s3427_s23 }
0x2ae2   :  { %v3363_v43 = vpop.eup %3362 }
0x2ae3   :  { %v3365_v9 = vpop.eup %3364  ;;  %v2457_v22 = vmul.f32 %v3363_v43, %v2455_v56  ;;  %v2572_v56 = vrot.slane %v4179_v58, 4 }
0x2b46   :  { %v2460_v13 = vpop.permute.xlu0 %2459 }
0x2b47   :  { %v2462_v55 = vmul.f32 %v3363_v43, %v2460_v13  ;;  %v2575_v13 = vrot.slane %v4177_v2, 2 }
0x2b49   :  { %2464 = vrot.lane.b32.xlu1 %v2462_v55, %s3427_s23 }
0x2b4a   :  { %v2431_v11 = vpop.permute.xlu0 %2430 }
0x2b4b   :  { %v2433_v38 = vmul.f32 %v3365_v9, %v2431_v11 }
0x2b4d   :  { %2435 = vrot.lane.b32.xlu1 %v2433_v38, %s3427_s23 }
0x2b4e   :  { %v2338_v5 = vpop.permute.xlu0 %2337 }
0x2b4f   :  { %v4493_v40 = vadd.f32 %v2338_v5, %v2333_v37 }
0x2b51   :  { %v2428_v63 = vmul.f32 %v3365_v9, %v4493_v40 }
0x2bbb   :  { %v2465_v29 = vpop.permute.xlu1 %2464 }
0x2bbc   :  { %v2467_v59 = vadd.f32 %v2465_v29, %v2457_v22  ;;  %v2499_v22 = vrot.slane %v4493_v40, 6 }
0x2bbe   :  { %3366 = vtanh.f32 %v2467_v59  ;;  %v2510_v1 = vrot.slane %v2467_v59, 4 }
0x2bbf   :  { %v2436_v62 = vpop.permute.xlu1 %2435 }
0x2bc0   :  { %v2438_v23 = vadd.f32 %v2436_v62, %v2428_v63 }
0x2bc2   :  { %3368 = vtanh.f32 %v2438_v23  ;;  %v2493_v45 = vrot.slane %v2438_v23, 6 }
0x2bc8   :  { %v3367_v35 = vpop.eup %3366 }
0x2bc9   :  { %2470 = vrot.lane.b32.xlu0 %v3367_v35, %s3426_s3 }
0x2bcc   :  { %v3369_v8 = vpop.eup %3368 }
0x2bcd   :  { %2441 = vrot.lane.b32.xlu1 %v3369_v8, %s3426_s3 }
0x2c3b   :  { %v2471_v24 = vpop.permute.xlu0 %2470 }
0x2c3c   :  { %v2473_v48 = vmul.f32 %v3363_v43, %v2471_v24 }
0x2c3e   :  { %v2481_v50 = vrot.slane %v2473_v48, 4 }
0x2c3f   :  { %v2442_v42 = vpop.permute.xlu1 %2441 }
0x2c40   :  { %v2444_v16 = vmul.f32 %v3365_v9, %v2442_v42  ;;  %2482 = vrot.lane.b32.xlu0 %v2481_v50, %s3427_s23 }
0x2c42   :  { %v2475_v47 = vrot.slane %v2444_v16, 6 }
0x2c44   :  { %2476 = vrot.lane.b32.xlu1 %v2475_v47, %s3427_s23  ;;  %2487 = vrot.lane.b32.xlu0 %v2486_v61, %s3427_s23 }
0x2c48   :  { %2511 = vrot.lane.b32.xlu0 %v2510_v1, %s3428_s1 }
0x2c4c   :  { %2494 = vrot.lane.b32.xlu0 %v2493_v45, %s3428_s1 }
0x2cb2   :  { %v2483_v19 = vpop.permute.xlu0 %2482 }
0x2cb3   :  { %v4507_v21 = vmul.f32 %v2483_v19, %v3652_v27 }
0x2cb5   :  { %v4510_v33 = vadd.f32 %v2507_v41, %v4507_v21 }
0x2cb6   :  { %v2488_v53 = vpop.permute.xlu0 %2487  ;;  %v2477_v14 = vpop.permute.xlu1 %2476 }
0x2cb7   :  { %v2520_v28 = vrot.slane %v4510_v33, 2  ;;  %v4524_v36 = vmul.f32 %v2477_v14, %v3648_v25  ;;  %v2490_v49 = vmul.f32 %v2488_v53, %v3650_v26 }
0x2cb9   :  { %2521 = vrot.lane.b32.xlu1 %v2520_v28, %s3427_s23  ;;  %v4528_v54 = vadd.f32 %v2490_v49, %v4524_v36 }
0x2cba   :  { %v2512_v3 = vpop.permute.xlu0 %2511 }
0x2cbb   :  { %v2514_v10 = vmul.f32 %v2512_v3, %v3652_v27 }
0x2cbd   :  { %v4519_v57 = vadd.f32 %v2517_v52, %v2514_v10 }
0x2cbe   :  { %v2495_v42 = vpop.permute.xlu0 %2494 }
0x2cbf   :  { %v2615_v20 = vrot.slane %v4519_v57, 4  ;;  %v2497_v16 = vmul.f32 %v2495_v42, %v3648_v25 }
0x2cc1   :  { %2616 = vrot.lane.b32.xlu0 %v2615_v20, %s3427_s23 }
0x2d2b   :  { %v2522_v7 = vpop.permute.xlu1 %2521 }
0x2d2c   :  { %v2524_v39 = vsel %vm395_vm0, %v4528_v54, %v2522_v7 }
0x2d2d   :  { %v2525_v46 = vpack.c.bf16 %v2524_v39, %v2524_v39 }
0x2d2f   :  { %v2527_v60 = vrot.slane %v2525_v46, 1 }
0x2d31   :  { %3009 = vmatmul.mubr.msk.bf16.vlgmr.msra.gmra.mrb[32].mxu1 %vm246_vm1, %v2527_v60 }
0x2d33   :  { %v2617_v41 = vpop.permute.xlu0 %2616 }
0x2e04   :  { %v2565_v43 = vpop.f32.mrb[32].mxu1 }
0x2e05   :  { %v2567_v55 = vpop.f32.mrb[33].mxu1  ;;  %v2574_v5 = vadd.f32 %v2572_v56, %v2565_v43 }
0x2e06   :  { %v2577_v9 = vadd.f32 %v2575_v13, %v2567_v55  ;;  %v2569_v11 = vpop.f32.mrb[34].mxu1 }
0x2e07   :  { %v2570_v38 = vpop.f32.mrb[35].mxu1  ;;  %v3010_v63 = vmul.f32 -1.442695, %v2574_v5 }
0x2e08   :  { %3370 = vtanh.f32 %v2577_v9  ;;  %v3011_v59 = vmul.f32 -1.442695, %v2577_v9  ;;  %v2664_v38 = vmul.f32 %v2520_v28, %v3654_v30  ;;  %v4566_v28 = vadd.f32 %v4507_v21, %v4321_v12 }
0x2e09   :  { %3372 = vtanh.f32 %v2574_v5  ;;  %v4555_v5 = vadd.f32 %v4524_v36, %v4311_v44  ;;  %v2649_v12 = vrot.slane %v4528_v54, 6 }
0x2e0a   :  { %3374 = vpow2.f32 %v3011_v59 }
0x2e0b   :  { %3376 = vpow2.f32 %v3010_v63 }
0x2e12   :  { %v3371_v37 = vpop.eup %3370 }
0x2e13   :  { %2621 = vrot.lane.b32.xlu1 %v3371_v37, %s3426_s3  ;;  %v3373_v29 = vpop.eup %3372 }
0x2e14   :  { %v3375_v62 = vpop.eup %3374 }
0x2e15   :  { %v2610_v23 = vadd.f32 1.0, %v3375_v62  ;;  %v3377_v35 = vpop.eup %3376 }
0x2e16   :  { %v2581_v8 = vadd.f32 1.0, %v3377_v35 }
0x2e17   :  { %2500 = vrot.lane.b32.xlu1 %v2499_v22, %s3428_s1  ;;  %3378 = vrcp.f32 %v2610_v23 }
0x2e18   :  { %3380 = vrcp.f32 %v2581_v8 }
0x2e1b   :  { %2592 = vrot.lane.b32.xlu1 %v3373_v29, %s3426_s3 }
0x2e21   :  { %v3379_v24 = vpop.eup %3378 }
0x2e22   :  { %v3381_v1 = vpop.eup %3380  ;;  %v2619_v53 = vmul.f32 %v3379_v24, %v2617_v41 }
0x2e85   :  { %v2622_v48 = vpop.permute.xlu1 %2621 }
0x2e86   :  { %v2624_v50 = vmul.f32 %v3379_v24, %v2622_v48 }
0x2e88   :  { %2626 = vrot.lane.b32.xlu0 %v2624_v50, %s3427_s23 }
0x2e89   :  { %v2501_v40 = vpop.permute.xlu1 %2500 }
0x2e8a   :  { %v2503_v61 = vmul.f32 %v2501_v40, %v3650_v26 }
0x2e8c   :  { %v2504_v47 = vadd.f32 %v2503_v61, %v2497_v16  ;;  %v2729_v61 = vrot.slane %v4179_v58, 6  ;;  %v2672_v58 = vrot.slane %v4519_v57, 2 }
0x2e8d   :  { %v2593_v45 = vpop.permute.xlu1 %2592 }
0x2e8e   :  { %v2586_v32 = vrot.slane %v2504_v47, 2  ;;  %v2595_v19 = vmul.f32 %v3381_v1, %v2593_v45  ;;  %v2659_v62 = vrot.slane %v2504_v47, 6 }
0x2e90   :  { %2597 = vrot.lane.b32.xlu0 %v2595_v19, %s3427_s23  ;;  %2587 = vrot.lane.b32.xlu1 %v2586_v32, %s3427_s23  ;;  %v2661_v23 = vmul.f32 %v2659_v62, %v3650_v26 }
0x2efa   :  { %v2627_v31 = vpop.permute.xlu0 %2626 }
0x2efb   :  { %v2629_v3 = vadd.f32 %v2627_v31, %v2619_v53 }
0x2efd   :  { %3382 = vtanh.f32 %v2629_v3  ;;  %v2667_v48 = vrot.slane %v2629_v3, 6 }
0x2f02   :  { %v2588_v52 = vpop.permute.xlu1 %2587  ;;  %v2598_v20 = vpop.permute.xlu0 %2597 }
0x2f03   :  { %v2590_v10 = vmul.f32 %v3381_v1, %v2588_v52 }
0x2f05   :  { %v2600_v14 = vadd.f32 %v2598_v20, %v2590_v10 }
0x2f07   :  { %v3383_v49 = vpop.eup %3382  ;;  %3384 = vtanh.f32 %v2600_v14  ;;  %v2654_v9 = vrot.slane %v2600_v14, 4 }
0x2f08   :  { %2632 = vrot.lane.b32.xlu1 %v3383_v49, %s3426_s3 }
0x2f11   :  { %v3385_v7 = vpop.eup %3384 }
0x2f12   :  { %2603 = vrot.lane.b32.xlu0 %v3385_v7, %s3426_s3  ;;  %v2674_v7 = vmul.f32 %v2672_v58, %v3654_v30 }
0x2f7a   :  { %v2633_v39 = vpop.permute.xlu1 %2632 }
0x2f7b   :  { %v2635_v46 = vmul.f32 %v3379_v24, %v2633_v39 }
0x2f7d   :  { %v2643_v60 = vrot.slane %v2635_v46, 6 }
0x2f7f   :  { %2644 = vrot.lane.b32.xlu1 %v2643_v60, %s3427_s23 }
0x2f84   :  { %v2604_v43 = vpop.permute.xlu0 %2603 }
0x2f85   :  { %v2606_v13 = vmul.f32 %v3381_v1, %v2604_v43 }
0x2f87   :  { %v2637_v55 = vrot.slane %v2606_v13, 4 }
0x2f89   :  { %2638 = vrot.lane.b32.xlu0 %v2637_v55, %s3427_s23 }
0x2f8d   :  { %2655 = vrot.lane.b32.xlu0 %v2654_v9, %s3428_s1 }
0x2ff1   :  { %v2645_v11 = vpop.permute.xlu1 %2644 }
0x2ff2   :  { %v2647_v56 = vmul.f32 %v2645_v11, %v3652_v27 }
0x2ff4   :  { %v4558_v37 = vadd.f32 %v2647_v56, %v4270_v6  ;;  %v2665_v22 = vadd.f32 %v2664_v38, %v2647_v56 }
0x2ff6   :  { %v3074_v29 = vpack.i.bf16 %v4555_v5, %v4558_v37  ;;  %v2677_v59 = vrot.slane %v2665_v22, 6  ;;  %v3145_v37 = vld [vmem:[%s4642_s8 + $0x8] sm:$0xff]  }
0x2ff8   :  { %2678 = vrot.lane.b32.xlu1 %v2677_v59, %s3427_s23 }
0x2ffb   :  { %v2639_v63 = vpop.permute.xlu0 %2638 }
0x2ffc   :  { %v2641_v33 = vmul.f32 %v2639_v63, %v3648_v25 }
0x2ffe   :  { %v4569_v44 = vadd.f32 %v2641_v33, %v4253_v34  ;;  %v2651_v34 = vmul.f32 %v2649_v12, %v3650_v26 }
0x2fff   :  { %v2656_v6 = vpop.permute.xlu0 %2655 }
0x3000   :  { %v3079_v36 = vpack.i.bf16 %v4569_v44, %v4566_v28  ;;  %v2658_v35 = vmul.f32 %v2656_v6, %v3648_v25  ;;  %v2652_v21 = vadd.f32 %v2651_v34, %v2641_v33 }
0x3002   :  { %v2662_v8 = vadd.f32 %v2661_v23, %v2658_v35 }
0x3004   :  { %v2741_v24 = vrot.slane %v2662_v8, 4 }
0x3006   :  { %2742 = vrot.lane.b32.xlu0 %v2741_v24, %s3427_s23  ;;  %v3429_v24 = vmov 0.0  }
0x3007   :  { %3022 = vmatprep.subr.bf16.mxu1 %v3429_v24  ;;  %3026 = vmatprep.mubr.msk.bf16.mxu1 %vm3430_vm5, %v3429_v24 }
0x300a   :  { %2668 = vrot.lane.b32.xlu0 %v2667_v48, %s3428_s1  ;;  %v3144_v48 = vld [vmem:[%s4642_s8] sm:$0xff]  }
0x300b   :  { %3023 = vmatpush3.bf16.msra.mxu1 %v3144_v48 }
0x300c   :  { %3024 = vmatprep.subr.bf16.mxu1 %v3429_v24 }
0x300f   :  { %3025 = vmatpush3.bf16.msra.mxu1 %v3145_v37 }
0x306a   :  { %v2679_v50 = vpop.permute.xlu1 %2678 }
0x306b   :  { %v2681_v42 = vsel %vm395_vm0, %v2652_v21, %v2679_v50 }
0x306c   :  { %v2682_v40 = vpack.c.bf16 %v2681_v42, %v2681_v42 }
0x306e   :  { %v2684_v16 = vrot.slane %v2682_v40, 2 }
0x3070   :  { %3012 = vmatmul.mubr.msk.bf16.vlgmr.msra.gmra.mrb[32].mxu0 %vm246_vm1, %v2684_v16 }
0x3078   :  { %v2743_v31 = vpop.permute.xlu0 %2742 }
0x307c   :  { %v2669_v52 = vpop.permute.xlu0 %2668 }
0x307d   :  { %v2671_v14 = vmul.f32 %v2669_v52, %v3652_v27 }
0x307f   :  { %v2675_v39 = vadd.f32 %v2674_v7, %v2671_v14 }
0x3081   :  { %v2770_v60 = vrot.slane %v2675_v39, 2 }
0x3143   :  { %v2722_v47 = vpop.f32.mrb[32].mxu0 }
0x3144   :  { %v2731_v1 = vadd.f32 %v2729_v61, %v2722_v47  ;;  %v2724_v45 = vpop.f32.mrb[33].mxu0 }
0x3145   :  { %v2726_v32 = vpop.f32.mrb[34].mxu0  ;;  %v2732_v3 = vadd.f32 %v2724_v45, %v4177_v2 }
0x3146   :  { %3386 = vtanh.f32 %v2731_v1  ;;  %v2727_v19 = vpop.f32.mrb[35].mxu0  ;;  %v3013_v26 = vmul.f32 -1.442695, %v2731_v1 }
0x3147   :  { %v3014_v2 = vmul.f32 -1.442695, %v2732_v3 }
0x3148   :  { %3388 = vpow2.f32 %v3013_v26 }
0x3150   :  { %v3387_v41 = vpop.eup %3386 }
0x3151   :  { %2747 = vrot.lane.b32.xlu1 %v3387_v41, %s3426_s3 }
0x3152   :  { %v3389_v54 = vpop.eup %3388 }
0x3153   :  { %v2736_v53 = vadd.f32 1.0, %v3389_v54 }
0x3155   :  { %3390 = vrcp.f32 %v2736_v53 }
0x3156   :  { %3392 = vtanh.f32 %v2732_v3 }
0x3157   :  { %3394 = vpow2.f32 %v3014_v2 }
0x315f   :  { %v3391_v10 = vpop.eup %3390 }
0x3160   :  { %v3393_v46 = vpop.eup %3392  ;;  %v2745_v57 = vmul.f32 %v3391_v10, %v2743_v31 }
0x3161   :  { %v3395_v43 = vpop.eup %3394 }
0x3162   :  { %v2765_v55 = vadd.f32 1.0, %v3395_v43 }
0x31c3   :  { %v2748_v20 = vpop.permute.xlu1 %2747 }
0x31c4   :  { %v2750_v49 = vmul.f32 %v3391_v10, %v2748_v20 }
0x31c6   :  { %2752 = vrot.lane.b32.xlu1 %v2750_v49, %s3427_s23 }
0x31ca   :  { %2776 = vrot.lane.b32.xlu1 %v3393_v46, %s3426_s3 }
0x31ce   :  { %2771 = vrot.lane.b32.xlu1 %v2770_v60, %s3427_s23 }
0x3238   :  { %v2753_v13 = vpop.permute.xlu1 %2752 }
0x3239   :  { %v2755_v9 = vadd.f32 %v2753_v13, %v2745_v57 }
0x323b   :  { %3396 = vtanh.f32 %v2755_v9 }
0x323c   :  { %3398 = vrcp.f32 %v2765_v55  ;;  %v2777_v30 = vpop.permute.xlu1 %2776 }
0x3240   :  { %v2772_v22 = vpop.permute.xlu1 %2771 }
0x3245   :  { %v3397_v11 = vpop.eup %3396 }
0x3246   :  { %2758 = vrot.lane.b32.xlu0 %v3397_v11, %s3426_s3  ;;  %v3399_v38 = vpop.eup %3398 }
0x3247   :  { %v2779_v56 = vmul.f32 %v3399_v38, %v2777_v30  ;;  %v2774_v62 = vmul.f32 %v3399_v38, %v2772_v22 }
0x324a   :  { %2781 = vrot.lane.b32.xlu0 %v2779_v56, %s3427_s23 }
0x32b8   :  { %v2759_v59 = vpop.permute.xlu0 %2758 }
0x32b9   :  { %v2761_v63 = vmul.f32 %v3391_v10, %v2759_v59 }
0x32bb   :  { %v2792_v33 = vrot.slane %v2761_v63, 2 }
0x32bc   :  { %v2782_v6 = vpop.permute.xlu0 %2781 }
0x32bd   :  { %v2784_v23 = vadd.f32 %v2782_v6, %v2774_v62  ;;  %2793 = vrot.lane.b32.xlu1 %v2792_v33, %s3427_s23 }
0x32bf   :  { %3400 = vtanh.f32 %v2784_v23 }
0x32c1   :  { %3075 = vrot.lane.b32.xlu1 %v3074_v29, %s3428_s1  ;;  %v2801_v29 = vadd.f32 %v4436_v17, %v4384_v18 }
0x32c9   :  { %v3401_v35 = vpop.eup %3400 }
0x32ca   :  { %2787 = vrot.lane.b32.xlu0 %v3401_v35, %s3426_s3 }
0x32ce   :  { %3080 = vrot.lane.b32.xlu0 %v3079_v36, %s3428_s1 }
0x332f   :  { %v2794_v8 = vpop.permute.xlu1 %2793 }
0x3330   :  { %v2796_v5 = vmul.f32 %v2794_v8, %v3648_v25 }
0x3332   :  { %v2805_v28 = vadd.f32 %v2796_v5, %v4200_v51  ;;  %v2802_v51 = vadd.f32 %v4442_v0, %v4370_v15  ;;  %v3015_v15 = vld [vmem:[%s4643_s9] ss:$0 sm:$0xff] }
0x3333   :  { %v3076_v25 = vpop.permute.xlu1 %3075 }
0x3334   :  { %v3084_v44 = vpack.i.bf16 %v2805_v28, %v2801_v29  ;;  %v3078_v42 = vunpack.i.h.bf16 %v3076_v25  ;;  %v3077_v40 = vunpack.i.l.bf16 %v3076_v25 }
0x3336   :  { %3085 = vrot.lane.b32.xlu1 %v3084_v44, %s3428_s1  ;;  %v2833_v47 = vsel %vm1481_vm2, %v2802_v51, %v3078_v42 }
0x333c   :  { %v2788_v36 = vpop.permute.xlu0 %2787 }
0x333d   :  { %v2790_v12 = vmul.f32 %v3399_v38, %v2788_v36 }
0x333f   :  { %v2797_v34 = vmul.f32 %v2790_v12, %v3652_v27 }
0x3340   :  { %v3081_v50 = vpop.permute.xlu0 %3080 }
0x3341   :  { %v2798_v21 = vadd.f32 %v2797_v34, %v4197_v4  ;;  %v3083_v16 = vunpack.i.h.bf16 %v3081_v50  ;;  %v3082_v61 = vunpack.i.l.bf16 %v3081_v50 }
0x3343   :  { %v2830_v18 = vsel %vm1481_vm2, %v2798_v21, %v3077_v40  ;;  %v2834_v27 = vsel %vm1483_vm3, %v2833_v47, %v3083_v16 }
0x3344   :  { %v2831_v32 = vsel %vm1483_vm3, %v2830_v18, %v3082_v61 }
0x33a8   :  { %v3086_v17 = vpop.permute.xlu1 %3085 }
0x33a9   :  { %v3088_v1 = vunpack.i.h.bf16 %v3086_v17  ;;  %v3087_v45 = vunpack.i.l.bf16 %v3086_v17 }
0x33ab   :  { %v2832_v4 = vsel %vm1485_vm4, %v2831_v32, %v3087_v45  ;;  %v2835_v19 = vsel %vm1485_vm4, %v2834_v27, %v3088_v1 }
0x33ac   :  { %v2836_v41 = vpack.c.bf16 %v2835_v19, %v2832_v4 }
0x33ae   :  { %2849 = vrot.lane.b32.xlu0 %v2836_v41, %s3427_s23 }
0x3420   :  { %v2850_v26 = vpop.permute.xlu0 %2849 }
0x3421   :  { %3027 = vmatmul.mubr.msk.bf16.vlgmr.msra.gmra.mrb[36].mxu1 %vm395_vm0, %v2850_v26 }
0x34f4   :  { %v2900_v0 = vpop.f32.mrb[36].mxu1 }
0x34f5   :  { %v2901_v54 = vadd.f32 %v3015_v15, %v2900_v0  ;;  %v3028_v53 = vpop.f32.mrb[37].mxu1 }
0x34f6   :  { %v2903_v31 = vpop.f32.mrb[38].mxu1 }
0x34f7   :  { %v2904_v3 = vadd.f32 %v3015_v15, %v2903_v31  ;;  %2907 = vmax.xlane.f32.xlu1 %v2901_v54  ;;  %v3029_v52 = vpop.f32.mrb[39].mxu1 }
0x34f9   :  { %2909 = vmax.xlane.f32.xlu0 %v2904_v3 }
0x3584   :  { %v2908_v58 = vpop.xlane.xlu1 %2907 }
0x3585   :  { %v2911_v10 = vsub.f32 %v2901_v54, %v2908_v58 }
0x3586   :  { %v2910_v20 = vpop.xlane.xlu0 %2909 }
0x3587   :  { %v2913_v14 = vmul.f32 1.442695, %v2911_v10  ;;  %v2912_v49 = vsub.f32 %v2904_v3, %v2910_v20 }
0x3589   :  { %3402 = vpow2.f32 %v2913_v14  ;;  %v2915_v7 = vmul.f32 1.442695, %v2912_v49 }
0x358b   :  { %3404 = vpow2.f32 %v2915_v7 }
0x3593   :  { %v3403_v39 = vpop.eup %3402 }
0x3594   :  { %2917 = vadd.xlane.f32.xlu0 %v3403_v39 }
0x3595   :  { %v3405_v46 = vpop.eup %3404 }
0x3596   :  { %2919 = vadd.xlane.f32.xlu1 %v3405_v46 }
0x3621   :  { %v2918_v60 = vpop.xlane.xlu0 %2917 }
0x3622   :  { %3406 = vrcp.f32 %v2918_v60 }
0x3623   :  { %v2920_v2 = vpop.xlane.xlu1 %2919 }
0x3624   :  { %3408 = vrcp.f32 %v2920_v2 }
0x362c   :  { %v3407_v43 = vpop.eup %3406 }
0x362d   :  { %v2922_v57 = vmul.f32 %v3407_v43, %v3403_v39 }
0x362e   :  { %v3409_v13 = vpop.eup %3408 }
0x362f   :  { %2925 = vst [vmem:[%s4644_s10] sm:$0xff] %v2922_v57  ;;  %v2924_v55 = vmul.f32 %v3409_v13, %v3405_v46 }
0x3631   :  { %2926 = vst [vmem:[%s4644_s10 + $0x8] sm:$0xff] %v2924_v55 }

// kernel: deepspeech_forward.4
= control target key start
LH: loop header
LB: loop body
LE: loop exit
PB: predicated region body
PF: predicated region fallthrough
CT: control target
= control target key end

     0   :  { %s11064_s1 = inlined_call_operand.vmem [shape: bf16[7424,128], index: 1, kind: input, shape index: {}]   ;;  %s11065_s0 = inlined_call_operand.vmem [shape: bf16[48,7424], index: 0, kind: input, shape index: {}]   ;;  %s11066_s2 = inlined_call_operand.vmem [shape: f32[1,128], index: 2, kind: input, shape index: {}]   ;;  %s11067_s3 = inlined_call_operand.vmem [shape: f32[48,1], index: 3, kind: input, shape index: {}]   ;;  %s11068_s4 = inlined_call_operand.vmem [shape: bf16[48,128], index: 4, kind: output, shape index: {}]  }
   0x1   :  { %v8195_v0 = vld [vmem:[%s11064_s1 + $0x40] sm:$0xff]   ;;  %v8199_v4 = vld [vmem:[%s11064_s1 + $0x48] sm:$0xff]   ;;  %v8203_v8 = vld [vmem:[%s11064_s1 + $0x50] sm:$0xff]  }
   0x2   :  { %v8196_v1 = vld [vmem:[%s11064_s1 + $0xc0] sm:$0xff]   ;;  %7190 = vmatprep.subr.bf16.mxu0 %v8195_v0  ;;  %v8200_v5 = vld [vmem:[%s11064_s1 + $0xc8] sm:$0xff]   ;;  %v8204_v9 = vld [vmem:[%s11064_s1 + $0xd0] sm:$0xff]  }
   0x3   :  { %v8197_v2 = vld [vmem:[%s11064_s1] sm:$0xff]   ;;  %7224 = vmatprep.subr.bf16.mxu1 %v8196_v1  ;;  %v8201_v6 = vld [vmem:[%s11064_s1 + $0x8] sm:$0xff]   ;;  %v8205_v10 = vld [vmem:[%s11064_s1 + $0x10] sm:$0xff]  }
   0x4   :  { %v8198_v3 = vld [vmem:[%s11064_s1 + $0x80] sm:$0xff]   ;;  %7191 = vmatpush3.bf16.msra.mxu0 %v8197_v2  ;;  %v8202_v7 = vld [vmem:[%s11064_s1 + $0x88] sm:$0xff]   ;;  %v8206_v11 = vld [vmem:[%s11064_s1 + $0x90] sm:$0xff]  }
   0x5   :  { %7225 = vmatpush3.bf16.msra.mxu1 %v8198_v3  ;;  %7192 = vmatprep.subr.bf16.mxu0 %v8199_v4  ;;  %v8207_v12 = vld [vmem:[%s11064_s1 + $0x58] sm:$0xff]   ;;  %v8211_v16 = vld [vmem:[%s11064_s1 + $0x60] sm:$0xff]   ;;  %v8215_v20 = vld [vmem:[%s11064_s1 + $0x68] sm:$0xff]  }
   0x6   :  { %7226 = vmatprep.subr.bf16.mxu1 %v8200_v5  ;;  %v8208_v13 = vld [vmem:[%s11064_s1 + $0xd8] sm:$0xff]   ;;  %v8212_v17 = vld [vmem:[%s11064_s1 + $0xe0] sm:$0xff]   ;;  %v8216_v21 = vld [vmem:[%s11064_s1 + $0xe8] sm:$0xff]  }
   0x7   :  { %v8209_v14 = vld [vmem:[%s11064_s1 + $0x18] sm:$0xff]   ;;  %v8213_v18 = vld [vmem:[%s11064_s1 + $0x20] sm:$0xff]   ;;  %v8217_v22 = vld [vmem:[%s11064_s1 + $0x28] sm:$0xff]  }
   0x8   :  { %7193 = vmatpush3.bf16.msra.mxu0 %v8201_v6  ;;  %v8210_v15 = vld [vmem:[%s11064_s1 + $0x98] sm:$0xff]   ;;  %v8214_v19 = vld [vmem:[%s11064_s1 + $0xa0] sm:$0xff]   ;;  %v8218_v23 = vld [vmem:[%s11064_s1 + $0xa8] sm:$0xff]  }
   0x9   :  { %7227 = vmatpush3.bf16.msra.mxu1 %v8202_v7  ;;  %7194 = vmatprep.subr.bf16.mxu0 %v8203_v8  ;;  %v8219_v24 = vld [vmem:[%s11064_s1 + $0x70] sm:$0xff]   ;;  %v8223_v28 = vld [vmem:[%s11064_s1 + $0x78] sm:$0xff]   ;;  %v8227_v32 = vld [vmem:[%s11065_s0] ss:$232 sps:$4 sm:$0xff]  }
   0xa   :  { %7228 = vmatprep.subr.bf16.mxu1 %v8204_v9  ;;  %v8220_v25 = vld [vmem:[%s11064_s1 + $0xf0] sm:$0xff]   ;;  %v8224_v29 = vld [vmem:[%s11064_s1 + $0xf8] sm:$0xff]   ;;  %v8229_v33 = vld [vmem:[%s11065_s0 + $0x4] ss:$232 sps:$4 sm:$0xff]  }
   0xb   :  { %v8221_v26 = vld [vmem:[%s11064_s1 + $0x30] sm:$0xff]   ;;  %v8225_v30 = vld [vmem:[%s11064_s1 + $0x38] sm:$0xff]   ;;  %4813 = vmatprep.mubr.bf16.mxu0 %v8229_v33  ;;  %v8233_v36 = vld [vmem:[%s11064_s1 + $0x140] sm:$0xff]  }
   0xc   :  { %7195 = vmatpush3.bf16.msra.mxu0 %v8205_v10  ;;  %v8222_v27 = vld [vmem:[%s11064_s1 + $0xb0] sm:$0xff]   ;;  %v8226_v31 = vld [vmem:[%s11064_s1 + $0xb8] sm:$0xff]   ;;  %v8234_v37 = vld [vmem:[%s11064_s1 + $0x1c0] sm:$0xff]  }
   0xd   :  { %7229 = vmatpush3.bf16.msra.mxu1 %v8206_v11  ;;  %7196 = vmatprep.subr.bf16.mxu0 %v8207_v12  ;;  %v8230_v34 = vld [vmem:[%s11065_s0 + $0x8] ss:$232 sps:$4 sm:$0xff]   ;;  %v8232_v35 = vld [vmem:[%s11065_s0 + $0xc] ss:$232 sps:$4 sm:$0xff]   ;;  %v8235_v38 = vld [vmem:[%s11064_s1 + $0x100] sm:$0xff]  }
   0xe   :  { %7230 = vmatprep.subr.bf16.mxu1 %v8208_v13  ;;  %4870 = vmatprep.mubr.bf16.mxu1 %v8232_v35  ;;  %v8236_v39 = vld [vmem:[%s11064_s1 + $0x180] sm:$0xff]   ;;  %v8237_v40 = vld [vmem:[%s11064_s1 + $0x148] sm:$0xff]   ;;  %v8241_v44 = vld [vmem:[%s11064_s1 + $0x150] sm:$0xff]  }
   0xf   :  { %v8238_v41 = vld [vmem:[%s11064_s1 + $0x1c8] sm:$0xff]   ;;  %v8242_v45 = vld [vmem:[%s11064_s1 + $0x1d0] sm:$0xff]   ;;  %v8248_v50 = vld [vmem:[%s11064_s1 + $0x158] sm:$0xff]  }
  0x10   :  { %7197 = vmatpush3.bf16.msra.mxu0 %v8209_v14  ;;  %v8239_v42 = vld [vmem:[%s11064_s1 + $0x108] sm:$0xff]   ;;  %v8243_v46 = vld [vmem:[%s11064_s1 + $0x110] sm:$0xff]   ;;  %v8249_v51 = vld [vmem:[%s11064_s1 + $0x1d8] sm:$0xff]  }
  0x11   :  { %7231 = vmatpush3.bf16.msra.mxu1 %v8210_v15  ;;  %7198 = vmatprep.subr.bf16.mxu0 %v8211_v16  ;;  %v8240_v43 = vld [vmem:[%s11064_s1 + $0x188] sm:$0xff]   ;;  %v8244_v47 = vld [vmem:[%s11064_s1 + $0x190] sm:$0xff]   ;;  %v8250_v52 = vld [vmem:[%s11065_s0 + $0x1dc] ss:$232 sps:$4 sm:$0xff]  }
  0x12   :  { %7232 = vmatprep.subr.bf16.mxu1 %v8212_v17  ;;  %v8245_v48 = vld [vmem:[%s11065_s0 + $0x1d4] ss:$232 sps:$4 sm:$0xff]   ;;  %v8247_v49 = vld [vmem:[%s11065_s0 + $0x1d0] ss:$232 sps:$4 sm:$0xff]   ;;  %v8255_v56 = vld [vmem:[%s11064_s1 + $0x160] sm:$0xff]  }
  0x13   :  { %v8252_v53 = vld [vmem:[%s11064_s1 + $0x118] sm:$0xff]   ;;  %v8256_v57 = vld [vmem:[%s11064_s1 + $0x1e0] sm:$0xff]   ;;  %v8262_v62 = vld [vmem:[%s11064_s1 + $0x168] sm:$0xff]  }
  0x14   :  { %7199 = vmatpush3.bf16.msra.mxu0 %v8213_v18  ;;  %v8253_v54 = vld [vmem:[%s11064_s1 + $0x198] sm:$0xff]   ;;  %v8257_v58 = vld [vmem:[%s11064_s1 + $0x120] sm:$0xff]   ;;  %v8263_v63 = vld [vmem:[%s11064_s1 + $0x1e8] sm:$0xff]  }
  0x15   :  { %7233 = vmatpush3.bf16.msra.mxu1 %v8214_v19  ;;  %7200 = vmatprep.subr.bf16.mxu0 %v8215_v20  ;;  %v8254_v55 = vld [vmem:[%s11065_s0 + $0x1d8] ss:$232 sps:$4 sm:$0xff]   ;;  %v8259_v60 = vld [vmem:[%s11065_s0 + $0x3a4] ss:$232 sps:$4 sm:$0xff]   ;;  %v8268_v3 = vld [vmem:[%s11065_s0 + $0x3a8] ss:$232 sps:$4 sm:$0xff]  }
  0x16   :  { %7234 = vmatprep.subr.bf16.mxu1 %v8216_v21  ;;  %v8258_v59 = vld [vmem:[%s11064_s1 + $0x1a0] sm:$0xff]   ;;  %v8264_v0 = vld [vmem:[%s11065_s0 + $0x3ac] ss:$232 sps:$4 sm:$0xff]   ;;  %v8273_v8 = vld [vmem:[%s11064_s1 + $0x178] sm:$0xff]  }
  0x17   :  { %v8261_v61 = vld [vmem:[%s11065_s0 + $0x3a0] ss:$232 sps:$4 sm:$0xff]   ;;  %v8269_v4 = vld [vmem:[%s11064_s1 + $0x170] sm:$0xff]   ;;  %v8274_v9 = vld [vmem:[%s11064_s1 + $0x1f8] sm:$0xff]  }
  0x18   :  { %7201 = vmatpush3.bf16.msra.mxu0 %v8217_v22  ;;  %v8266_v1 = vld [vmem:[%s11064_s1 + $0x128] sm:$0xff]   ;;  %v8270_v5 = vld [vmem:[%s11064_s1 + $0x1f0] sm:$0xff]   ;;  %v8275_v10 = vld [vmem:[%s11064_s1 + $0x138] sm:$0xff]  }
  0x19   :  { %7235 = vmatpush3.bf16.msra.mxu1 %v8218_v23  ;;  %7202 = vmatprep.subr.bf16.mxu0 %v8219_v24  ;;  %v8267_v2 = vld [vmem:[%s11064_s1 + $0x1a8] sm:$0xff]   ;;  %v8271_v6 = vld [vmem:[%s11064_s1 + $0x130] sm:$0xff]   ;;  %v8276_v11 = vld [vmem:[%s11064_s1 + $0x1b8] sm:$0xff]  }
  0x1a   :  { %7236 = vmatprep.subr.bf16.mxu1 %v8220_v25  ;;  %v8272_v7 = vld [vmem:[%s11064_s1 + $0x1b0] sm:$0xff]   ;;  %v8280_v14 = vld [vmem:[%s11065_s0 + $0x18] ss:$232 sps:$4 sm:$0xff]   ;;  %v8282_v15 = vld [vmem:[%s11065_s0 + $0x1c] ss:$232 sps:$4 sm:$0xff]  }
  0x1b   :  { %v8277_v12 = vld [vmem:[%s11065_s0 + $0x10] ss:$232 sps:$4 sm:$0xff]   ;;  %v8279_v13 = vld [vmem:[%s11065_s0 + $0x14] ss:$232 sps:$4 sm:$0xff]   ;;  %v8283_v16 = vld [vmem:[%s11064_s1 + $0x240] sm:$0xff]  }
  0x1c   :  { %7203 = vmatpush3.bf16.msra.mxu0 %v8221_v26  ;;  %v8284_v17 = vld [vmem:[%s11064_s1 + $0x2c0] sm:$0xff]   ;;  %v8287_v20 = vld [vmem:[%s11064_s1 + $0x248] sm:$0xff]   ;;  %v8294_v26 = vld [vmem:[%s11064_s1 + $0x250] sm:$0xff]  }
  0x1d   :  { %7237 = vmatpush3.bf16.msra.mxu1 %v8222_v27  ;;  %7204 = vmatprep.subr.bf16.mxu0 %v8223_v28  ;;  %v8285_v18 = vld [vmem:[%s11064_s1 + $0x200] sm:$0xff]   ;;  %v8288_v21 = vld [vmem:[%s11064_s1 + $0x2c8] sm:$0xff]   ;;  %v8295_v27 = vld [vmem:[%s11064_s1 + $0x2d0] sm:$0xff]  }
  0x1e   :  { %7238 = vmatprep.subr.bf16.mxu1 %v8224_v29  ;;  %v8286_v19 = vld [vmem:[%s11064_s1 + $0x280] sm:$0xff]   ;;  %v8289_v22 = vld [vmem:[%s11064_s1 + $0x208] sm:$0xff]   ;;  %v8298_v29 = vld [vmem:[%s11064_s1 + $0x210] sm:$0xff]  }
  0x1f   :  { %v8290_v23 = vld [vmem:[%s11064_s1 + $0x288] sm:$0xff]   ;;  %v8302_v33 = vld [vmem:[%s11064_s1 + $0x2d8] sm:$0xff]  }
  0x20   :  { %7205 = vmatpush3.bf16.msra.mxu0 %v8225_v30  ;;  %v8291_v24 = vld [vmem:[%s11065_s0 + $0x1e4] ss:$232 sps:$4 sm:$0xff]   ;;  %v8293_v25 = vld [vmem:[%s11065_s0 + $0x1e0] ss:$232 sps:$4 sm:$0xff]   ;;  %v8299_v30 = vld [vmem:[%s11064_s1 + $0x290] sm:$0xff]  }
  0x21   :  { %7239 = vmatpush3.bf16.msra.mxu1 %v8226_v31  ;;  %7258 = vmatprep.subr.bf16.mxu0 %v8233_v36  ;;  %v8296_v28 = vld [vmem:[%s11065_s0 + $0x1ec] ss:$232 sps:$4 sm:$0xff]   ;;  %v8300_v31 = vld [vmem:[%s11065_s0 + $0x1e8] ss:$232 sps:$4 sm:$0xff]   ;;  %v8304_v35 = vld [vmem:[%s11064_s1 + $0x298] sm:$0xff]  }
  0x22   :  { %7292 = vmatprep.subr.bf16.mxu1 %v8234_v37  ;;  %v8305_v36 = vld [vmem:[%s11065_s0 + $0x3b4] ss:$232 sps:$4 sm:$0xff]   ;;  %v8307_v37 = vld [vmem:[%s11065_s0 + $0x3b0] ss:$232 sps:$4 sm:$0xff]  }
  0x23   :  { %4814 = vmatmul.mubr.bf16.vlgmr.msra.gmra.mrb[0].mxu0 %v8227_v32  ;;  %v8301_v32 = vld [vmem:[%s11064_s1 + $0x258] sm:$0xff]  }
  0x24   :  { %4871 = vmatmul.mubr.bf16.vlgmr.msra.gmra.mrb[0].mxu1 %v8230_v34  ;;  %7259 = vmatpush3.bf16.msra.mxu0 %v8235_v38  ;;  %v8303_v34 = vld [vmem:[%s11064_s1 + $0x218] sm:$0xff]   ;;  %v8308_v38 = vld [vmem:[%s11064_s1 + $0x260] sm:$0xff]  }
  0x25   :  { %7293 = vmatpush3.bf16.msra.mxu1 %v8236_v39  ;;  %7260 = vmatprep.subr.bf16.mxu0 %v8237_v40  ;;  %v8309_v39 = vld [vmem:[%s11064_s1 + $0x2e0] sm:$0xff]  }
  0x26   :  { %7294 = vmatprep.subr.bf16.mxu1 %v8238_v41  ;;  %4821 = vmatprep.mubr.bf16.mxu0 %v8245_v48  ;;  %v8310_v40 = vld [vmem:[%s11065_s0 + $0x3bc] ss:$232 sps:$4 sm:$0xff]   ;;  %v8319_v48 = vld [vmem:[%s11064_s1 + $0x270] sm:$0xff]  }
  0x27   :  { %4878 = vmatprep.mubr.bf16.mxu1 %v8250_v52  ;;  %v8312_v41 = vld [vmem:[%s11064_s1 + $0x220] sm:$0xff]   ;;  %v8323_v52 = vld [vmem:[%s11064_s1 + $0x278] sm:$0xff]  }
  0x28   :  { %7261 = vmatpush3.bf16.msra.mxu0 %v8239_v42  ;;  %v8313_v42 = vld [vmem:[%s11064_s1 + $0x2a0] sm:$0xff]  }
  0x29   :  { %7295 = vmatpush3.bf16.msra.mxu1 %v8240_v43  ;;  %7262 = vmatprep.subr.bf16.mxu0 %v8241_v44  ;;  %v8314_v43 = vld [vmem:[%s11065_s0 + $0x3b8] ss:$232 sps:$4 sm:$0xff]   ;;  %v8315_v44 = vld [vmem:[%s11064_s1 + $0x268] sm:$0xff]  }
  0x2a   :  { %7296 = vmatprep.subr.bf16.mxu1 %v8242_v45  ;;  %v8316_v45 = vld [vmem:[%s11064_s1 + $0x2e8] sm:$0xff]  }
  0x2b   :  { %4822 = vmatmul.mubr.bf16.gmra.mrb[4].mxu0 %v8247_v49  ;;  %v8320_v49 = vld [vmem:[%s11064_s1 + $0x2f0] sm:$0xff]  }
  0x2c   :  { %7263 = vmatpush3.bf16.msra.mxu0 %v8243_v46  ;;  %4879 = vmatmul.mubr.bf16.gmra.mrb[4].mxu1 %v8254_v55  ;;  %v8317_v46 = vld [vmem:[%s11064_s1 + $0x228] sm:$0xff]   ;;  %v8326_v55 = vld [vmem:[%s11064_s1 + $0x2b8] sm:$0xff]  }
  0x2d   :  { %7297 = vmatpush3.bf16.msra.mxu1 %v8244_v47  ;;  %7264 = vmatprep.subr.bf16.mxu0 %v8248_v50  ;;  %v8318_v47 = vld [vmem:[%s11064_s1 + $0x2a8] sm:$0xff]   ;;  %v8321_v50 = vld [vmem:[%s11064_s1 + $0x230] sm:$0xff]  }
  0x2e   :  { %7298 = vmatprep.subr.bf16.mxu1 %v8249_v51  ;;  %4829 = vmatprep.mubr.bf16.mxu0 %v8259_v60  ;;  %v8322_v51 = vld [vmem:[%s11064_s1 + $0x2b0] sm:$0xff]   ;;  %v8333_v60 = vld [vmem:[%s11064_s1 + $0x340] sm:$0xff]  }
  0x2f   :  { %4886 = vmatprep.mubr.bf16.mxu1 %v8264_v0  ;;  %v8337_v0 = vld [vmem:[%s11064_s1 + $0x348] sm:$0xff]  }
  0x30   :  { %7265 = vmatpush3.bf16.msra.mxu0 %v8252_v53  ;;  %v8324_v53 = vld [vmem:[%s11064_s1 + $0x2f8] sm:$0xff]  }
  0x31   :  { %7299 = vmatpush3.bf16.msra.mxu1 %v8253_v54  ;;  %7266 = vmatprep.subr.bf16.mxu0 %v8255_v56  ;;  %v8325_v54 = vld [vmem:[%s11064_s1 + $0x238] sm:$0xff]   ;;  %v8327_v56 = vld [vmem:[%s11065_s0 + $0x20] ss:$232 sps:$4 sm:$0xff]  }
  0x32   :  { %7300 = vmatprep.subr.bf16.mxu1 %v8256_v57  ;;  %v8329_v57 = vld [vmem:[%s11065_s0 + $0x24] ss:$232 sps:$4 sm:$0xff]  }
  0x33   :  { %4830 = vmatmul.mubr.bf16.gmra.mrb[8].mxu0 %v8261_v61  ;;  %v8334_v61 = vld [vmem:[%s11064_s1 + $0x3c0] sm:$0xff]  }
  0x34   :  { %7267 = vmatpush3.bf16.msra.mxu0 %v8257_v58  ;;  %4887 = vmatmul.mubr.bf16.gmra.mrb[8].mxu1 %v8268_v3  ;;  %v8330_v58 = vld [vmem:[%s11065_s0 + $0x28] ss:$232 sps:$4 sm:$0xff]  }
  0x35   :  { %7301 = vmatpush3.bf16.msra.mxu1 %v8258_v59  ;;  %7268 = vmatprep.subr.bf16.mxu0 %v8262_v62  ;;  %v8332_v59 = vld [vmem:[%s11065_s0 + $0x2c] ss:$232 sps:$4 sm:$0xff]   ;;  %v8335_v62 = vld [vmem:[%s11064_s1 + $0x300] sm:$0xff]  }
  0x36   :  { %7302 = vmatprep.subr.bf16.mxu1 %v8263_v63  ;;  %4927 = vmatprep.mubr.bf16.mxu0 %v8279_v13  ;;  %v8336_v63 = vld [vmem:[%s11064_s1 + $0x380] sm:$0xff]   ;;  %v8340_v3 = vld [vmem:[%s11064_s1 + $0x388] sm:$0xff]   ;;  %v8352_v13 = vld [vmem:[%s11064_s1 + $0x3d8] sm:$0xff]  }
  0x37   :  { %4984 = vmatprep.mubr.bf16.mxu1 %v8282_v15  ;;  %v8354_v15 = vld [vmem:[%s11064_s1 + $0x398] sm:$0xff]  }
  0x38   :  { %7269 = vmatpush3.bf16.msra.mxu0 %v8266_v1  ;;  %v8338_v1 = vld [vmem:[%s11064_s1 + $0x3c8] sm:$0xff]  }
  0x39   :  { %7303 = vmatpush3.bf16.msra.mxu1 %v8267_v2  ;;  %7270 = vmatprep.subr.bf16.mxu0 %v8269_v4  ;;  %v8339_v2 = vld [vmem:[%s11064_s1 + $0x308] sm:$0xff]   ;;  %v8341_v4 = vld [vmem:[%s11065_s0 + $0x1f4] ss:$232 sps:$4 sm:$0xff]  }
  0x3a   :  { %7304 = vmatprep.subr.bf16.mxu1 %v8270_v5  ;;  %v8343_v5 = vld [vmem:[%s11065_s0 + $0x1f0] ss:$232 sps:$4 sm:$0xff]  }
  0x3c   :  { %7271 = vmatpush3.bf16.msra.mxu0 %v8271_v6  ;;  %v8344_v6 = vld [vmem:[%s11064_s1 + $0x350] sm:$0xff]  }
  0x3d   :  { %7305 = vmatpush3.bf16.msra.mxu1 %v8272_v7  ;;  %7272 = vmatprep.subr.bf16.mxu0 %v8273_v8  ;;  %v8345_v7 = vld [vmem:[%s11064_s1 + $0x3d0] sm:$0xff]   ;;  %v8346_v8 = vld [vmem:[%s11065_s0 + $0x1fc] ss:$232 sps:$4 sm:$0xff]  }
  0x3e   :  { %7306 = vmatprep.subr.bf16.mxu1 %v8274_v9  ;;  %v8348_v9 = vld [vmem:[%s11064_s1 + $0x310] sm:$0xff]  }
  0x40   :  { %7273 = vmatpush3.bf16.msra.mxu0 %v8275_v10  ;;  %v8349_v10 = vld [vmem:[%s11064_s1 + $0x390] sm:$0xff]  }
  0x41   :  { %7307 = vmatpush3.bf16.msra.mxu1 %v8276_v11  ;;  %7326 = vmatprep.subr.bf16.mxu0 %v8283_v16  ;;  %v8350_v11 = vld [vmem:[%s11065_s0 + $0x1f8] ss:$232 sps:$4 sm:$0xff]   ;;  %v8355_v16 = vld [vmem:[%s11065_s0 + $0x3c4] ss:$232 sps:$4 sm:$0xff]  }
  0x42   :  { %7360 = vmatprep.subr.bf16.mxu1 %v8284_v17  ;;  %v8357_v17 = vld [vmem:[%s11065_s0 + $0x3c0] ss:$232 sps:$4 sm:$0xff]  }
  0x43   :  { %4928 = vmatmul.mubr.bf16.vlgmr.msra.gmra.mrb[12].mxu0 %v8277_v12  ;;  %v8351_v12 = vld [vmem:[%s11064_s1 + $0x358] sm:$0xff]  }
  0x44   :  { %4985 = vmatmul.mubr.bf16.vlgmr.msra.gmra.mrb[12].mxu1 %v8280_v14  ;;  %7327 = vmatpush3.bf16.msra.mxu0 %v8285_v18  ;;  %v8353_v14 = vld [vmem:[%s11064_s1 + $0x318] sm:$0xff]   ;;  %v8358_v18 = vld [vmem:[%s11064_s1 + $0x360] sm:$0xff]  }
  0x45   :  { %7361 = vmatpush3.bf16.msra.mxu1 %v8286_v19  ;;  %7328 = vmatprep.subr.bf16.mxu0 %v8287_v20  ;;  %v8359_v19 = vld [vmem:[%s11064_s1 + $0x3e0] sm:$0xff]   ;;  %v8360_v20 = vld [vmem:[%s11065_s0 + $0x3cc] ss:$232 sps:$4 sm:$0xff]  }
  0x46   :  { %7362 = vmatprep.subr.bf16.mxu1 %v8288_v21  ;;  %4935 = vmatprep.mubr.bf16.mxu0 %v8291_v24  ;;  %v8362_v21 = vld [vmem:[%s11064_s1 + $0x320] sm:$0xff]   ;;  %v8365_v24 = vld [vmem:[%s11064_s1 + $0x368] sm:$0xff]  }
  0x47   :  { %4992 = vmatprep.mubr.bf16.mxu1 %v8296_v28  ;;  %v8369_v28 = vld [vmem:[%s11064_s1 + $0x370] sm:$0xff]  }
  0x48   :  { %7329 = vmatpush3.bf16.msra.mxu0 %v8289_v22  ;;  %v8363_v22 = vld [vmem:[%s11064_s1 + $0x3a0] sm:$0xff]  }
  0x49   :  { %7363 = vmatpush3.bf16.msra.mxu1 %v8290_v23  ;;  %7330 = vmatprep.subr.bf16.mxu0 %v8294_v26  ;;  %v8364_v23 = vld [vmem:[%s11065_s0 + $0x3c8] ss:$232 sps:$4 sm:$0xff]  }
  0x4a   :  { %7364 = vmatprep.subr.bf16.mxu1 %v8295_v27  ;;  %v8367_v26 = vld [vmem:[%s11064_s1 + $0x328] sm:$0xff]  }
  0x4b   :  { %4936 = vmatmul.mubr.bf16.gmra.mrb[16].mxu0 %v8293_v25  ;;  %v8366_v25 = vld [vmem:[%s11064_s1 + $0x3e8] sm:$0xff]  }
  0x4c   :  { %7331 = vmatpush3.bf16.msra.mxu0 %v8298_v29  ;;  %4993 = vmatmul.mubr.bf16.gmra.mrb[16].mxu1 %v8300_v31  ;;  %v8368_v27 = vld [vmem:[%s11064_s1 + $0x3a8] sm:$0xff]   ;;  %v8370_v29 = vld [vmem:[%s11064_s1 + $0x3f0] sm:$0xff]  }
  0x4d   :  { %7365 = vmatpush3.bf16.msra.mxu1 %v8299_v30  ;;  %7332 = vmatprep.subr.bf16.mxu0 %v8301_v32  ;;  %v8371_v30 = vld [vmem:[%s11064_s1 + $0x330] sm:$0xff]   ;;  %v8373_v32 = vld [vmem:[%s11064_s1 + $0x378] sm:$0xff]  }
  0x4e   :  { %7366 = vmatprep.subr.bf16.mxu1 %v8302_v33  ;;  %4943 = vmatprep.mubr.bf16.mxu0 %v8305_v36  ;;  %v8372_v31 = vld [vmem:[%s11064_s1 + $0x3b0] sm:$0xff]   ;;  %v8374_v33 = vld [vmem:[%s11064_s1 + $0x3f8] sm:$0xff]  }
  0x4f   :  { %5000 = vmatprep.mubr.bf16.mxu1 %v8310_v40  ;;  %v8377_v36 = vld [vmem:[%s11065_s0 + $0x30] ss:$232 sps:$4 sm:$0xff]   ;;  %v8383_v40 = vld [vmem:[%s11064_s1 + $0x440] sm:$0xff]  }
  0x50   :  { %7333 = vmatpush3.bf16.msra.mxu0 %v8303_v34  ;;  %v8375_v34 = vld [vmem:[%s11064_s1 + $0x338] sm:$0xff]  }
  0x51   :  { %7367 = vmatpush3.bf16.msra.mxu1 %v8304_v35  ;;  %7334 = vmatprep.subr.bf16.mxu0 %v8308_v38  ;;  %v8376_v35 = vld [vmem:[%s11064_s1 + $0x3b8] sm:$0xff]  }
  0x52   :  { %7368 = vmatprep.subr.bf16.mxu1 %v8309_v39  ;;  %v8380_v38 = vld [vmem:[%s11065_s0 + $0x38] ss:$232 sps:$4 sm:$0xff]   ;;  %v8382_v39 = vld [vmem:[%s11065_s0 + $0x3c] ss:$232 sps:$4 sm:$0xff]  }
  0x53   :  { %4944 = vmatmul.mubr.bf16.gmra.mrb[20].mxu0 %v8307_v37  ;;  %v8379_v37 = vld [vmem:[%s11065_s0 + $0x34] ss:$232 sps:$4 sm:$0xff]  }
  0x54   :  { %7335 = vmatpush3.bf16.msra.mxu0 %v8312_v41  ;;  %5001 = vmatmul.mubr.bf16.gmra.mrb[20].mxu1 %v8314_v43  ;;  %v8384_v41 = vld [vmem:[%s11064_s1 + $0x4c0] sm:$0xff]  }
  0x55   :  { %7369 = vmatpush3.bf16.msra.mxu1 %v8313_v42  ;;  %7336 = vmatprep.subr.bf16.mxu0 %v8315_v44  ;;  %v8385_v42 = vld [vmem:[%s11064_s1 + $0x400] sm:$0xff]   ;;  %v8387_v44 = vld [vmem:[%s11064_s1 + $0x448] sm:$0xff]  }
  0x56   :  { %7370 = vmatprep.subr.bf16.mxu1 %v8316_v45  ;;  %5041 = vmatprep.mubr.bf16.mxu0 %v8329_v57  ;;  %v8386_v43 = vld [vmem:[%s11064_s1 + $0x480] sm:$0xff]   ;;  %v8388_v45 = vld [vmem:[%s11064_s1 + $0x4c8] sm:$0xff]   ;;  %v8402_v57 = vld [vmem:[%s11064_s1 + $0x4d8] sm:$0xff]  }
  0x57   :  { %5098 = vmatprep.mubr.bf16.mxu1 %v8332_v59  ;;  %v8404_v59 = vld [vmem:[%s11064_s1 + $0x498] sm:$0xff]  }
  0x58   :  { %7337 = vmatpush3.bf16.msra.mxu0 %v8317_v46  ;;  %v8389_v46 = vld [vmem:[%s11064_s1 + $0x408] sm:$0xff]  }
  0x59   :  { %7371 = vmatpush3.bf16.msra.mxu1 %v8318_v47  ;;  %7338 = vmatprep.subr.bf16.mxu0 %v8319_v48  ;;  %v8390_v47 = vld [vmem:[%s11064_s1 + $0x488] sm:$0xff]  }
  0x5a   :  { %7372 = vmatprep.subr.bf16.mxu1 %v8320_v49  ;;  %v8391_v48 = vld [vmem:[%s11065_s0 + $0x204] ss:$232 sps:$4 sm:$0xff]   ;;  %v8393_v49 = vld [vmem:[%s11065_s0 + $0x200] ss:$232 sps:$4 sm:$0xff]  }
  0x5c   :  { %7339 = vmatpush3.bf16.msra.mxu0 %v8321_v50  ;;  %v8394_v50 = vld [vmem:[%s11064_s1 + $0x450] sm:$0xff]  }
  0x5d   :  { %7373 = vmatpush3.bf16.msra.mxu1 %v8322_v51  ;;  %7340 = vmatprep.subr.bf16.mxu0 %v8323_v52  ;;  %v8395_v51 = vld [vmem:[%s11064_s1 + $0x4d0] sm:$0xff]  }
  0x5e   :  { %7374 = vmatprep.subr.bf16.mxu1 %v8324_v53  ;;  %v8396_v52 = vld [vmem:[%s11065_s0 + $0x20c] ss:$232 sps:$4 sm:$0xff]  }
  0x5f   :  { %v8398_v53 = vld [vmem:[%s11064_s1 + $0x410] sm:$0xff]  }
  0x60   :  { %7341 = vmatpush3.bf16.msra.mxu0 %v8325_v54  ;;  %v8399_v54 = vld [vmem:[%s11064_s1 + $0x490] sm:$0xff]  }
  0x61   :  { %7375 = vmatpush3.bf16.msra.mxu1 %v8326_v55  ;;  %7394 = vmatprep.subr.bf16.mxu0 %v8333_v60  ;;  %v8400_v55 = vld [vmem:[%s11065_s0 + $0x208] ss:$232 sps:$4 sm:$0xff]   ;;  %v8405_v60 = vld [vmem:[%s11065_s0 + $0x3d4] ss:$232 sps:$4 sm:$0xff]  }
  0x62   :  { %7428 = vmatprep.subr.bf16.mxu1 %v8334_v61  ;;  %v8407_v61 = vld [vmem:[%s11065_s0 + $0x3d0] ss:$232 sps:$4 sm:$0xff]  }
  0x63   :  { %5042 = vmatmul.mubr.bf16.vlgmr.msra.gmra.mrb[24].mxu0 %v8327_v56  ;;  %v8401_v56 = vld [vmem:[%s11064_s1 + $0x458] sm:$0xff]  }
  0x64   :  { %5099 = vmatmul.mubr.bf16.vlgmr.msra.gmra.mrb[24].mxu1 %v8330_v58  ;;  %7395 = vmatpush3.bf16.msra.mxu0 %v8335_v62  ;;  %v8403_v58 = vld [vmem:[%s11064_s1 + $0x418] sm:$0xff]   ;;  %v8408_v62 = vld [vmem:[%s11064_s1 + $0x460] sm:$0xff]  }
  0x65   :  { %7429 = vmatpush3.bf16.msra.mxu1 %v8336_v63  ;;  %7396 = vmatprep.subr.bf16.mxu0 %v8337_v0  ;;  %v8409_v63 = vld [vmem:[%s11064_s1 + $0x4e0] sm:$0xff]  }
  0x66   :  { %7430 = vmatprep.subr.bf16.mxu1 %v8338_v1  ;;  %5049 = vmatprep.mubr.bf16.mxu0 %v8341_v4  ;;  %v8410_v0 = vld [vmem:[%s11065_s0 + $0x3dc] ss:$232 sps:$4 sm:$0xff]   ;;  %v8415_v4 = vld [vmem:[%s11064_s1 + $0x468] sm:$0xff]  }
  0x67   :  { %5106 = vmatprep.mubr.bf16.mxu1 %v8346_v8  ;;  %v8412_v1 = vld [vmem:[%s11064_s1 + $0x420] sm:$0xff]   ;;  %v8419_v8 = vld [vmem:[%s11064_s1 + $0x470] sm:$0xff]  }
  0x68   :  { %7397 = vmatpush3.bf16.msra.mxu0 %v8339_v2  ;;  %v8413_v2 = vld [vmem:[%s11064_s1 + $0x4a0] sm:$0xff]  }
  0x69   :  { %7431 = vmatpush3.bf16.msra.mxu1 %v8340_v3  ;;  %7398 = vmatprep.subr.bf16.mxu0 %v8344_v6  ;;  %v8414_v3 = vld [vmem:[%s11065_s0 + $0x3d8] ss:$232 sps:$4 sm:$0xff]   ;;  %v8417_v6 = vld [vmem:[%s11064_s1 + $0x428] sm:$0xff]  }
  0x6a   :  { %7432 = vmatprep.subr.bf16.mxu1 %v8345_v7  ;;  %v8418_v7 = vld [vmem:[%s11064_s1 + $0x4a8] sm:$0xff]  }
  0x6b   :  { %5050 = vmatmul.mubr.bf16.gmra.mrb[28].mxu0 %v8343_v5  ;;  %v8416_v5 = vld [vmem:[%s11064_s1 + $0x4e8] sm:$0xff]  }
  0x6c   :  { %7399 = vmatpush3.bf16.msra.mxu0 %v8348_v9  ;;  %5107 = vmatmul.mubr.bf16.gmra.mrb[28].mxu1 %v8350_v11  ;;  %v8420_v9 = vld [vmem:[%s11064_s1 + $0x4f0] sm:$0xff]  }
  0x6d   :  { %7433 = vmatpush3.bf16.msra.mxu1 %v8349_v10  ;;  %7400 = vmatprep.subr.bf16.mxu0 %v8351_v12  ;;  %v8421_v10 = vld [vmem:[%s11064_s1 + $0x430] sm:$0xff]   ;;  %v8423_v12 = vld [vmem:[%s11064_s1 + $0x478] sm:$0xff]  }
  0x6e   :  { %7434 = vmatprep.subr.bf16.mxu1 %v8352_v13  ;;  %5057 = vmatprep.mubr.bf16.mxu0 %v8355_v16  ;;  %v8422_v11 = vld [vmem:[%s11064_s1 + $0x4b0] sm:$0xff]   ;;  %v8424_v13 = vld [vmem:[%s11064_s1 + $0x4f8] sm:$0xff]   ;;  %v8427_v16 = vld [vmem:[%s11065_s0 + $0x40] ss:$232 sps:$4 sm:$0xff]  }
  0x6f   :  { %5114 = vmatprep.mubr.bf16.mxu1 %v8360_v20  ;;  %v8433_v20 = vld [vmem:[%s11064_s1 + $0x540] sm:$0xff]  }
  0x70   :  { %7401 = vmatpush3.bf16.msra.mxu0 %v8353_v14  ;;  %v8425_v14 = vld [vmem:[%s11064_s1 + $0x438] sm:$0xff]  }
  0x71   :  { %7435 = vmatpush3.bf16.msra.mxu1 %v8354_v15  ;;  %7402 = vmatprep.subr.bf16.mxu0 %v8358_v18  ;;  %v8426_v15 = vld [vmem:[%s11064_s1 + $0x4b8] sm:$0xff]   ;;  %v8430_v18 = vld [vmem:[%s11065_s0 + $0x48] ss:$232 sps:$4 sm:$0xff]  }
  0x72   :  { %7436 = vmatprep.subr.bf16.mxu1 %v8359_v19  ;;  %v8432_v19 = vld [vmem:[%s11065_s0 + $0x4c] ss:$232 sps:$4 sm:$0xff]  }
  0x73   :  { %5058 = vmatmul.mubr.bf16.gmra.mrb[32].mxu0 %v8357_v17  ;;  %v8429_v17 = vld [vmem:[%s11065_s0 + $0x44] ss:$232 sps:$4 sm:$0xff]  }
  0x74   :  { %7403 = vmatpush3.bf16.msra.mxu0 %v8362_v21  ;;  %5115 = vmatmul.mubr.bf16.gmra.mrb[32].mxu1 %v8364_v23  ;;  %v8434_v21 = vld [vmem:[%s11064_s1 + $0x5c0] sm:$0xff]  }
  0x75   :  { %7437 = vmatpush3.bf16.msra.mxu1 %v8363_v22  ;;  %7404 = vmatprep.subr.bf16.mxu0 %v8365_v24  ;;  %v8435_v22 = vld [vmem:[%s11064_s1 + $0x500] sm:$0xff]   ;;  %v8437_v24 = vld [vmem:[%s11064_s1 + $0x548] sm:$0xff]  }
  0x76   :  { %7438 = vmatprep.subr.bf16.mxu1 %v8366_v25  ;;  %5155 = vmatprep.mubr.bf16.mxu0 %v8379_v37  ;;  %v8436_v23 = vld [vmem:[%s11064_s1 + $0x580] sm:$0xff]   ;;  %v8438_v25 = vld [vmem:[%s11064_s1 + $0x5c8] sm:$0xff]   ;;  %v8452_v37 = vld [vmem:[%s11064_s1 + $0x5d8] sm:$0xff]  }
  0x77   :  { %5212 = vmatprep.mubr.bf16.mxu1 %v8382_v39  ;;  %v8454_v39 = vld [vmem:[%s11064_s1 + $0x598] sm:$0xff]  }
  0x78   :  { %7405 = vmatpush3.bf16.msra.mxu0 %v8367_v26  ;;  %v8439_v26 = vld [vmem:[%s11064_s1 + $0x508] sm:$0xff]  }
  0x79   :  { %7439 = vmatpush3.bf16.msra.mxu1 %v8368_v27  ;;  %7406 = vmatprep.subr.bf16.mxu0 %v8369_v28  ;;  %v8440_v27 = vld [vmem:[%s11064_s1 + $0x588] sm:$0xff]   ;;  %v8441_v28 = vld [vmem:[%s11065_s0 + $0x214] ss:$232 sps:$4 sm:$0xff]  }
  0x7a   :  { %7440 = vmatprep.subr.bf16.mxu1 %v8370_v29  ;;  %v8443_v29 = vld [vmem:[%s11065_s0 + $0x210] ss:$232 sps:$4 sm:$0xff]  }
  0x7c   :  { %7407 = vmatpush3.bf16.msra.mxu0 %v8371_v30  ;;  %v8444_v30 = vld [vmem:[%s11064_s1 + $0x550] sm:$0xff]  }
  0x7d   :  { %7441 = vmatpush3.bf16.msra.mxu1 %v8372_v31  ;;  %7408 = vmatprep.subr.bf16.mxu0 %v8373_v32  ;;  %v8445_v31 = vld [vmem:[%s11064_s1 + $0x5d0] sm:$0xff]   ;;  %v8446_v32 = vld [vmem:[%s11065_s0 + $0x21c] ss:$232 sps:$4 sm:$0xff]  }
  0x7e   :  { %7442 = vmatprep.subr.bf16.mxu1 %v8374_v33  ;;  %v8448_v33 = vld [vmem:[%s11064_s1 + $0x510] sm:$0xff]  }
  0x80   :  { %7409 = vmatpush3.bf16.msra.mxu0 %v8375_v34  ;;  %v8449_v34 = vld [vmem:[%s11064_s1 + $0x590] sm:$0xff]  }
  0x81   :  { %7443 = vmatpush3.bf16.msra.mxu1 %v8376_v35  ;;  %7462 = vmatprep.subr.bf16.mxu0 %v8383_v40  ;;  %v8450_v35 = vld [vmem:[%s11065_s0 + $0x218] ss:$232 sps:$4 sm:$0xff]   ;;  %v8455_v40 = vld [vmem:[%s11065_s0 + $0x3e4] ss:$232 sps:$4 sm:$0xff]  }
  0x82   :  { %7496 = vmatprep.subr.bf16.mxu1 %v8384_v41  ;;  %v8457_v41 = vld [vmem:[%s11065_s0 + $0x3e0] ss:$232 sps:$4 sm:$0xff]  }
  0x83   :  { %5156 = vmatmul.mubr.bf16.vlgmr.msra.gmra.mrb[36].mxu0 %v8377_v36  ;;  %v8451_v36 = vld [vmem:[%s11064_s1 + $0x558] sm:$0xff]  }
  0x84   :  { %5213 = vmatmul.mubr.bf16.vlgmr.msra.gmra.mrb[36].mxu1 %v8380_v38  ;;  %7463 = vmatpush3.bf16.msra.mxu0 %v8385_v42  ;;  %v8453_v38 = vld [vmem:[%s11064_s1 + $0x518] sm:$0xff]   ;;  %v8458_v42 = vld [vmem:[%s11064_s1 + $0x560] sm:$0xff]  }
  0x85   :  { %7497 = vmatpush3.bf16.msra.mxu1 %v8386_v43  ;;  %7464 = vmatprep.subr.bf16.mxu0 %v8387_v44  ;;  %v8459_v43 = vld [vmem:[%s11064_s1 + $0x5e0] sm:$0xff]   ;;  %v8460_v44 = vld [vmem:[%s11065_s0 + $0x3ec] ss:$232 sps:$4 sm:$0xff]  }
  0x86   :  { %7498 = vmatprep.subr.bf16.mxu1 %v8388_v45  ;;  %5163 = vmatprep.mubr.bf16.mxu0 %v8391_v48  ;;  %v8462_v45 = vld [vmem:[%s11064_s1 + $0x520] sm:$0xff]   ;;  %v8465_v48 = vld [vmem:[%s11064_s1 + $0x568] sm:$0xff]  }
  0x87   :  { %5220 = vmatprep.mubr.bf16.mxu1 %v8396_v52  ;;  %v8469_v52 = vld [vmem:[%s11064_s1 + $0x570] sm:$0xff]  }
  0x88   :  { %7465 = vmatpush3.bf16.msra.mxu0 %v8389_v46  ;;  %v8463_v46 = vld [vmem:[%s11064_s1 + $0x5a0] sm:$0xff]  }
  0x89   :  { %7499 = vmatpush3.bf16.msra.mxu1 %v8390_v47  ;;  %7466 = vmatprep.subr.bf16.mxu0 %v8394_v50  ;;  %v8464_v47 = vld [vmem:[%s11065_s0 + $0x3e8] ss:$232 sps:$4 sm:$0xff]  }
  0x8a   :  { %7500 = vmatprep.subr.bf16.mxu1 %v8395_v51  ;;  %v8467_v50 = vld [vmem:[%s11064_s1 + $0x528] sm:$0xff]  }
  0x8b   :  { %5164 = vmatmul.mubr.bf16.gmra.mrb[40].mxu0 %v8393_v49  ;;  %v8466_v49 = vld [vmem:[%s11064_s1 + $0x5e8] sm:$0xff]  }
  0x8c   :  { %7467 = vmatpush3.bf16.msra.mxu0 %v8398_v53  ;;  %5221 = vmatmul.mubr.bf16.gmra.mrb[40].mxu1 %v8400_v55  ;;  %v8468_v51 = vld [vmem:[%s11064_s1 + $0x5a8] sm:$0xff]   ;;  %v8470_v53 = vld [vmem:[%s11064_s1 + $0x5f0] sm:$0xff]  }
  0x8d   :  { %7501 = vmatpush3.bf16.msra.mxu1 %v8399_v54  ;;  %7468 = vmatprep.subr.bf16.mxu0 %v8401_v56  ;;  %v8471_v54 = vld [vmem:[%s11064_s1 + $0x530] sm:$0xff]   ;;  %v8473_v56 = vld [vmem:[%s11064_s1 + $0x578] sm:$0xff]  }
  0x8e   :  { %7502 = vmatprep.subr.bf16.mxu1 %v8402_v57  ;;  %5171 = vmatprep.mubr.bf16.mxu0 %v8405_v60  ;;  %v8472_v55 = vld [vmem:[%s11064_s1 + $0x5b0] sm:$0xff]   ;;  %v8474_v57 = vld [vmem:[%s11064_s1 + $0x5f8] sm:$0xff]  }
  0x8f   :  { %5228 = vmatprep.mubr.bf16.mxu1 %v8410_v0  ;;  %v8477_v60 = vld [vmem:[%s11065_s0 + $0x50] ss:$232 sps:$4 sm:$0xff]   ;;  %v8483_v0 = vld [vmem:[%s11064_s1 + $0x640] sm:$0xff]  }
  0x90   :  { %7469 = vmatpush3.bf16.msra.mxu0 %v8403_v58  ;;  %v8475_v58 = vld [vmem:[%s11064_s1 + $0x538] sm:$0xff]  }
  0x91   :  { %7503 = vmatpush3.bf16.msra.mxu1 %v8404_v59  ;;  %7470 = vmatprep.subr.bf16.mxu0 %v8408_v62  ;;  %v8476_v59 = vld [vmem:[%s11064_s1 + $0x5b8] sm:$0xff]  }
  0x92   :  { %7504 = vmatprep.subr.bf16.mxu1 %v8409_v63  ;;  %v8480_v62 = vld [vmem:[%s11065_s0 + $0x58] ss:$232 sps:$4 sm:$0xff]   ;;  %v8482_v63 = vld [vmem:[%s11065_s0 + $0x5c] ss:$232 sps:$4 sm:$0xff]  }
  0x93   :  { %5172 = vmatmul.mubr.bf16.gmra.mrb[44].mxu0 %v8407_v61  ;;  %v8479_v61 = vld [vmem:[%s11065_s0 + $0x54] ss:$232 sps:$4 sm:$0xff]  }
  0x94   :  { %7471 = vmatpush3.bf16.msra.mxu0 %v8412_v1  ;;  %5229 = vmatmul.mubr.bf16.gmra.mrb[44].mxu1 %v8414_v3  ;;  %v8484_v1 = vld [vmem:[%s11064_s1 + $0x6c0] sm:$0xff]  }
  0x95   :  { %7505 = vmatpush3.bf16.msra.mxu1 %v8413_v2  ;;  %7472 = vmatprep.subr.bf16.mxu0 %v8415_v4  ;;  %v8485_v2 = vld [vmem:[%s11064_s1 + $0x600] sm:$0xff]   ;;  %v8487_v4 = vld [vmem:[%s11064_s1 + $0x648] sm:$0xff]  }
  0x96   :  { %7506 = vmatprep.subr.bf16.mxu1 %v8416_v5  ;;  %5269 = vmatprep.mubr.bf16.mxu0 %v8429_v17  ;;  %v8486_v3 = vld [vmem:[%s11064_s1 + $0x680] sm:$0xff]   ;;  %v8488_v5 = vld [vmem:[%s11064_s1 + $0x6c8] sm:$0xff]  }
  0x97   :  { %5326 = vmatprep.mubr.bf16.mxu1 %v8432_v19  ;;  %v8500_v17 = vld [vmem:[%s11065_s0 + $0x228] ss:$232 sps:$4 sm:$0xff]  }
  0x98   :  { %7473 = vmatpush3.bf16.msra.mxu0 %v8417_v6  ;;  %v8489_v6 = vld [vmem:[%s11064_s1 + $0x608] sm:$0xff]  }
  0x99   :  { %7507 = vmatpush3.bf16.msra.mxu1 %v8418_v7  ;;  %7474 = vmatprep.subr.bf16.mxu0 %v8419_v8  ;;  %v8490_v7 = vld [vmem:[%s11064_s1 + $0x688] sm:$0xff]  }
  0x9a   :  { %7508 = vmatprep.subr.bf16.mxu1 %v8420_v9  ;;  %v8491_v8 = vld [vmem:[%s11065_s0 + $0x224] ss:$232 sps:$4 sm:$0xff]   ;;  %v8493_v9 = vld [vmem:[%s11065_s0 + $0x220] ss:$232 sps:$4 sm:$0xff]  }
  0x9c   :  { %7475 = vmatpush3.bf16.msra.mxu0 %v8421_v10  ;;  %v8494_v10 = vld [vmem:[%s11064_s1 + $0x650] sm:$0xff]  }
  0x9d   :  { %7509 = vmatpush3.bf16.msra.mxu1 %v8422_v11  ;;  %7476 = vmatprep.subr.bf16.mxu0 %v8423_v12  ;;  %v8495_v11 = vld [vmem:[%s11064_s1 + $0x6d0] sm:$0xff]  }
  0x9e   :  { %7510 = vmatprep.subr.bf16.mxu1 %v8424_v13  ;;  %v8496_v12 = vld [vmem:[%s11065_s0 + $0x22c] ss:$232 sps:$4 sm:$0xff]  }
  0x9f   :  { %v8498_v13 = vld [vmem:[%s11064_s1 + $0x610] sm:$0xff]  }
  0xa0   :  { %7477 = vmatpush3.bf16.msra.mxu0 %v8425_v14 }
  0xa1   :  { %7511 = vmatpush3.bf16.msra.mxu1 %v8426_v15  ;;  %7530 = vmatprep.subr.bf16.mxu0 %v8433_v20  ;;  %v8499_v15 = vld [vmem:[%s11064_s1 + $0x690] sm:$0xff]   ;;  %v8502_v20 = vld [vmem:[%s11064_s1 + $0x6d8] sm:$0xff]  }
  0xa2   :  { %7564 = vmatprep.subr.bf16.mxu1 %v8434_v21 }
  0xa3   :  { %5270 = vmatmul.mubr.bf16.vlgmr.msra.gmra.mrb[48].mxu0 %v8427_v16 }
  0xa4   :  { %5327 = vmatmul.mubr.bf16.vlgmr.msra.gmra.mrb[48].mxu1 %v8430_v18  ;;  %7531 = vmatpush3.bf16.msra.mxu0 %v8435_v22  ;;  %v8501_v18 = vld [vmem:[%s11064_s1 + $0x658] sm:$0xff]  }
  0xa5   :  { %7565 = vmatpush3.bf16.msra.mxu1 %v8436_v23  ;;  %7532 = vmatprep.subr.bf16.mxu0 %v8437_v24  ;;  %v8503_v23 = vld [vmem:[%s11064_s1 + $0x618] sm:$0xff]  }
  0xa6   :  { %7566 = vmatprep.subr.bf16.mxu1 %v8438_v25  ;;  %5277 = vmatprep.mubr.bf16.mxu0 %v8441_v28 }
  0xa7   :  { %5334 = vmatprep.mubr.bf16.mxu1 %v8446_v32  ;;  %v8508_v32 = vld [vmem:[%s11064_s1 + $0x660] sm:$0xff]  }
  0xa8   :  { %7533 = vmatpush3.bf16.msra.mxu0 %v8439_v26  ;;  %v8504_v26 = vld [vmem:[%s11064_s1 + $0x698] sm:$0xff]  }
  0xa9   :  { %7567 = vmatpush3.bf16.msra.mxu1 %v8440_v27  ;;  %7534 = vmatprep.subr.bf16.mxu0 %v8444_v30  ;;  %v8507_v30 = vld [vmem:[%s11065_s0 + $0x3f0] ss:$232 sps:$4 sm:$0xff]  }
  0xaa   :  { %7568 = vmatprep.subr.bf16.mxu1 %v8445_v31 }
  0xab   :  { %5278 = vmatmul.mubr.bf16.gmra.mrb[52].mxu0 %v8443_v29  ;;  %v8505_v29 = vld [vmem:[%s11065_s0 + $0x3f4] ss:$232 sps:$4 sm:$0xff]  }
  0xac   :  { %7535 = vmatpush3.bf16.msra.mxu0 %v8448_v33  ;;  %5335 = vmatmul.mubr.bf16.gmra.mrb[52].mxu1 %v8450_v35 }
  0xad   :  { %7569 = vmatpush3.bf16.msra.mxu1 %v8449_v34  ;;  %7536 = vmatprep.subr.bf16.mxu0 %v8451_v36  ;;  %v8509_v34 = vld [vmem:[%s11064_s1 + $0x6e0] sm:$0xff]  }
  0xae   :  { %7570 = vmatprep.subr.bf16.mxu1 %v8452_v37  ;;  %5285 = vmatprep.mubr.bf16.mxu0 %v8455_v40  ;;  %v8510_v36 = vld [vmem:[%s11065_s0 + $0x3fc] ss:$232 sps:$4 sm:$0xff]   ;;  %v8515_v40 = vld [vmem:[%s11064_s1 + $0x668] sm:$0xff]  }
  0xaf   :  { %5342 = vmatprep.mubr.bf16.mxu1 %v8460_v44  ;;  %v8512_v37 = vld [vmem:[%s11064_s1 + $0x620] sm:$0xff]  }
  0xb0   :  { %7537 = vmatpush3.bf16.msra.mxu0 %v8453_v38  ;;  %v8513_v38 = vld [vmem:[%s11064_s1 + $0x6a0] sm:$0xff]  }
  0xb1   :  { %7571 = vmatpush3.bf16.msra.mxu1 %v8454_v39  ;;  %7538 = vmatprep.subr.bf16.mxu0 %v8458_v42  ;;  %v8514_v39 = vld [vmem:[%s11065_s0 + $0x3f8] ss:$232 sps:$4 sm:$0xff]  }
  0xb2   :  { %7572 = vmatprep.subr.bf16.mxu1 %v8459_v43  ;;  %v8517_v43 = vld [vmem:[%s11064_s1 + $0x628] sm:$0xff]  }
  0xb3   :  { %5286 = vmatmul.mubr.bf16.gmra.mrb[56].mxu0 %v8457_v41  ;;  %v8516_v41 = vld [vmem:[%s11064_s1 + $0x6e8] sm:$0xff]  }
  0xb4   :  { %7539 = vmatpush3.bf16.msra.mxu0 %v8462_v45  ;;  %5343 = vmatmul.mubr.bf16.gmra.mrb[56].mxu1 %v8464_v47  ;;  %v8518_v45 = vld [vmem:[%s11064_s1 + $0x6a8] sm:$0xff]  }
  0xb5   :  { %7573 = vmatpush3.bf16.msra.mxu1 %v8463_v46  ;;  %7540 = vmatprep.subr.bf16.mxu0 %v8465_v48  ;;  %v8519_v48 = vld [vmem:[%s11064_s1 + $0x670] sm:$0xff]  }
  0xb6   :  { %7574 = vmatprep.subr.bf16.mxu1 %v8466_v49  ;;  %5383 = vmatprep.mubr.bf16.mxu0 %v8479_v61  ;;  %v8525_v61 = vld [vmem:[%s11064_s1 + $0x638] sm:$0xff]  }
  0xb7   :  { %5440 = vmatprep.mubr.bf16.mxu1 %v8482_v63  ;;  %v8526_v63 = vld [vmem:[%s11064_s1 + $0x6b8] sm:$0xff]  }
  0xb8   :  { %7541 = vmatpush3.bf16.msra.mxu0 %v8467_v50  ;;  %v8520_v50 = vld [vmem:[%s11064_s1 + $0x6f0] sm:$0xff]  }
  0xb9   :  { %7575 = vmatpush3.bf16.msra.mxu1 %v8468_v51  ;;  %7542 = vmatprep.subr.bf16.mxu0 %v8469_v52  ;;  %v8521_v52 = vld [vmem:[%s11064_s1 + $0x630] sm:$0xff]  }
  0xba   :  { %7576 = vmatprep.subr.bf16.mxu1 %v8470_v53 }
  0xbc   :  { %7543 = vmatpush3.bf16.msra.mxu0 %v8471_v54  ;;  %v8522_v54 = vld [vmem:[%s11064_s1 + $0x6b0] sm:$0xff]  }
  0xbd   :  { %7577 = vmatpush3.bf16.msra.mxu1 %v8472_v55  ;;  %7544 = vmatprep.subr.bf16.mxu0 %v8473_v56  ;;  %v8523_v56 = vld [vmem:[%s11064_s1 + $0x678] sm:$0xff]  }
  0xbe   :  { %7578 = vmatprep.subr.bf16.mxu1 %v8474_v57 }
  0xc0   :  { %7545 = vmatpush3.bf16.msra.mxu0 %v8475_v58 }
  0xc1   :  { %7579 = vmatpush3.bf16.msra.mxu1 %v8476_v59  ;;  %7598 = vmatprep.subr.bf16.mxu0 %v8483_v0  ;;  %v8524_v59 = vld [vmem:[%s11064_s1 + $0x6f8] sm:$0xff]   ;;  %v8527_v0 = vld [vmem:[%s11065_s0 + $0x60] ss:$232 sps:$4 sm:$0xff]  }
  0xc2   :  { %7632 = vmatprep.subr.bf16.mxu1 %v8484_v1 }
  0xc3   :  { %5384 = vmatmul.mubr.bf16.vlgmr.msra.gmra.mrb[60].mxu0 %v8477_v60 }
  0xc4   :  { %5441 = vmatmul.mubr.bf16.vlgmr.msra.gmra.mrb[60].mxu1 %v8480_v62  ;;  %7599 = vmatpush3.bf16.msra.mxu0 %v8485_v2  ;;  %v8529_v2 = vld [vmem:[%s11065_s0 + $0x64] ss:$232 sps:$4 sm:$0xff]  }
  0xc5   :  { %7633 = vmatpush3.bf16.msra.mxu1 %v8486_v3  ;;  %7600 = vmatprep.subr.bf16.mxu0 %v8487_v4  ;;  %v8530_v4 = vld [vmem:[%s11065_s0 + $0x68] ss:$232 sps:$4 sm:$0xff]  }
  0xc6   :  { %7634 = vmatprep.subr.bf16.mxu1 %v8488_v5  ;;  %5391 = vmatprep.mubr.bf16.mxu0 %v8491_v8  ;;  %v8532_v5 = vld [vmem:[%s11065_s0 + $0x6c] ss:$232 sps:$4 sm:$0xff]  }
  0xc7   :  { %5448 = vmatprep.mubr.bf16.mxu1 %v8496_v12 }
  0xc8   :  { %7601 = vmatpush3.bf16.msra.mxu0 %v8489_v6 }
  0xc9   :  { %7635 = vmatpush3.bf16.msra.mxu1 %v8490_v7  ;;  %7602 = vmatprep.subr.bf16.mxu0 %v8494_v10  ;;  %v8533_v7 = vld [vmem:[%s11064_s1 + $0x740] sm:$0xff]  }
  0xca   :  { %7636 = vmatprep.subr.bf16.mxu1 %v8495_v11  ;;  %v8535_v11 = vld [vmem:[%s11064_s1 + $0x700] sm:$0xff]  }
  0xcb   :  { %5392 = vmatmul.mubr.bf16.gmra.mrb[64].mxu0 %v8493_v9  ;;  %v8534_v9 = vld [vmem:[%s11064_s1 + $0x7c0] sm:$0xff]  }
  0xcc   :  { %7603 = vmatpush3.bf16.msra.mxu0 %v8498_v13  ;;  %5449 = vmatmul.mubr.bf16.gmra.mrb[64].mxu1 %v8500_v17 }
  0xcd   :  { %7637 = vmatpush3.bf16.msra.mxu1 %v8499_v15  ;;  %7604 = vmatprep.subr.bf16.mxu0 %v8501_v18 }
  0xce   :  { %7638 = vmatprep.subr.bf16.mxu1 %v8502_v20  ;;  %5399 = vmatprep.mubr.bf16.mxu0 %v8505_v29  ;;  %v8545_v29 = vld [vmem:[%s11064_s1 + $0x7d0] sm:$0xff]  }
  0xcf   :  { %5456 = vmatprep.mubr.bf16.mxu1 %v8510_v36 }
  0xd0   :  { %7605 = vmatpush3.bf16.msra.mxu0 %v8503_v23 }
  0xd1   :  { %7639 = vmatpush3.bf16.msra.mxu1 %v8504_v26  ;;  %7606 = vmatprep.subr.bf16.mxu0 %v8508_v32  ;;  %v8541_v26 = vld [vmem:[%s11065_s0 + $0x234] ss:$232 sps:$4 sm:$0xff]  }
  0xd2   :  { %7640 = vmatprep.subr.bf16.mxu1 %v8509_v34  ;;  %v8548_v32 = vld [vmem:[%s11064_s1 + $0x710] sm:$0xff]  }
  0xd3   :  { %5400 = vmatmul.mubr.bf16.gmra.mrb[68].mxu0 %v8507_v30  ;;  %v8546_v30 = vld [vmem:[%s11065_s0 + $0x23c] ss:$232 sps:$4 sm:$0xff]   ;;  %v8549_v34 = vld [vmem:[%s11064_s1 + $0x790] sm:$0xff]  }
  0xd4   :  { %7607 = vmatpush3.bf16.msra.mxu0 %v8512_v37  ;;  %5457 = vmatmul.mubr.bf16.gmra.mrb[68].mxu1 %v8514_v39  ;;  %v8550_v37 = vld [vmem:[%s11065_s0 + $0x238] ss:$232 sps:$4 sm:$0xff]  }
  0xd5   :  { %7641 = vmatpush3.bf16.msra.mxu1 %v8513_v38  ;;  %7608 = vmatprep.subr.bf16.mxu0 %v8515_v40  ;;  %v8551_v38 = vld [vmem:[%s11064_s1 + $0x758] sm:$0xff]  }
  0xd6   :  { %7642 = vmatprep.subr.bf16.mxu1 %v8516_v41  ;;  %5497 = vmatprep.mubr.bf16.mxu0 %v8529_v2  ;;  %v8552_v40 = vld [vmem:[%s11064_s1 + $0x7d8] sm:$0xff]  }
  0xd7   :  { %5554 = vmatprep.mubr.bf16.mxu1 %v8532_v5 }
  0xd8   :  { %7609 = vmatpush3.bf16.msra.mxu0 %v8517_v43  ;;  %v8553_v43 = vld [vmem:[%s11064_s1 + $0x718] sm:$0xff]  }
  0xd9   :  { %7643 = vmatpush3.bf16.msra.mxu1 %v8518_v45  ;;  %7610 = vmatprep.subr.bf16.mxu0 %v8519_v48 }
  0xda   :  { %7644 = vmatprep.subr.bf16.mxu1 %v8520_v50  ;;  %v8555_v50 = vld [vmem:[%s11065_s0 + $0x404] ss:$232 sps:$4 sm:$0xff]  }
  0xdc   :  { %7611 = vmatpush3.bf16.msra.mxu0 %v8521_v52  ;;  %v8557_v52 = vld [vmem:[%s11065_s0 + $0x400] ss:$232 sps:$4 sm:$0xff]  }
  0xdd   :  { %7645 = vmatpush3.bf16.msra.mxu1 %v8522_v54  ;;  %7612 = vmatprep.subr.bf16.mxu0 %v8523_v56  ;;  %v8558_v54 = vld [vmem:[%s11064_s1 + $0x760] sm:$0xff]  }
  0xde   :  { %7646 = vmatprep.subr.bf16.mxu1 %v8524_v59  ;;  %v8559_v56 = vld [vmem:[%s11064_s1 + $0x7e0] sm:$0xff]   ;;  %v8560_v59 = vld [vmem:[%s11065_s0 + $0x40c] ss:$232 sps:$4 sm:$0xff]  }
  0xe0   :  { %7613 = vmatpush3.bf16.msra.mxu0 %v8525_v61  ;;  %v8562_v61 = vld [vmem:[%s11064_s1 + $0x720] sm:$0xff]  }
  0xe1   :  { %7647 = vmatpush3.bf16.msra.mxu1 %v8526_v63  ;;  %7666 = vmatprep.subr.bf16.mxu0 %v8533_v7  ;;  %v8565_v7 = vld [vmem:[%s11064_s1 + $0x768] sm:$0xff]  }
  0xe2   :  { %7700 = vmatprep.subr.bf16.mxu1 %v8534_v9 }
  0xe3   :  { %5498 = vmatmul.mubr.bf16.vlgmr.msra.gmra.mrb[72].mxu0 %v8527_v0  ;;  %v8563_v0 = vld [vmem:[%s11064_s1 + $0x7a0] sm:$0xff]  }
  0xe4   :  { %5555 = vmatmul.mubr.bf16.vlgmr.msra.gmra.mrb[72].mxu1 %v8530_v4  ;;  %7667 = vmatpush3.bf16.msra.mxu0 %v8535_v11  ;;  %v6522_v4 = vld [vmem:[%s11066_s2] ss:$0 sm:$0xff] }
  0xe5   :  { %5505 = vmatprep.mubr.bf16.mxu0 %v8541_v26  ;;  %5562 = vmatprep.mubr.bf16.mxu1 %v8546_v30 }
  0xec   :  { %5563 = vmatmul.mubr.bf16.gmra.mrb[76].mxu1 %v8550_v37 }
  0xed   :  { %5570 = vmatprep.mubr.bf16.mxu1 %v8560_v59 }
  0xf6   :  { %v7206_v14 = vpop.f32.mrb[0].mxu0 }
  0xf7   :  { %v7240_v16 = vpop.f32.mrb[0].mxu1  ;;  %v7207_v19 = vpop.f32.mrb[1].mxu0 }
  0xf8   :  { %v9768_v21 = vadd.f32 %v7207_v19, %v7206_v14  ;;  %v7241_v22 = vpop.f32.mrb[1].mxu1  ;;  %v7209_v25 = vpop.f32.mrb[2].mxu0  ;;  %v8536_v14 = vld [vmem:[%s11064_s1 + $0x780] sm:$0xff]   ;;  %v8538_v19 = vld [vmem:[%s11064_s1 + $0x7c8] sm:$0xff]  }
  0xf9   :  { %v9773_v24 = vadd.f32 %v7241_v22, %v7240_v16  ;;  %v7243_v27 = vpop.f32.mrb[2].mxu1  ;;  %v7210_v28 = vpop.f32.mrb[3].mxu0  ;;  %v8537_v16 = vld [vmem:[%s11064_s1 + $0x748] sm:$0xff]   ;;  %7701 = vmatpush3.bf16.msra.mxu1 %v8536_v14 }
  0xfa   :  { %v9784_v31 = vadd.f32 %v7210_v28, %v7209_v25  ;;  %v7244_v33 = vpop.f32.mrb[3].mxu1  ;;  %7668 = vmatprep.subr.bf16.mxu0 %v8537_v16  ;;  %v8539_v22 = vld [vmem:[%s11064_s1 + $0x708] sm:$0xff]   ;;  %7702 = vmatprep.subr.bf16.mxu1 %v8538_v19  ;;  %v8544_v28 = vld [vmem:[%s11064_s1 + $0x750] sm:$0xff]   ;;  %v4816_v5 = vadd.f32 %v9768_v21, %v6522_v4 }
  0xfb   :  { %v9792_v35 = vadd.f32 %v7244_v33, %v7243_v27  ;;  %v8540_v25 = vld [vmem:[%s11064_s1 + $0x788] sm:$0xff]   ;;  %7669 = vmatpush3.bf16.msra.mxu0 %v8539_v22  ;;  %v8543_v27 = vld [vmem:[%s11065_s0 + $0x230] ss:$232 sps:$4 sm:$0xff]  }
  0xfc   :  { %5506 = vmatmul.mubr.bf16.gmra.mrb[76].mxu0 %v8543_v27  ;;  %7670 = vmatprep.subr.bf16.mxu0 %v8544_v28 }
  0xfd   :  { %7703 = vmatpush3.bf16.msra.mxu1 %v8540_v25  ;;  %5513 = vmatprep.mubr.bf16.mxu0 %v8555_v50  ;;  %v8579_v50 = vld [vmem:[%s11065_s0 + $0x74] ss:$232 sps:$4 sm:$0xff]  }
  0xfe   :  { %v7212_v42 = vpop.f32.mrb[4].mxu0  ;;  %7704 = vmatprep.subr.bf16.mxu1 %v8545_v29 }
  0xff   :  { %v7213_v44 = vpop.f32.mrb[5].mxu0  ;;  %v7246_v53 = vpop.f32.mrb[4].mxu1  ;;  %7671 = vmatpush3.bf16.msra.mxu0 %v8548_v32 }
 0x100   :  { %v9818_v46 = vadd.f32 %v7213_v44, %v7212_v42  ;;  %v7215_v47 = vpop.f32.mrb[6].mxu0  ;;  %v7247_v55 = vpop.f32.mrb[5].mxu1  ;;  %7672 = vmatprep.subr.bf16.mxu0 %v8551_v38  ;;  %v8573_v38 = vld [vmem:[%s11064_s1 + $0x778] sm:$0xff]  }
 0x101   :  { %v7216_v49 = vpop.f32.mrb[7].mxu0  ;;  %v9837_v57 = vadd.f32 %v7247_v55, %v7246_v53  ;;  %v7249_v58 = vpop.f32.mrb[6].mxu1  ;;  %7705 = vmatpush3.bf16.msra.mxu1 %v8549_v34  ;;  %v8572_v34 = vld [vmem:[%s11064_s1 + $0x7b0] sm:$0xff]  }
 0x102   :  { %v9826_v51 = vadd.f32 %v7216_v49, %v7215_v47  ;;  %v7250_v60 = vpop.f32.mrb[7].mxu1  ;;  %7706 = vmatprep.subr.bf16.mxu1 %v8552_v40  ;;  %v8554_v47 = vld [vmem:[%s11064_s1 + $0x798] sm:$0xff]   ;;  %v4824_v9 = vadd.f32 %v9818_v46, %v6522_v4 }
 0x103   :  { %v9845_v62 = vadd.f32 %v7250_v60, %v7249_v58  ;;  %7673 = vmatpush3.bf16.msra.mxu0 %v8553_v43  ;;  %v8574_v40 = vld [vmem:[%s11064_s1 + $0x7f8] sm:$0xff]  }
 0x104   :  { %5514 = vmatmul.mubr.bf16.gmra.mrb[80].mxu0 %v8557_v52  ;;  %7674 = vmatprep.subr.bf16.mxu0 %v8558_v54  ;;  %v8575_v43 = vld [vmem:[%s11064_s1 + $0x738] sm:$0xff]  }
 0x105   :  { %7707 = vmatpush3.bf16.msra.mxu1 %v8554_v47  ;;  %v8582_v54 = vld [vmem:[%s11065_s0 + $0x7c] ss:$232 sps:$4 sm:$0xff]   ;;  %5611 = vmatprep.mubr.bf16.mxu0 %v8579_v50 }
 0x106   :  { %v7218_v1 = vpop.f32.mrb[8].mxu0  ;;  %7708 = vmatprep.subr.bf16.mxu1 %v8559_v56 }
 0x107   :  { %v7219_v3 = vpop.f32.mrb[9].mxu0  ;;  %v7252_v12 = vpop.f32.mrb[8].mxu1  ;;  %7675 = vmatpush3.bf16.msra.mxu0 %v8562_v61  ;;  %v8584_v61 = vld [vmem:[%s11064_s1 + $0x8c0] sm:$0xff]  }
 0x108   :  { %v9862_v6 = vadd.f32 %v7219_v3, %v7218_v1  ;;  %v7221_v8 = vpop.f32.mrb[10].mxu0  ;;  %v7253_v15 = vpop.f32.mrb[9].mxu1  ;;  %v8564_v1 = vld [vmem:[%s11065_s0 + $0x408] ss:$232 sps:$4 sm:$0xff]   ;;  %7676 = vmatprep.subr.bf16.mxu0 %v8565_v7 }
 0x109   :  { %v7222_v10 = vpop.f32.mrb[11].mxu0  ;;  %v9881_v17 = vadd.f32 %v7253_v15, %v7252_v12  ;;  %v7255_v18 = vpop.f32.mrb[10].mxu1  ;;  %7709 = vmatpush3.bf16.msra.mxu1 %v8563_v0  ;;  %v8566_v12 = vld [vmem:[%s11064_s1 + $0x7e8] sm:$0xff]   ;;  %v8585_v0 = vld [vmem:[%s11064_s1 + $0x800] sm:$0xff]  }
 0x10a   :  { %v9873_v13 = vadd.f32 %v7222_v10, %v7221_v8  ;;  %v7256_v20 = vpop.f32.mrb[11].mxu1  ;;  %v4819_v8 = vadd.f32 %v9784_v31, %v6522_v4  ;;  %v4827_v10 = vadd.f32 %v9826_v51, %v6522_v4  ;;  %5571 = vmatmul.mubr.bf16.gmra.mrb[80].mxu1 %v8564_v1  ;;  %v4832_v14 = vadd.f32 %v9862_v6, %v6522_v4  ;;  %v8567_v31 = vld [vmem:[%s11064_s1 + $0x728] sm:$0xff]  }
 0x10b   :  { %v9889_v23 = vadd.f32 %v7256_v20, %v7255_v18  ;;  %v4873_v18 = vadd.f32 %v9773_v24, %v4816_v5  ;;  %v4881_v51 = vadd.f32 %v9837_v57, %v4824_v9  ;;  %7710 = vmatprep.subr.bf16.mxu1 %v8566_v12  ;;  %v8568_v6 = vld [vmem:[%s11064_s1 + $0x7a8] sm:$0xff]   ;;  %7677 = vmatpush3.bf16.msra.mxu0 %v8567_v31  ;;  %v8594_v12 = vld [vmem:[%s11064_s1 + $0x850] sm:$0xff]  }
 0x10c   :  { %v4835_v21 = vadd.f32 %v9873_v13, %v6522_v4  ;;  %v4876_v46 = vadd.f32 %v9792_v35, %v4819_v8  ;;  %v4884_v19 = vadd.f32 %v9845_v62, %v4827_v10  ;;  %v4889_v13 = vadd.f32 %v9881_v17, %v4832_v14  ;;  %v8569_v35 = vld [vmem:[%s11064_s1 + $0x770] sm:$0xff]   ;;  %5668 = vmatprep.mubr.bf16.mxu1 %v8582_v54  ;;  %v8587_v4 = vld [vmem:[%s11064_s1 + $0x848] sm:$0xff]  }
 0x10d   :  { %7711 = vmatpush3.bf16.msra.mxu1 %v8568_v6  ;;  %v8570_v17 = vld [vmem:[%s11064_s1 + $0x7f0] sm:$0xff]   ;;  %7678 = vmatprep.subr.bf16.mxu0 %v8569_v35  ;;  %v8588_v7 = vld [vmem:[%s11064_s1 + $0x8c8] sm:$0xff]   ;;  %v8604_v35 = vld [vmem:[%s11064_s1 + $0x898] sm:$0xff]  }
 0x10e   :  { %v4892_v24 = vadd.f32 %v9889_v23, %v4835_v21  ;;  %v8571_v23 = vld [vmem:[%s11064_s1 + $0x730] sm:$0xff]   ;;  %7712 = vmatprep.subr.bf16.mxu1 %v8570_v17  ;;  %v8589_v8 = vld [vmem:[%s11064_s1 + $0x808] sm:$0xff]  }
 0x10f   :  { %7679 = vmatpush3.bf16.msra.mxu0 %v8571_v23  ;;  %v8590_v9 = vld [vmem:[%s11064_s1 + $0x888] sm:$0xff]   ;;  %v8595_v14 = vld [vmem:[%s11064_s1 + $0x8d0] sm:$0xff]   ;;  %v8608_v23 = vld [vmem:[%s11064_s1 + $0x860] sm:$0xff]  }
 0x110   :  { %7680 = vmatprep.subr.bf16.mxu0 %v8573_v38  ;;  %v8591_v10 = vld [vmem:[%s11065_s0 + $0x244] ss:$232 sps:$4 sm:$0xff]   ;;  %v8600_v31 = vld [vmem:[%s11065_s0 + $0x248] ss:$232 sps:$4 sm:$0xff]  }
 0x111   :  { %7713 = vmatpush3.bf16.msra.mxu1 %v8572_v34  ;;  %v8596_v21 = vld [vmem:[%s11065_s0 + $0x24c] ss:$232 sps:$4 sm:$0xff]  }
 0x112   :  { %7714 = vmatprep.subr.bf16.mxu1 %v8574_v40 }
 0x113   :  { %7681 = vmatpush3.bf16.msra.mxu0 %v8575_v43 }
 0x116   :  { %v7274_v33 = vpop.f32.mrb[12].mxu0 }
 0x117   :  { %v7308_v36 = vpop.f32.mrb[12].mxu1  ;;  %v7275_v39 = vpop.f32.mrb[13].mxu0 }
 0x118   :  { %v9924_v41 = vadd.f32 %v7275_v39, %v7274_v33  ;;  %v7309_v42 = vpop.f32.mrb[13].mxu1  ;;  %v7277_v45 = vpop.f32.mrb[14].mxu0 }
 0x119   :  { %v9929_v44 = vadd.f32 %v7309_v42, %v7308_v36  ;;  %v7311_v48 = vpop.f32.mrb[14].mxu1  ;;  %v7278_v49 = vpop.f32.mrb[15].mxu0 }
 0x11a   :  { %v7279_v53 = vadd.f32 %v7278_v49, %v7277_v45  ;;  %v7312_v55 = vpop.f32.mrb[15].mxu1  ;;  %v4930_v57 = vadd.f32 %v9924_v41, %v4873_v18  ;;  %v8576_v45 = vld [vmem:[%s11064_s1 + $0x7b8] sm:$0xff]   ;;  %v8599_v18 = vld [vmem:[%s11064_s1 + $0x890] sm:$0xff]  }
 0x11b   :  { %v7313_v58 = vadd.f32 %v7312_v55, %v7311_v48  ;;  %v8577_v49 = vld [vmem:[%s11065_s0 + $0x70] ss:$232 sps:$4 sm:$0xff]   ;;  %7715 = vmatpush3.bf16.msra.mxu1 %v8576_v45 }
 0x11c   :  { %v4933_v62 = vadd.f32 %v7279_v53, %v4876_v46  ;;  %v9996_v30 = vadd.f32 %v9929_v44, %v4930_v57  ;;  %v8580_v53 = vld [vmem:[%s11065_s0 + $0x78] ss:$232 sps:$4 sm:$0xff]   ;;  %5612 = vmatmul.mubr.bf16.vlgmr.msra.gmra.mrb[84].mxu0 %v8577_v49  ;;  %7768 = vmatprep.subr.bf16.mxu1 %v8584_v61  ;;  %v8619_v61 = vld [vmem:[%s11064_s1 + $0x870] sm:$0xff]  }
 0x11d   :  { %5619 = vmatprep.mubr.bf16.mxu0 %v8591_v10 }
 0x11e   :  { %v7280_v60 = vpop.f32.mrb[16].mxu0  ;;  %v9998_v32 = vadd.f32 %v7313_v58, %v4933_v62  ;;  %v8583_v58 = vld [vmem:[%s11064_s1 + $0x840] sm:$0xff]   ;;  %5669 = vmatmul.mubr.bf16.vlgmr.msra.gmra.mrb[84].mxu1 %v8580_v53 }
 0x11f   :  { %v7281_v63 = vpop.f32.mrb[17].mxu0  ;;  %v7314_v15 = vpop.f32.mrb[16].mxu1  ;;  %7734 = vmatprep.subr.bf16.mxu0 %v8583_v58  ;;  %5676 = vmatprep.mubr.bf16.mxu1 %v8596_v21  ;;  %v8618_v58 = vld [vmem:[%s11064_s1 + $0x8a8] sm:$0xff]   ;;  %v8625_v21 = vld [vmem:[%s11064_s1 + $0x838] sm:$0xff]  }
 0x120   :  { %v7282_v2 = vadd.f32 %v7281_v63, %v7280_v60  ;;  %v7283_v3 = vpop.f32.mrb[18].mxu0  ;;  %v7315_v20 = vpop.f32.mrb[17].mxu1  ;;  %7735 = vmatpush3.bf16.msra.mxu0 %v8585_v0  ;;  %v8620_v0 = vld [vmem:[%s11064_s1 + $0x8f0] sm:$0xff]  }
 0x121   :  { %v7284_v11 = vpop.f32.mrb[19].mxu0  ;;  %v7316_v22 = vadd.f32 %v7315_v20, %v7314_v15  ;;  %v7317_v25 = vpop.f32.mrb[18].mxu1  ;;  %7736 = vmatprep.subr.bf16.mxu0 %v8587_v4  ;;  %v8598_v15 = vld [vmem:[%s11064_s1 + $0x810] sm:$0xff]   ;;  %v8602_v20 = vld [vmem:[%s11064_s1 + $0x8d8] sm:$0xff]  }
 0x122   :  { %v7285_v16 = vadd.f32 %v7284_v11, %v7283_v3  ;;  %v4938_v26 = vadd.f32 %v7282_v2, %v4881_v51  ;;  %v7318_v28 = vpop.f32.mrb[19].mxu1  ;;  %v8586_v3 = vld [vmem:[%s11064_s1 + $0x880] sm:$0xff]   ;;  %v8601_v51 = vld [vmem:[%s11064_s1 + $0x858] sm:$0xff]   ;;  %v8622_v4 = vld [vmem:[%s11064_s1 + $0x8b0] sm:$0xff]  }
 0x123   :  { %v7319_v29 = vadd.f32 %v7318_v28, %v7317_v25  ;;  %7769 = vmatpush3.bf16.msra.mxu1 %v8586_v3  ;;  %v8593_v11 = vld [vmem:[%s11065_s0 + $0x240] ss:$232 sps:$4 sm:$0xff]   ;;  %v8607_v28 = vld [vmem:[%s11065_s0 + $0x410] ss:$232 sps:$4 sm:$0xff]  }
 0x124   :  { %v4941_v27 = vadd.f32 %v7285_v16, %v4884_v19  ;;  %v10000_v33 = vadd.f32 %v7316_v22, %v4938_v26  ;;  %7770 = vmatprep.subr.bf16.mxu1 %v8588_v7  ;;  %7737 = vmatpush3.bf16.msra.mxu0 %v8589_v8 }
 0x125   :  { %5620 = vmatmul.mubr.bf16.gmra.mrb[88].mxu0 %v8593_v11  ;;  %7738 = vmatprep.subr.bf16.mxu0 %v8594_v12  ;;  %v8624_v11 = vld [vmem:[%s11064_s1 + $0x8f8] sm:$0xff]  }
 0x126   :  { %v10005_v36 = vadd.f32 %v7319_v29, %v4941_v27  ;;  %v7286_v37 = vpop.f32.mrb[20].mxu0  ;;  %5677 = vmatmul.mubr.bf16.gmra.mrb[88].mxu1 %v8600_v31  ;;  %v8605_v27 = vld [vmem:[%s11065_s0 + $0x414] ss:$232 sps:$4 sm:$0xff]  }
 0x127   :  { %v7287_v39 = vpop.f32.mrb[21].mxu0  ;;  %v7320_v52 = vpop.f32.mrb[20].mxu1  ;;  %7771 = vmatpush3.bf16.msra.mxu1 %v8590_v9  ;;  %5627 = vmatprep.mubr.bf16.mxu0 %v8605_v27  ;;  %v8623_v9 = vld [vmem:[%s11064_s1 + $0x878] sm:$0xff]   ;;  %v8636_v27 = vld [vmem:[%s11064_s1 + $0x980] sm:$0xff]  }
 0x128   :  { %v7288_v41 = vadd.f32 %v7287_v39, %v7286_v37  ;;  %v7289_v42 = vpop.f32.mrb[22].mxu0  ;;  %v7321_v56 = vpop.f32.mrb[21].mxu1  ;;  %7772 = vmatprep.subr.bf16.mxu1 %v8595_v14  ;;  %7739 = vmatpush3.bf16.msra.mxu0 %v8598_v15  ;;  %v8609_v37 = vld [vmem:[%s11064_s1 + $0x8e0] sm:$0xff]  }
 0x129   :  { %v7290_v44 = vpop.f32.mrb[23].mxu0  ;;  %v7322_v59 = vadd.f32 %v7321_v56, %v7320_v52  ;;  %v7323_v60 = vpop.f32.mrb[22].mxu1  ;;  %7740 = vmatprep.subr.bf16.mxu0 %v8601_v51  ;;  %v8610_v39 = vld [vmem:[%s11065_s0 + $0x41c] ss:$232 sps:$4 sm:$0xff]   ;;  %v8616_v52 = vld [vmem:[%s11064_s1 + $0x8e8] sm:$0xff]  }
 0x12a   :  { %v4946_v47 = vadd.f32 %v7288_v41, %v4889_v13  ;;  %v7291_v48 = vadd.f32 %v7290_v44, %v7289_v42  ;;  %v7324_v63 = vpop.f32.mrb[23].mxu1  ;;  %v8612_v41 = vld [vmem:[%s11064_s1 + $0x820] sm:$0xff]   ;;  %5684 = vmatprep.mubr.bf16.mxu1 %v8610_v39  ;;  %v8644_v39 = vld [vmem:[%s11064_s1 + $0x950] sm:$0xff]  }
 0x12b   :  { %v7325_v2 = vadd.f32 %v7324_v63, %v7323_v60  ;;  %7773 = vmatpush3.bf16.msra.mxu1 %v8599_v18  ;;  %v8629_v51 = vld [vmem:[%s11065_s0 + $0x84] ss:$232 sps:$4 sm:$0xff]  }
 0x12c   :  { %v4949_v55 = vadd.f32 %v7291_v48, %v4892_v24  ;;  %v10040_v1 = vadd.f32 %v7322_v59, %v4946_v47  ;;  %v8603_v24 = vld [vmem:[%s11064_s1 + $0x818] sm:$0xff]   ;;  %7774 = vmatprep.subr.bf16.mxu1 %v8602_v20  ;;  %v8615_v48 = vld [vmem:[%s11064_s1 + $0x868] sm:$0xff]  }
 0x12d   :  { %7741 = vmatpush3.bf16.msra.mxu0 %v8603_v24  ;;  %v8614_v47 = vld [vmem:[%s11065_s0 + $0x418] ss:$232 sps:$4 sm:$0xff]   ;;  %v8630_v20 = vld [vmem:[%s11065_s0 + $0x88] ss:$232 sps:$4 sm:$0xff]  }
 0x12e   :  { %v10048_v5 = vadd.f32 %v7325_v2, %v4949_v55  ;;  %5628 = vmatmul.mubr.bf16.gmra.mrb[92].mxu0 %v8607_v28  ;;  %7742 = vmatprep.subr.bf16.mxu0 %v8608_v23  ;;  %v8617_v55 = vld [vmem:[%s11064_s1 + $0x828] sm:$0xff]   ;;  %v8633_v24 = vld [vmem:[%s11064_s1 + $0x940] sm:$0xff]  }
 0x12f   :  { %7775 = vmatpush3.bf16.msra.mxu1 %v8604_v35  ;;  %5725 = vmatprep.mubr.bf16.mxu0 %v8629_v51  ;;  %v8634_v35 = vld [vmem:[%s11064_s1 + $0x9c0] sm:$0xff]   ;;  %v8637_v28 = vld [vmem:[%s11064_s1 + $0x948] sm:$0xff]  }
 0x130   :  { %7776 = vmatprep.subr.bf16.mxu1 %v8609_v37  ;;  %5685 = vmatmul.mubr.bf16.gmra.mrb[92].mxu1 %v8614_v47  ;;  %v8639_v23 = vld [vmem:[%s11064_s1 + $0x908] sm:$0xff]   ;;  %v8641_v37 = vld [vmem:[%s11065_s0 + $0x254] ss:$232 sps:$4 sm:$0xff]  }
 0x131   :  { %7743 = vmatpush3.bf16.msra.mxu0 %v8612_v41  ;;  %v8646_v41 = vld [vmem:[%s11065_s0 + $0x25c] ss:$232 sps:$4 sm:$0xff]  }
 0x132   :  { %7744 = vmatprep.subr.bf16.mxu0 %v8615_v48  ;;  %v8651_v48 = vld [vmem:[%s11064_s1 + $0x958] sm:$0xff]  }
 0x135   :  { %7745 = vmatpush3.bf16.msra.mxu0 %v8617_v55 }
 0x136   :  { %v7342_v16 = vpop.f32.mrb[24].mxu0  ;;  %7746 = vmatprep.subr.bf16.mxu0 %v8619_v61  ;;  %v8655_v61 = vld [vmem:[%s11065_s0 + $0x424] ss:$232 sps:$4 sm:$0xff]  }
 0x137   :  { %v7376_v46 = vpop.f32.mrb[24].mxu1  ;;  %v7343_v19 = vpop.f32.mrb[25].mxu0 }
 0x138   :  { %v7344_v6 = vadd.f32 %v7343_v19, %v7342_v16  ;;  %v7377_v13 = vpop.f32.mrb[25].mxu1  ;;  %v7345_v25 = vpop.f32.mrb[26].mxu0  ;;  %v8626_v16 = vld [vmem:[%s11064_s1 + $0x8b8] sm:$0xff]  }
 0x139   :  { %v7378_v22 = vadd.f32 %v7377_v13, %v7376_v46  ;;  %v7379_v62 = vpop.f32.mrb[26].mxu1  ;;  %v7346_v26 = vpop.f32.mrb[27].mxu0  ;;  %v8627_v46 = vld [vmem:[%s11065_s0 + $0x80] ss:$232 sps:$4 sm:$0xff]  }
 0x13a   :  { %v5044_v57 = vadd.f32 %v7344_v6, %v9996_v30  ;;  %v7347_v17 = vadd.f32 %v7346_v26, %v7345_v25  ;;  %v7380_v29 = vpop.f32.mrb[27].mxu1 }
 0x13b   :  { %v7381_v30 = vadd.f32 %v7380_v29, %v7379_v62  ;;  %v8638_v29 = vld [vmem:[%s11064_s1 + $0x9c8] sm:$0xff]  }
 0x13c   :  { %v10105_v34 = vadd.f32 %v7378_v22, %v5044_v57  ;;  %v5047_v38 = vadd.f32 %v7347_v17, %v9998_v32  ;;  %v8613_v32 = vld [vmem:[%s11064_s1 + $0x8a0] sm:$0xff]  }
 0x13d   :  { %7777 = vmatpush3.bf16.msra.mxu1 %v8613_v32 }
 0x13e   :  { %v7348_v40 = vpop.f32.mrb[28].mxu0  ;;  %v10117_v42 = vadd.f32 %v7381_v30, %v5047_v38  ;;  %7778 = vmatprep.subr.bf16.mxu1 %v8616_v52  ;;  %v8640_v30 = vld [vmem:[%s11064_s1 + $0x988] sm:$0xff]   ;;  %v8643_v38 = vld [vmem:[%s11065_s0 + $0x250] ss:$232 sps:$4 sm:$0xff]  }
 0x13f   :  { %v7349_v43 = vpop.f32.mrb[29].mxu0  ;;  %v7382_v53 = vpop.f32.mrb[28].mxu1 }
 0x140   :  { %v7350_v44 = vadd.f32 %v7349_v43, %v7348_v40  ;;  %v7351_v45 = vpop.f32.mrb[30].mxu0  ;;  %v7383_v56 = vpop.f32.mrb[29].mxu1  ;;  %v8645_v40 = vld [vmem:[%s11064_s1 + $0x9d0] sm:$0xff]  }
 0x141   :  { %v7352_v50 = vpop.f32.mrb[31].mxu0  ;;  %v7384_v59 = vadd.f32 %v7383_v56, %v7382_v53  ;;  %v7385_v60 = vpop.f32.mrb[30].mxu1  ;;  %7779 = vmatpush3.bf16.msra.mxu1 %v8618_v58  ;;  %v8648_v43 = vld [vmem:[%s11064_s1 + $0x910] sm:$0xff]   ;;  %v8654_v58 = vld [vmem:[%s11064_s1 + $0x998] sm:$0xff]  }
 0x142   :  { %v5052_v49 = vadd.f32 %v7350_v44, %v10000_v33  ;;  %v7353_v54 = vadd.f32 %v7352_v50, %v7351_v45  ;;  %v7386_v63 = vpop.f32.mrb[31].mxu1  ;;  %7780 = vmatprep.subr.bf16.mxu1 %v8620_v0  ;;  %v8649_v44 = vld [vmem:[%s11064_s1 + $0x990] sm:$0xff]   ;;  %v8650_v45 = vld [vmem:[%s11065_s0 + $0x258] ss:$232 sps:$4 sm:$0xff]  }
 0x143   :  { %v7387_v3 = vadd.f32 %v7386_v63, %v7385_v60  ;;  %v8652_v50 = vld [vmem:[%s11064_s1 + $0x9d8] sm:$0xff]   ;;  %v8657_v63 = vld [vmem:[%s11065_s0 + $0x420] ss:$232 sps:$4 sm:$0xff]  }
 0x144   :  { %v5055_v33 = vadd.f32 %v7353_v54, %v10005_v36  ;;  %v10145_v2 = vadd.f32 %v7384_v59, %v5052_v49  ;;  %v8621_v36 = vld [vmem:[%s11064_s1 + $0x830] sm:$0xff]   ;;  %v8653_v54 = vld [vmem:[%s11064_s1 + $0x918] sm:$0xff]  }
 0x145   :  { %7747 = vmatpush3.bf16.msra.mxu0 %v8621_v36  ;;  %7781 = vmatpush3.bf16.msra.mxu1 %v8622_v4  ;;  %v8658_v36 = vld [vmem:[%s11064_s1 + $0x960] sm:$0xff]  }
 0x146   :  { %v10153_v7 = vadd.f32 %v7387_v3, %v5055_v33  ;;  %v7354_v8 = vpop.f32.mrb[32].mxu0  ;;  %7748 = vmatprep.subr.bf16.mxu0 %v8623_v9  ;;  %7782 = vmatprep.subr.bf16.mxu1 %v8624_v11 }
 0x147   :  { %v7355_v10 = vpop.f32.mrb[33].mxu0  ;;  %v7388_v19 = vpop.f32.mrb[32].mxu1 }
 0x148   :  { %v7356_v12 = vadd.f32 %v7355_v10, %v7354_v8  ;;  %v7357_v14 = vpop.f32.mrb[34].mxu0  ;;  %v7389_v13 = vpop.f32.mrb[33].mxu1  ;;  %v8659_v8 = vld [vmem:[%s11064_s1 + $0x9e0] sm:$0xff]   ;;  %v8660_v10 = vld [vmem:[%s11065_s0 + $0x42c] ss:$232 sps:$4 sm:$0xff]  }
 0x149   :  { %v7358_v15 = vpop.f32.mrb[35].mxu0  ;;  %7749 = vmatpush3.bf16.msra.mxu0 %v8625_v21  ;;  %7783 = vmatpush3.bf16.msra.mxu1 %v8626_v16  ;;  %v7390_v22 = vadd.f32 %v7389_v13, %v7388_v19  ;;  %v7391_v25 = vpop.f32.mrb[34].mxu1  ;;  %v8666_v19 = vld [vmem:[%s11064_s1 + $0x9e8] sm:$0xff]  }
 0x14a   :  { %v5060_v18 = vadd.f32 %v7356_v12, %v10040_v1  ;;  %v7359_v31 = vadd.f32 %v7358_v15, %v7357_v14  ;;  %v8632_v1 = vld [vmem:[%s11065_s0 + $0x8c] ss:$232 sps:$4 sm:$0xff]   ;;  %v7392_v57 = vpop.f32.mrb[35].mxu1  ;;  %7802 = vmatprep.subr.bf16.mxu0 %v8633_v24  ;;  %7836 = vmatprep.subr.bf16.mxu1 %v8634_v35  ;;  %v8662_v12 = vld [vmem:[%s11064_s1 + $0x920] sm:$0xff]  }
 0x14b   :  { %5782 = vmatprep.mubr.bf16.mxu1 %v8632_v1  ;;  %v7393_v26 = vadd.f32 %v7392_v57, %v7391_v25  ;;  %v8668_v24 = vld [vmem:[%s11064_s1 + $0x9a8] sm:$0xff]   ;;  %v8669_v35 = vld [vmem:[%s11064_s1 + $0x970] sm:$0xff]  }
 0x14c   :  { %v5063_v6 = vadd.f32 %v7359_v31, %v10048_v5  ;;  %5726 = vmatmul.mubr.bf16.vlgmr.msra.gmra.mrb[96].mxu0 %v8627_v46  ;;  %5783 = vmatmul.mubr.bf16.vlgmr.msra.gmra.mrb[96].mxu1 %v8630_v20  ;;  %v8635_v5 = vld [vmem:[%s11064_s1 + $0x900] sm:$0xff]   ;;  %v10190_v62 = vadd.f32 %v7390_v22, %v5060_v18  ;;  %v8664_v18 = vld [vmem:[%s11065_s0 + $0x428] ss:$232 sps:$4 sm:$0xff]  }
 0x14d   :  { %7803 = vmatpush3.bf16.msra.mxu0 %v8635_v5  ;;  %7837 = vmatpush3.bf16.msra.mxu1 %v8636_v27  ;;  %v8665_v31 = vld [vmem:[%s11064_s1 + $0x968] sm:$0xff]   ;;  %v8670_v5 = vld [vmem:[%s11064_s1 + $0x9f0] sm:$0xff]  }
 0x14e   :  { %v10198_v17 = vadd.f32 %v7393_v26, %v5063_v6  ;;  %7804 = vmatprep.subr.bf16.mxu0 %v8637_v28  ;;  %7838 = vmatprep.subr.bf16.mxu1 %v8638_v29  ;;  %v8667_v6 = vld [vmem:[%s11064_s1 + $0x928] sm:$0xff]   ;;  %v8672_v28 = vld [vmem:[%s11064_s1 + $0x9b0] sm:$0xff]  }
 0x14f   :  { %5733 = vmatprep.mubr.bf16.mxu0 %v8641_v37  ;;  %5790 = vmatprep.mubr.bf16.mxu1 %v8646_v41  ;;  %v8675_v41 = vld [vmem:[%s11064_s1 + $0x938] sm:$0xff]  }
 0x151   :  { %7805 = vmatpush3.bf16.msra.mxu0 %v8639_v23  ;;  %7839 = vmatpush3.bf16.msra.mxu1 %v8640_v30  ;;  %v8673_v30 = vld [vmem:[%s11064_s1 + $0x978] sm:$0xff]  }
 0x152   :  { %7806 = vmatprep.subr.bf16.mxu0 %v8644_v39  ;;  %7840 = vmatprep.subr.bf16.mxu1 %v8645_v40 }
 0x154   :  { %5734 = vmatmul.mubr.bf16.gmra.mrb[100].mxu0 %v8643_v38  ;;  %5791 = vmatmul.mubr.bf16.gmra.mrb[100].mxu1 %v8650_v45  ;;  %v8674_v38 = vld [vmem:[%s11064_s1 + $0x9f8] sm:$0xff]  }
 0x155   :  { %7807 = vmatpush3.bf16.msra.mxu0 %v8648_v43  ;;  %7841 = vmatpush3.bf16.msra.mxu1 %v8649_v44 }
 0x156   :  { %v7410_v32 = vpop.f32.mrb[36].mxu0  ;;  %7808 = vmatprep.subr.bf16.mxu0 %v8651_v48  ;;  %7842 = vmatprep.subr.bf16.mxu1 %v8652_v50  ;;  %v8679_v48 = vld [vmem:[%s11065_s0 + $0x94] ss:$232 sps:$4 sm:$0xff]   ;;  %v8680_v50 = vld [vmem:[%s11065_s0 + $0x98] ss:$232 sps:$4 sm:$0xff]  }
 0x157   :  { %v7444_v47 = vpop.f32.mrb[36].mxu1  ;;  %v7411_v49 = vpop.f32.mrb[37].mxu0  ;;  %5741 = vmatprep.mubr.bf16.mxu0 %v8655_v61  ;;  %5798 = vmatprep.mubr.bf16.mxu1 %v8660_v10  ;;  %v8686_v61 = vld [vmem:[%s11064_s1 + $0xa80] sm:$0xff]   ;;  %v8694_v10 = vld [vmem:[%s11064_s1 + $0xa50] sm:$0xff]  }
 0x158   :  { %v7412_v52 = vadd.f32 %v7411_v49, %v7410_v32  ;;  %v7445_v53 = vpop.f32.mrb[37].mxu1  ;;  %v7413_v56 = vpop.f32.mrb[38].mxu0  ;;  %v8676_v32 = vld [vmem:[%s11064_s1 + $0x9b8] sm:$0xff]  }
 0x159   :  { %v7446_v55 = vadd.f32 %v7445_v53, %v7444_v47  ;;  %v7447_v59 = vpop.f32.mrb[38].mxu1  ;;  %v7414_v60 = vpop.f32.mrb[39].mxu0  ;;  %7809 = vmatpush3.bf16.msra.mxu0 %v8653_v54  ;;  %7843 = vmatpush3.bf16.msra.mxu1 %v8654_v58  ;;  %v8677_v47 = vld [vmem:[%s11065_s0 + $0x90] ss:$232 sps:$4 sm:$0xff]   ;;  %v8683_v54 = vld [vmem:[%s11064_s1 + $0xa40] sm:$0xff]  }
 0x15a   :  { %v5158_v33 = vadd.f32 %v7412_v52, %v10105_v34  ;;  %v7415_v0 = vadd.f32 %v7414_v60, %v7413_v56  ;;  %v7448_v3 = vpop.f32.mrb[39].mxu1  ;;  %7810 = vmatprep.subr.bf16.mxu0 %v8658_v36  ;;  %7844 = vmatprep.subr.bf16.mxu1 %v8659_v8  ;;  %v8684_v58 = vld [vmem:[%s11064_s1 + $0xac0] sm:$0xff]   ;;  %v8689_v36 = vld [vmem:[%s11064_s1 + $0xa08] sm:$0xff]  }
 0x15b   :  { %v7449_v34 = vadd.f32 %v7448_v3, %v7447_v59  ;;  %v8688_v3 = vld [vmem:[%s11064_s1 + $0xac8] sm:$0xff]  }
 0x15c   :  { %v10255_v4 = vadd.f32 %v7446_v55, %v5158_v33  ;;  %v5161_v9 = vadd.f32 %v7415_v0, %v10117_v42  ;;  %5742 = vmatmul.mubr.bf16.gmra.mrb[104].mxu0 %v8657_v63  ;;  %v8663_v42 = vld [vmem:[%s11064_s1 + $0x9a0] sm:$0xff]   ;;  %5799 = vmatmul.mubr.bf16.gmra.mrb[104].mxu1 %v8664_v18  ;;  %v8687_v63 = vld [vmem:[%s11064_s1 + $0xa48] sm:$0xff]  }
 0x15d   :  { %7811 = vmatpush3.bf16.msra.mxu0 %v8662_v12  ;;  %7845 = vmatpush3.bf16.msra.mxu1 %v8663_v42  ;;  %v8691_v8 = vld [vmem:[%s11065_s0 + $0x264] ss:$232 sps:$4 sm:$0xff]  }
 0x15e   :  { %v7416_v11 = vpop.f32.mrb[40].mxu0  ;;  %v10267_v14 = vadd.f32 %v7449_v34, %v5161_v9  ;;  %7812 = vmatprep.subr.bf16.mxu0 %v8665_v31  ;;  %7846 = vmatprep.subr.bf16.mxu1 %v8666_v19  ;;  %v8690_v34 = vld [vmem:[%s11064_s1 + $0xa88] sm:$0xff]   ;;  %v8701_v31 = vld [vmem:[%s11064_s1 + $0xa58] sm:$0xff]  }
 0x15f   :  { %v7417_v21 = vpop.f32.mrb[41].mxu0  ;;  %v7450_v20 = vpop.f32.mrb[40].mxu1  ;;  %5839 = vmatprep.mubr.bf16.mxu0 %v8679_v48  ;;  %v8693_v9 = vld [vmem:[%s11065_s0 + $0x260] ss:$232 sps:$4 sm:$0xff]   ;;  %v8696_v12 = vld [vmem:[%s11065_s0 + $0x26c] ss:$232 sps:$4 sm:$0xff]  }
 0x160   :  { %v7418_v15 = vadd.f32 %v7417_v21, %v7416_v11  ;;  %v7419_v16 = vpop.f32.mrb[42].mxu0  ;;  %v7451_v13 = vpop.f32.mrb[41].mxu1  ;;  %v8695_v11 = vld [vmem:[%s11064_s1 + $0xad0] sm:$0xff]  }
 0x161   :  { %v7420_v51 = vpop.f32.mrb[43].mxu0  ;;  %v7452_v22 = vadd.f32 %v7451_v13, %v7450_v20  ;;  %v7453_v25 = vpop.f32.mrb[42].mxu1  ;;  %7813 = vmatpush3.bf16.msra.mxu0 %v8667_v6  ;;  %7847 = vmatpush3.bf16.msra.mxu1 %v8668_v24  ;;  %v8698_v21 = vld [vmem:[%s11064_s1 + $0xa10] sm:$0xff]   ;;  %v8704_v24 = vld [vmem:[%s11064_s1 + $0xa98] sm:$0xff]  }
 0x162   :  { %v5166_v46 = vadd.f32 %v7418_v15, %v10145_v2  ;;  %v7421_v1 = vadd.f32 %v7420_v51, %v7419_v16  ;;  %v7454_v57 = vpop.f32.mrb[43].mxu1  ;;  %7814 = vmatprep.subr.bf16.mxu0 %v8669_v35  ;;  %7848 = vmatprep.subr.bf16.mxu1 %v8670_v5  ;;  %v8699_v15 = vld [vmem:[%s11064_s1 + $0xa90] sm:$0xff]   ;;  %v8702_v51 = vld [vmem:[%s11064_s1 + $0xad8] sm:$0xff]  }
 0x163   :  { %v7455_v27 = vadd.f32 %v7454_v57, %v7453_v25  ;;  %v8700_v16 = vld [vmem:[%s11065_s0 + $0x268] ss:$232 sps:$4 sm:$0xff]   ;;  %v8705_v35 = vld [vmem:[%s11065_s0 + $0x434] ss:$232 sps:$4 sm:$0xff]  }
 0x164   :  { %v5169_v2 = vadd.f32 %v7421_v1, %v10153_v7  ;;  %v10295_v26 = vadd.f32 %v7452_v22, %v5166_v46  ;;  %v8671_v7 = vld [vmem:[%s11064_s1 + $0x930] sm:$0xff]   ;;  %v8703_v1 = vld [vmem:[%s11064_s1 + $0xa18] sm:$0xff]  }
 0x165   :  { %7815 = vmatpush3.bf16.msra.mxu0 %v8671_v7  ;;  %7849 = vmatpush3.bf16.msra.mxu1 %v8672_v28  ;;  %v8707_v57 = vld [vmem:[%s11065_s0 + $0x430] ss:$232 sps:$4 sm:$0xff]   ;;  %v8708_v7 = vld [vmem:[%s11064_s1 + $0xa60] sm:$0xff]  }
 0x166   :  { %v10303_v29 = vadd.f32 %v7455_v27, %v5169_v2  ;;  %v7422_v23 = vpop.f32.mrb[44].mxu0  ;;  %7816 = vmatprep.subr.bf16.mxu0 %v8673_v30  ;;  %7850 = vmatprep.subr.bf16.mxu1 %v8674_v38 }
 0x167   :  { %v7423_v37 = vpop.f32.mrb[45].mxu0  ;;  %v7456_v49 = vpop.f32.mrb[44].mxu1 }
 0x168   :  { %v7424_v39 = vadd.f32 %v7423_v37, %v7422_v23  ;;  %v7425_v40 = vpop.f32.mrb[46].mxu0  ;;  %v7457_v53 = vpop.f32.mrb[45].mxu1  ;;  %v8709_v23 = vld [vmem:[%s11064_s1 + $0xae0] sm:$0xff]  }
 0x169   :  { %v7426_v43 = vpop.f32.mrb[47].mxu0  ;;  %7817 = vmatpush3.bf16.msra.mxu0 %v8675_v41  ;;  %7851 = vmatpush3.bf16.msra.mxu1 %v8676_v32  ;;  %v7458_v55 = vadd.f32 %v7457_v53, %v7456_v49  ;;  %v7459_v56 = vpop.f32.mrb[46].mxu1  ;;  %v8710_v37 = vld [vmem:[%s11065_s0 + $0x43c] ss:$232 sps:$4 sm:$0xff]   ;;  %v8716_v49 = vld [vmem:[%s11064_s1 + $0xae8] sm:$0xff]  }
 0x16a   :  { %v5174_v44 = vadd.f32 %v7424_v39, %v10190_v62  ;;  %v7427_v45 = vadd.f32 %v7426_v43, %v7425_v40  ;;  %v8682_v62 = vld [vmem:[%s11065_s0 + $0x9c] ss:$232 sps:$4 sm:$0xff]   ;;  %v7460_v33 = vpop.f32.mrb[47].mxu1  ;;  %7870 = vmatprep.subr.bf16.mxu0 %v8683_v54  ;;  %7904 = vmatprep.subr.bf16.mxu1 %v8684_v58  ;;  %v8718_v54 = vld [vmem:[%s11064_s1 + $0xaa8] sm:$0xff]   ;;  %v8719_v58 = vld [vmem:[%s11064_s1 + $0xa70] sm:$0xff]  }
 0x16b   :  { %5896 = vmatprep.mubr.bf16.mxu1 %v8682_v62  ;;  %v7461_v60 = vadd.f32 %v7460_v33, %v7459_v56  ;;  %v8712_v39 = vld [vmem:[%s11064_s1 + $0xa20] sm:$0xff]  }
 0x16c   :  { %v5177_v52 = vadd.f32 %v7427_v45, %v10198_v17  ;;  %5840 = vmatmul.mubr.bf16.vlgmr.msra.gmra.mrb[108].mxu0 %v8677_v47  ;;  %5897 = vmatmul.mubr.bf16.vlgmr.msra.gmra.mrb[108].mxu1 %v8680_v50  ;;  %v8685_v17 = vld [vmem:[%s11064_s1 + $0xa00] sm:$0xff]   ;;  %v10340_v59 = vadd.f32 %v7458_v55, %v5174_v44  ;;  %v8715_v45 = vld [vmem:[%s11064_s1 + $0xa68] sm:$0xff]  }
 0x16d   :  { %7871 = vmatpush3.bf16.msra.mxu0 %v8685_v17  ;;  %7905 = vmatpush3.bf16.msra.mxu1 %v8686_v61  ;;  %v8714_v44 = vld [vmem:[%s11065_s0 + $0x438] ss:$232 sps:$4 sm:$0xff]   ;;  %v8720_v17 = vld [vmem:[%s11064_s1 + $0xaf0] sm:$0xff]  }
 0x16e   :  { %v10348_v0 = vadd.f32 %v7461_v60, %v5177_v52  ;;  %7872 = vmatprep.subr.bf16.mxu0 %v8687_v63  ;;  %7906 = vmatprep.subr.bf16.mxu1 %v8688_v3  ;;  %v8717_v52 = vld [vmem:[%s11064_s1 + $0xa28] sm:$0xff]   ;;  %v8722_v63 = vld [vmem:[%s11064_s1 + $0xab0] sm:$0xff]  }
 0x16f   :  { %5847 = vmatprep.mubr.bf16.mxu0 %v8691_v8  ;;  %5904 = vmatprep.mubr.bf16.mxu1 %v8696_v12  ;;  %v8725_v12 = vld [vmem:[%s11064_s1 + $0xa38] sm:$0xff]  }
 0x171   :  { %7873 = vmatpush3.bf16.msra.mxu0 %v8689_v36  ;;  %7907 = vmatpush3.bf16.msra.mxu1 %v8690_v34  ;;  %v8723_v34 = vld [vmem:[%s11064_s1 + $0xa78] sm:$0xff]  }
 0x172   :  { %7874 = vmatprep.subr.bf16.mxu0 %v8694_v10  ;;  %7908 = vmatprep.subr.bf16.mxu1 %v8695_v11 }
 0x174   :  { %5848 = vmatmul.mubr.bf16.gmra.mrb[112].mxu0 %v8693_v9  ;;  %5905 = vmatmul.mubr.bf16.gmra.mrb[112].mxu1 %v8700_v16  ;;  %v8724_v9 = vld [vmem:[%s11064_s1 + $0xaf8] sm:$0xff]  }
 0x175   :  { %7875 = vmatpush3.bf16.msra.mxu0 %v8698_v21  ;;  %7909 = vmatpush3.bf16.msra.mxu1 %v8699_v15 }
 0x176   :  { %v7478_v42 = vpop.f32.mrb[48].mxu0  ;;  %7876 = vmatprep.subr.bf16.mxu0 %v8701_v31  ;;  %7910 = vmatprep.subr.bf16.mxu1 %v8702_v51  ;;  %v8729_v31 = vld [vmem:[%s11065_s0 + $0xa4] ss:$232 sps:$4 sm:$0xff]   ;;  %v8730_v51 = vld [vmem:[%s11065_s0 + $0xa8] ss:$232 sps:$4 sm:$0xff]  }
 0x177   :  { %v7512_v18 = vpop.f32.mrb[48].mxu1  ;;  %v7479_v46 = vpop.f32.mrb[49].mxu0  ;;  %5855 = vmatprep.mubr.bf16.mxu0 %v8705_v35  ;;  %5912 = vmatprep.mubr.bf16.mxu1 %v8710_v37  ;;  %v8736_v35 = vld [vmem:[%s11064_s1 + $0xb80] sm:$0xff]   ;;  %v8744_v37 = vld [vmem:[%s11064_s1 + $0xb50] sm:$0xff]  }
 0x178   :  { %v7480_v19 = vadd.f32 %v7479_v46, %v7478_v42  ;;  %v7513_v20 = vpop.f32.mrb[49].mxu1  ;;  %v7481_v13 = vpop.f32.mrb[50].mxu0  ;;  %v8726_v42 = vld [vmem:[%s11064_s1 + $0xab8] sm:$0xff]  }
 0x179   :  { %v7514_v6 = vadd.f32 %v7513_v20, %v7512_v18  ;;  %v7515_v22 = vpop.f32.mrb[50].mxu1  ;;  %v7482_v25 = vpop.f32.mrb[51].mxu0  ;;  %7877 = vmatpush3.bf16.msra.mxu0 %v8703_v1  ;;  %7911 = vmatpush3.bf16.msra.mxu1 %v8704_v24  ;;  %v8727_v18 = vld [vmem:[%s11065_s0 + $0xa0] ss:$232 sps:$4 sm:$0xff]  }
 0x17a   :  { %v5272_v2 = vadd.f32 %v7480_v19, %v10255_v4  ;;  %v7483_v5 = vadd.f32 %v7482_v25, %v7481_v13  ;;  %v7516_v27 = vpop.f32.mrb[51].mxu1  ;;  %7878 = vmatprep.subr.bf16.mxu0 %v8708_v7  ;;  %7912 = vmatprep.subr.bf16.mxu1 %v8709_v23  ;;  %v8733_v1 = vld [vmem:[%s11064_s1 + $0xb40] sm:$0xff]   ;;  %v8739_v7 = vld [vmem:[%s11064_s1 + $0xb08] sm:$0xff]   ;;  %v8741_v23 = vld [vmem:[%s11065_s0 + $0x274] ss:$232 sps:$4 sm:$0xff]  }
 0x17b   :  { %v7517_v4 = vadd.f32 %v7516_v27, %v7515_v22  ;;  %v8734_v24 = vld [vmem:[%s11064_s1 + $0xbc0] sm:$0xff]   ;;  %v8738_v27 = vld [vmem:[%s11064_s1 + $0xbc8] sm:$0xff]  }
 0x17c   :  { %v10405_v28 = vadd.f32 %v7514_v6, %v5272_v2  ;;  %v5275_v30 = vadd.f32 %v7483_v5, %v10267_v14  ;;  %5856 = vmatmul.mubr.bf16.gmra.mrb[116].mxu0 %v8707_v57  ;;  %v8713_v14 = vld [vmem:[%s11064_s1 + $0xaa0] sm:$0xff]   ;;  %5913 = vmatmul.mubr.bf16.gmra.mrb[116].mxu1 %v8714_v44  ;;  %v8737_v57 = vld [vmem:[%s11064_s1 + $0xb48] sm:$0xff]  }
 0x17d   :  { %7879 = vmatpush3.bf16.msra.mxu0 %v8712_v39  ;;  %7913 = vmatpush3.bf16.msra.mxu1 %v8713_v14  ;;  %v8746_v39 = vld [vmem:[%s11065_s0 + $0x27c] ss:$232 sps:$4 sm:$0xff]  }
 0x17e   :  { %v7484_v38 = vpop.f32.mrb[52].mxu0  ;;  %v10417_v40 = vadd.f32 %v7517_v4, %v5275_v30  ;;  %7880 = vmatprep.subr.bf16.mxu0 %v8715_v45  ;;  %7914 = vmatprep.subr.bf16.mxu1 %v8716_v49  ;;  %v8740_v4 = vld [vmem:[%s11064_s1 + $0xb88] sm:$0xff]   ;;  %v8743_v30 = vld [vmem:[%s11065_s0 + $0x270] ss:$232 sps:$4 sm:$0xff]  }
 0x17f   :  { %v7485_v41 = vpop.f32.mrb[53].mxu0  ;;  %v7518_v50 = vpop.f32.mrb[52].mxu1  ;;  %5953 = vmatprep.mubr.bf16.mxu0 %v8729_v31  ;;  %v8751_v45 = vld [vmem:[%s11064_s1 + $0xb58] sm:$0xff]  }
 0x180   :  { %v7486_v43 = vadd.f32 %v7485_v41, %v7484_v38  ;;  %v7487_v32 = vpop.f32.mrb[54].mxu0  ;;  %v7519_v53 = vpop.f32.mrb[53].mxu1  ;;  %v8745_v38 = vld [vmem:[%s11064_s1 + $0xbd0] sm:$0xff]  }
 0x181   :  { %v7488_v48 = vpop.f32.mrb[55].mxu0  ;;  %v7520_v55 = vadd.f32 %v7519_v53, %v7518_v50  ;;  %v7521_v56 = vpop.f32.mrb[54].mxu1  ;;  %7881 = vmatpush3.bf16.msra.mxu0 %v8717_v52  ;;  %7915 = vmatpush3.bf16.msra.mxu1 %v8718_v54  ;;  %v8748_v41 = vld [vmem:[%s11064_s1 + $0xb10] sm:$0xff]   ;;  %v8754_v54 = vld [vmem:[%s11064_s1 + $0xb98] sm:$0xff]  }
 0x182   :  { %v5280_v47 = vadd.f32 %v7486_v43, %v10295_v26  ;;  %v7489_v62 = vadd.f32 %v7488_v48, %v7487_v32  ;;  %v7522_v33 = vpop.f32.mrb[55].mxu1  ;;  %7882 = vmatprep.subr.bf16.mxu0 %v8719_v58  ;;  %7916 = vmatprep.subr.bf16.mxu1 %v8720_v17  ;;  %v8749_v43 = vld [vmem:[%s11064_s1 + $0xb90] sm:$0xff]   ;;  %v8750_v32 = vld [vmem:[%s11065_s0 + $0x278] ss:$232 sps:$4 sm:$0xff]   ;;  %v8755_v58 = vld [vmem:[%s11065_s0 + $0x444] ss:$232 sps:$4 sm:$0xff]  }
 0x183   :  { %v7523_v61 = vadd.f32 %v7522_v33, %v7521_v56  ;;  %v8752_v48 = vld [vmem:[%s11064_s1 + $0xbd8] sm:$0xff]   ;;  %v8757_v33 = vld [vmem:[%s11065_s0 + $0x440] ss:$232 sps:$4 sm:$0xff]  }
 0x184   :  { %v5283_v26 = vadd.f32 %v7489_v62, %v10303_v29  ;;  %v10445_v60 = vadd.f32 %v7520_v55, %v5280_v47  ;;  %v8721_v29 = vld [vmem:[%s11064_s1 + $0xa30] sm:$0xff]   ;;  %v8753_v62 = vld [vmem:[%s11064_s1 + $0xb18] sm:$0xff]  }
 0x185   :  { %7883 = vmatpush3.bf16.msra.mxu0 %v8721_v29  ;;  %7917 = vmatpush3.bf16.msra.mxu1 %v8722_v63  ;;  %v8758_v29 = vld [vmem:[%s11064_s1 + $0xb60] sm:$0xff]  }
 0x186   :  { %v10453_v3 = vadd.f32 %v7523_v61, %v5283_v26  ;;  %v7490_v36 = vpop.f32.mrb[56].mxu0  ;;  %7884 = vmatprep.subr.bf16.mxu0 %v8723_v34  ;;  %7918 = vmatprep.subr.bf16.mxu1 %v8724_v9 }
 0x187   :  { %v7491_v8 = vpop.f32.mrb[57].mxu0  ;;  %v7524_v46 = vpop.f32.mrb[56].mxu1 }
 0x188   :  { %v7492_v10 = vadd.f32 %v7491_v8, %v7490_v36  ;;  %v7493_v11 = vpop.f32.mrb[58].mxu0  ;;  %v7525_v20 = vpop.f32.mrb[57].mxu1  ;;  %v8759_v36 = vld [vmem:[%s11064_s1 + $0xbe0] sm:$0xff]   ;;  %v8760_v8 = vld [vmem:[%s11065_s0 + $0x44c] ss:$232 sps:$4 sm:$0xff]  }
 0x189   :  { %v7494_v21 = vpop.f32.mrb[59].mxu0  ;;  %7885 = vmatpush3.bf16.msra.mxu0 %v8725_v12  ;;  %7919 = vmatpush3.bf16.msra.mxu1 %v8726_v42  ;;  %v7526_v6 = vadd.f32 %v7525_v20, %v7524_v46  ;;  %v7527_v13 = vpop.f32.mrb[58].mxu1  ;;  %v8766_v46 = vld [vmem:[%s11064_s1 + $0xbe8] sm:$0xff]  }
 0x18a   :  { %v5288_v15 = vadd.f32 %v7492_v10, %v10340_v59  ;;  %v7495_v16 = vadd.f32 %v7494_v21, %v7493_v11  ;;  %v8732_v59 = vld [vmem:[%s11065_s0 + $0xac] ss:$232 sps:$4 sm:$0xff]   ;;  %v7528_v2 = vpop.f32.mrb[59].mxu1  ;;  %7938 = vmatprep.subr.bf16.mxu0 %v8733_v1  ;;  %7972 = vmatprep.subr.bf16.mxu1 %v8734_v24  ;;  %v8762_v10 = vld [vmem:[%s11064_s1 + $0xb20] sm:$0xff]  }
 0x18b   :  { %6010 = vmatprep.mubr.bf16.mxu1 %v8732_v59  ;;  %v7529_v25 = vadd.f32 %v7528_v2, %v7527_v13  ;;  %v8768_v1 = vld [vmem:[%s11064_s1 + $0xba8] sm:$0xff]   ;;  %v8769_v24 = vld [vmem:[%s11064_s1 + $0xb70] sm:$0xff]  }
 0x18c   :  { %v5291_v19 = vadd.f32 %v7495_v16, %v10348_v0  ;;  %5954 = vmatmul.mubr.bf16.vlgmr.msra.gmra.mrb[120].mxu0 %v8727_v18  ;;  %6011 = vmatmul.mubr.bf16.vlgmr.msra.gmra.mrb[120].mxu1 %v8730_v51  ;;  %v8735_v0 = vld [vmem:[%s11064_s1 + $0xb00] sm:$0xff]   ;;  %v10490_v22 = vadd.f32 %v7526_v6, %v5288_v15  ;;  %v8764_v15 = vld [vmem:[%s11065_s0 + $0x448] ss:$232 sps:$4 sm:$0xff]  }
 0x18d   :  { %7939 = vmatpush3.bf16.msra.mxu0 %v8735_v0  ;;  %7973 = vmatpush3.bf16.msra.mxu1 %v8736_v35  ;;  %v8765_v16 = vld [vmem:[%s11064_s1 + $0xb68] sm:$0xff]   ;;  %v8770_v0 = vld [vmem:[%s11064_s1 + $0xbf0] sm:$0xff]  }
 0x18e   :  { %v10498_v5 = vadd.f32 %v7529_v25, %v5291_v19  ;;  %7940 = vmatprep.subr.bf16.mxu0 %v8737_v57  ;;  %7974 = vmatprep.subr.bf16.mxu1 %v8738_v27  ;;  %v8767_v19 = vld [vmem:[%s11064_s1 + $0xb28] sm:$0xff]   ;;  %v8772_v57 = vld [vmem:[%s11064_s1 + $0xbb0] sm:$0xff]  }
 0x18f   :  { %5961 = vmatprep.mubr.bf16.mxu0 %v8741_v23  ;;  %6018 = vmatprep.mubr.bf16.mxu1 %v8746_v39  ;;  %v8775_v39 = vld [vmem:[%s11064_s1 + $0xb38] sm:$0xff]  }
 0x191   :  { %7941 = vmatpush3.bf16.msra.mxu0 %v8739_v7  ;;  %7975 = vmatpush3.bf16.msra.mxu1 %v8740_v4  ;;  %v8773_v4 = vld [vmem:[%s11064_s1 + $0xb78] sm:$0xff]  }
 0x192   :  { %7942 = vmatprep.subr.bf16.mxu0 %v8744_v37  ;;  %7976 = vmatprep.subr.bf16.mxu1 %v8745_v38 }
 0x194   :  { %5962 = vmatmul.mubr.bf16.gmra.mrb[124].mxu0 %v8743_v30  ;;  %6019 = vmatmul.mubr.bf16.gmra.mrb[124].mxu1 %v8750_v32  ;;  %v8774_v30 = vld [vmem:[%s11064_s1 + $0xbf8] sm:$0xff]  }
 0x195   :  { %7943 = vmatpush3.bf16.msra.mxu0 %v8748_v41  ;;  %7977 = vmatpush3.bf16.msra.mxu1 %v8749_v43 }
 0x196   :  { %v7546_v14 = vpop.f32.mrb[60].mxu0  ;;  %7944 = vmatprep.subr.bf16.mxu0 %v8751_v45  ;;  %7978 = vmatprep.subr.bf16.mxu1 %v8752_v48  ;;  %v8779_v45 = vld [vmem:[%s11065_s0 + $0xb4] ss:$232 sps:$4 sm:$0xff]   ;;  %v8780_v48 = vld [vmem:[%s11065_s0 + $0xb8] ss:$232 sps:$4 sm:$0xff]  }
 0x197   :  { %v7580_v44 = vpop.f32.mrb[60].mxu1  ;;  %v7547_v47 = vpop.f32.mrb[61].mxu0  ;;  %5969 = vmatprep.mubr.bf16.mxu0 %v8755_v58  ;;  %6026 = vmatprep.mubr.bf16.mxu1 %v8760_v8  ;;  %v8786_v58 = vld [vmem:[%s11064_s1 + $0xc80] sm:$0xff]   ;;  %v8794_v8 = vld [vmem:[%s11064_s1 + $0xc50] sm:$0xff]  }
 0x198   :  { %v7548_v49 = vadd.f32 %v7547_v47, %v7546_v14  ;;  %v7581_v50 = vpop.f32.mrb[61].mxu1  ;;  %v7549_v53 = vpop.f32.mrb[62].mxu0  ;;  %v8776_v14 = vld [vmem:[%s11064_s1 + $0xbb8] sm:$0xff]  }
 0x199   :  { %v7582_v52 = vadd.f32 %v7581_v50, %v7580_v44  ;;  %v7583_v55 = vpop.f32.mrb[62].mxu1  ;;  %v7550_v56 = vpop.f32.mrb[63].mxu0  ;;  %7945 = vmatpush3.bf16.msra.mxu0 %v8753_v62  ;;  %7979 = vmatpush3.bf16.msra.mxu1 %v8754_v54  ;;  %v8777_v44 = vld [vmem:[%s11065_s0 + $0xb0] ss:$232 sps:$4 sm:$0xff]   ;;  %v8783_v62 = vld [vmem:[%s11064_s1 + $0xc40] sm:$0xff]  }
 0x19a   :  { %v5386_v26 = vadd.f32 %v7548_v49, %v10405_v28  ;;  %v7551_v17 = vadd.f32 %v7550_v56, %v7549_v53  ;;  %v7584_v61 = vpop.f32.mrb[63].mxu1  ;;  %7946 = vmatprep.subr.bf16.mxu0 %v8758_v29  ;;  %7980 = vmatprep.subr.bf16.mxu1 %v8759_v36  ;;  %v8784_v54 = vld [vmem:[%s11064_s1 + $0xcc0] sm:$0xff]   ;;  %v8789_v29 = vld [vmem:[%s11064_s1 + $0xc08] sm:$0xff]  }
 0x19b   :  { %v7585_v28 = vadd.f32 %v7584_v61, %v7583_v55  ;;  %v8788_v61 = vld [vmem:[%s11064_s1 + $0xcc8] sm:$0xff]  }
 0x19c   :  { %v10555_v63 = vadd.f32 %v7582_v52, %v5386_v26  ;;  %v5389_v34 = vadd.f32 %v7551_v17, %v10417_v40  ;;  %5970 = vmatmul.mubr.bf16.gmra.mrb[128].mxu0 %v8757_v33  ;;  %v8763_v40 = vld [vmem:[%s11064_s1 + $0xba0] sm:$0xff]   ;;  %6027 = vmatmul.mubr.bf16.gmra.mrb[128].mxu1 %v8764_v15  ;;  %v8787_v33 = vld [vmem:[%s11064_s1 + $0xc48] sm:$0xff]  }
 0x19d   :  { %7947 = vmatpush3.bf16.msra.mxu0 %v8762_v10  ;;  %7981 = vmatpush3.bf16.msra.mxu1 %v8763_v40  ;;  %v8791_v36 = vld [vmem:[%s11065_s0 + $0x284] ss:$232 sps:$4 sm:$0xff]  }
 0x19e   :  { %v7552_v9 = vpop.f32.mrb[64].mxu0  ;;  %v10567_v11 = vadd.f32 %v7585_v28, %v5389_v34  ;;  %7948 = vmatprep.subr.bf16.mxu0 %v8765_v16  ;;  %7982 = vmatprep.subr.bf16.mxu1 %v8766_v46  ;;  %v8790_v28 = vld [vmem:[%s11064_s1 + $0xc88] sm:$0xff]   ;;  %v8801_v16 = vld [vmem:[%s11064_s1 + $0xc58] sm:$0xff]  }
 0x19f   :  { %v7553_v12 = vpop.f32.mrb[65].mxu0  ;;  %v7586_v51 = vpop.f32.mrb[64].mxu1  ;;  %6067 = vmatprep.mubr.bf16.mxu0 %v8779_v45  ;;  %v8793_v34 = vld [vmem:[%s11065_s0 + $0x280] ss:$232 sps:$4 sm:$0xff]   ;;  %v8796_v10 = vld [vmem:[%s11065_s0 + $0x28c] ss:$232 sps:$4 sm:$0xff]  }
 0x1a0   :  { %v7554_v21 = vadd.f32 %v7553_v12, %v7552_v9  ;;  %v7555_v42 = vpop.f32.mrb[66].mxu0  ;;  %v7587_v20 = vpop.f32.mrb[65].mxu1  ;;  %v8795_v9 = vld [vmem:[%s11064_s1 + $0xcd0] sm:$0xff]  }
 0x1a1   :  { %v7556_v31 = vpop.f32.mrb[67].mxu0  ;;  %v7588_v6 = vadd.f32 %v7587_v20, %v7586_v51  ;;  %v7589_v13 = vpop.f32.mrb[66].mxu1  ;;  %7949 = vmatpush3.bf16.msra.mxu0 %v8767_v19  ;;  %7983 = vmatpush3.bf16.msra.mxu1 %v8768_v1  ;;  %v8798_v12 = vld [vmem:[%s11064_s1 + $0xc10] sm:$0xff]   ;;  %v8804_v1 = vld [vmem:[%s11064_s1 + $0xc98] sm:$0xff]  }
 0x1a2   :  { %v5394_v18 = vadd.f32 %v7554_v21, %v10445_v60  ;;  %v7557_v59 = vadd.f32 %v7556_v31, %v7555_v42  ;;  %v7590_v2 = vpop.f32.mrb[67].mxu1  ;;  %7950 = vmatprep.subr.bf16.mxu0 %v8769_v24  ;;  %7984 = vmatprep.subr.bf16.mxu1 %v8770_v0  ;;  %v8799_v21 = vld [vmem:[%s11064_s1 + $0xc90] sm:$0xff]   ;;  %v8802_v31 = vld [vmem:[%s11064_s1 + $0xcd8] sm:$0xff]  }
 0x1a3   :  { %v7591_v35 = vadd.f32 %v7590_v2, %v7589_v13  ;;  %v8800_v42 = vld [vmem:[%s11065_s0 + $0x288] ss:$232 sps:$4 sm:$0xff]   ;;  %v8805_v24 = vld [vmem:[%s11065_s0 + $0x454] ss:$232 sps:$4 sm:$0xff]  }
 0x1a4   :  { %v5397_v60 = vadd.f32 %v7557_v59, %v10453_v3  ;;  %v10595_v25 = vadd.f32 %v7588_v6, %v5394_v18  ;;  %v8771_v3 = vld [vmem:[%s11064_s1 + $0xb30] sm:$0xff]   ;;  %v8803_v59 = vld [vmem:[%s11064_s1 + $0xc18] sm:$0xff]  }
 0x1a5   :  { %7951 = vmatpush3.bf16.msra.mxu0 %v8771_v3  ;;  %7985 = vmatpush3.bf16.msra.mxu1 %v8772_v57  ;;  %v8807_v2 = vld [vmem:[%s11065_s0 + $0x450] ss:$232 sps:$4 sm:$0xff]   ;;  %v8808_v3 = vld [vmem:[%s11064_s1 + $0xc60] sm:$0xff]  }
 0x1a6   :  { %v10603_v27 = vadd.f32 %v7591_v35, %v5397_v60  ;;  %v7558_v7 = vpop.f32.mrb[68].mxu0  ;;  %7952 = vmatprep.subr.bf16.mxu0 %v8773_v4  ;;  %7986 = vmatprep.subr.bf16.mxu1 %v8774_v30 }
 0x1a7   :  { %v7559_v23 = vpop.f32.mrb[69].mxu0  ;;  %v7592_v47 = vpop.f32.mrb[68].mxu1 }
 0x1a8   :  { %v7560_v37 = vadd.f32 %v7559_v23, %v7558_v7  ;;  %v7561_v38 = vpop.f32.mrb[70].mxu0  ;;  %v7593_v50 = vpop.f32.mrb[69].mxu1  ;;  %v8809_v7 = vld [vmem:[%s11064_s1 + $0xce0] sm:$0xff]  }
 0x1a9   :  { %v7562_v41 = vpop.f32.mrb[71].mxu0  ;;  %7953 = vmatpush3.bf16.msra.mxu0 %v8775_v39  ;;  %7987 = vmatpush3.bf16.msra.mxu1 %v8776_v14  ;;  %v7594_v52 = vadd.f32 %v7593_v50, %v7592_v47  ;;  %v7595_v53 = vpop.f32.mrb[70].mxu1  ;;  %v8810_v23 = vld [vmem:[%s11065_s0 + $0x45c] ss:$232 sps:$4 sm:$0xff]   ;;  %v8816_v47 = vld [vmem:[%s11064_s1 + $0xce8] sm:$0xff]  }
 0x1aa   :  { %v5402_v43 = vadd.f32 %v7560_v37, %v10490_v22  ;;  %v7563_v32 = vadd.f32 %v7562_v41, %v7561_v38  ;;  %v8782_v22 = vld [vmem:[%s11065_s0 + $0xbc] ss:$232 sps:$4 sm:$0xff]   ;;  %v7596_v26 = vpop.f32.mrb[71].mxu1  ;;  %8006 = vmatprep.subr.bf16.mxu0 %v8783_v62  ;;  %8040 = vmatprep.subr.bf16.mxu1 %v8784_v54  ;;  %v8818_v62 = vld [vmem:[%s11064_s1 + $0xca8] sm:$0xff]   ;;  %v8819_v54 = vld [vmem:[%s11064_s1 + $0xc70] sm:$0xff]  }
 0x1ab   :  { %6124 = vmatprep.mubr.bf16.mxu1 %v8782_v22  ;;  %v7597_v56 = vadd.f32 %v7596_v26, %v7595_v53  ;;  %v8812_v37 = vld [vmem:[%s11064_s1 + $0xc20] sm:$0xff]  }
 0x1ac   :  { %v5405_v49 = vadd.f32 %v7563_v32, %v10498_v5  ;;  %6068 = vmatmul.mubr.bf16.vlgmr.msra.gmra.mrb[132].mxu0 %v8777_v44  ;;  %6125 = vmatmul.mubr.bf16.vlgmr.msra.gmra.mrb[132].mxu1 %v8780_v48  ;;  %v8785_v5 = vld [vmem:[%s11064_s1 + $0xc00] sm:$0xff]   ;;  %v10640_v55 = vadd.f32 %v7594_v52, %v5402_v43  ;;  %v8815_v32 = vld [vmem:[%s11064_s1 + $0xc68] sm:$0xff]  }
 0x1ad   :  { %8007 = vmatpush3.bf16.msra.mxu0 %v8785_v5  ;;  %8041 = vmatpush3.bf16.msra.mxu1 %v8786_v58  ;;  %v8814_v43 = vld [vmem:[%s11065_s0 + $0x458] ss:$232 sps:$4 sm:$0xff]   ;;  %v8820_v5 = vld [vmem:[%s11064_s1 + $0xcf0] sm:$0xff]  }
 0x1ae   :  { %v10648_v17 = vadd.f32 %v7597_v56, %v5405_v49  ;;  %8008 = vmatprep.subr.bf16.mxu0 %v8787_v33  ;;  %8042 = vmatprep.subr.bf16.mxu1 %v8788_v61  ;;  %v8817_v49 = vld [vmem:[%s11064_s1 + $0xc28] sm:$0xff]   ;;  %v8822_v33 = vld [vmem:[%s11064_s1 + $0xcb0] sm:$0xff]  }
 0x1af   :  { %6075 = vmatprep.mubr.bf16.mxu0 %v8791_v36  ;;  %6132 = vmatprep.mubr.bf16.mxu1 %v8796_v10  ;;  %v8825_v10 = vld [vmem:[%s11064_s1 + $0xc38] sm:$0xff]  }
 0x1b1   :  { %8009 = vmatpush3.bf16.msra.mxu0 %v8789_v29  ;;  %8043 = vmatpush3.bf16.msra.mxu1 %v8790_v28  ;;  %v8823_v28 = vld [vmem:[%s11064_s1 + $0xc78] sm:$0xff]  }
 0x1b2   :  { %8010 = vmatprep.subr.bf16.mxu0 %v8794_v8  ;;  %8044 = vmatprep.subr.bf16.mxu1 %v8795_v9 }
 0x1b4   :  { %6076 = vmatmul.mubr.bf16.gmra.mrb[136].mxu0 %v8793_v34  ;;  %6133 = vmatmul.mubr.bf16.gmra.mrb[136].mxu1 %v8800_v42  ;;  %v8824_v34 = vld [vmem:[%s11064_s1 + $0xcf8] sm:$0xff]  }
 0x1b5   :  { %8011 = vmatpush3.bf16.msra.mxu0 %v8798_v12  ;;  %8045 = vmatpush3.bf16.msra.mxu1 %v8799_v21 }
 0x1b6   :  { %v7614_v40 = vpop.f32.mrb[72].mxu0  ;;  %8012 = vmatprep.subr.bf16.mxu0 %v8801_v16  ;;  %8046 = vmatprep.subr.bf16.mxu1 %v8802_v31  ;;  %v8829_v16 = vld [vmem:[%s11065_s0 + $0xc4] ss:$232 sps:$4 sm:$0xff]   ;;  %v8830_v31 = vld [vmem:[%s11065_s0 + $0xc8] ss:$232 sps:$4 sm:$0xff]  }
 0x1b7   :  { %v7648_v15 = vpop.f32.mrb[72].mxu1  ;;  %v7615_v18 = vpop.f32.mrb[73].mxu0  ;;  %6083 = vmatprep.mubr.bf16.mxu0 %v8805_v24  ;;  %6140 = vmatprep.mubr.bf16.mxu1 %v8810_v23  ;;  %v8836_v24 = vld [vmem:[%s11064_s1 + $0xd80] sm:$0xff]   ;;  %v8844_v23 = vld [vmem:[%s11064_s1 + $0xd50] sm:$0xff]  }
 0x1b8   :  { %v7616_v46 = vadd.f32 %v7615_v18, %v7614_v40  ;;  %v7649_v51 = vpop.f32.mrb[73].mxu1  ;;  %v7617_v20 = vpop.f32.mrb[74].mxu0  ;;  %v8826_v40 = vld [vmem:[%s11064_s1 + $0xcb8] sm:$0xff]  }
 0x1b9   :  { %v7650_v19 = vadd.f32 %v7649_v51, %v7648_v15  ;;  %v7651_v6 = vpop.f32.mrb[74].mxu1  ;;  %v7618_v13 = vpop.f32.mrb[75].mxu0  ;;  %8013 = vmatpush3.bf16.msra.mxu0 %v8803_v59  ;;  %8047 = vmatpush3.bf16.msra.mxu1 %v8804_v1  ;;  %v8827_v15 = vld [vmem:[%s11065_s0 + $0xc0] ss:$232 sps:$4 sm:$0xff]  }
 0x1ba   :  { %v5500_v60 = vadd.f32 %v7616_v46, %v10555_v63  ;;  %v7619_v0 = vadd.f32 %v7618_v13, %v7617_v20  ;;  %v7652_v35 = vpop.f32.mrb[75].mxu1  ;;  %8014 = vmatprep.subr.bf16.mxu0 %v8808_v3  ;;  %8048 = vmatprep.subr.bf16.mxu1 %v8809_v7  ;;  %v8833_v59 = vld [vmem:[%s11064_s1 + $0xd40] sm:$0xff]   ;;  %v8839_v3 = vld [vmem:[%s11064_s1 + $0xd08] sm:$0xff]   ;;  %v8841_v7 = vld [vmem:[%s11065_s0 + $0x294] ss:$232 sps:$4 sm:$0xff]  }
 0x1bb   :  { %v7653_v63 = vadd.f32 %v7652_v35, %v7651_v6  ;;  %v8834_v1 = vld [vmem:[%s11064_s1 + $0xdc0] sm:$0xff]   ;;  %v8838_v35 = vld [vmem:[%s11064_s1 + $0xdc8] sm:$0xff]  }
 0x1bc   :  { %v10705_v57 = vadd.f32 %v7650_v19, %v5500_v60  ;;  %v5503_v4 = vadd.f32 %v7619_v0, %v10567_v11  ;;  %6084 = vmatmul.mubr.bf16.gmra.mrb[140].mxu0 %v8807_v2  ;;  %v8813_v11 = vld [vmem:[%s11064_s1 + $0xca0] sm:$0xff]   ;;  %6141 = vmatmul.mubr.bf16.gmra.mrb[140].mxu1 %v8814_v43  ;;  %v8837_v2 = vld [vmem:[%s11064_s1 + $0xd48] sm:$0xff]  }
 0x1bd   :  { %8015 = vmatpush3.bf16.msra.mxu0 %v8812_v37  ;;  %8049 = vmatpush3.bf16.msra.mxu1 %v8813_v11  ;;  %v8920_v37 = vmov 0   ;;  %v8848_v11 = vld [vmem:[%s11064_s1 + $0xd10] sm:$0xff]   ;;  %v8850_v43 = vld [vmem:[%s11065_s0 + $0x298] ss:$232 sps:$4 sm:$0xff]  }
 0x1be   :  { %v10717_v38 = vadd.f32 %v7653_v63, %v5503_v4  ;;  %8016 = vmatprep.subr.bf16.mxu0 %v8815_v32  ;;  %8050 = vmatprep.subr.bf16.mxu1 %v8816_v47  ;;  %v8840_v63 = vld [vmem:[%s11064_s1 + $0xd88] sm:$0xff]   ;;  %v8843_v4 = vld [vmem:[%s11065_s0 + $0x290] ss:$232 sps:$4 sm:$0xff]  }
 0x1bf   :  { %v7654_v48 = vpop.f32.mrb[76].mxu1  ;;  %6181 = vmatprep.mubr.bf16.mxu0 %v8829_v16  ;;  %8194 = vset.pattern.permute.xlu1 %v8920_v37  ;;  %v8852_v47 = vld [vmem:[%s11064_s1 + $0xdd8] sm:$0xff]  }
 0x1c0   :  { %v7655_v50 = vpop.f32.mrb[77].mxu1  ;;  %8193 = vset.pattern.permute.xlu0 %v8920_v37 }
 0x1c1   :  { %v7656_v52 = vadd.f32 %v7655_v50, %v7654_v48  ;;  %v7657_v53 = vpop.f32.mrb[78].mxu1  ;;  %8017 = vmatpush3.bf16.msra.mxu0 %v8817_v49  ;;  %8051 = vmatpush3.bf16.msra.mxu1 %v8818_v62  ;;  %v8853_v49 = vld [vmem:[%s11064_s1 + $0xd18] sm:$0xff]  }
 0x1c2   :  { %v7658_v26 = vpop.f32.mrb[79].mxu1  ;;  %8018 = vmatprep.subr.bf16.mxu0 %v8819_v54  ;;  %8052 = vmatprep.subr.bf16.mxu1 %v8820_v5  ;;  %v8857_v5 = vld [vmem:[%s11065_s0 + $0x460] ss:$232 sps:$4 sm:$0xff]  }
 0x1c3   :  { %v7659_v58 = vadd.f32 %v7658_v26, %v7657_v53  ;;  %v8855_v26 = vld [vmem:[%s11065_s0 + $0x464] ss:$232 sps:$4 sm:$0xff]  }
 0x1c5   :  { %8053 = vmatpush3.bf16.msra.mxu1 %v8822_v33  ;;  %v8858_v33 = vld [vmem:[%s11064_s1 + $0xd60] sm:$0xff]  }
 0x1c6   :  { %8054 = vmatprep.subr.bf16.mxu1 %v8824_v34  ;;  %v8860_v34 = vld [vmem:[%s11065_s0 + $0x46c] ss:$232 sps:$4 sm:$0xff]  }
 0x1c9   :  { %8055 = vmatpush3.bf16.msra.mxu1 %v8826_v40 }
 0x1ca   :  { %8108 = vmatprep.subr.bf16.mxu1 %v8834_v1 }
 0x1cf   :  { %v7620_v30 = vpop.f32.mrb[76].mxu0 }
 0x1d0   :  { %v7621_v39 = vpop.f32.mrb[77].mxu0 }
 0x1d1   :  { %v7622_v41 = vadd.f32 %v7621_v39, %v7620_v30  ;;  %v7623_v14 = vpop.f32.mrb[78].mxu0  ;;  %v8845_v30 = vld [vmem:[%s11064_s1 + $0xdd0] sm:$0xff]   ;;  %v8846_v39 = vld [vmem:[%s11065_s0 + $0x29c] ss:$232 sps:$4 sm:$0xff]  }
 0x1d2   :  { %v7624_v45 = vpop.f32.mrb[79].mxu0 }
 0x1d3   :  { %v5508_v44 = vadd.f32 %v7622_v41, %v10595_v25  ;;  %v7625_v22 = vadd.f32 %v7624_v45, %v7623_v14  ;;  %v8849_v14 = vld [vmem:[%s11064_s1 + $0xd90] sm:$0xff]  }
 0x1d5   :  { %v5511_v25 = vadd.f32 %v7625_v22, %v10603_v27  ;;  %v10745_v56 = vadd.f32 %v7656_v52, %v5508_v44  ;;  %v8821_v27 = vld [vmem:[%s11064_s1 + $0xc30] sm:$0xff]   ;;  %v8851_v44 = vld [vmem:[%s11064_s1 + $0xd58] sm:$0xff]  }
 0x1d6   :  { %8019 = vmatpush3.bf16.msra.mxu0 %v8821_v27 }
 0x1d7   :  { %v10753_v61 = vadd.f32 %v7659_v58, %v5511_v25  ;;  %v7626_v29 = vpop.f32.mrb[80].mxu0  ;;  %8020 = vmatprep.subr.bf16.mxu0 %v8823_v28  ;;  %v8854_v25 = vld [vmem:[%s11064_s1 + $0xd98] sm:$0xff]   ;;  %v8859_v28 = vld [vmem:[%s11064_s1 + $0xde0] sm:$0xff]  }
 0x1d8   :  { %v7627_v36 = vpop.f32.mrb[81].mxu0 }
 0x1d9   :  { %v7628_v8 = vadd.f32 %v7627_v36, %v7626_v29  ;;  %v7629_v9 = vpop.f32.mrb[82].mxu0 }
 0x1da   :  { %v7630_v12 = vpop.f32.mrb[83].mxu0  ;;  %8021 = vmatpush3.bf16.msra.mxu0 %v8825_v10 }
 0x1db   :  { %v5516_v21 = vadd.f32 %v7628_v8, %v10640_v55  ;;  %v7631_v42 = vadd.f32 %v7630_v12, %v7629_v9  ;;  %v8832_v55 = vld [vmem:[%s11065_s0 + $0xcc] ss:$232 sps:$4 sm:$0xff]   ;;  %8074 = vmatprep.subr.bf16.mxu0 %v8833_v59  ;;  %v8862_v9 = vld [vmem:[%s11064_s1 + $0xd20] sm:$0xff]  }
 0x1dc   :  { %6238 = vmatprep.mubr.bf16.mxu1 %v8832_v55  ;;  %v8868_v59 = vld [vmem:[%s11064_s1 + $0xda8] sm:$0xff]  }
 0x1dd   :  { %v7660_v18 = vpop.f32.mrb[80].mxu1  ;;  %v5519_v46 = vadd.f32 %v7631_v42, %v10648_v17  ;;  %6182 = vmatmul.mubr.bf16.vlgmr.msra.gmra.mrb[144].mxu0 %v8827_v15  ;;  %6239 = vmatmul.mubr.bf16.vlgmr.msra.gmra.mrb[144].mxu1 %v8830_v31  ;;  %v8835_v17 = vld [vmem:[%s11064_s1 + $0xd00] sm:$0xff]   ;;  %v8864_v42 = vld [vmem:[%s11065_s0 + $0x468] ss:$232 sps:$4 sm:$0xff]  }
 0x1de   :  { %v7661_v51 = vpop.f32.mrb[81].mxu1  ;;  %8075 = vmatpush3.bf16.msra.mxu0 %v8835_v17  ;;  %8109 = vmatpush3.bf16.msra.mxu1 %v8836_v24  ;;  %v8865_v15 = vld [vmem:[%s11064_s1 + $0xd68] sm:$0xff]   ;;  %v8870_v17 = vld [vmem:[%s11064_s1 + $0xdf0] sm:$0xff]  }
 0x1df   :  { %v7662_v19 = vadd.f32 %v7661_v51, %v7660_v18  ;;  %v7663_v20 = vpop.f32.mrb[82].mxu1  ;;  %8076 = vmatprep.subr.bf16.mxu0 %v8837_v2  ;;  %8110 = vmatprep.subr.bf16.mxu1 %v8838_v35  ;;  %v8866_v31 = vld [vmem:[%s11064_s1 + $0xde8] sm:$0xff]   ;;  %v8871_v24 = vld [vmem:[%s11064_s1 + $0xd30] sm:$0xff]  }
 0x1e0   :  { %v7664_v60 = vpop.f32.mrb[83].mxu1  ;;  %6189 = vmatprep.mubr.bf16.mxu0 %v8841_v7  ;;  %6246 = vmatprep.mubr.bf16.mxu1 %v8846_v39  ;;  %v8872_v35 = vld [vmem:[%s11064_s1 + $0xdb0] sm:$0xff]   ;;  %v8875_v39 = vld [vmem:[%s11064_s1 + $0xd38] sm:$0xff]  }
 0x1e1   :  { %v10790_v6 = vadd.f32 %v7662_v19, %v5516_v21  ;;  %v7665_v13 = vadd.f32 %v7664_v60, %v7663_v20  ;;  %v8869_v20 = vld [vmem:[%s11064_s1 + $0xd70] sm:$0xff]  }
 0x1e2   :  { %8077 = vmatpush3.bf16.msra.mxu0 %v8839_v3  ;;  %8111 = vmatpush3.bf16.msra.mxu1 %v8840_v63  ;;  %v8873_v63 = vld [vmem:[%s11064_s1 + $0xd78] sm:$0xff]  }
 0x1e3   :  { %v10798_v0 = vadd.f32 %v7665_v13, %v5519_v46  ;;  %8078 = vmatprep.subr.bf16.mxu0 %v8844_v23  ;;  %8112 = vmatprep.subr.bf16.mxu1 %v8845_v30  ;;  %v8867_v46 = vld [vmem:[%s11064_s1 + $0xd28] sm:$0xff]   ;;  %v8874_v23 = vld [vmem:[%s11064_s1 + $0xdf8] sm:$0xff]  }
 0x1e5   :  { %6190 = vmatmul.mubr.bf16.gmra.mrb[148].mxu0 %v8843_v4  ;;  %6247 = vmatmul.mubr.bf16.gmra.mrb[148].mxu1 %v8850_v43 }
 0x1e6   :  { %8079 = vmatpush3.bf16.msra.mxu0 %v8848_v11  ;;  %8113 = vmatpush3.bf16.msra.mxu1 %v8849_v14 }
 0x1e7   :  { %8080 = vmatprep.subr.bf16.mxu0 %v8851_v44  ;;  %8114 = vmatprep.subr.bf16.mxu1 %v8852_v47  ;;  %v8879_v44 = vld [vmem:[%s11065_s0 + $0xd4] ss:$232 sps:$4 sm:$0xff]   ;;  %v8880_v47 = vld [vmem:[%s11065_s0 + $0xd8] ss:$232 sps:$4 sm:$0xff]  }
 0x1e8   :  { %6197 = vmatprep.mubr.bf16.mxu0 %v8855_v26  ;;  %6254 = vmatprep.mubr.bf16.mxu1 %v8860_v34  ;;  %v8886_v26 = vld [vmem:[%s11064_s1 + $0xe08] sm:$0xff]   ;;  %v8895_v34 = vld [vmem:[%s11064_s1 + $0xe58] sm:$0xff]  }
 0x1ea   :  { %8081 = vmatpush3.bf16.msra.mxu0 %v8853_v49  ;;  %8115 = vmatpush3.bf16.msra.mxu1 %v8854_v25  ;;  %v8883_v49 = vld [vmem:[%s11064_s1 + $0xe40] sm:$0xff]  }
 0x1eb   :  { %8082 = vmatprep.subr.bf16.mxu0 %v8858_v33  ;;  %8116 = vmatprep.subr.bf16.mxu1 %v8859_v28  ;;  %v8884_v25 = vld [vmem:[%s11064_s1 + $0xe00] sm:$0xff]   ;;  %v8890_v33 = vld [vmem:[%s11064_s1 + $0xe50] sm:$0xff]  }
 0x1ec   :  { %v8893_v28 = vld [vmem:[%s11064_s1 + $0xe10] sm:$0xff]  }
 0x1ed   :  { %6198 = vmatmul.mubr.bf16.gmra.mrb[152].mxu0 %v8857_v5  ;;  %6255 = vmatmul.mubr.bf16.gmra.mrb[152].mxu1 %v8864_v42  ;;  %v8887_v5 = vld [vmem:[%s11065_s0 + $0x2a4] ss:$232 sps:$4 sm:$0xff]  }
 0x1ee   :  { %8083 = vmatpush3.bf16.msra.mxu0 %v8862_v9  ;;  %6295 = vmatprep.mubr.bf16.mxu0 %v8879_v44  ;;  %v8897_v9 = vld [vmem:[%s11065_s0 + $0x474] ss:$232 sps:$4 sm:$0xff]  }
 0x1ef   :  { %v7682_v41 = vpop.f32.mrb[84].mxu0  ;;  %8084 = vmatprep.subr.bf16.mxu0 %v8865_v15  ;;  %v8910_v44 = vld [vmem:[%s11064_s1 + $0xe38] sm:$0xff]  }
 0x1f0   :  { %v7683_v45 = vpop.f32.mrb[85].mxu0 }
 0x1f1   :  { %v7716_v32 = vpop.f32.mrb[84].mxu1  ;;  %v7684_v48 = vadd.f32 %v7683_v45, %v7682_v41  ;;  %v7685_v62 = vpop.f32.mrb[86].mxu0  ;;  %v8876_v41 = vld [vmem:[%s11064_s1 + $0xdb8] sm:$0xff]  }
 0x1f2   :  { %v7717_v22 = vpop.f32.mrb[85].mxu1  ;;  %v7686_v54 = vpop.f32.mrb[87].mxu0  ;;  %8085 = vmatpush3.bf16.msra.mxu0 %v8867_v46 }
 0x1f3   :  { %v7718_v50 = vadd.f32 %v7717_v22, %v7716_v32  ;;  %v5614_v52 = vadd.f32 %v7684_v48, %v10705_v57  ;;  %v7719_v53 = vpop.f32.mrb[86].mxu1  ;;  %v7687_v58 = vadd.f32 %v7686_v54, %v7685_v62  ;;  %8086 = vmatprep.subr.bf16.mxu0 %v8869_v20  ;;  %v8877_v32 = vld [vmem:[%s11065_s0 + $0xd0] ss:$232 sps:$4 sm:$0xff]  }
 0x1f4   :  { %v7720_v27 = vpop.f32.mrb[87].mxu1 }
 0x1f5   :  { %v10855_v29 = vadd.f32 %v7718_v50, %v5614_v52  ;;  %v7721_v57 = vadd.f32 %v7720_v27, %v7719_v53  ;;  %v5617_v36 = vadd.f32 %v7687_v58, %v10717_v38  ;;  %v8863_v38 = vld [vmem:[%s11064_s1 + $0xda0] sm:$0xff]  }
 0x1f6   :  { %8117 = vmatpush3.bf16.msra.mxu1 %v8863_v38  ;;  %8087 = vmatpush3.bf16.msra.mxu0 %v8871_v24  ;;  %v8889_v27 = vld [vmem:[%s11065_s0 + $0x2a0] ss:$232 sps:$4 sm:$0xff]  }
 0x1f7   :  { %v10867_v10 = vadd.f32 %v7721_v57, %v5617_v36  ;;  %8118 = vmatprep.subr.bf16.mxu1 %v8866_v31  ;;  %8088 = vmatprep.subr.bf16.mxu0 %v8873_v63  ;;  %v8891_v57 = vld [vmem:[%s11065_s0 + $0x2ac] ss:$232 sps:$4 sm:$0xff]   ;;  %v8894_v36 = vld [vmem:[%s11065_s0 + $0x2a8] ss:$232 sps:$4 sm:$0xff]   ;;  %v8900_v38 = vld [vmem:[%s11064_s1 + $0xe60] sm:$0xff]  }
 0x1f8   :  { %v7688_v8 = vpop.f32.mrb[88].mxu0  ;;  %v8908_v63 = vld [vmem:[%s11064_s1 + $0xe30] sm:$0xff]  }
 0x1f9   :  { %v7689_v12 = vpop.f32.mrb[89].mxu0  ;;  %v7722_v51 = vpop.f32.mrb[88].mxu1 }
 0x1fa   :  { %v7690_v40 = vadd.f32 %v7689_v12, %v7688_v8  ;;  %v7691_v21 = vpop.f32.mrb[90].mxu0  ;;  %v7723_v19 = vpop.f32.mrb[89].mxu1  ;;  %8119 = vmatpush3.bf16.msra.mxu1 %v8868_v59  ;;  %8089 = vmatpush3.bf16.msra.mxu0 %v8875_v39  ;;  %v8896_v8 = vld [vmem:[%s11064_s1 + $0xe18] sm:$0xff]  }
 0x1fb   :  { %v7692_v18 = vpop.f32.mrb[91].mxu0  ;;  %v7724_v1 = vadd.f32 %v7723_v19, %v7722_v51  ;;  %v7725_v60 = vpop.f32.mrb[90].mxu1  ;;  %8120 = vmatprep.subr.bf16.mxu1 %v8870_v17  ;;  %8142 = vmatprep.subr.bf16.mxu0 %v8883_v49  ;;  %v8899_v12 = vld [vmem:[%s11065_s0 + $0x470] ss:$232 sps:$4 sm:$0xff]   ;;  %v8905_v51 = vld [vmem:[%s11064_s1 + $0xe68] sm:$0xff]  }
 0x1fc   :  { %v5622_v16 = vadd.f32 %v7690_v40, %v10745_v56  ;;  %v7693_v55 = vadd.f32 %v7692_v18, %v7691_v21  ;;  %v7726_v13 = vpop.f32.mrb[91].mxu1  ;;  %v8901_v21 = vld [vmem:[%s11065_s0 + $0x47c] ss:$232 sps:$4 sm:$0xff]  }
 0x1fd   :  { %v7727_v2 = vadd.f32 %v7726_v13, %v7725_v60  ;;  %6296 = vmatmul.mubr.bf16.vlgmr.msra.gmra.mrb[156].mxu0 %v8877_v32  ;;  %v8906_v60 = vld [vmem:[%s11064_s1 + $0xe28] sm:$0xff]  }
 0x1fe   :  { %v5625_v56 = vadd.f32 %v7693_v55, %v10753_v61  ;;  %v10898_v61 = vadd.f32 %v7724_v1, %v5622_v16  ;;  %8121 = vmatpush3.bf16.msra.mxu1 %v8872_v35  ;;  %8143 = vmatpush3.bf16.msra.mxu0 %v8884_v25  ;;  %v8903_v16 = vld [vmem:[%s11064_s1 + $0xe20] sm:$0xff]  }
 0x1ff   :  { %8122 = vmatprep.subr.bf16.mxu1 %v8874_v23  ;;  %6303 = vmatprep.mubr.bf16.mxu0 %v8887_v5  ;;  %v8904_v55 = vld [vmem:[%s11065_s0 + $0x478] ss:$232 sps:$4 sm:$0xff]   ;;  %v8913_v35 = vld [vmem:[%s11065_s0 + $0xe4] ss:$232 sps:$4 sm:$0xff]  }
 0x200   :  { %v10906_v7 = vadd.f32 %v7727_v2, %v5625_v56 }
 0x201   :  { %v7694_v3 = vpop.f32.mrb[92].mxu0 }
 0x202   :  { %v7695_v4 = vpop.f32.mrb[93].mxu0  ;;  %8123 = vmatpush3.bf16.msra.mxu1 %v8876_v41  ;;  %v6448_v41 = vld [vmem:[%s11067_s3 + $0x10] sm:$0xff] }
 0x203   :  { %v7696_v30 = vadd.f32 %v7695_v4, %v7694_v3  ;;  %v7697_v37 = vpop.f32.mrb[94].mxu0  ;;  %v7728_v45 = vpop.f32.mrb[92].mxu1  ;;  %8176 = vmatprep.subr.bf16.mxu1 %v8883_v49  ;;  %v8916_v4 = vld [vmem:[%s11065_s0 + $0x2b4] ss:$232 sps:$4 sm:$0xff]   ;;  %6464 = vperm.xlu1 %8194, %v6448_v41  }
 0x204   :  { %v7698_v11 = vpop.f32.mrb[95].mxu0  ;;  %v7729_v22 = vpop.f32.mrb[93].mxu1 }
 0x205   :  { %v5630_v14 = vadd.f32 %v7696_v30, %v10790_v6  ;;  %v7699_v43 = vadd.f32 %v7698_v11, %v7697_v37  ;;  %v8882_v6 = vld [vmem:[%s11065_s0 + $0xdc] ss:$232 sps:$4 sm:$0xff]   ;;  %v7730_v50 = vadd.f32 %v7729_v22, %v7728_v45  ;;  %v7731_v62 = vpop.f32.mrb[94].mxu1  ;;  %6304 = vmatmul.mubr.bf16.gmra.mrb[160].mxu0 %v8889_v27  ;;  %v8911_v22 = vld [vmem:[%s11065_s0 + $0xe0] ss:$232 sps:$4 sm:$0xff]  }
 0x206   :  { %6352 = vmatprep.mubr.bf16.mxu1 %v8882_v6  ;;  %v7732_v52 = vpop.f32.mrb[95].mxu1  ;;  %6311 = vmatprep.mubr.bf16.mxu0 %v8897_v9  ;;  %v6449_v45 = vld [vmem:[%s11067_s3 + $0x18] sm:$0xff] }
 0x207   :  { %v5633_v48 = vadd.f32 %v7699_v43, %v10798_v0  ;;  %6353 = vmatmul.mubr.bf16.vlgmr.msra.gmra.mrb[156].mxu1 %v8880_v47  ;;  %v8885_v0 = vld [vmem:[%s11064_s1 + $0xe48] sm:$0xff]   ;;  %v10940_v53 = vadd.f32 %v7730_v50, %v5630_v14  ;;  %v7733_v54 = vadd.f32 %v7732_v52, %v7731_v62  ;;  %v6446_v14 = vld [vmem:[%s11067_s3] sm:$0xff]  ;;  %6469 = vperm.xlu1 %8194, %v6449_v45   ;;  %v8914_v62 = vld [vmem:[%s11065_s0 + $0x2b0] ss:$232 sps:$4 sm:$0xff]  }
 0x208   :  { %8184 = vmatpush3.bf16.msra.mxu1 %v8884_v25  ;;  %8144 = vmatprep.subr.bf16.mxu0 %v8885_v0  ;;  %v8917_v52 = vld [vmem:[%s11065_s0 + $0x484] ss:$232 sps:$4 sm:$0xff]  }
 0x209   :  { %v10948_v58 = vadd.f32 %v7733_v54, %v5633_v48  ;;  %8177 = vmatprep.subr.bf16.mxu1 %v8885_v0  ;;  %8145 = vmatpush3.bf16.msra.mxu0 %v8886_v26 }
 0x20a   :  { %8146 = vmatprep.subr.bf16.mxu0 %v8890_v33  ;;  %6360 = vmatprep.mubr.bf16.mxu1 %v8891_v57 }
 0x20b   :  { %6454 = vperm.xlu0 %8193, %v6446_v14  }
 0x20c   :  { %8185 = vmatpush3.bf16.msra.mxu1 %v8886_v26  ;;  %v6450_v26 = vld [vmem:[%s11067_s3 + $0x20] sm:$0xff] }
 0x20d   :  { %8178 = vmatprep.subr.bf16.mxu1 %v8890_v33  ;;  %8147 = vmatpush3.bf16.msra.mxu0 %v8893_v28 }
 0x20e   :  { %8148 = vmatprep.subr.bf16.mxu0 %v8895_v34  ;;  %6312 = vmatmul.mubr.bf16.gmra.mrb[164].mxu0 %v8899_v12  ;;  %v8919_v12 = vld [vmem:[%s11065_s0 + $0x480] ss:$232 sps:$4 sm:$0xff]  }
 0x20f   :  { %6361 = vmatmul.mubr.bf16.gmra.mrb[160].mxu1 %v8894_v36  ;;  %6409 = vmatprep.mubr.bf16.mxu0 %v8913_v35 }
 0x210   :  { %8186 = vmatpush3.bf16.msra.mxu1 %v8893_v28  ;;  %6368 = vmatprep.mubr.bf16.mxu1 %v8901_v21 }
 0x211   :  { %8179 = vmatprep.subr.bf16.mxu1 %v8895_v34  ;;  %8149 = vmatpush3.bf16.msra.mxu0 %v8896_v8 }
 0x212   :  { %8150 = vmatprep.subr.bf16.mxu0 %v8900_v38 }
 0x214   :  { %8187 = vmatpush3.bf16.msra.mxu1 %v8896_v8 }
 0x215   :  { %8180 = vmatprep.subr.bf16.mxu1 %v8900_v38  ;;  %8151 = vmatpush3.bf16.msra.mxu0 %v8903_v16 }
 0x216   :  { %8152 = vmatprep.subr.bf16.mxu0 %v8905_v51 }
 0x217   :  { %6369 = vmatmul.mubr.bf16.gmra.mrb[164].mxu1 %v8904_v55 }
 0x218   :  { %8188 = vmatpush3.bf16.msra.mxu1 %v8903_v16  ;;  %6417 = vmatprep.mubr.bf16.mxu1 %v8916_v4 }
 0x219   :  { %8181 = vmatprep.subr.bf16.mxu1 %v8905_v51  ;;  %8153 = vmatpush3.bf16.msra.mxu0 %v8906_v60 }
 0x21c   :  { %8189 = vmatpush3.bf16.msra.mxu1 %v8906_v60 }
 0x21f   :  { %v7750_v40 = vpop.f32.mrb[96].mxu0  ;;  %v7784_v42 = vpop.f32.mrb[96].mxu1 }
 0x220   :  { %v7751_v15 = vpop.f32.mrb[97].mxu0  ;;  %v7785_v31 = vpop.f32.mrb[97].mxu1 }
 0x221   :  { %v7752_v18 = vadd.f32 %v7751_v15, %v7750_v40  ;;  %v7786_v46 = vadd.f32 %v7785_v31, %v7784_v42  ;;  %v7753_v56 = vpop.f32.mrb[98].mxu0  ;;  %v7787_v19 = vpop.f32.mrb[98].mxu1 }
 0x222   :  { %v7754_v1 = vpop.f32.mrb[99].mxu0  ;;  %v7788_v13 = vpop.f32.mrb[99].mxu1 }
 0x223   :  { %v5728_v59 = vadd.f32 %v7752_v18, %v10855_v29  ;;  %v7755_v17 = vadd.f32 %v7754_v1, %v7753_v56  ;;  %v8907_v29 = vld [vmem:[%s11064_s1 + $0xe70] sm:$0xff]   ;;  %v7789_v24 = vadd.f32 %v7788_v13, %v7787_v19 }
 0x224   :  { %8154 = vmatprep.subr.bf16.mxu0 %v8907_v29  ;;  %8182 = vmatprep.subr.bf16.mxu1 %v8907_v29 }
 0x225   :  { %v10993_v20 = vadd.f32 %v7786_v46, %v5728_v59  ;;  %v5731_v2 = vadd.f32 %v7755_v17, %v10867_v10  ;;  %v8909_v10 = vld [vmem:[%s11064_s1 + $0xe78] sm:$0xff]   ;;  %8155 = vmatpush3.bf16.msra.mxu0 %v8908_v63  ;;  %8190 = vmatpush3.bf16.msra.mxu1 %v8908_v63 }
 0x226   :  { %8156 = vmatprep.subr.bf16.mxu0 %v8909_v10  ;;  %8183 = vmatprep.subr.bf16.mxu1 %v8909_v10 }
 0x227   :  { %v7756_v3 = vpop.f32.mrb[100].mxu0  ;;  %v11011_v23 = vadd.f32 %v7789_v24, %v5731_v2  ;;  %v7790_v47 = vpop.f32.mrb[100].mxu1 }
 0x228   :  { %v7757_v30 = vpop.f32.mrb[101].mxu0  ;;  %v7791_v48 = vpop.f32.mrb[101].mxu1 }
 0x229   :  { %v7758_v37 = vadd.f32 %v7757_v30, %v7756_v3  ;;  %v7759_v39 = vpop.f32.mrb[102].mxu0  ;;  %v7792_v49 = vadd.f32 %v7791_v48, %v7790_v47  ;;  %v7793_v50 = vpop.f32.mrb[102].mxu1  ;;  %8157 = vmatpush3.bf16.msra.mxu0 %v8910_v44  ;;  %8191 = vmatpush3.bf16.msra.mxu1 %v8910_v44 }
 0x22a   :  { %v7760_v11 = vpop.f32.mrb[103].mxu0  ;;  %v7794_v25 = vpop.f32.mrb[103].mxu1 }
 0x22b   :  { %v5736_v43 = vadd.f32 %v7758_v37, %v10898_v61  ;;  %v7761_v32 = vadd.f32 %v7760_v11, %v7759_v39  ;;  %v6447_v61 = vld [vmem:[%s11067_s3 + $0x8] sm:$0xff]  ;;  %v7795_v54 = vadd.f32 %v7794_v25, %v7793_v50 }
 0x22c   :  { %6459 = vperm.xlu0 %8193, %v6447_v61   ;;  %6410 = vmatmul.mubr.bf16.vlgmr.msra.gmra.mrb[168].mxu0 %v8911_v22 }
 0x22d   :  { %v5739_v6 = vadd.f32 %v7761_v32, %v10906_v7  ;;  %v6451_v7 = vld [vmem:[%s11067_s3 + $0x28] sm:$0xff]  ;;  %v5793_v0 = vadd.f32 %v7792_v49, %v5736_v43  ;;  %6418 = vmatmul.mubr.bf16.vlgmr.msra.gmra.mrb[168].mxu1 %v8914_v62 }
 0x22e   :  { %6479 = vperm.xlu1 %8194, %v6451_v7   ;;  %6425 = vmatprep.mubr.bf16.mxu1 %v8917_v52 }
 0x22f   :  { %v7762_v5 = vpop.f32.mrb[104].mxu0  ;;  %v5796_v27 = vadd.f32 %v7795_v54, %v5739_v6  ;;  %v7796_v9 = vpop.f32.mrb[104].mxu1 }
 0x230   :  { %v7763_v33 = vpop.f32.mrb[105].mxu0  ;;  %6474 = vperm.xlu0 %8193, %v6450_v26   ;;  %v7797_v40 = vpop.f32.mrb[105].mxu1 }
 0x231   :  { %v7764_v57 = vadd.f32 %v7763_v33, %v7762_v5  ;;  %v7765_v28 = vpop.f32.mrb[106].mxu0  ;;  %v7798_v21 = vadd.f32 %v7797_v40, %v7796_v9  ;;  %v7799_v42 = vpop.f32.mrb[106].mxu1 }
 0x232   :  { %v7766_v36 = vpop.f32.mrb[107].mxu0  ;;  %v7800_v15 = vpop.f32.mrb[107].mxu1 }
 0x233   :  { %v5744_v34 = vadd.f32 %v7764_v57, %v10940_v53  ;;  %v7767_v8 = vadd.f32 %v7766_v36, %v7765_v28  ;;  %v7801_v18 = vadd.f32 %v7800_v15, %v7799_v42 }
 0x235   :  { %v5747_v38 = vadd.f32 %v7767_v8, %v10948_v58  ;;  %v5801_v16 = vadd.f32 %v7798_v21, %v5744_v34  ;;  %6426 = vmatmul.mubr.bf16.gmra.mrb[172].mxu1 %v8919_v12 }
 0x237   :  { %v5804_v31 = vadd.f32 %v7801_v18, %v5747_v38 }
 0x23f   :  { %v7818_v55 = vpop.f32.mrb[108].mxu0  ;;  %v7852_v46 = vpop.f32.mrb[108].mxu1 }
 0x240   :  { %v7819_v51 = vpop.f32.mrb[109].mxu0  ;;  %v7853_v59 = vpop.f32.mrb[109].mxu1 }
 0x241   :  { %v7820_v53 = vadd.f32 %v7819_v51, %v7818_v55  ;;  %v7821_v56 = vpop.f32.mrb[110].mxu0  ;;  %v7854_v19 = vadd.f32 %v7853_v59, %v7852_v46  ;;  %v7855_v1 = vpop.f32.mrb[110].mxu1 }
 0x242   :  { %v7822_v60 = vpop.f32.mrb[111].mxu0  ;;  %v7856_v13 = vpop.f32.mrb[111].mxu1 }
 0x243   :  { %v5842_v17 = vadd.f32 %v7820_v53, %v10993_v20  ;;  %v7823_v58 = vadd.f32 %v7822_v60, %v7821_v56  ;;  %v7857_v29 = vadd.f32 %v7856_v13, %v7855_v1 }
 0x245   :  { %v5899_v24 = vadd.f32 %v7854_v19, %v5842_v17  ;;  %v5845_v2 = vadd.f32 %v7823_v58, %v11011_v23 }
 0x247   :  { %v5902_v35 = vadd.f32 %v7857_v29, %v5845_v2  ;;  %v7824_v3 = vpop.f32.mrb[112].mxu0  ;;  %v7858_v11 = vpop.f32.mrb[112].mxu1 }
 0x248   :  { %v7825_v63 = vpop.f32.mrb[113].mxu0  ;;  %v7859_v14 = vpop.f32.mrb[113].mxu1 }
 0x249   :  { %v7826_v4 = vadd.f32 %v7825_v63, %v7824_v3  ;;  %v7827_v30 = vpop.f32.mrb[114].mxu0  ;;  %v7860_v43 = vadd.f32 %v7859_v14, %v7858_v11  ;;  %v7861_v32 = vpop.f32.mrb[114].mxu1 }
 0x24a   :  { %v7828_v10 = vpop.f32.mrb[115].mxu0  ;;  %v7862_v20 = vpop.f32.mrb[115].mxu1 }
 0x24b   :  { %v5850_v37 = vadd.f32 %v7826_v4, %v5793_v0  ;;  %v7829_v39 = vadd.f32 %v7828_v10, %v7827_v30  ;;  %v7863_v45 = vadd.f32 %v7862_v20, %v7861_v32 }
 0x24d   :  { %v5853_v41 = vadd.f32 %v7829_v39, %v5796_v27  ;;  %v5907_v44 = vadd.f32 %v7860_v43, %v5850_v37 }
 0x24f   :  { %v7830_v47 = vpop.f32.mrb[116].mxu0  ;;  %v5910_v6 = vadd.f32 %v7863_v45, %v5853_v41  ;;  %v7864_v62 = vpop.f32.mrb[116].mxu1 }
 0x250   :  { %v7831_v61 = vpop.f32.mrb[117].mxu0  ;;  %v7865_v7 = vpop.f32.mrb[117].mxu1 }
 0x251   :  { %v7832_v23 = vadd.f32 %v7831_v61, %v7830_v47  ;;  %v7833_v48 = vpop.f32.mrb[118].mxu0  ;;  %v7866_v52 = vadd.f32 %v7865_v7, %v7864_v62  ;;  %v7867_v0 = vpop.f32.mrb[118].mxu1 }
 0x252   :  { %v7834_v22 = vpop.f32.mrb[119].mxu0  ;;  %v7868_v54 = vpop.f32.mrb[119].mxu1 }
 0x253   :  { %v5858_v49 = vadd.f32 %v7832_v23, %v5801_v16  ;;  %v7835_v50 = vadd.f32 %v7834_v22, %v7833_v48  ;;  %v7869_v5 = vadd.f32 %v7868_v54, %v7867_v0 }
 0x255   :  { %v5861_v25 = vadd.f32 %v7835_v50, %v5804_v31  ;;  %v5915_v26 = vadd.f32 %v7866_v52, %v5858_v49 }
 0x257   :  { %v5918_v27 = vadd.f32 %v7869_v5, %v5861_v25 }
 0x25f   :  { %v7886_v33 = vpop.f32.mrb[120].mxu0  ;;  %v7920_v57 = vpop.f32.mrb[120].mxu1 }
 0x260   :  { %v7887_v28 = vpop.f32.mrb[121].mxu0  ;;  %v7921_v34 = vpop.f32.mrb[121].mxu1 }
 0x261   :  { %v7888_v36 = vadd.f32 %v7887_v28, %v7886_v33  ;;  %v7889_v8 = vpop.f32.mrb[122].mxu0  ;;  %v7922_v9 = vadd.f32 %v7921_v34, %v7920_v57  ;;  %v7923_v12 = vpop.f32.mrb[122].mxu1 }
 0x262   :  { %v7890_v38 = vpop.f32.mrb[123].mxu0  ;;  %v7924_v42 = vpop.f32.mrb[123].mxu1 }
 0x263   :  { %v5956_v40 = vadd.f32 %v7888_v36, %v5899_v24  ;;  %v7891_v21 = vadd.f32 %v7890_v38, %v7889_v8  ;;  %v7925_v15 = vadd.f32 %v7924_v42, %v7923_v12 }
 0x265   :  { %v6013_v16 = vadd.f32 %v7922_v9, %v5956_v40  ;;  %v5959_v18 = vadd.f32 %v7891_v21, %v5902_v35 }
 0x267   :  { %v6016_v31 = vadd.f32 %v7925_v15, %v5959_v18  ;;  %v7892_v55 = vpop.f32.mrb[124].mxu0  ;;  %v7926_v1 = vpop.f32.mrb[124].mxu1 }
 0x268   :  { %v7893_v46 = vpop.f32.mrb[125].mxu0  ;;  %v7927_v17 = vpop.f32.mrb[125].mxu1 }
 0x269   :  { %v7894_v51 = vadd.f32 %v7893_v46, %v7892_v55  ;;  %v7895_v53 = vpop.f32.mrb[126].mxu0  ;;  %v7928_v58 = vadd.f32 %v7927_v17, %v7926_v1  ;;  %v7929_v13 = vpop.f32.mrb[126].mxu1 }
 0x26a   :  { %v7896_v59 = vpop.f32.mrb[127].mxu0  ;;  %v7930_v29 = vpop.f32.mrb[127].mxu1 }
 0x26b   :  { %v5964_v56 = vadd.f32 %v7894_v51, %v5907_v44  ;;  %v7897_v19 = vadd.f32 %v7896_v59, %v7895_v53  ;;  %v7931_v2 = vadd.f32 %v7930_v29, %v7929_v13 }
 0x26d   :  { %v5967_v60 = vadd.f32 %v7897_v19, %v5910_v6  ;;  %v6021_v24 = vadd.f32 %v7928_v58, %v5964_v56 }
 0x26f   :  { %v7898_v3 = vpop.f32.mrb[128].mxu0  ;;  %v6024_v63 = vadd.f32 %v7931_v2, %v5967_v60  ;;  %v7932_v11 = vpop.f32.mrb[128].mxu1 }
 0x270   :  { %v7899_v4 = vpop.f32.mrb[129].mxu0  ;;  %v7933_v14 = vpop.f32.mrb[129].mxu1 }
 0x271   :  { %v7900_v35 = vadd.f32 %v7899_v4, %v7898_v3  ;;  %v7901_v30 = vpop.f32.mrb[130].mxu0  ;;  %v7934_v43 = vadd.f32 %v7933_v14, %v7932_v11  ;;  %v7935_v32 = vpop.f32.mrb[130].mxu1 }
 0x272   :  { %v7902_v10 = vpop.f32.mrb[131].mxu0  ;;  %v7936_v20 = vpop.f32.mrb[131].mxu1 }
 0x273   :  { %v5972_v37 = vadd.f32 %v7900_v35, %v5915_v26  ;;  %v7903_v39 = vadd.f32 %v7902_v10, %v7901_v30  ;;  %v7937_v45 = vadd.f32 %v7936_v20, %v7935_v32 }
 0x275   :  { %v5975_v41 = vadd.f32 %v7903_v39, %v5918_v27  ;;  %v6029_v44 = vadd.f32 %v7934_v43, %v5972_v37 }
 0x277   :  { %v6032_v47 = vadd.f32 %v7937_v45, %v5975_v41 }
 0x27f   :  { %v7954_v6 = vpop.f32.mrb[132].mxu0  ;;  %v7988_v61 = vpop.f32.mrb[132].mxu1 }
 0x280   :  { %v7955_v23 = vpop.f32.mrb[133].mxu0  ;;  %v7989_v22 = vpop.f32.mrb[133].mxu1 }
 0x281   :  { %v7956_v48 = vadd.f32 %v7955_v23, %v7954_v6  ;;  %v7957_v49 = vpop.f32.mrb[134].mxu0  ;;  %v7990_v50 = vadd.f32 %v7989_v22, %v7988_v61  ;;  %v7991_v62 = vpop.f32.mrb[134].mxu1 }
 0x282   :  { %v7958_v25 = vpop.f32.mrb[135].mxu0  ;;  %v7992_v0 = vpop.f32.mrb[135].mxu1 }
 0x283   :  { %v6070_v7 = vadd.f32 %v7956_v48, %v6013_v16  ;;  %v7959_v52 = vadd.f32 %v7958_v25, %v7957_v49  ;;  %v7993_v54 = vadd.f32 %v7992_v0, %v7991_v62 }
 0x285   :  { %v6127_v26 = vadd.f32 %v7990_v50, %v6070_v7  ;;  %v6073_v5 = vadd.f32 %v7959_v52, %v6016_v31 }
 0x287   :  { %v6130_v27 = vadd.f32 %v7993_v54, %v6073_v5  ;;  %v7960_v33 = vpop.f32.mrb[136].mxu0  ;;  %v7994_v12 = vpop.f32.mrb[136].mxu1 }
 0x288   :  { %v7961_v57 = vpop.f32.mrb[137].mxu0  ;;  %v7995_v40 = vpop.f32.mrb[137].mxu1 }
 0x289   :  { %v7962_v28 = vadd.f32 %v7961_v57, %v7960_v33  ;;  %v7963_v36 = vpop.f32.mrb[138].mxu0  ;;  %v7996_v21 = vadd.f32 %v7995_v40, %v7994_v12  ;;  %v7997_v42 = vpop.f32.mrb[138].mxu1 }
 0x28a   :  { %v7964_v34 = vpop.f32.mrb[139].mxu0  ;;  %v7998_v15 = vpop.f32.mrb[139].mxu1 }
 0x28b   :  { %v6078_v8 = vadd.f32 %v7962_v28, %v6021_v24  ;;  %v7965_v9 = vadd.f32 %v7964_v34, %v7963_v36  ;;  %v7999_v18 = vadd.f32 %v7998_v15, %v7997_v42 }
 0x28d   :  { %v6081_v38 = vadd.f32 %v7965_v9, %v6024_v63  ;;  %v6135_v16 = vadd.f32 %v7996_v21, %v6078_v8 }
 0x28f   :  { %v7966_v55 = vpop.f32.mrb[140].mxu0  ;;  %v6138_v46 = vadd.f32 %v7999_v18, %v6081_v38  ;;  %v8000_v1 = vpop.f32.mrb[140].mxu1 }
 0x290   :  { %v7967_v51 = vpop.f32.mrb[141].mxu0  ;;  %v8001_v17 = vpop.f32.mrb[141].mxu1 }
 0x291   :  { %v7968_v31 = vadd.f32 %v7967_v51, %v7966_v55  ;;  %v7969_v53 = vpop.f32.mrb[142].mxu0  ;;  %v8002_v58 = vadd.f32 %v8001_v17, %v8000_v1  ;;  %v8003_v13 = vpop.f32.mrb[142].mxu1 }
 0x292   :  { %v7970_v59 = vpop.f32.mrb[143].mxu0  ;;  %v8004_v29 = vpop.f32.mrb[143].mxu1 }
 0x293   :  { %v6086_v56 = vadd.f32 %v7968_v31, %v6029_v44  ;;  %v7971_v19 = vadd.f32 %v7970_v59, %v7969_v53  ;;  %v8005_v2 = vadd.f32 %v8004_v29, %v8003_v13 }
 0x295   :  { %v6089_v60 = vadd.f32 %v7971_v19, %v6032_v47  ;;  %v6143_v24 = vadd.f32 %v8002_v58, %v6086_v56 }
 0x297   :  { %v6146_v3 = vadd.f32 %v8005_v2, %v6089_v60 }
 0x2b0   :  { %v8022_v63 = vpop.f32.mrb[144].mxu0  ;;  %v8056_v4 = vpop.f32.mrb[144].mxu1 }
 0x2b1   :  { %v8023_v35 = vpop.f32.mrb[145].mxu0  ;;  %v8057_v10 = vpop.f32.mrb[145].mxu1 }
 0x2b2   :  { %v8024_v30 = vadd.f32 %v8023_v35, %v8022_v63  ;;  %v8025_v37 = vpop.f32.mrb[146].mxu0  ;;  %v8058_v39 = vadd.f32 %v8057_v10, %v8056_v4  ;;  %v8059_v11 = vpop.f32.mrb[146].mxu1 }
 0x2b3   :  { %v8026_v41 = vpop.f32.mrb[147].mxu0  ;;  %v8060_v32 = vpop.f32.mrb[147].mxu1 }
 0x2b4   :  { %v6184_v14 = vadd.f32 %v8024_v30, %v6127_v26  ;;  %v8027_v43 = vadd.f32 %v8026_v41, %v8025_v37  ;;  %v8061_v20 = vadd.f32 %v8060_v32, %v8059_v11 }
 0x2b6   :  { %v6241_v44 = vadd.f32 %v8058_v39, %v6184_v14  ;;  %v6187_v45 = vadd.f32 %v8027_v43, %v6130_v27 }
 0x2b8   :  { %v6244_v47 = vadd.f32 %v8061_v20, %v6187_v45  ;;  %v8028_v6 = vpop.f32.mrb[148].mxu0  ;;  %v8062_v62 = vpop.f32.mrb[148].mxu1 }
 0x2b9   :  { %v8029_v61 = vpop.f32.mrb[149].mxu0  ;;  %v8063_v7 = vpop.f32.mrb[149].mxu1 }
 0x2ba   :  { %v8030_v23 = vadd.f32 %v8029_v61, %v8028_v6  ;;  %v8031_v48 = vpop.f32.mrb[150].mxu0  ;;  %v8064_v52 = vadd.f32 %v8063_v7, %v8062_v62  ;;  %v8065_v0 = vpop.f32.mrb[150].mxu1 }
 0x2bb   :  { %v8032_v22 = vpop.f32.mrb[151].mxu0  ;;  %v8066_v54 = vpop.f32.mrb[151].mxu1 }
 0x2bc   :  { %v6192_v49 = vadd.f32 %v8030_v23, %v6135_v16  ;;  %v8033_v50 = vadd.f32 %v8032_v22, %v8031_v48  ;;  %v8067_v5 = vadd.f32 %v8066_v54, %v8065_v0 }
 0x2be   :  { %v6195_v25 = vadd.f32 %v8033_v50, %v6138_v46  ;;  %v6249_v26 = vadd.f32 %v8064_v52, %v6192_v49 }
 0x2c0   :  { %v8034_v33 = vpop.f32.mrb[152].mxu0  ;;  %v6252_v57 = vadd.f32 %v8067_v5, %v6195_v25  ;;  %v8068_v12 = vpop.f32.mrb[152].mxu1 }
 0x2c1   :  { %v8035_v28 = vpop.f32.mrb[153].mxu0  ;;  %v8069_v40 = vpop.f32.mrb[153].mxu1 }
 0x2c2   :  { %v8036_v27 = vadd.f32 %v8035_v28, %v8034_v33  ;;  %v8037_v36 = vpop.f32.mrb[154].mxu0  ;;  %v8070_v21 = vadd.f32 %v8069_v40, %v8068_v12  ;;  %v8071_v42 = vpop.f32.mrb[154].mxu1 }
 0x2c3   :  { %v8038_v34 = vpop.f32.mrb[155].mxu0  ;;  %v8072_v15 = vpop.f32.mrb[155].mxu1 }
 0x2c4   :  { %v6200_v8 = vadd.f32 %v8036_v27, %v6143_v24  ;;  %v8039_v9 = vadd.f32 %v8038_v34, %v8037_v36  ;;  %v8073_v18 = vadd.f32 %v8072_v15, %v8071_v42 }
 0x2c6   :  { %v6203_v38 = vadd.f32 %v8039_v9, %v6146_v3  ;;  %v6257_v16 = vadd.f32 %v8070_v21, %v6200_v8 }
 0x2c8   :  { %v6260_v55 = vadd.f32 %v8073_v18, %v6203_v38 }
 0x2d0   :  { %v8090_v46 = vpop.f32.mrb[156].mxu0 }
 0x2d1   :  { %v8091_v31 = vpop.f32.mrb[157].mxu0 }
 0x2d2   :  { %v8092_v53 = vadd.f32 %v8091_v31, %v8090_v46  ;;  %v8093_v56 = vpop.f32.mrb[158].mxu0  ;;  %v6465_v46 = vpop.permute.xlu1 %6464 }
 0x2d3   :  { %v8094_v60 = vpop.f32.mrb[159].mxu0 }
 0x2d4   :  { %v6298_v17 = vadd.f32 %v8092_v53, %v6241_v44  ;;  %v8095_v58 = vadd.f32 %v8094_v60, %v8093_v56 }
 0x2d6   :  { %v6301_v2 = vadd.f32 %v8095_v58, %v6244_v47 }
 0x2d8   :  { %v8096_v63 = vpop.f32.mrb[160].mxu0 }
 0x2d9   :  { %v8097_v4 = vpop.f32.mrb[161].mxu0 }
 0x2da   :  { %v8124_v51 = vpop.f32.mrb[156].mxu1  ;;  %v8098_v35 = vadd.f32 %v8097_v4, %v8096_v63  ;;  %v8099_v30 = vpop.f32.mrb[162].mxu0 }
 0x2db   :  { %v8125_v59 = vpop.f32.mrb[157].mxu1  ;;  %v8100_v37 = vpop.f32.mrb[163].mxu0 }
 0x2dc   :  { %v8126_v19 = vadd.f32 %v8125_v59, %v8124_v51  ;;  %v8127_v1 = vpop.f32.mrb[158].mxu1  ;;  %v6306_v11 = vadd.f32 %v8098_v35, %v6249_v26  ;;  %v8101_v41 = vadd.f32 %v8100_v37, %v8099_v30  ;;  %v6470_v4 = vpop.permute.xlu1 %6469 }
 0x2dd   :  { %v8128_v13 = vpop.f32.mrb[159].mxu1 }
 0x2de   :  { %v8129_v29 = vadd.f32 %v8128_v13, %v8127_v1  ;;  %v6355_v24 = vadd.f32 %v8126_v19, %v6298_v17  ;;  %v6309_v20 = vadd.f32 %v8101_v41, %v6252_v57 }
 0x2e0   :  { %v6358_v3 = vadd.f32 %v8129_v29, %v6301_v2 }
 0x2e1   :  { %v8102_v61 = vpop.f32.mrb[164].mxu0 }
 0x2e2   :  { %v8130_v10 = vpop.f32.mrb[160].mxu1  ;;  %v8103_v23 = vpop.f32.mrb[165].mxu0 }
 0x2e3   :  { %v8131_v39 = vpop.f32.mrb[161].mxu1  ;;  %v8104_v47 = vadd.f32 %v8103_v23, %v8102_v61  ;;  %v8105_v48 = vpop.f32.mrb[166].mxu0 }
 0x2e4   :  { %v8132_v14 = vadd.f32 %v8131_v39, %v8130_v10  ;;  %v8133_v43 = vpop.f32.mrb[162].mxu1  ;;  %v8106_v49 = vpop.f32.mrb[167].mxu0 }
 0x2e5   :  { %v8134_v32 = vpop.f32.mrb[163].mxu1  ;;  %v6314_v62 = vadd.f32 %v8104_v47, %v6257_v16  ;;  %v8107_v25 = vadd.f32 %v8106_v49, %v8105_v48  ;;  %v6455_v16 = vpop.permute.xlu0 %6454 }
 0x2e6   :  { %v6363_v44 = vadd.f32 %v8132_v14, %v6306_v11  ;;  %v8135_v45 = vadd.f32 %v8134_v32, %v8133_v43 }
 0x2e7   :  { %v6317_v54 = vadd.f32 %v8107_v25, %v6260_v55 }
 0x2e8   :  { %v6366_v6 = vadd.f32 %v8135_v45, %v6309_v20  ;;  %v6480_v45 = vpop.permute.xlu1 %6479 }
 0x2e9   :  { %v6460_v29 = vpop.permute.xlu0 %6459 }
 0x2ea   :  { %v8136_v22 = vpop.f32.mrb[164].mxu1 }
 0x2eb   :  { %v8137_v50 = vpop.f32.mrb[165].mxu1 }
 0x2ec   :  { %v8138_v7 = vadd.f32 %v8137_v50, %v8136_v22  ;;  %v8139_v52 = vpop.f32.mrb[166].mxu1 }
 0x2ed   :  { %v8140_v0 = vpop.f32.mrb[167].mxu1 }
 0x2ee   :  { %v6371_v26 = vadd.f32 %v8138_v7, %v6314_v62  ;;  %v8141_v5 = vadd.f32 %v8140_v0, %v8139_v52 }
 0x2f0   :  { %v6374_v33 = vadd.f32 %v8141_v5, %v6317_v54 }
 0x2ff   :  { %v8158_v57 = vpop.f32.mrb[168].mxu0 }
 0x300   :  { %v8164_v28 = vpop.f32.mrb[168].mxu1  ;;  %v8159_v27 = vpop.f32.mrb[169].mxu0 }
 0x301   :  { %v8160_v36 = vadd.f32 %v8159_v27, %v8158_v57  ;;  %v8165_v34 = vpop.f32.mrb[169].mxu1  ;;  %v8161_v8 = vpop.f32.mrb[170].mxu0 }
 0x302   :  { %v8166_v9 = vadd.f32 %v8165_v34, %v8164_v28  ;;  %v8167_v12 = vpop.f32.mrb[170].mxu1  ;;  %v8162_v38 = vpop.f32.mrb[171].mxu0 }
 0x303   :  { %v6412_v40 = vadd.f32 %v8160_v36, %v6355_v24  ;;  %v8163_v21 = vadd.f32 %v8162_v38, %v8161_v8  ;;  %v8168_v42 = vpop.f32.mrb[171].mxu1 }
 0x304   :  { %v6420_v15 = vadd.f32 %v8166_v9, %v6363_v44  ;;  %v8169_v18 = vadd.f32 %v8168_v42, %v8167_v12 }
 0x305   :  { %v6434_v55 = vmax.f32 %v6412_v40, 0.0  ;;  %v6415_v51 = vadd.f32 %v8163_v21, %v6358_v3 }
 0x306   :  { %v6436_v31 = vmax.f32 %v6420_v15, 0.0  ;;  %v6423_v53 = vadd.f32 %v8169_v18, %v6366_v6  ;;  %v6475_v6 = vpop.permute.xlu0 %6474 }
 0x307   :  { %v6440_v59 = vmin.f32 %v6434_v55, 20.0  ;;  %v6435_v56 = vmax.f32 %v6415_v51, 0.0 }
 0x308   :  { %v6442_v19 = vmin.f32 %v6436_v31, 20.0  ;;  %v6437_v1 = vmax.f32 %v6423_v53, 0.0  ;;  %v8170_v60 = vpop.f32.mrb[172].mxu1 }
 0x309   :  { %v6441_v17 = vmin.f32 %v6435_v56, 20.0  ;;  %v8171_v58 = vpop.f32.mrb[173].mxu1  ;;  %v6482_v63 = vmul.f32 %v6455_v16, %v6440_v59 }
 0x30a   :  { %v6443_v13 = vmin.f32 %v6437_v1, 20.0  ;;  %v8172_v24 = vadd.f32 %v8171_v58, %v8170_v60  ;;  %v8173_v2 = vpop.f32.mrb[174].mxu1  ;;  %v6484_v10 = vmul.f32 %v6465_v46, %v6442_v19 }
 0x30b   :  { %v6483_v35 = vmul.f32 %v6460_v29, %v6441_v17  ;;  %v8174_v30 = vpop.f32.mrb[175].mxu1 }
 0x30c   :  { %v6485_v37 = vmul.f32 %v6470_v4, %v6443_v13  ;;  %v6428_v3 = vadd.f32 %v8172_v24, %v6371_v26  ;;  %v8175_v39 = vadd.f32 %v8174_v30, %v8173_v2 }
 0x30d   :  { %v7176_v11 = vpack.c.bf16 %v6483_v35, %v6482_v63 }
 0x30e   :  { %v7181_v41 = vpack.c.bf16 %v6485_v37, %v6484_v10  ;;  %v6438_v14 = vmax.f32 %v6428_v3, 0.0  ;;  %v6431_v43 = vadd.f32 %v8175_v39, %v6374_v33 }
 0x30f   :  { %7177 = vst [vmem:[%s11068_s4] sm:$0xff] %v7176_v11  }
 0x310   :  { %7188 = vst [vmem:[%s11068_s4 + $0x8] sm:$0xff] %v7181_v41   ;;  %v6444_v32 = vmin.f32 %v6438_v14, 20.0  ;;  %v6439_v20 = vmax.f32 %v6431_v43, 0.0 }
 0x312   :  { %v6445_v44 = vmin.f32 %v6439_v20, 20.0  ;;  %v6486_v61 = vmul.f32 %v6475_v6, %v6444_v32 }
 0x314   :  { %v6487_v23 = vmul.f32 %v6480_v45, %v6445_v44 }
 0x316   :  { %v7186_v47 = vpack.c.bf16 %v6487_v23, %v6486_v61 }
 0x318   :  { %7189 = vst [vmem:[%s11068_s4 + $0x10] sm:$0xff] %v7186_v47  }

</bundles_post_ra>
